<compile_context>
chip_gen: v7x
topology: tpu7x:2x2x1
jax: 0.10.0
libtpu: 0.0.40
codegen_flags: <defaults>
</compile_context>

<pallas_src>
import jax
import jax.numpy as jnp
from jax.experimental import pallas as pl
from jax.experimental.pallas import tpu as pltpu

HOP = 16            # original: 150
LEAKY_SLOPE = 0.2
BN_EPS = 1e-5


def _round_up(x, m):
    return (x + m - 1) // m * m


# --------------------------------------------------------------------------
# Fused conv (+ LeakyReLU [+ BatchNorm] | tanh) Pallas kernel
# --------------------------------------------------------------------------
def _make_conv_kernel(N, OW, KW, SW, epilogue):
    """Builds a fused tap-conv kernel.

    x_ref: (SW, N, S, C) bf16   -- column-parity planes of the padded input
    w_ref: (KW, C, OC) bf16     -- one (C, OC) matrix per kernel tap
    g_ref, b_ref: (1, OC) f32   -- only for epilogue == 'leaky_bn'
    o_ref: (N, OW, OC)
    """
    def kernel(*refs):
        if epilogue == "leaky_bn":
            x_ref, w_ref, g_ref, b_ref, o_ref = refs
        else:
            x_ref, w_ref, o_ref = refs

        ys = []
        for n in range(N):                       # static (N == 2)
            acc = None
            for j in range(KW):                  # static (KW <= 9 taps)
                # tap j reads input positions sw*ow + j  ->  parity j%SW,
                # contiguous rows starting at j//SW in the parity plane.
                a = x_ref[j % SW, n, pl.ds(j // SW, OW), :]        # (OW, C)
                part = jnp.dot(a, w_ref[j],
                               preferred_element_type=jnp.float32)  # MXU, f32 acc
                acc = part if acc is None else acc + part
            if epilogue == "tanh":
                acc = jnp.tanh(acc)
            else:  # 'leaky' or 'leaky_bn'
                acc = jnp.where(acc >= 0, acc, LEAKY_SLOPE * acc)
            ys.append(acc)

        if epilogue == "leaky_bn":
            # Training-mode BatchNorm2d: biased batch stats over all N*OW rows
            # per channel, computed on the exact (unpadded) f32 accumulators.
            M = N * OW
            mean = sum(jnp.sum(y, axis=0, keepdims=True) for y in ys) / M
            var = sum(jnp.sum((y - mean) * (y - mean), axis=0, keepdims=True)
                      for y in ys) / M
            scale = jax.lax.rsqrt(var + BN_EPS) * g_ref[...]
            shift = b_ref[...] - mean * scale
            ys = [y * scale + shift for y in ys]

        for n in range(N):
            o_ref[n] = ys[n].astype(o_ref.dtype)

    return kernel


def conv_layer(x_nwc, w_taps, *, sw, pw, epilogue, gamma=None, beta=None,
               out_dtype=jnp.bfloat16):
    """Fused 1xKW conv on a channels-last slab.

    x_nwc:  (N, W, C) activation slab (cast to bf16 for the MXU).
    w_taps: (KW, C, OC) spectrally-normalized weight, one matrix per tap.
    Returns (N, OW, OC) slab in `out_dtype`.
    """
    N, W, C = x_nwc.shape
    KW, C2, OC = w_taps.shape
    assert C == C2
    OW = (W + 2 * pw - KW) // sw + 1

    # Pad width, then split into `sw` column-parity planes (free reshape) so
    # every in-kernel tap load is a contiguous sublane slice.
    Wp = W + 2 * pw
    Wr = _round_up(Wp, sw)
    xp = jnp.pad(x_nwc.astype(jnp.bfloat16), ((0, 0), (pw, Wr - W - pw), (0, 0)))
    S = Wr // sw
    x4 = xp.reshape(N, S, sw, C).transpose(2, 0, 1, 3)          # (sw, N, S, C)

    args = [x4, w_taps.astype(jnp.bfloat16)]
    if epilogue == "leaky_bn":
        args += [gamma.reshape(1, OC).astype(jnp.float32),
                 beta.reshape(1, OC).astype(jnp.float32)]

    return pl.pallas_call(
        _make_conv_kernel(N, OW, KW, sw, epilogue),
        out_shape=jax.ShapeDtypeStruct((N, OW, OC), out_dtype),
        # Full-array blocks, single invocation; data is tiny but keep the
        # scoped VMEM limit explicit so a HOP=150 scale-up stays in budget.
        compiler_params=pltpu.CompilerParams(
            vmem_limit_bytes=32 * 1024 * 1024),
    )(*args)


# --------------------------------------------------------------------------
# Spectral "normalization" exactly as written in the PyTorch module
# --------------------------------------------------------------------------
def _l2_normalize(x):
    n = jnp.sqrt(jnp.sum(x * x))
    return x / jnp.maximum(n, 1e-12)     # F.normalize(p=2, eps=1e-12)


def spectral_normalize(W, u):
    # Mirrors ConvSN2D.compute_spectral_norm: one power iteration, then a
    # *row-wise* sigma (W @ u^T) divides each row of the reshaped weight.
    kw = W.shape[-1]
    Wm = W.reshape(-1, kw)
    v = _l2_normalize(u @ Wm.T)
    u_new = _l2_normalize(v @ Wm)
    sigma = Wm @ u_new.T                  # (rows, 1)
    return (Wm / sigma).reshape(W.shape)


def same_pad_w(W, sw, kw):
    return ((W - 1) * sw - W + kw) // 2   # exact ConvSN2D 'same' formula


# --------------------------------------------------------------------------
# Generator parameters + forward
# --------------------------------------------------------------------------
def init_generator_params(key, input_shape):
    h, w, c = input_shape
    ks = jax.random.split(key, 12)

    def conv_w(k, oc, ic, kh, kw):
        bound = 1.0 / float(jnp.sqrt(ic * kh * kw))
        return jax.random.uniform(k, (oc, ic, kh, kw), jnp.float32, -bound, bound)

    def u_vec(k, kw):                      # self.u ~ uniform(0, 1), shape (1, kw)
        return jax.random.uniform(k, (1, kw), jnp.float32, 0.0, 1.0)

    bound6 = 1.0 / float(jnp.sqrt(1.0 * h * 2))
    return {
        "g1_w": conv_w(ks[0], 256, c, h, 3),   "g1_u": u_vec(ks[1], 3),
        "g2_w": conv_w(ks[2], 256, 256, 1, 9), "g2_u": u_vec(ks[3], 9),
        "g3_w": conv_w(ks[4], 256, 256, 1, 7), "g3_u": u_vec(ks[5], 7),
        "g4_w": conv_w(ks[6], 256, 256, 1, 7), "g4_u": u_vec(ks[7], 7),
        "g5_w": conv_w(ks[8], 256, 256, 1, 9), "g5_u": u_vec(ks[9], 9),
        # ConvTranspose2d weight layout: (IC, OC, KH, KW)
        "g6_w": jax.random.uniform(ks[10], (256, 1, h, 2), jnp.float32,
                                   -bound6, bound6),
        "g6_u": u_vec(ks[11], 2),
        "bn_gamma": jnp.ones((256,), jnp.float32),
        "bn_beta": jnp.zeros((256,), jnp.float32),
    }


def generator_forward(params, x, hop=HOP):
    N, c, h, w = x.shape
    assert c == 1
    gamma, beta = params["bn_gamma"], params["bn_beta"]

    # ---- g1: (h,3) 'valid' conv; height collapses to 1, so fold H into the
    # contraction axis: per tap kw the GEMM is (N*OW, h) x (h, 256).
    W1 = spectral_normalize(params["g1_w"], params["g1_u"])     # (256, 1, h, 3)
    w1_taps = W1[:, 0, :, :].transpose(2, 1, 0)                 # (3, h, 256)
    x_cl = x[:, 0, :, :].transpose(0, 2, 1)                     # (N, w, h)
    x1 = conv_layer(x_cl, w1_taps, sw=1, pw=0, epilogue="leaky_bn",
                    gamma=gamma, beta=beta)                     # (N, w-2, 256)

    # ---- g2 (1x9, stride (1,2), 'same') -> leaky -> BN
    W2 = spectral_normalize(params["g2_w"], params["g2_u"])
    x2 = conv_layer(x1, W2[:, :, 0, :].transpose(2, 1, 0), sw=2,
                    pw=same_pad_w(x1.shape[1], 2, 9),
                    epilogue="leaky_bn", gamma=gamma, beta=beta)

    # ---- g3 (1x7, stride (1,2), 'same') -> leaky -> BN
    W3 = spectral_normalize(params["g3_w"], params["g3_u"])
    x3 = conv_layer(x2, W3[:, :, 0, :].transpose(2, 1, 0), sw=2,
                    pw=same_pad_w(x2.shape[1], 2, 7),
                    epilogue="leaky_bn", gamma=gamma, beta=beta)

    # F.interpolate(size=(H, 2W), mode='nearest') == repeat each column twice
    x4 = jnp.repeat(x3, 2, axis=1)

    # ---- g4 (1x7, stride 1, 'same') -> leaky -> BN
    W4 = spectral_normalize(params["g4_w"], params["g4_u"])
    xx = conv_layer(x4, W4[:, :, 0, :].transpose(2, 1, 0), sw=1,
                    pw=same_pad_w(x4.shape[1], 1, 7),
                    epilogue="leaky_bn", gamma=gamma, beta=beta)

    xx = jnp.concatenate([xx, x3], axis=1)
    xx = jnp.repeat(xx, 2, axis=1)

    # ---- g5 (1x9, stride 1, 'same') -> leaky (no BN)
    W5 = spectral_normalize(params["g5_w"], params["g5_u"])
    xx = conv_layer(xx, W5[:, :, 0, :].transpose(2, 1, 0), sw=1,
                    pw=same_pad_w(xx.shape[1], 1, 9), epilogue="leaky")

    xx = jnp.concatenate([xx, x2], axis=1)                      # (N, Wcat, 256)

    # ---- g6: ConvSN2DTranspose (h,2), stride (1,1), padding 'same' (uses the
    # hard-coded `hop` / 24 from the module).  A stride-1 transposed conv on a
    # height-1 input == a valid 1x2 conv on a cropped window with the flipped
    # kernel rows becoming the out_h output channels.  Fused tanh epilogue.
    Wt = spectral_normalize(params["g6_w"], params["g6_u"])     # (256, 1, h, 2)
    KH, KW = h, 2
    Wcat = xx.shape[1]
    ph = ((1 - 1) * 1 - hop + KH) // 2
    pw = ((Wcat - 1) * 1 - 24 + KW) // 2
    out_h = (1 - 1) * 1 - 2 * ph + KH
    out_w = (Wcat - 1) * 1 - 2 * pw + KW
    assert ph >= 0 and ph + out_h <= KH, "unsupported transposed-conv padding"
    assert pw >= KW - 1 and pw + out_w <= Wcat, "unsupported transposed-conv padding"
    x_crop = xx[:, pw - (KW - 1): pw + out_w, :]                # (N, out_w+1, 256)
    w6_taps = jnp.flip(Wt[:, 0, ph:ph + out_h, :], axis=-1).transpose(2, 0, 1)
    # w6_taps: (2, 256, out_h) -- output "channels" are the out_h output rows.
    # TODO(synk): out_h=16 output channels are lane-sparse (<128 lanes); the
    # slab is tiny so this is left as a single masked store.
    y = conv_layer(x_crop, w6_taps, sw=1, pw=0, epilogue="tanh",
                   out_dtype=jnp.float32)                       # (N, out_w, out_h)
    return y.transpose(0, 2, 1)[:, None, :, :]                  # (N, 1, out_h, out_w)


# TODO(synk): PyTorch-side parameter mutation (self.u power-iteration write-back,
# BatchNorm running-stat tracking) is stateful training bookkeeping and is
# intentionally not modeled.

if __name__ == "__main__":
    # input_shape = (h, w, c) for Generator; input tensor is NCHW = (N, c, h, w)
    H, W_IN, C_IN, N = HOP, 16, 1, 2
    key = jax.random.PRNGKey(0)
    kp, kx = jax.random.split(key)
    params = init_generator_params(kp, (H, W_IN, C_IN))
    x = jax.random.normal(kx, (N, C_IN, H, W_IN), jnp.float32)

    fwd = jax.jit(generator_forward)
    out = jax.block_until_ready(fwd(params, x))

    assert out.shape == (N, 1, H, 24), out.shape
    assert bool(jnp.all(jnp.isfinite(out)))
    print("KERNEL_OK")
</pallas_src>

<mosaic_0001>
module attributes {stable_mosaic.version = 11 : i64} {
  func.func @kernel(%arg0: memref<1x2x16x16xbf16, #tpu.memory_space<vmem>>, %arg1: memref<3x16x256xbf16, #tpu.memory_space<vmem>>, %arg2: memref<1x256xf32, #tpu.memory_space<vmem>>, %arg3: memref<1x256xf32, #tpu.memory_space<vmem>>, %arg4: memref<2x14x256xbf16, #tpu.memory_space<vmem>>) attributes {dimension_semantics = [], scalar_prefetch = 0 : i64, scratch_operands = 0 : i64, tpu.core_type = #tpu.core_type<tc>} {
    %c0 = arith.constant 0 : index
    %c0_0 = arith.constant 0 : index
    %c0_1 = arith.constant 0 : index
    %c0_2 = arith.constant 0 : index
    %0 = vector.load %arg0[%c0, %c0_0, %c0_1, %c0_2] : memref<1x2x16x16xbf16, #tpu.memory_space<vmem>>, vector<1x1x14x16xbf16>
    %1 = vector.shape_cast %0 : vector<1x1x14x16xbf16> to vector<14x16xbf16>
    %c0_3 = arith.constant 0 : index
    %c0_4 = arith.constant 0 : index
    %c0_5 = arith.constant 0 : index
    %2 = vector.load %arg1[%c0_3, %c0_4, %c0_5] : memref<3x16x256xbf16, #tpu.memory_space<vmem>>, vector<1x16x256xbf16>
    %3 = vector.shape_cast %2 : vector<1x16x256xbf16> to vector<16x256xbf16>
    %cst = arith.constant dense<0.000000e+00> : vector<14x256xf32>
    %4 = tpu.matmul %1, %3, %cst {dimension_numbers = #tpu.dot_dimension_numbers<[1], [0], [0], [1], [0, 0, 1, 1], [], []>} : vector<14x16xbf16>, vector<16x256xbf16>, vector<14x256xf32> -> vector<14x256xf32>
    %c0_6 = arith.constant 0 : index
    %c0_7 = arith.constant 0 : index
    %c1 = arith.constant 1 : index
    %c0_8 = arith.constant 0 : index
    %5 = vector.load %arg0[%c0_6, %c0_7, %c1, %c0_8] : memref<1x2x16x16xbf16, #tpu.memory_space<vmem>>, vector<1x1x14x16xbf16>
    %6 = vector.shape_cast %5 : vector<1x1x14x16xbf16> to vector<14x16xbf16>
    %c1_9 = arith.constant 1 : index
    %c0_10 = arith.constant 0 : index
    %c0_11 = arith.constant 0 : index
    %7 = vector.load %arg1[%c1_9, %c0_10, %c0_11] : memref<3x16x256xbf16, #tpu.memory_space<vmem>>, vector<1x16x256xbf16>
    %8 = vector.shape_cast %7 : vector<1x16x256xbf16> to vector<16x256xbf16>
    %cst_12 = arith.constant dense<0.000000e+00> : vector<14x256xf32>
    %9 = tpu.matmul %6, %8, %cst_12 {dimension_numbers = #tpu.dot_dimension_numbers<[1], [0], [0], [1], [0, 0, 1, 1], [], []>} : vector<14x16xbf16>, vector<16x256xbf16>, vector<14x256xf32> -> vector<14x256xf32>
    %10 = arith.addf %4, %9 : vector<14x256xf32>
    %c0_13 = arith.constant 0 : index
    %c0_14 = arith.constant 0 : index
    %c2 = arith.constant 2 : index
    %c0_15 = arith.constant 0 : index
    %11 = vector.load %arg0[%c0_13, %c0_14, %c2, %c0_15] : memref<1x2x16x16xbf16, #tpu.memory_space<vmem>>, vector<1x1x14x16xbf16>
    %12 = vector.shape_cast %11 : vector<1x1x14x16xbf16> to vector<14x16xbf16>
    %c2_16 = arith.constant 2 : index
    %c0_17 = arith.constant 0 : index
    %c0_18 = arith.constant 0 : index
    %13 = vector.load %arg1[%c2_16, %c0_17, %c0_18] : memref<3x16x256xbf16, #tpu.memory_space<vmem>>, vector<1x16x256xbf16>
    %14 = vector.shape_cast %13 : vector<1x16x256xbf16> to vector<16x256xbf16>
    %cst_19 = arith.constant dense<0.000000e+00> : vector<14x256xf32>
    %15 = tpu.matmul %12, %14, %cst_19 {dimension_numbers = #tpu.dot_dimension_numbers<[1], [0], [0], [1], [0, 0, 1, 1], [], []>} : vector<14x16xbf16>, vector<16x256xbf16>, vector<14x256xf32> -> vector<14x256xf32>
    %16 = arith.addf %10, %15 : vector<14x256xf32>
    %cst_20 = arith.constant 0.000000e+00 : f32
    %17 = vector.broadcast %cst_20 : f32 to vector<14x256xf32>
    %18 = arith.cmpf oge, %16, %17 : vector<14x256xf32>
    %cst_21 = arith.constant 2.000000e-01 : f32
    %19 = vector.broadcast %cst_21 : f32 to vector<14x256xf32>
    %20 = arith.mulf %19, %16 : vector<14x256xf32>
    %21 = arith.select %18, %16, %20 : vector<14x256xi1>, vector<14x256xf32>
    %c0_22 = arith.constant 0 : index
    %c1_23 = arith.constant 1 : index
    %c0_24 = arith.constant 0 : index
    %c0_25 = arith.constant 0 : index
    %22 = vector.load %arg0[%c0_22, %c1_23, %c0_24, %c0_25] : memref<1x2x16x16xbf16, #tpu.memory_space<vmem>>, vector<1x1x14x16xbf16>
    %23 = vector.shape_cast %22 : vector<1x1x14x16xbf16> to vector<14x16xbf16>
    %c0_26 = arith.constant 0 : index
    %c0_27 = arith.constant 0 : index
    %c0_28 = arith.constant 0 : index
    %24 = vector.load %arg1[%c0_26, %c0_27, %c0_28] : memref<3x16x256xbf16, #tpu.memory_space<vmem>>, vector<1x16x256xbf16>
    %25 = vector.shape_cast %24 : vector<1x16x256xbf16> to vector<16x256xbf16>
    %cst_29 = arith.constant dense<0.000000e+00> : vector<14x256xf32>
    %26 = tpu.matmul %23, %25, %cst_29 {dimension_numbers = #tpu.dot_dimension_numbers<[1], [0], [0], [1], [0, 0, 1, 1], [], []>} : vector<14x16xbf16>, vector<16x256xbf16>, vector<14x256xf32> -> vector<14x256xf32>
    %c0_30 = arith.constant 0 : index
    %c1_31 = arith.constant 1 : index
    %c1_32 = arith.constant 1 : index
    %c0_33 = arith.constant 0 : index
    %27 = vector.load %arg0[%c0_30, %c1_31, %c1_32, %c0_33] : memref<1x2x16x16xbf16, #tpu.memory_space<vmem>>, vector<1x1x14x16xbf16>
    %28 = vector.shape_cast %27 : vector<1x1x14x16xbf16> to vector<14x16xbf16>
    %c1_34 = arith.constant 1 : index
    %c0_35 = arith.constant 0 : index
    %c0_36 = arith.constant 0 : index
    %29 = vector.load %arg1[%c1_34, %c0_35, %c0_36] : memref<3x16x256xbf16, #tpu.memory_space<vmem>>, vector<1x16x256xbf16>
    %30 = vector.shape_cast %29 : vector<1x16x256xbf16> to vector<16x256xbf16>
    %cst_37 = arith.constant dense<0.000000e+00> : vector<14x256xf32>
    %31 = tpu.matmul %28, %30, %cst_37 {dimension_numbers = #tpu.dot_dimension_numbers<[1], [0], [0], [1], [0, 0, 1, 1], [], []>} : vector<14x16xbf16>, vector<16x256xbf16>, vector<14x256xf32> -> vector<14x256xf32>
    %32 = arith.addf %26, %31 : vector<14x256xf32>
    %c0_38 = arith.constant 0 : index
    %c1_39 = arith.constant 1 : index
    %c2_40 = arith.constant 2 : index
    %c0_41 = arith.constant 0 : index
    %33 = vector.load %arg0[%c0_38, %c1_39, %c2_40, %c0_41] : memref<1x2x16x16xbf16, #tpu.memory_space<vmem>>, vector<1x1x14x16xbf16>
    %34 = vector.shape_cast %33 : vector<1x1x14x16xbf16> to vector<14x16xbf16>
    %c2_42 = arith.constant 2 : index
    %c0_43 = arith.constant 0 : index
    %c0_44 = arith.constant 0 : index
    %35 = vector.load %arg1[%c2_42, %c0_43, %c0_44] : memref<3x16x256xbf16, #tpu.memory_space<vmem>>, vector<1x16x256xbf16>
    %36 = vector.shape_cast %35 : vector<1x16x256xbf16> to vector<16x256xbf16>
    %cst_45 = arith.constant dense<0.000000e+00> : vector<14x256xf32>
    %37 = tpu.matmul %34, %36, %cst_45 {dimension_numbers = #tpu.dot_dimension_numbers<[1], [0], [0], [1], [0, 0, 1, 1], [], []>} : vector<14x16xbf16>, vector<16x256xbf16>, vector<14x256xf32> -> vector<14x256xf32>
    %38 = arith.addf %32, %37 : vector<14x256xf32>
    %cst_46 = arith.constant 0.000000e+00 : f32
    %39 = vector.broadcast %cst_46 : f32 to vector<14x256xf32>
    %40 = arith.cmpf oge, %38, %39 : vector<14x256xf32>
    %cst_47 = arith.constant 2.000000e-01 : f32
    %41 = vector.broadcast %cst_47 : f32 to vector<14x256xf32>
    %42 = arith.mulf %41, %38 : vector<14x256xf32>
    %43 = arith.select %40, %38, %42 : vector<14x256xi1>, vector<14x256xf32>
    %cst_48 = arith.constant dense<0.000000e+00> : vector<256xf32>
    %44 = vector.multi_reduction <add>, %21, %cst_48 [0] : vector<14x256xf32> to vector<256xf32>
    %45 = vector.shape_cast %44 : vector<256xf32> to vector<1x256xf32>
    %cst_49 = arith.constant 0.000000e+00 : f32
    %46 = vector.broadcast %cst_49 : f32 to vector<1x256xf32>
    %47 = arith.addf %46, %45 : vector<1x256xf32>
    %cst_50 = arith.constant dense<0.000000e+00> : vector<256xf32>
    %48 = vector.multi_reduction <add>, %43, %cst_50 [0] : vector<14x256xf32> to vector<256xf32>
    %49 = vector.shape_cast %48 : vector<256xf32> to vector<1x256xf32>
    %50 = arith.addf %47, %49 : vector<1x256xf32>
    %cst_51 = arith.constant 2.800000e+01 : f32
    %51 = vector.broadcast %cst_51 : f32 to vector<1x256xf32>
    %52 = arith.divf %50, %51 : vector<1x256xf32>
    %53 = vector.broadcast %52 : vector<1x256xf32> to vector<14x256xf32>
    %54 = arith.subf %21, %53 : vector<14x256xf32>
    %55 = vector.broadcast %52 : vector<1x256xf32> to vector<14x256xf32>
    %56 = arith.subf %21, %55 : vector<14x256xf32>
    %57 = arith.mulf %54, %56 : vector<14x256xf32>
    %cst_52 = arith.constant dense<0.000000e+00> : vector<256xf32>
    %58 = vector.multi_reduction <add>, %57, %cst_52 [0] : vector<14x256xf32> to vector<256xf32>
    %59 = vector.shape_cast %58 : vector<256xf32> to vector<1x256xf32>
    %cst_53 = arith.constant 0.000000e+00 : f32
    %60 = vector.broadcast %cst_53 : f32 to vector<1x256xf32>
    %61 = arith.addf %60, %59 : vector<1x256xf32>
    %62 = vector.broadcast %52 : vector<1x256xf32> to vector<14x256xf32>
    %63 = arith.subf %43, %62 : vector<14x256xf32>
    %64 = vector.broadcast %52 : vector<1x256xf32> to vector<14x256xf32>
    %65 = arith.subf %43, %64 : vector<14x256xf32>
    %66 = arith.mulf %63, %65 : vector<14x256xf32>
    %cst_54 = arith.constant dense<0.000000e+00> : vector<256xf32>
    %67 = vector.multi_reduction <add>, %66, %cst_54 [0] : vector<14x256xf32> to vector<256xf32>
    %68 = vector.shape_cast %67 : vector<256xf32> to vector<1x256xf32>
    %69 = arith.addf %61, %68 : vector<1x256xf32>
    %cst_55 = arith.constant 2.800000e+01 : f32
    %70 = vector.broadcast %cst_55 : f32 to vector<1x256xf32>
    %71 = arith.divf %69, %70 : vector<1x256xf32>
    %cst_56 = arith.constant 9.99999974E-6 : f32
    %72 = vector.broadcast %cst_56 : f32 to vector<1x256xf32>
    %73 = arith.addf %71, %72 : vector<1x256xf32>
    %74 = math.rsqrt %73 : vector<1x256xf32>
    %c0_57 = arith.constant 0 : index
    %c0_58 = arith.constant 0 : index
    %75 = vector.load %arg2[%c0_57, %c0_58] : memref<1x256xf32, #tpu.memory_space<vmem>>, vector<1x256xf32>
    %76 = arith.mulf %74, %75 : vector<1x256xf32>
    %c0_59 = arith.constant 0 : index
    %c0_60 = arith.constant 0 : index
    %77 = vector.load %arg3[%c0_59, %c0_60] : memref<1x256xf32, #tpu.memory_space<vmem>>, vector<1x256xf32>
    %78 = arith.mulf %52, %76 : vector<1x256xf32>
    %79 = arith.subf %77, %78 : vector<1x256xf32>
    %80 = vector.broadcast %76 : vector<1x256xf32> to vector<14x256xf32>
    %81 = arith.mulf %21, %80 : vector<14x256xf32>
    %82 = vector.broadcast %79 : vector<1x256xf32> to vector<14x256xf32>
    %83 = arith.addf %81, %82 : vector<14x256xf32>
    %84 = vector.broadcast %76 : vector<1x256xf32> to vector<14x256xf32>
    %85 = arith.mulf %43, %84 : vector<14x256xf32>
    %86 = vector.broadcast %79 : vector<1x256xf32> to vector<14x256xf32>
    %87 = arith.addf %85, %86 : vector<14x256xf32>
    %88 = arith.truncf %83 : vector<14x256xf32> to vector<14x256xbf16>
    %c0_61 = arith.constant 0 : index
    %c0_62 = arith.constant 0 : index
    %c0_63 = arith.constant 0 : index
    %89 = vector.load %arg4[%c0_61, %c0_62, %c0_63] : memref<2x14x256xbf16, #tpu.memory_space<vmem>>, vector<1x14x256xbf16>
    %90 = vector.shape_cast %89 : vector<1x14x256xbf16> to vector<14x256xbf16>
    %91 = vector.shape_cast %88 : vector<14x256xbf16> to vector<1x14x256xbf16>
    tpu.vector_store %arg4[%c0_61, %c0_62, %c0_63], %91 {strides = array<i32>} : memref<2x14x256xbf16, #tpu.memory_space<vmem>>, vector<1x14x256xbf16>,
    %92 = arith.truncf %87 : vector<14x256xf32> to vector<14x256xbf16>
    %c1_64 = arith.constant 1 : index
    %c0_65 = arith.constant 0 : index
    %c0_66 = arith.constant 0 : index
    %93 = vector.load %arg4[%c1_64, %c0_65, %c0_66] : memref<2x14x256xbf16, #tpu.memory_space<vmem>>, vector<1x14x256xbf16>
    %94 = vector.shape_cast %93 : vector<1x14x256xbf16> to vector<14x256xbf16>
    %95 = vector.shape_cast %92 : vector<14x256xbf16> to vector<1x14x256xbf16>
    tpu.vector_store %arg4[%c1_64, %c0_65, %c0_66], %95 {strides = array<i32>} : memref<2x14x256xbf16, #tpu.memory_space<vmem>>, vector<1x14x256xbf16>,
    return
  }
}

module attributes {stable_mosaic.version = 11 : i64} {
  func.func @kernel(%arg0: memref<2x2x17x256xbf16, #tpu.memory_space<vmem>>, %arg1: memref<9x256x256xbf16, #tpu.memory_space<vmem>>, %arg2: memref<1x256xf32, #tpu.memory_space<vmem>>, %arg3: memref<1x256xf32, #tpu.memory_space<vmem>>, %arg4: memref<2x13x256xbf16, #tpu.memory_space<vmem>>) attributes {dimension_semantics = [], scalar_prefetch = 0 : i64, scratch_operands = 0 : i64, tpu.core_type = #tpu.core_type<tc>} {
    %c0 = arith.constant 0 : index
    %c0_0 = arith.constant 0 : index
    %c0_1 = arith.constant 0 : index
    %c0_2 = arith.constant 0 : index
    %0 = vector.load %arg0[%c0, %c0_0, %c0_1, %c0_2] : memref<2x2x17x256xbf16, #tpu.memory_space<vmem>>, vector<1x1x13x256xbf16>
    %1 = vector.shape_cast %0 : vector<1x1x13x256xbf16> to vector<13x256xbf16>
    %c0_3 = arith.constant 0 : index
    %c0_4 = arith.constant 0 : index
    %c0_5 = arith.constant 0 : index
    %2 = vector.load %arg1[%c0_3, %c0_4, %c0_5] : memref<9x256x256xbf16, #tpu.memory_space<vmem>>, vector<1x256x256xbf16>
    %3 = vector.shape_cast %2 : vector<1x256x256xbf16> to vector<256x256xbf16>
    %cst = arith.constant dense<0.000000e+00> : vector<13x256xf32>
    %4 = tpu.matmul %1, %3, %cst {dimension_numbers = #tpu.dot_dimension_numbers<[1], [0], [0], [1], [0, 0, 1, 1], [], []>} : vector<13x256xbf16>, vector<256x256xbf16>, vector<13x256xf32> -> vector<13x256xf32>
    %c1 = arith.constant 1 : index
    %c0_6 = arith.constant 0 : index
    %c0_7 = arith.constant 0 : index
    %c0_8 = arith.constant 0 : index
    %5 = vector.load %arg0[%c1, %c0_6, %c0_7, %c0_8] : memref<2x2x17x256xbf16, #tpu.memory_space<vmem>>, vector<1x1x13x256xbf16>
    %6 = vector.shape_cast %5 : vector<1x1x13x256xbf16> to vector<13x256xbf16>
    %c1_9 = arith.constant 1 : index
    %c0_10 = arith.constant 0 : index
    %c0_11 = arith.constant 0 : index
    %7 = vector.load %arg1[%c1_9, %c0_10, %c0_11] : memref<9x256x256xbf16, #tpu.memory_space<vmem>>, vector<1x256x256xbf16>
    %8 = vector.shape_cast %7 : vector<1x256x256xbf16> to vector<256x256xbf16>
    %cst_12 = arith.constant dense<0.000000e+00> : vector<13x256xf32>
    %9 = tpu.matmul %6, %8, %cst_12 {dimension_numbers = #tpu.dot_dimension_numbers<[1], [0], [0], [1], [0, 0, 1, 1], [], []>} : vector<13x256xbf16>, vector<256x256xbf16>, vector<13x256xf32> -> vector<13x256xf32>
    %10 = arith.addf %4, %9 : vector<13x256xf32>
    %c0_13 = arith.constant 0 : index
    %c0_14 = arith.constant 0 : index
    %c1_15 = arith.constant 1 : index
    %c0_16 = arith.constant 0 : index
    %11 = vector.load %arg0[%c0_13, %c0_14, %c1_15, %c0_16] : memref<2x2x17x256xbf16, #tpu.memory_space<vmem>>, vector<1x1x13x256xbf16>
    %12 = vector.shape_cast %11 : vector<1x1x13x256xbf16> to vector<13x256xbf16>
    %c2 = arith.constant 2 : index
    %c0_17 = arith.constant 0 : index
    %c0_18 = arith.constant 0 : index
    %13 = vector.load %arg1[%c2, %c0_17, %c0_18] : memref<9x256x256xbf16, #tpu.memory_space<vmem>>, vector<1x256x256xbf16>
    %14 = vector.shape_cast %13 : vector<1x256x256xbf16> to vector<256x256xbf16>
    %cst_19 = arith.constant dense<0.000000e+00> : vector<13x256xf32>
    %15 = tpu.matmul %12, %14, %cst_19 {dimension_numbers = #tpu.dot_dimension_numbers<[1], [0], [0], [1], [0, 0, 1, 1], [], []>} : vector<13x256xbf16>, vector<256x256xbf16>, vector<13x256xf32> -> vector<13x256xf32>
    %16 = arith.addf %10, %15 : vector<13x256xf32>
    %c1_20 = arith.constant 1 : index
    %c0_21 = arith.constant 0 : index
    %c1_22 = arith.constant 1 : index
    %c0_23 = arith.constant 0 : index
    %17 = vector.load %arg0[%c1_20, %c0_21, %c1_22, %c0_23] : memref<2x2x17x256xbf16, #tpu.memory_space<vmem>>, vector<1x1x13x256xbf16>
    %18 = vector.shape_cast %17 : vector<1x1x13x256xbf16> to vector<13x256xbf16>
    %c3 = arith.constant 3 : index
    %c0_24 = arith.constant 0 : index
    %c0_25 = arith.constant 0 : index
    %19 = vector.load %arg1[%c3, %c0_24, %c0_25] : memref<9x256x256xbf16, #tpu.memory_space<vmem>>, vector<1x256x256xbf16>
    %20 = vector.shape_cast %19 : vector<1x256x256xbf16> to vector<256x256xbf16>
    %cst_26 = arith.constant dense<0.000000e+00> : vector<13x256xf32>
    %21 = tpu.matmul %18, %20, %cst_26 {dimension_numbers = #tpu.dot_dimension_numbers<[1], [0], [0], [1], [0, 0, 1, 1], [], []>} : vector<13x256xbf16>, vector<256x256xbf16>, vector<13x256xf32> -> vector<13x256xf32>
    %22 = arith.addf %16, %21 : vector<13x256xf32>
    %c0_27 = arith.constant 0 : index
    %c0_28 = arith.constant 0 : index
    %c2_29 = arith.constant 2 : index
    %c0_30 = arith.constant 0 : index
    %23 = vector.load %arg0[%c0_27, %c0_28, %c2_29, %c0_30] : memref<2x2x17x256xbf16, #tpu.memory_space<vmem>>, vector<1x1x13x256xbf16>
    %24 = vector.shape_cast %23 : vector<1x1x13x256xbf16> to vector<13x256xbf16>
    %c4 = arith.constant 4 : index
    %c0_31 = arith.constant 0 : index
    %c0_32 = arith.constant 0 : index
    %25 = vector.load %arg1[%c4, %c0_31, %c0_32] : memref<9x256x256xbf16, #tpu.memory_space<vmem>>, vector<1x256x256xbf16>
    %26 = vector.shape_cast %25 : vector<1x256x256xbf16> to vector<256x256xbf16>
    %cst_33 = arith.constant dense<0.000000e+00> : vector<13x256xf32>
    %27 = tpu.matmul %24, %26, %cst_33 {dimension_numbers = #tpu.dot_dimension_numbers<[1], [0], [0], [1], [0, 0, 1, 1], [], []>} : vector<13x256xbf16>, vector<256x256xbf16>, vector<13x256xf32> -> vector<13x256xf32>
    %28 = arith.addf %22, %27 : vector<13x256xf32>
    %c1_34 = arith.constant 1 : index
    %c0_35 = arith.constant 0 : index
    %c2_36 = arith.constant 2 : index
    %c0_37 = arith.constant 0 : index
    %29 = vector.load %arg0[%c1_34, %c0_35, %c2_36, %c0_37] : memref<2x2x17x256xbf16, #tpu.memory_space<vmem>>, vector<1x1x13x256xbf16>
    %30 = vector.shape_cast %29 : vector<1x1x13x256xbf16> to vector<13x256xbf16>
    %c5 = arith.constant 5 : index
    %c0_38 = arith.constant 0 : index
    %c0_39 = arith.constant 0 : index
    %31 = vector.load %arg1[%c5, %c0_38, %c0_39] : memref<9x256x256xbf16, #tpu.memory_space<vmem>>, vector<1x256x256xbf16>
    %32 = vector.shape_cast %31 : vector<1x256x256xbf16> to vector<256x256xbf16>
    %cst_40 = arith.constant dense<0.000000e+00> : vector<13x256xf32>
    %33 = tpu.matmul %30, %32, %cst_40 {dimension_numbers = #tpu.dot_dimension_numbers<[1], [0], [0], [1], [0, 0, 1, 1], [], []>} : vector<13x256xbf16>, vector<256x256xbf16>, vector<13x256xf32> -> vector<13x256xf32>
    %34 = arith.addf %28, %33 : vector<13x256xf32>
    %c0_41 = arith.constant 0 : index
    %c0_42 = arith.constant 0 : index
    %c3_43 = arith.constant 3 : index
    %c0_44 = arith.constant 0 : index
    %35 = vector.load %arg0[%c0_41, %c0_42, %c3_43, %c0_44] : memref<2x2x17x256xbf16, #tpu.memory_space<vmem>>, vector<1x1x13x256xbf16>
    %36 = vector.shape_cast %35 : vector<1x1x13x256xbf16> to vector<13x256xbf16>
    %c6 = arith.constant 6 : index
    %c0_45 = arith.constant 0 : index
    %c0_46 = arith.constant 0 : index
    %37 = vector.load %arg1[%c6, %c0_45, %c0_46] : memref<9x256x256xbf16, #tpu.memory_space<vmem>>, vector<1x256x256xbf16>
    %38 = vector.shape_cast %37 : vector<1x256x256xbf16> to vector<256x256xbf16>
    %cst_47 = arith.constant dense<0.000000e+00> : vector<13x256xf32>
    %39 = tpu.matmul %36, %38, %cst_47 {dimension_numbers = #tpu.dot_dimension_numbers<[1], [0], [0], [1], [0, 0, 1, 1], [], []>} : vector<13x256xbf16>, vector<256x256xbf16>, vector<13x256xf32> -> vector<13x256xf32>
    %40 = arith.addf %34, %39 : vector<13x256xf32>
    %c1_48 = arith.constant 1 : index
    %c0_49 = arith.constant 0 : index
    %c3_50 = arith.constant 3 : index
    %c0_51 = arith.constant 0 : index
    %41 = vector.load %arg0[%c1_48, %c0_49, %c3_50, %c0_51] : memref<2x2x17x256xbf16, #tpu.memory_space<vmem>>, vector<1x1x13x256xbf16>
    %42 = vector.shape_cast %41 : vector<1x1x13x256xbf16> to vector<13x256xbf16>
    %c7 = arith.constant 7 : index
    %c0_52 = arith.constant 0 : index
    %c0_53 = arith.constant 0 : index
    %43 = vector.load %arg1[%c7, %c0_52, %c0_53] : memref<9x256x256xbf16, #tpu.memory_space<vmem>>, vector<1x256x256xbf16>
    %44 = vector.shape_cast %43 : vector<1x256x256xbf16> to vector<256x256xbf16>
    %cst_54 = arith.constant dense<0.000000e+00> : vector<13x256xf32>
    %45 = tpu.matmul %42, %44, %cst_54 {dimension_numbers = #tpu.dot_dimension_numbers<[1], [0], [0], [1], [0, 0, 1, 1], [], []>} : vector<13x256xbf16>, vector<256x256xbf16>, vector<13x256xf32> -> vector<13x256xf32>
    %46 = arith.addf %40, %45 : vector<13x256xf32>
    %c0_55 = arith.constant 0 : index
    %c0_56 = arith.constant 0 : index
    %c4_57 = arith.constant 4 : index
    %c0_58 = arith.constant 0 : index
    %47 = vector.load %arg0[%c0_55, %c0_56, %c4_57, %c0_58] : memref<2x2x17x256xbf16, #tpu.memory_space<vmem>>, vector<1x1x13x256xbf16>
    %48 = vector.shape_cast %47 : vector<1x1x13x256xbf16> to vector<13x256xbf16>
    %c8 = arith.constant 8 : index
    %c0_59 = arith.constant 0 : index
    %c0_60 = arith.constant 0 : index
    %49 = vector.load %arg1[%c8, %c0_59, %c0_60] : memref<9x256x256xbf16, #tpu.memory_space<vmem>>, vector<1x256x256xbf16>
    %50 = vector.shape_cast %49 : vector<1x256x256xbf16> to vector<256x256xbf16>
    %cst_61 = arith.constant dense<0.000000e+00> : vector<13x256xf32>
    %51 = tpu.matmul %48, %50, %cst_61 {dimension_numbers = #tpu.dot_dimension_numbers<[1], [0], [0], [1], [0, 0, 1, 1], [], []>} : vector<13x256xbf16>, vector<256x256xbf16>, vector<13x256xf32> -> vector<13x256xf32>
    %52 = arith.addf %46, %51 : vector<13x256xf32>
    %cst_62 = arith.constant 0.000000e+00 : f32
    %53 = vector.broadcast %cst_62 : f32 to vector<13x256xf32>
    %54 = arith.cmpf oge, %52, %53 : vector<13x256xf32>
    %cst_63 = arith.constant 2.000000e-01 : f32
    %55 = vector.broadcast %cst_63 : f32 to vector<13x256xf32>
    %56 = arith.mulf %55, %52 : vector<13x256xf32>
    %57 = arith.select %54, %52, %56 : vector<13x256xi1>, vector<13x256xf32>
    %c0_64 = arith.constant 0 : index
    %c1_65 = arith.constant 1 : index
    %c0_66 = arith.constant 0 : index
    %c0_67 = arith.constant 0 : index
    %58 = vector.load %arg0[%c0_64, %c1_65, %c0_66, %c0_67] : memref<2x2x17x256xbf16, #tpu.memory_space<vmem>>, vector<1x1x13x256xbf16>
    %59 = vector.shape_cast %58 : vector<1x1x13x256xbf16> to vector<13x256xbf16>
    %c0_68 = arith.constant 0 : index
    %c0_69 = arith.constant 0 : index
    %c0_70 = arith.constant 0 : index
    %60 = vector.load %arg1[%c0_68, %c0_69, %c0_70] : memref<9x256x256xbf16, #tpu.memory_space<vmem>>, vector<1x256x256xbf16>
    %61 = vector.shape_cast %60 : vector<1x256x256xbf16> to vector<256x256xbf16>
    %cst_71 = arith.constant dense<0.000000e+00> : vector<13x256xf32>
    %62 = tpu.matmul %59, %61, %cst_71 {dimension_numbers = #tpu.dot_dimension_numbers<[1], [0], [0], [1], [0, 0, 1, 1], [], []>} : vector<13x256xbf16>, vector<256x256xbf16>, vector<13x256xf32> -> vector<13x256xf32>
    %c1_72 = arith.constant 1 : index
    %c1_73 = arith.constant 1 : index
    %c0_74 = arith.constant 0 : index
    %c0_75 = arith.constant 0 : index
    %63 = vector.load %arg0[%c1_72, %c1_73, %c0_74, %c0_75] : memref<2x2x17x256xbf16, #tpu.memory_space<vmem>>, vector<1x1x13x256xbf16>
    %64 = vector.shape_cast %63 : vector<1x1x13x256xbf16> to vector<13x256xbf16>
    %c1_76 = arith.constant 1 : index
    %c0_77 = arith.constant 0 : index
    %c0_78 = arith.constant 0 : index
    %65 = vector.load %arg1[%c1_76, %c0_77, %c0_78] : memref<9x256x256xbf16, #tpu.memory_space<vmem>>, vector<1x256x256xbf16>
    %66 = vector.shape_cast %65 : vector<1x256x256xbf16> to vector<256x256xbf16>
    %cst_79 = arith.constant dense<0.000000e+00> : vector<13x256xf32>
    %67 = tpu.matmul %64, %66, %cst_79 {dimension_numbers = #tpu.dot_dimension_numbers<[1], [0], [0], [1], [0, 0, 1, 1], [], []>} : vector<13x256xbf16>, vector<256x256xbf16>, vector<13x256xf32> -> vector<13x256xf32>
    %68 = arith.addf %62, %67 : vector<13x256xf32>
    %c0_80 = arith.constant 0 : index
    %c1_81 = arith.constant 1 : index
    %c1_82 = arith.constant 1 : index
    %c0_83 = arith.constant 0 : index
    %69 = vector.load %arg0[%c0_80, %c1_81, %c1_82, %c0_83] : memref<2x2x17x256xbf16, #tpu.memory_space<vmem>>, vector<1x1x13x256xbf16>
    %70 = vector.shape_cast %69 : vector<1x1x13x256xbf16> to vector<13x256xbf16>
    %c2_84 = arith.constant 2 : index
    %c0_85 = arith.constant 0 : index
    %c0_86 = arith.constant 0 : index
    %71 = vector.load %arg1[%c2_84, %c0_85, %c0_86] : memref<9x256x256xbf16, #tpu.memory_space<vmem>>, vector<1x256x256xbf16>
    %72 = vector.shape_cast %71 : vector<1x256x256xbf16> to vector<256x256xbf16>
    %cst_87 = arith.constant dense<0.000000e+00> : vector<13x256xf32>
    %73 = tpu.matmul %70, %72, %cst_87 {dimension_numbers = #tpu.dot_dimension_numbers<[1], [0], [0], [1], [0, 0, 1, 1], [], []>} : vector<13x256xbf16>, vector<256x256xbf16>, vector<13x256xf32> -> vector<13x256xf32>
    %74 = arith.addf %68, %73 : vector<13x256xf32>
    %c1_88 = arith.constant 1 : index
    %c1_89 = arith.constant 1 : index
    %c1_90 = arith.constant 1 : index
    %c0_91 = arith.constant 0 : index
    %75 = vector.load %arg0[%c1_88, %c1_89, %c1_90, %c0_91] : memref<2x2x17x256xbf16, #tpu.memory_space<vmem>>, vector<1x1x13x256xbf16>
    %76 = vector.shape_cast %75 : vector<1x1x13x256xbf16> to vector<13x256xbf16>
    %c3_92 = arith.constant 3 : index
    %c0_93 = arith.constant 0 : index
    %c0_94 = arith.constant 0 : index
    %77 = vector.load %arg1[%c3_92, %c0_93, %c0_94] : memref<9x256x256xbf16, #tpu.memory_space<vmem>>, vector<1x256x256xbf16>
    %78 = vector.shape_cast %77 : vector<1x256x256xbf16> to vector<256x256xbf16>
    %cst_95 = arith.constant dense<0.000000e+00> : vector<13x256xf32>
    %79 = tpu.matmul %76, %78, %cst_95 {dimension_numbers = #tpu.dot_dimension_numbers<[1], [0], [0], [1], [0, 0, 1, 1], [], []>} : vector<13x256xbf16>, vector<256x256xbf16>, vector<13x256xf32> -> vector<13x256xf32>
    %80 = arith.addf %74, %79 : vector<13x256xf32>
    %c0_96 = arith.constant 0 : index
    %c1_97 = arith.constant 1 : index
    %c2_98 = arith.constant 2 : index
    %c0_99 = arith.constant 0 : index
    %81 = vector.load %arg0[%c0_96, %c1_97, %c2_98, %c0_99] : memref<2x2x17x256xbf16, #tpu.memory_space<vmem>>, vector<1x1x13x256xbf16>
    %82 = vector.shape_cast %81 : vector<1x1x13x256xbf16> to vector<13x256xbf16>
    %c4_100 = arith.constant 4 : index
    %c0_101 = arith.constant 0 : index
    %c0_102 = arith.constant 0 : index
    %83 = vector.load %arg1[%c4_100, %c0_101, %c0_102] : memref<9x256x256xbf16, #tpu.memory_space<vmem>>, vector<1x256x256xbf16>
    %84 = vector.shape_cast %83 : vector<1x256x256xbf16> to vector<256x256xbf16>
    %cst_103 = arith.constant dense<0.000000e+00> : vector<13x256xf32>
    %85 = tpu.matmul %82, %84, %cst_103 {dimension_numbers = #tpu.dot_dimension_numbers<[1], [0], [0], [1], [0, 0, 1, 1], [], []>} : vector<13x256xbf16>, vector<256x256xbf16>, vector<13x256xf32> -> vector<13x256xf32>
    %86 = arith.addf %80, %85 : vector<13x256xf32>
    %c1_104 = arith.constant 1 : index
    %c1_105 = arith.constant 1 : index
    %c2_106 = arith.constant 2 : index
    %c0_107 = arith.constant 0 : index
    %87 = vector.load %arg0[%c1_104, %c1_105, %c2_106, %c0_107] : memref<2x2x17x256xbf16, #tpu.memory_space<vmem>>, vector<1x1x13x256xbf16>
    %88 = vector.shape_cast %87 : vector<1x1x13x256xbf16> to vector<13x256xbf16>
    %c5_108 = arith.constant 5 : index
    %c0_109 = arith.constant 0 : index
    %c0_110 = arith.constant 0 : index
    %89 = vector.load %arg1[%c5_108, %c0_109, %c0_110] : memref<9x256x256xbf16, #tpu.memory_space<vmem>>, vector<1x256x256xbf16>
    %90 = vector.shape_cast %89 : vector<1x256x256xbf16> to vector<256x256xbf16>
    %cst_111 = arith.constant dense<0.000000e+00> : vector<13x256xf32>
    %91 = tpu.matmul %88, %90, %cst_111 {dimension_numbers = #tpu.dot_dimension_numbers<[1], [0], [0], [1], [0, 0, 1, 1], [], []>} : vector<13x256xbf16>, vector<256x256xbf16>, vector<13x256xf32> -> vector<13x256xf32>
    %92 = arith.addf %86, %91 : vector<13x256xf32>
    %c0_112 = arith.constant 0 : index
    %c1_113 = arith.constant 1 : index
    %c3_114 = arith.constant 3 : index
    %c0_115 = arith.constant 0 : index
    %93 = vector.load %arg0[%c0_112, %c1_113, %c3_114, %c0_115] : memref<2x2x17x256xbf16, #tpu.memory_space<vmem>>, vector<1x1x13x256xbf16>
    %94 = vector.shape_cast %93 : vector<1x1x13x256xbf16> to vector<13x256xbf16>
    %c6_116 = arith.constant 6 : index
    %c0_117 = arith.constant 0 : index
    %c0_118 = arith.constant 0 : index
    %95 = vector.load %arg1[%c6_116, %c0_117, %c0_118] : memref<9x256x256xbf16, #tpu.memory_space<vmem>>, vector<1x256x256xbf16>
    %96 = vector.shape_cast %95 : vector<1x256x256xbf16> to vector<256x256xbf16>
    %cst_119 = arith.constant dense<0.000000e+00> : vector<13x256xf32>
    %97 = tpu.matmul %94, %96, %cst_119 {dimension_numbers = #tpu.dot_dimension_numbers<[1], [0], [0], [1], [0, 0, 1, 1], [], []>} : vector<13x256xbf16>, vector<256x256xbf16>, vector<13x256xf32> -> vector<13x256xf32>
    %98 = arith.addf %92, %97 : vector<13x256xf32>
    %c1_120 = arith.constant 1 : index
    %c1_121 = arith.constant 1 : index
    %c3_122 = arith.constant 3 : index
    %c0_123 = arith.constant 0 : index
    %99 = vector.load %arg0[%c1_120, %c1_121, %c3_122, %c0_123] : memref<2x2x17x256xbf16, #tpu.memory_space<vmem>>, vector<1x1x13x256xbf16>
    %100 = vector.shape_cast %99 : vector<1x1x13x256xbf16> to vector<13x256xbf16>
    %c7_124 = arith.constant 7 : index
    %c0_125 = arith.constant 0 : index
    %c0_126 = arith.constant 0 : index
    %101 = vector.load %arg1[%c7_124, %c0_125, %c0_126] : memref<9x256x256xbf16, #tpu.memory_space<vmem>>, vector<1x256x256xbf16>
    %102 = vector.shape_cast %101 : vector<1x256x256xbf16> to vector<256x256xbf16>
    %cst_127 = arith.constant dense<0.000000e+00> : vector<13x256xf32>
    %103 = tpu.matmul %100, %102, %cst_127 {dimension_numbers = #tpu.dot_dimension_numbers<[1], [0], [0], [1], [0, 0, 1, 1], [], []>} : vector<13x256xbf16>, vector<256x256xbf16>, vector<13x256xf32> -> vector<13x256xf32>
    %104 = arith.addf %98, %103 : vector<13x256xf32>
    %c0_128 = arith.constant 0 : index
    %c1_129 = arith.constant 1 : index
    %c4_130 = arith.constant 4 : index
    %c0_131 = arith.constant 0 : index
    %105 = vector.load %arg0[%c0_128, %c1_129, %c4_130, %c0_131] : memref<2x2x17x256xbf16, #tpu.memory_space<vmem>>, vector<1x1x13x256xbf16>
    %106 = vector.shape_cast %105 : vector<1x1x13x256xbf16> to vector<13x256xbf16>
    %c8_132 = arith.constant 8 : index
    %c0_133 = arith.constant 0 : index
    %c0_134 = arith.constant 0 : index
    %107 = vector.load %arg1[%c8_132, %c0_133, %c0_134] : memref<9x256x256xbf16, #tpu.memory_space<vmem>>, vector<1x256x256xbf16>
    %108 = vector.shape_cast %107 : vector<1x256x256xbf16> to vector<256x256xbf16>
    %cst_135 = arith.constant dense<0.000000e+00> : vector<13x256xf32>
    %109 = tpu.matmul %106, %108, %cst_135 {dimension_numbers = #tpu.dot_dimension_numbers<[1], [0], [0], [1], [0, 0, 1, 1], [], []>} : vector<13x256xbf16>, vector<256x256xbf16>, vector<13x256xf32> -> vector<13x256xf32>
    %110 = arith.addf %104, %109 : vector<13x256xf32>
    %cst_136 = arith.constant 0.000000e+00 : f32
    %111 = vector.broadcast %cst_136 : f32 to vector<13x256xf32>
    %112 = arith.cmpf oge, %110, %111 : vector<13x256xf32>
    %cst_137 = arith.constant 2.000000e-01 : f32
    %113 = vector.broadcast %cst_137 : f32 to vector<13x256xf32>
    %114 = arith.mulf %113, %110 : vector<13x256xf32>
    %115 = arith.select %112, %110, %114 : vector<13x256xi1>, vector<13x256xf32>
    %cst_138 = arith.constant dense<0.000000e+00> : vector<256xf32>
    %116 = vector.multi_reduction <add>, %57, %cst_138 [0] : vector<13x256xf32> to vector<256xf32>
    %117 = vector.shape_cast %116 : vector<256xf32> to vector<1x256xf32>
    %cst_139 = arith.constant 0.000000e+00 : f32
    %118 = vector.broadcast %cst_139 : f32 to vector<1x256xf32>
    %119 = arith.addf %118, %117 : vector<1x256xf32>
    %cst_140 = arith.constant dense<0.000000e+00> : vector<256xf32>
    %120 = vector.multi_reduction <add>, %115, %cst_140 [0] : vector<13x256xf32> to vector<256xf32>
    %121 = vector.shape_cast %120 : vector<256xf32> to vector<1x256xf32>
    %122 = arith.addf %119, %121 : vector<1x256xf32>
    %cst_141 = arith.constant 2.600000e+01 : f32
    %123 = vector.broadcast %cst_141 : f32 to vector<1x256xf32>
    %124 = arith.divf %122, %123 : vector<1x256xf32>
    %125 = vector.broadcast %124 : vector<1x256xf32> to vector<13x256xf32>
    %126 = arith.subf %57, %125 : vector<13x256xf32>
    %127 = vector.broadcast %124 : vector<1x256xf32> to vector<13x256xf32>
    %128 = arith.subf %57, %127 : vector<13x256xf32>
    %129 = arith.mulf %126, %128 : vector<13x256xf32>
    %cst_142 = arith.constant dense<0.000000e+00> : vector<256xf32>
    %130 = vector.multi_reduction <add>, %129, %cst_142 [0] : vector<13x256xf32> to vector<256xf32>
    %131 = vector.shape_cast %130 : vector<256xf32> to vector<1x256xf32>
    %cst_143 = arith.constant 0.000000e+00 : f32
    %132 = vector.broadcast %cst_143 : f32 to vector<1x256xf32>
    %133 = arith.addf %132, %131 : vector<1x256xf32>
    %134 = vector.broadcast %124 : vector<1x256xf32> to vector<13x256xf32>
    %135 = arith.subf %115, %134 : vector<13x256xf32>
    %136 = vector.broadcast %124 : vector<1x256xf32> to vector<13x256xf32>
    %137 = arith.subf %115, %136 : vector<13x256xf32>
    %138 = arith.mulf %135, %137 : vector<13x256xf32>
    %cst_144 = arith.constant dense<0.000000e+00> : vector<256xf32>
    %139 = vector.multi_reduction <add>, %138, %cst_144 [0] : vector<13x256xf32> to vector<256xf32>
    %140 = vector.shape_cast %139 : vector<256xf32> to vector<1x256xf32>
    %141 = arith.addf %133, %140 : vector<1x256xf32>
    %cst_145 = arith.constant 2.600000e+01 : f32
    %142 = vector.broadcast %cst_145 : f32 to vector<1x256xf32>
    %143 = arith.divf %141, %142 : vector<1x256xf32>
    %cst_146 = arith.constant 9.99999974E-6 : f32
    %144 = vector.broadcast %cst_146 : f32 to vector<1x256xf32>
    %145 = arith.addf %143, %144 : vector<1x256xf32>
    %146 = math.rsqrt %145 : vector<1x256xf32>
    %c0_147 = arith.constant 0 : index
    %c0_148 = arith.constant 0 : index
    %147 = vector.load %arg2[%c0_147, %c0_148] : memref<1x256xf32, #tpu.memory_space<vmem>>, vector<1x256xf32>
    %148 = arith.mulf %146, %147 : vector<1x256xf32>
    %c0_149 = arith.constant 0 : index
    %c0_150 = arith.constant 0 : index
    %149 = vector.load %arg3[%c0_149, %c0_150] : memref<1x256xf32, #tpu.memory_space<vmem>>, vector<1x256xf32>
    %150 = arith.mulf %124, %148 : vector<1x256xf32>
    %151 = arith.subf %149, %150 : vector<1x256xf32>
    %152 = vector.broadcast %148 : vector<1x256xf32> to vector<13x256xf32>
    %153 = arith.mulf %57, %152 : vector<13x256xf32>
    %154 = vector.broadcast %151 : vector<1x256xf32> to vector<13x256xf32>
    %155 = arith.addf %153, %154 : vector<13x256xf32>
    %156 = vector.broadcast %148 : vector<1x256xf32> to vector<13x256xf32>
    %157 = arith.mulf %115, %156 : vector<13x256xf32>
    %158 = vector.broadcast %151 : vector<1x256xf32> to vector<13x256xf32>
    %159 = arith.addf %157, %158 : vector<13x256xf32>
    %160 = arith.truncf %155 : vector<13x256xf32> to vector<13x256xbf16>
    %c0_151 = arith.constant 0 : index
    %c0_152 = arith.constant 0 : index
    %c0_153 = arith.constant 0 : index
    %161 = vector.load %arg4[%c0_151, %c0_152, %c0_153] : memref<2x13x256xbf16, #tpu.memory_space<vmem>>, vector<1x13x256xbf16>
    %162 = vector.shape_cast %161 : vector<1x13x256xbf16> to vector<13x256xbf16>
    %163 = vector.shape_cast %160 : vector<13x256xbf16> to vector<1x13x256xbf16>
    tpu.vector_store %arg4[%c0_151, %c0_152, %c0_153], %163 {strides = array<i32>} : memref<2x13x256xbf16, #tpu.memory_space<vmem>>, vector<1x13x256xbf16>,
    %164 = arith.truncf %159 : vector<13x256xf32> to vector<13x256xbf16>
    %c1_154 = arith.constant 1 : index
    %c0_155 = arith.constant 0 : index
    %c0_156 = arith.constant 0 : index
    %165 = vector.load %arg4[%c1_154, %c0_155, %c0_156] : memref<2x13x256xbf16, #tpu.memory_space<vmem>>, vector<1x13x256xbf16>
    %166 = vector.shape_cast %165 : vector<1x13x256xbf16> to vector<13x256xbf16>
    %167 = vector.shape_cast %164 : vector<13x256xbf16> to vector<1x13x256xbf16>
    tpu.vector_store %arg4[%c1_154, %c0_155, %c0_156], %167 {strides = array<i32>} : memref<2x13x256xbf16, #tpu.memory_space<vmem>>, vector<1x13x256xbf16>,
    return
  }
}

module attributes {stable_mosaic.version = 11 : i64} {
  func.func @kernel(%arg0: memref<2x2x16x256xbf16, #tpu.memory_space<vmem>>, %arg1: memref<7x256x256xbf16, #tpu.memory_space<vmem>>, %arg2: memref<1x256xf32, #tpu.memory_space<vmem>>, %arg3: memref<1x256xf32, #tpu.memory_space<vmem>>, %arg4: memref<2x13x256xbf16, #tpu.memory_space<vmem>>) attributes {dimension_semantics = [], scalar_prefetch = 0 : i64, scratch_operands = 0 : i64, tpu.core_type = #tpu.core_type<tc>} {
    %c0 = arith.constant 0 : index
    %c0_0 = arith.constant 0 : index
    %c0_1 = arith.constant 0 : index
    %c0_2 = arith.constant 0 : index
    %0 = vector.load %arg0[%c0, %c0_0, %c0_1, %c0_2] : memref<2x2x16x256xbf16, #tpu.memory_space<vmem>>, vector<1x1x13x256xbf16>
    %1 = vector.shape_cast %0 : vector<1x1x13x256xbf16> to vector<13x256xbf16>
    %c0_3 = arith.constant 0 : index
    %c0_4 = arith.constant 0 : index
    %c0_5 = arith.constant 0 : index
    %2 = vector.load %arg1[%c0_3, %c0_4, %c0_5] : memref<7x256x256xbf16, #tpu.memory_space<vmem>>, vector<1x256x256xbf16>
    %3 = vector.shape_cast %2 : vector<1x256x256xbf16> to vector<256x256xbf16>
    %cst = arith.constant dense<0.000000e+00> : vector<13x256xf32>
    %4 = tpu.matmul %1, %3, %cst {dimension_numbers = #tpu.dot_dimension_numbers<[1], [0], [0], [1], [0, 0, 1, 1], [], []>} : vector<13x256xbf16>, vector<256x256xbf16>, vector<13x256xf32> -> vector<13x256xf32>
    %c1 = arith.constant 1 : index
    %c0_6 = arith.constant 0 : index
    %c0_7 = arith.constant 0 : index
    %c0_8 = arith.constant 0 : index
    %5 = vector.load %arg0[%c1, %c0_6, %c0_7, %c0_8] : memref<2x2x16x256xbf16, #tpu.memory_space<vmem>>, vector<1x1x13x256xbf16>
    %6 = vector.shape_cast %5 : vector<1x1x13x256xbf16> to vector<13x256xbf16>
    %c1_9 = arith.constant 1 : index
    %c0_10 = arith.constant 0 : index
    %c0_11 = arith.constant 0 : index
    %7 = vector.load %arg1[%c1_9, %c0_10, %c0_11] : memref<7x256x256xbf16, #tpu.memory_space<vmem>>, vector<1x256x256xbf16>
    %8 = vector.shape_cast %7 : vector<1x256x256xbf16> to vector<256x256xbf16>
    %cst_12 = arith.constant dense<0.000000e+00> : vector<13x256xf32>
    %9 = tpu.matmul %6, %8, %cst_12 {dimension_numbers = #tpu.dot_dimension_numbers<[1], [0], [0], [1], [0, 0, 1, 1], [], []>} : vector<13x256xbf16>, vector<256x256xbf16>, vector<13x256xf32> -> vector<13x256xf32>
    %10 = arith.addf %4, %9 : vector<13x256xf32>
    %c0_13 = arith.constant 0 : index
    %c0_14 = arith.constant 0 : index
    %c1_15 = arith.constant 1 : index
    %c0_16 = arith.constant 0 : index
    %11 = vector.load %arg0[%c0_13, %c0_14, %c1_15, %c0_16] : memref<2x2x16x256xbf16, #tpu.memory_space<vmem>>, vector<1x1x13x256xbf16>
    %12 = vector.shape_cast %11 : vector<1x1x13x256xbf16> to vector<13x256xbf16>
    %c2 = arith.constant 2 : index
    %c0_17 = arith.constant 0 : index
    %c0_18 = arith.constant 0 : index
    %13 = vector.load %arg1[%c2, %c0_17, %c0_18] : memref<7x256x256xbf16, #tpu.memory_space<vmem>>, vector<1x256x256xbf16>
    %14 = vector.shape_cast %13 : vector<1x256x256xbf16> to vector<256x256xbf16>
    %cst_19 = arith.constant dense<0.000000e+00> : vector<13x256xf32>
    %15 = tpu.matmul %12, %14, %cst_19 {dimension_numbers = #tpu.dot_dimension_numbers<[1], [0], [0], [1], [0, 0, 1, 1], [], []>} : vector<13x256xbf16>, vector<256x256xbf16>, vector<13x256xf32> -> vector<13x256xf32>
    %16 = arith.addf %10, %15 : vector<13x256xf32>
    %c1_20 = arith.constant 1 : index
    %c0_21 = arith.constant 0 : index
    %c1_22 = arith.constant 1 : index
    %c0_23 = arith.constant 0 : index
    %17 = vector.load %arg0[%c1_20, %c0_21, %c1_22, %c0_23] : memref<2x2x16x256xbf16, #tpu.memory_space<vmem>>, vector<1x1x13x256xbf16>
    %18 = vector.shape_cast %17 : vector<1x1x13x256xbf16> to vector<13x256xbf16>
    %c3 = arith.constant 3 : index
    %c0_24 = arith.constant 0 : index
    %c0_25 = arith.constant 0 : index
    %19 = vector.load %arg1[%c3, %c0_24, %c0_25] : memref<7x256x256xbf16, #tpu.memory_space<vmem>>, vector<1x256x256xbf16>
    %20 = vector.shape_cast %19 : vector<1x256x256xbf16> to vector<256x256xbf16>
    %cst_26 = arith.constant dense<0.000000e+00> : vector<13x256xf32>
    %21 = tpu.matmul %18, %20, %cst_26 {dimension_numbers = #tpu.dot_dimension_numbers<[1], [0], [0], [1], [0, 0, 1, 1], [], []>} : vector<13x256xbf16>, vector<256x256xbf16>, vector<13x256xf32> -> vector<13x256xf32>
    %22 = arith.addf %16, %21 : vector<13x256xf32>
    %c0_27 = arith.constant 0 : index
    %c0_28 = arith.constant 0 : index
    %c2_29 = arith.constant 2 : index
    %c0_30 = arith.constant 0 : index
    %23 = vector.load %arg0[%c0_27, %c0_28, %c2_29, %c0_30] : memref<2x2x16x256xbf16, #tpu.memory_space<vmem>>, vector<1x1x13x256xbf16>
    %24 = vector.shape_cast %23 : vector<1x1x13x256xbf16> to vector<13x256xbf16>
    %c4 = arith.constant 4 : index
    %c0_31 = arith.constant 0 : index
    %c0_32 = arith.constant 0 : index
    %25 = vector.load %arg1[%c4, %c0_31, %c0_32] : memref<7x256x256xbf16, #tpu.memory_space<vmem>>, vector<1x256x256xbf16>
    %26 = vector.shape_cast %25 : vector<1x256x256xbf16> to vector<256x256xbf16>
    %cst_33 = arith.constant dense<0.000000e+00> : vector<13x256xf32>
    %27 = tpu.matmul %24, %26, %cst_33 {dimension_numbers = #tpu.dot_dimension_numbers<[1], [0], [0], [1], [0, 0, 1, 1], [], []>} : vector<13x256xbf16>, vector<256x256xbf16>, vector<13x256xf32> -> vector<13x256xf32>
    %28 = arith.addf %22, %27 : vector<13x256xf32>
    %c1_34 = arith.constant 1 : index
    %c0_35 = arith.constant 0 : index
    %c2_36 = arith.constant 2 : index
    %c0_37 = arith.constant 0 : index
    %29 = vector.load %arg0[%c1_34, %c0_35, %c2_36, %c0_37] : memref<2x2x16x256xbf16, #tpu.memory_space<vmem>>, vector<1x1x13x256xbf16>
    %30 = vector.shape_cast %29 : vector<1x1x13x256xbf16> to vector<13x256xbf16>
    %c5 = arith.constant 5 : index
    %c0_38 = arith.constant 0 : index
    %c0_39 = arith.constant 0 : index
    %31 = vector.load %arg1[%c5, %c0_38, %c0_39] : memref<7x256x256xbf16, #tpu.memory_space<vmem>>, vector<1x256x256xbf16>
    %32 = vector.shape_cast %31 : vector<1x256x256xbf16> to vector<256x256xbf16>
    %cst_40 = arith.constant dense<0.000000e+00> : vector<13x256xf32>
    %33 = tpu.matmul %30, %32, %cst_40 {dimension_numbers = #tpu.dot_dimension_numbers<[1], [0], [0], [1], [0, 0, 1, 1], [], []>} : vector<13x256xbf16>, vector<256x256xbf16>, vector<13x256xf32> -> vector<13x256xf32>
    %34 = arith.addf %28, %33 : vector<13x256xf32>
    %c0_41 = arith.constant 0 : index
    %c0_42 = arith.constant 0 : index
    %c3_43 = arith.constant 3 : index
    %c0_44 = arith.constant 0 : index
    %35 = vector.load %arg0[%c0_41, %c0_42, %c3_43, %c0_44] : memref<2x2x16x256xbf16, #tpu.memory_space<vmem>>, vector<1x1x13x256xbf16>
    %36 = vector.shape_cast %35 : vector<1x1x13x256xbf16> to vector<13x256xbf16>
    %c6 = arith.constant 6 : index
    %c0_45 = arith.constant 0 : index
    %c0_46 = arith.constant 0 : index
    %37 = vector.load %arg1[%c6, %c0_45, %c0_46] : memref<7x256x256xbf16, #tpu.memory_space<vmem>>, vector<1x256x256xbf16>
    %38 = vector.shape_cast %37 : vector<1x256x256xbf16> to vector<256x256xbf16>
    %cst_47 = arith.constant dense<0.000000e+00> : vector<13x256xf32>
    %39 = tpu.matmul %36, %38, %cst_47 {dimension_numbers = #tpu.dot_dimension_numbers<[1], [0], [0], [1], [0, 0, 1, 1], [], []>} : vector<13x256xbf16>, vector<256x256xbf16>, vector<13x256xf32> -> vector<13x256xf32>
    %40 = arith.addf %34, %39 : vector<13x256xf32>
    %cst_48 = arith.constant 0.000000e+00 : f32
    %41 = vector.broadcast %cst_48 : f32 to vector<13x256xf32>
    %42 = arith.cmpf oge, %40, %41 : vector<13x256xf32>
    %cst_49 = arith.constant 2.000000e-01 : f32
    %43 = vector.broadcast %cst_49 : f32 to vector<13x256xf32>
    %44 = arith.mulf %43, %40 : vector<13x256xf32>
    %45 = arith.select %42, %40, %44 : vector<13x256xi1>, vector<13x256xf32>
    %c0_50 = arith.constant 0 : index
    %c1_51 = arith.constant 1 : index
    %c0_52 = arith.constant 0 : index
    %c0_53 = arith.constant 0 : index
    %46 = vector.load %arg0[%c0_50, %c1_51, %c0_52, %c0_53] : memref<2x2x16x256xbf16, #tpu.memory_space<vmem>>, vector<1x1x13x256xbf16>
    %47 = vector.shape_cast %46 : vector<1x1x13x256xbf16> to vector<13x256xbf16>
    %c0_54 = arith.constant 0 : index
    %c0_55 = arith.constant 0 : index
    %c0_56 = arith.constant 0 : index
    %48 = vector.load %arg1[%c0_54, %c0_55, %c0_56] : memref<7x256x256xbf16, #tpu.memory_space<vmem>>, vector<1x256x256xbf16>
    %49 = vector.shape_cast %48 : vector<1x256x256xbf16> to vector<256x256xbf16>
    %cst_57 = arith.constant dense<0.000000e+00> : vector<13x256xf32>
    %50 = tpu.matmul %47, %49, %cst_57 {dimension_numbers = #tpu.dot_dimension_numbers<[1], [0], [0], [1], [0, 0, 1, 1], [], []>} : vector<13x256xbf16>, vector<256x256xbf16>, vector<13x256xf32> -> vector<13x256xf32>
    %c1_58 = arith.constant 1 : index
    %c1_59 = arith.constant 1 : index
    %c0_60 = arith.constant 0 : index
    %c0_61 = arith.constant 0 : index
    %51 = vector.load %arg0[%c1_58, %c1_59, %c0_60, %c0_61] : memref<2x2x16x256xbf16, #tpu.memory_space<vmem>>, vector<1x1x13x256xbf16>
    %52 = vector.shape_cast %51 : vector<1x1x13x256xbf16> to vector<13x256xbf16>
    %c1_62 = arith.constant 1 : index
    %c0_63 = arith.constant 0 : index
    %c0_64 = arith.constant 0 : index
    %53 = vector.load %arg1[%c1_62, %c0_63, %c0_64] : memref<7x256x256xbf16, #tpu.memory_space<vmem>>, vector<1x256x256xbf16>
    %54 = vector.shape_cast %53 : vector<1x256x256xbf16> to vector<256x256xbf16>
    %cst_65 = arith.constant dense<0.000000e+00> : vector<13x256xf32>
    %55 = tpu.matmul %52, %54, %cst_65 {dimension_numbers = #tpu.dot_dimension_numbers<[1], [0], [0], [1], [0, 0, 1, 1], [], []>} : vector<13x256xbf16>, vector<256x256xbf16>, vector<13x256xf32> -> vector<13x256xf32>
    %56 = arith.addf %50, %55 : vector<13x256xf32>
    %c0_66 = arith.constant 0 : index
    %c1_67 = arith.constant 1 : index
    %c1_68 = arith.constant 1 : index
    %c0_69 = arith.constant 0 : index
    %57 = vector.load %arg0[%c0_66, %c1_67, %c1_68, %c0_69] : memref<2x2x16x256xbf16, #tpu.memory_space<vmem>>, vector<1x1x13x256xbf16>
    %58 = vector.shape_cast %57 : vector<1x1x13x256xbf16> to vector<13x256xbf16>
    %c2_70 = arith.constant 2 : index
    %c0_71 = arith.constant 0 : index
    %c0_72 = arith.constant 0 : index
    %59 = vector.load %arg1[%c2_70, %c0_71, %c0_72] : memref<7x256x256xbf16, #tpu.memory_space<vmem>>, vector<1x256x256xbf16>
    %60 = vector.shape_cast %59 : vector<1x256x256xbf16> to vector<256x256xbf16>
    %cst_73 = arith.constant dense<0.000000e+00> : vector<13x256xf32>
    %61 = tpu.matmul %58, %60, %cst_73 {dimension_numbers = #tpu.dot_dimension_numbers<[1], [0], [0], [1], [0, 0, 1, 1], [], []>} : vector<13x256xbf16>, vector<256x256xbf16>, vector<13x256xf32> -> vector<13x256xf32>
    %62 = arith.addf %56, %61 : vector<13x256xf32>
    %c1_74 = arith.constant 1 : index
    %c1_75 = arith.constant 1 : index
    %c1_76 = arith.constant 1 : index
    %c0_77 = arith.constant 0 : index
    %63 = vector.load %arg0[%c1_74, %c1_75, %c1_76, %c0_77] : memref<2x2x16x256xbf16, #tpu.memory_space<vmem>>, vector<1x1x13x256xbf16>
    %64 = vector.shape_cast %63 : vector<1x1x13x256xbf16> to vector<13x256xbf16>
    %c3_78 = arith.constant 3 : index
    %c0_79 = arith.constant 0 : index
    %c0_80 = arith.constant 0 : index
    %65 = vector.load %arg1[%c3_78, %c0_79, %c0_80] : memref<7x256x256xbf16, #tpu.memory_space<vmem>>, vector<1x256x256xbf16>
    %66 = vector.shape_cast %65 : vector<1x256x256xbf16> to vector<256x256xbf16>
    %cst_81 = arith.constant dense<0.000000e+00> : vector<13x256xf32>
    %67 = tpu.matmul %64, %66, %cst_81 {dimension_numbers = #tpu.dot_dimension_numbers<[1], [0], [0], [1], [0, 0, 1, 1], [], []>} : vector<13x256xbf16>, vector<256x256xbf16>, vector<13x256xf32> -> vector<13x256xf32>
    %68 = arith.addf %62, %67 : vector<13x256xf32>
    %c0_82 = arith.constant 0 : index
    %c1_83 = arith.constant 1 : index
    %c2_84 = arith.constant 2 : index
    %c0_85 = arith.constant 0 : index
    %69 = vector.load %arg0[%c0_82, %c1_83, %c2_84, %c0_85] : memref<2x2x16x256xbf16, #tpu.memory_space<vmem>>, vector<1x1x13x256xbf16>
    %70 = vector.shape_cast %69 : vector<1x1x13x256xbf16> to vector<13x256xbf16>
    %c4_86 = arith.constant 4 : index
    %c0_87 = arith.constant 0 : index
    %c0_88 = arith.constant 0 : index
    %71 = vector.load %arg1[%c4_86, %c0_87, %c0_88] : memref<7x256x256xbf16, #tpu.memory_space<vmem>>, vector<1x256x256xbf16>
    %72 = vector.shape_cast %71 : vector<1x256x256xbf16> to vector<256x256xbf16>
    %cst_89 = arith.constant dense<0.000000e+00> : vector<13x256xf32>
    %73 = tpu.matmul %70, %72, %cst_89 {dimension_numbers = #tpu.dot_dimension_numbers<[1], [0], [0], [1], [0, 0, 1, 1], [], []>} : vector<13x256xbf16>, vector<256x256xbf16>, vector<13x256xf32> -> vector<13x256xf32>
    %74 = arith.addf %68, %73 : vector<13x256xf32>
    %c1_90 = arith.constant 1 : index
    %c1_91 = arith.constant 1 : index
    %c2_92 = arith.constant 2 : index
    %c0_93 = arith.constant 0 : index
    %75 = vector.load %arg0[%c1_90, %c1_91, %c2_92, %c0_93] : memref<2x2x16x256xbf16, #tpu.memory_space<vmem>>, vector<1x1x13x256xbf16>
    %76 = vector.shape_cast %75 : vector<1x1x13x256xbf16> to vector<13x256xbf16>
    %c5_94 = arith.constant 5 : index
    %c0_95 = arith.constant 0 : index
    %c0_96 = arith.constant 0 : index
    %77 = vector.load %arg1[%c5_94, %c0_95, %c0_96] : memref<7x256x256xbf16, #tpu.memory_space<vmem>>, vector<1x256x256xbf16>
    %78 = vector.shape_cast %77 : vector<1x256x256xbf16> to vector<256x256xbf16>
    %cst_97 = arith.constant dense<0.000000e+00> : vector<13x256xf32>
    %79 = tpu.matmul %76, %78, %cst_97 {dimension_numbers = #tpu.dot_dimension_numbers<[1], [0], [0], [1], [0, 0, 1, 1], [], []>} : vector<13x256xbf16>, vector<256x256xbf16>, vector<13x256xf32> -> vector<13x256xf32>
    %80 = arith.addf %74, %79 : vector<13x256xf32>
    %c0_98 = arith.constant 0 : index
    %c1_99 = arith.constant 1 : index
    %c3_100 = arith.constant 3 : index
    %c0_101 = arith.constant 0 : index
    %81 = vector.load %arg0[%c0_98, %c1_99, %c3_100, %c0_101] : memref<2x2x16x256xbf16, #tpu.memory_space<vmem>>, vector<1x1x13x256xbf16>
    %82 = vector.shape_cast %81 : vector<1x1x13x256xbf16> to vector<13x256xbf16>
    %c6_102 = arith.constant 6 : index
    %c0_103 = arith.constant 0 : index
    %c0_104 = arith.constant 0 : index
    %83 = vector.load %arg1[%c6_102, %c0_103, %c0_104] : memref<7x256x256xbf16, #tpu.memory_space<vmem>>, vector<1x256x256xbf16>
    %84 = vector.shape_cast %83 : vector<1x256x256xbf16> to vector<256x256xbf16>
    %cst_105 = arith.constant dense<0.000000e+00> : vector<13x256xf32>
    %85 = tpu.matmul %82, %84, %cst_105 {dimension_numbers = #tpu.dot_dimension_numbers<[1], [0], [0], [1], [0, 0, 1, 1], [], []>} : vector<13x256xbf16>, vector<256x256xbf16>, vector<13x256xf32> -> vector<13x256xf32>
    %86 = arith.addf %80, %85 : vector<13x256xf32>
    %cst_106 = arith.constant 0.000000e+00 : f32
    %87 = vector.broadcast %cst_106 : f32 to vector<13x256xf32>
    %88 = arith.cmpf oge, %86, %87 : vector<13x256xf32>
    %cst_107 = arith.constant 2.000000e-01 : f32
    %89 = vector.broadcast %cst_107 : f32 to vector<13x256xf32>
    %90 = arith.mulf %89, %86 : vector<13x256xf32>
    %91 = arith.select %88, %86, %90 : vector<13x256xi1>, vector<13x256xf32>
    %cst_108 = arith.constant dense<0.000000e+00> : vector<256xf32>
    %92 = vector.multi_reduction <add>, %45, %cst_108 [0] : vector<13x256xf32> to vector<256xf32>
    %93 = vector.shape_cast %92 : vector<256xf32> to vector<1x256xf32>
    %cst_109 = arith.constant 0.000000e+00 : f32
    %94 = vector.broadcast %cst_109 : f32 to vector<1x256xf32>
    %95 = arith.addf %94, %93 : vector<1x256xf32>
    %cst_110 = arith.constant dense<0.000000e+00> : vector<256xf32>
    %96 = vector.multi_reduction <add>, %91, %cst_110 [0] : vector<13x256xf32> to vector<256xf32>
    %97 = vector.shape_cast %96 : vector<256xf32> to vector<1x256xf32>
    %98 = arith.addf %95, %97 : vector<1x256xf32>
    %cst_111 = arith.constant 2.600000e+01 : f32
    %99 = vector.broadcast %cst_111 : f32 to vector<1x256xf32>
    %100 = arith.divf %98, %99 : vector<1x256xf32>
    %101 = vector.broadcast %100 : vector<1x256xf32> to vector<13x256xf32>
    %102 = arith.subf %45, %101 : vector<13x256xf32>
    %103 = vector.broadcast %100 : vector<1x256xf32> to vector<13x256xf32>
    %104 = arith.subf %45, %103 : vector<13x256xf32>
    %105 = arith.mulf %102, %104 : vector<13x256xf32>
    %cst_112 = arith.constant dense<0.000000e+00> : vector<256xf32>
    %106 = vector.multi_reduction <add>, %105, %cst_112 [0] : vector<13x256xf32> to vector<256xf32>
    %107 = vector.shape_cast %106 : vector<256xf32> to vector<1x256xf32>
    %cst_113 = arith.constant 0.000000e+00 : f32
    %108 = vector.broadcast %cst_113 : f32 to vector<1x256xf32>
    %109 = arith.addf %108, %107 : vector<1x256xf32>
    %110 = vector.broadcast %100 : vector<1x256xf32> to vector<13x256xf32>
    %111 = arith.subf %91, %110 : vector<13x256xf32>
    %112 = vector.broadcast %100 : vector<1x256xf32> to vector<13x256xf32>
    %113 = arith.subf %91, %112 : vector<13x256xf32>
    %114 = arith.mulf %111, %113 : vector<13x256xf32>
    %cst_114 = arith.constant dense<0.000000e+00> : vector<256xf32>
    %115 = vector.multi_reduction <add>, %114, %cst_114 [0] : vector<13x256xf32> to vector<256xf32>
    %116 = vector.shape_cast %115 : vector<256xf32> to vector<1x256xf32>
    %117 = arith.addf %109, %116 : vector<1x256xf32>
    %cst_115 = arith.constant 2.600000e+01 : f32
    %118 = vector.broadcast %cst_115 : f32 to vector<1x256xf32>
    %119 = arith.divf %117, %118 : vector<1x256xf32>
    %cst_116 = arith.constant 9.99999974E-6 : f32
    %120 = vector.broadcast %cst_116 : f32 to vector<1x256xf32>
    %121 = arith.addf %119, %120 : vector<1x256xf32>
    %122 = math.rsqrt %121 : vector<1x256xf32>
    %c0_117 = arith.constant 0 : index
    %c0_118 = arith.constant 0 : index
    %123 = vector.load %arg2[%c0_117, %c0_118] : memref<1x256xf32, #tpu.memory_space<vmem>>, vector<1x256xf32>
    %124 = arith.mulf %122, %123 : vector<1x256xf32>
    %c0_119 = arith.constant 0 : index
    %c0_120 = arith.constant 0 : index
    %125 = vector.load %arg3[%c0_119, %c0_120] : memref<1x256xf32, #tpu.memory_space<vmem>>, vector<1x256xf32>
    %126 = arith.mulf %100, %124 : vector<1x256xf32>
    %127 = arith.subf %125, %126 : vector<1x256xf32>
    %128 = vector.broadcast %124 : vector<1x256xf32> to vector<13x256xf32>
    %129 = arith.mulf %45, %128 : vector<13x256xf32>
    %130 = vector.broadcast %127 : vector<1x256xf32> to vector<13x256xf32>
    %131 = arith.addf %129, %130 : vector<13x256xf32>
    %132 = vector.broadcast %124 : vector<1x256xf32> to vector<13x256xf32>
    %133 = arith.mulf %91, %132 : vector<13x256xf32>
    %134 = vector.broadcast %127 : vector<1x256xf32> to vector<13x256xf32>
    %135 = arith.addf %133, %134 : vector<13x256xf32>
    %136 = arith.truncf %131 : vector<13x256xf32> to vector<13x256xbf16>
    %c0_121 = arith.constant 0 : index
    %c0_122 = arith.constant 0 : index
    %c0_123 = arith.constant 0 : index
    %137 = vector.load %arg4[%c0_121, %c0_122, %c0_123] : memref<2x13x256xbf16, #tpu.memory_space<vmem>>, vector<1x13x256xbf16>
    %138 = vector.shape_cast %137 : vector<1x13x256xbf16> to vector<13x256xbf16>
    %139 = vector.shape_cast %136 : vector<13x256xbf16> to vector<1x13x256xbf16>
    tpu.vector_store %arg4[%c0_121, %c0_122, %c0_123], %139 {strides = array<i32>} : memref<2x13x256xbf16, #tpu.memory_space<vmem>>, vector<1x13x256xbf16>,
    %140 = arith.truncf %135 : vector<13x256xf32> to vector<13x256xbf16>
    %c1_124 = arith.constant 1 : index
    %c0_125 = arith.constant 0 : index
    %c0_126 = arith.constant 0 : index
    %141 = vector.load %arg4[%c1_124, %c0_125, %c0_126] : memref<2x13x256xbf16, #tpu.memory_space<vmem>>, vector<1x13x256xbf16>
    %142 = vector.shape_cast %141 : vector<1x13x256xbf16> to vector<13x256xbf16>
    %143 = vector.shape_cast %140 : vector<13x256xbf16> to vector<1x13x256xbf16>
    tpu.vector_store %arg4[%c1_124, %c0_125, %c0_126], %143 {strides = array<i32>} : memref<2x13x256xbf16, #tpu.memory_space<vmem>>, vector<1x13x256xbf16>,
    return
  }
}

module attributes {stable_mosaic.version = 11 : i64} {
  func.func @kernel(%arg0: memref<1x2x32x256xbf16, #tpu.memory_space<vmem>>, %arg1: memref<7x256x256xbf16, #tpu.memory_space<vmem>>, %arg2: memref<1x256xf32, #tpu.memory_space<vmem>>, %arg3: memref<1x256xf32, #tpu.memory_space<vmem>>, %arg4: memref<2x26x256xbf16, #tpu.memory_space<vmem>>) attributes {dimension_semantics = [], scalar_prefetch = 0 : i64, scratch_operands = 0 : i64, tpu.core_type = #tpu.core_type<tc>} {
    %c0 = arith.constant 0 : index
    %c0_0 = arith.constant 0 : index
    %c0_1 = arith.constant 0 : index
    %c0_2 = arith.constant 0 : index
    %0 = vector.load %arg0[%c0, %c0_0, %c0_1, %c0_2] : memref<1x2x32x256xbf16, #tpu.memory_space<vmem>>, vector<1x1x26x256xbf16>
    %1 = vector.shape_cast %0 : vector<1x1x26x256xbf16> to vector<26x256xbf16>
    %c0_3 = arith.constant 0 : index
    %c0_4 = arith.constant 0 : index
    %c0_5 = arith.constant 0 : index
    %2 = vector.load %arg1[%c0_3, %c0_4, %c0_5] : memref<7x256x256xbf16, #tpu.memory_space<vmem>>, vector<1x256x256xbf16>
    %3 = vector.shape_cast %2 : vector<1x256x256xbf16> to vector<256x256xbf16>
    %cst = arith.constant dense<0.000000e+00> : vector<26x256xf32>
    %4 = tpu.matmul %1, %3, %cst {dimension_numbers = #tpu.dot_dimension_numbers<[1], [0], [0], [1], [0, 0, 1, 1], [], []>} : vector<26x256xbf16>, vector<256x256xbf16>, vector<26x256xf32> -> vector<26x256xf32>
    %c0_6 = arith.constant 0 : index
    %c0_7 = arith.constant 0 : index
    %c1 = arith.constant 1 : index
    %c0_8 = arith.constant 0 : index
    %5 = vector.load %arg0[%c0_6, %c0_7, %c1, %c0_8] : memref<1x2x32x256xbf16, #tpu.memory_space<vmem>>, vector<1x1x26x256xbf16>
    %6 = vector.shape_cast %5 : vector<1x1x26x256xbf16> to vector<26x256xbf16>
    %c1_9 = arith.constant 1 : index
    %c0_10 = arith.constant 0 : index
    %c0_11 = arith.constant 0 : index
    %7 = vector.load %arg1[%c1_9, %c0_10, %c0_11] : memref<7x256x256xbf16, #tpu.memory_space<vmem>>, vector<1x256x256xbf16>
    %8 = vector.shape_cast %7 : vector<1x256x256xbf16> to vector<256x256xbf16>
    %cst_12 = arith.constant dense<0.000000e+00> : vector<26x256xf32>
    %9 = tpu.matmul %6, %8, %cst_12 {dimension_numbers = #tpu.dot_dimension_numbers<[1], [0], [0], [1], [0, 0, 1, 1], [], []>} : vector<26x256xbf16>, vector<256x256xbf16>, vector<26x256xf32> -> vector<26x256xf32>
    %10 = arith.addf %4, %9 : vector<26x256xf32>
    %c0_13 = arith.constant 0 : index
    %c0_14 = arith.constant 0 : index
    %c2 = arith.constant 2 : index
    %c0_15 = arith.constant 0 : index
    %11 = vector.load %arg0[%c0_13, %c0_14, %c2, %c0_15] : memref<1x2x32x256xbf16, #tpu.memory_space<vmem>>, vector<1x1x26x256xbf16>
    %12 = vector.shape_cast %11 : vector<1x1x26x256xbf16> to vector<26x256xbf16>
    %c2_16 = arith.constant 2 : index
    %c0_17 = arith.constant 0 : index
    %c0_18 = arith.constant 0 : index
    %13 = vector.load %arg1[%c2_16, %c0_17, %c0_18] : memref<7x256x256xbf16, #tpu.memory_space<vmem>>, vector<1x256x256xbf16>
    %14 = vector.shape_cast %13 : vector<1x256x256xbf16> to vector<256x256xbf16>
    %cst_19 = arith.constant dense<0.000000e+00> : vector<26x256xf32>
    %15 = tpu.matmul %12, %14, %cst_19 {dimension_numbers = #tpu.dot_dimension_numbers<[1], [0], [0], [1], [0, 0, 1, 1], [], []>} : vector<26x256xbf16>, vector<256x256xbf16>, vector<26x256xf32> -> vector<26x256xf32>
    %16 = arith.addf %10, %15 : vector<26x256xf32>
    %c0_20 = arith.constant 0 : index
    %c0_21 = arith.constant 0 : index
    %c3 = arith.constant 3 : index
    %c0_22 = arith.constant 0 : index
    %17 = vector.load %arg0[%c0_20, %c0_21, %c3, %c0_22] : memref<1x2x32x256xbf16, #tpu.memory_space<vmem>>, vector<1x1x26x256xbf16>
    %18 = vector.shape_cast %17 : vector<1x1x26x256xbf16> to vector<26x256xbf16>
    %c3_23 = arith.constant 3 : index
    %c0_24 = arith.constant 0 : index
    %c0_25 = arith.constant 0 : index
    %19 = vector.load %arg1[%c3_23, %c0_24, %c0_25] : memref<7x256x256xbf16, #tpu.memory_space<vmem>>, vector<1x256x256xbf16>
    %20 = vector.shape_cast %19 : vector<1x256x256xbf16> to vector<256x256xbf16>
    %cst_26 = arith.constant dense<0.000000e+00> : vector<26x256xf32>
    %21 = tpu.matmul %18, %20, %cst_26 {dimension_numbers = #tpu.dot_dimension_numbers<[1], [0], [0], [1], [0, 0, 1, 1], [], []>} : vector<26x256xbf16>, vector<256x256xbf16>, vector<26x256xf32> -> vector<26x256xf32>
    %22 = arith.addf %16, %21 : vector<26x256xf32>
    %c0_27 = arith.constant 0 : index
    %c0_28 = arith.constant 0 : index
    %c4 = arith.constant 4 : index
    %c0_29 = arith.constant 0 : index
    %23 = vector.load %arg0[%c0_27, %c0_28, %c4, %c0_29] : memref<1x2x32x256xbf16, #tpu.memory_space<vmem>>, vector<1x1x26x256xbf16>
    %24 = vector.shape_cast %23 : vector<1x1x26x256xbf16> to vector<26x256xbf16>
    %c4_30 = arith.constant 4 : index
    %c0_31 = arith.constant 0 : index
    %c0_32 = arith.constant 0 : index
    %25 = vector.load %arg1[%c4_30, %c0_31, %c0_32] : memref<7x256x256xbf16, #tpu.memory_space<vmem>>, vector<1x256x256xbf16>
    %26 = vector.shape_cast %25 : vector<1x256x256xbf16> to vector<256x256xbf16>
    %cst_33 = arith.constant dense<0.000000e+00> : vector<26x256xf32>
    %27 = tpu.matmul %24, %26, %cst_33 {dimension_numbers = #tpu.dot_dimension_numbers<[1], [0], [0], [1], [0, 0, 1, 1], [], []>} : vector<26x256xbf16>, vector<256x256xbf16>, vector<26x256xf32> -> vector<26x256xf32>
    %28 = arith.addf %22, %27 : vector<26x256xf32>
    %c0_34 = arith.constant 0 : index
    %c0_35 = arith.constant 0 : index
    %c5 = arith.constant 5 : index
    %c0_36 = arith.constant 0 : index
    %29 = vector.load %arg0[%c0_34, %c0_35, %c5, %c0_36] : memref<1x2x32x256xbf16, #tpu.memory_space<vmem>>, vector<1x1x26x256xbf16>
    %30 = vector.shape_cast %29 : vector<1x1x26x256xbf16> to vector<26x256xbf16>
    %c5_37 = arith.constant 5 : index
    %c0_38 = arith.constant 0 : index
    %c0_39 = arith.constant 0 : index
    %31 = vector.load %arg1[%c5_37, %c0_38, %c0_39] : memref<7x256x256xbf16, #tpu.memory_space<vmem>>, vector<1x256x256xbf16>
    %32 = vector.shape_cast %31 : vector<1x256x256xbf16> to vector<256x256xbf16>
    %cst_40 = arith.constant dense<0.000000e+00> : vector<26x256xf32>
    %33 = tpu.matmul %30, %32, %cst_40 {dimension_numbers = #tpu.dot_dimension_numbers<[1], [0], [0], [1], [0, 0, 1, 1], [], []>} : vector<26x256xbf16>, vector<256x256xbf16>, vector<26x256xf32> -> vector<26x256xf32>
    %34 = arith.addf %28, %33 : vector<26x256xf32>
    %c0_41 = arith.constant 0 : index
    %c0_42 = arith.constant 0 : index
    %c6 = arith.constant 6 : index
    %c0_43 = arith.constant 0 : index
    %35 = vector.load %arg0[%c0_41, %c0_42, %c6, %c0_43] : memref<1x2x32x256xbf16, #tpu.memory_space<vmem>>, vector<1x1x26x256xbf16>
    %36 = vector.shape_cast %35 : vector<1x1x26x256xbf16> to vector<26x256xbf16>
    %c6_44 = arith.constant 6 : index
    %c0_45 = arith.constant 0 : index
    %c0_46 = arith.constant 0 : index
    %37 = vector.load %arg1[%c6_44, %c0_45, %c0_46] : memref<7x256x256xbf16, #tpu.memory_space<vmem>>, vector<1x256x256xbf16>
    %38 = vector.shape_cast %37 : vector<1x256x256xbf16> to vector<256x256xbf16>
    %cst_47 = arith.constant dense<0.000000e+00> : vector<26x256xf32>
    %39 = tpu.matmul %36, %38, %cst_47 {dimension_numbers = #tpu.dot_dimension_numbers<[1], [0], [0], [1], [0, 0, 1, 1], [], []>} : vector<26x256xbf16>, vector<256x256xbf16>, vector<26x256xf32> -> vector<26x256xf32>
    %40 = arith.addf %34, %39 : vector<26x256xf32>
    %cst_48 = arith.constant 0.000000e+00 : f32
    %41 = vector.broadcast %cst_48 : f32 to vector<26x256xf32>
    %42 = arith.cmpf oge, %40, %41 : vector<26x256xf32>
    %cst_49 = arith.constant 2.000000e-01 : f32
    %43 = vector.broadcast %cst_49 : f32 to vector<26x256xf32>
    %44 = arith.mulf %43, %40 : vector<26x256xf32>
    %45 = arith.select %42, %40, %44 : vector<26x256xi1>, vector<26x256xf32>
    %c0_50 = arith.constant 0 : index
    %c1_51 = arith.constant 1 : index
    %c0_52 = arith.constant 0 : index
    %c0_53 = arith.constant 0 : index
    %46 = vector.load %arg0[%c0_50, %c1_51, %c0_52, %c0_53] : memref<1x2x32x256xbf16, #tpu.memory_space<vmem>>, vector<1x1x26x256xbf16>
    %47 = vector.shape_cast %46 : vector<1x1x26x256xbf16> to vector<26x256xbf16>
    %c0_54 = arith.constant 0 : index
    %c0_55 = arith.constant 0 : index
    %c0_56 = arith.constant 0 : index
    %48 = vector.load %arg1[%c0_54, %c0_55, %c0_56] : memref<7x256x256xbf16, #tpu.memory_space<vmem>>, vector<1x256x256xbf16>
    %49 = vector.shape_cast %48 : vector<1x256x256xbf16> to vector<256x256xbf16>
    %cst_57 = arith.constant dense<0.000000e+00> : vector<26x256xf32>
    %50 = tpu.matmul %47, %49, %cst_57 {dimension_numbers = #tpu.dot_dimension_numbers<[1], [0], [0], [1], [0, 0, 1, 1], [], []>} : vector<26x256xbf16>, vector<256x256xbf16>, vector<26x256xf32> -> vector<26x256xf32>
    %c0_58 = arith.constant 0 : index
    %c1_59 = arith.constant 1 : index
    %c1_60 = arith.constant 1 : index
    %c0_61 = arith.constant 0 : index
    %51 = vector.load %arg0[%c0_58, %c1_59, %c1_60, %c0_61] : memref<1x2x32x256xbf16, #tpu.memory_space<vmem>>, vector<1x1x26x256xbf16>
    %52 = vector.shape_cast %51 : vector<1x1x26x256xbf16> to vector<26x256xbf16>
    %c1_62 = arith.constant 1 : index
    %c0_63 = arith.constant 0 : index
    %c0_64 = arith.constant 0 : index
    %53 = vector.load %arg1[%c1_62, %c0_63, %c0_64] : memref<7x256x256xbf16, #tpu.memory_space<vmem>>, vector<1x256x256xbf16>
    %54 = vector.shape_cast %53 : vector<1x256x256xbf16> to vector<256x256xbf16>
    %cst_65 = arith.constant dense<0.000000e+00> : vector<26x256xf32>
    %55 = tpu.matmul %52, %54, %cst_65 {dimension_numbers = #tpu.dot_dimension_numbers<[1], [0], [0], [1], [0, 0, 1, 1], [], []>} : vector<26x256xbf16>, vector<256x256xbf16>, vector<26x256xf32> -> vector<26x256xf32>
    %56 = arith.addf %50, %55 : vector<26x256xf32>
    %c0_66 = arith.constant 0 : index
    %c1_67 = arith.constant 1 : index
    %c2_68 = arith.constant 2 : index
    %c0_69 = arith.constant 0 : index
    %57 = vector.load %arg0[%c0_66, %c1_67, %c2_68, %c0_69] : memref<1x2x32x256xbf16, #tpu.memory_space<vmem>>, vector<1x1x26x256xbf16>
    %58 = vector.shape_cast %57 : vector<1x1x26x256xbf16> to vector<26x256xbf16>
    %c2_70 = arith.constant 2 : index
    %c0_71 = arith.constant 0 : index
    %c0_72 = arith.constant 0 : index
    %59 = vector.load %arg1[%c2_70, %c0_71, %c0_72] : memref<7x256x256xbf16, #tpu.memory_space<vmem>>, vector<1x256x256xbf16>
    %60 = vector.shape_cast %59 : vector<1x256x256xbf16> to vector<256x256xbf16>
    %cst_73 = arith.constant dense<0.000000e+00> : vector<26x256xf32>
    %61 = tpu.matmul %58, %60, %cst_73 {dimension_numbers = #tpu.dot_dimension_numbers<[1], [0], [0], [1], [0, 0, 1, 1], [], []>} : vector<26x256xbf16>, vector<256x256xbf16>, vector<26x256xf32> -> vector<26x256xf32>
    %62 = arith.addf %56, %61 : vector<26x256xf32>
    %c0_74 = arith.constant 0 : index
    %c1_75 = arith.constant 1 : index
    %c3_76 = arith.constant 3 : index
    %c0_77 = arith.constant 0 : index
    %63 = vector.load %arg0[%c0_74, %c1_75, %c3_76, %c0_77] : memref<1x2x32x256xbf16, #tpu.memory_space<vmem>>, vector<1x1x26x256xbf16>
    %64 = vector.shape_cast %63 : vector<1x1x26x256xbf16> to vector<26x256xbf16>
    %c3_78 = arith.constant 3 : index
    %c0_79 = arith.constant 0 : index
    %c0_80 = arith.constant 0 : index
    %65 = vector.load %arg1[%c3_78, %c0_79, %c0_80] : memref<7x256x256xbf16, #tpu.memory_space<vmem>>, vector<1x256x256xbf16>
    %66 = vector.shape_cast %65 : vector<1x256x256xbf16> to vector<256x256xbf16>
    %cst_81 = arith.constant dense<0.000000e+00> : vector<26x256xf32>
    %67 = tpu.matmul %64, %66, %cst_81 {dimension_numbers = #tpu.dot_dimension_numbers<[1], [0], [0], [1], [0, 0, 1, 1], [], []>} : vector<26x256xbf16>, vector<256x256xbf16>, vector<26x256xf32> -> vector<26x256xf32>
    %68 = arith.addf %62, %67 : vector<26x256xf32>
    %c0_82 = arith.constant 0 : index
    %c1_83 = arith.constant 1 : index
    %c4_84 = arith.constant 4 : index
    %c0_85 = arith.constant 0 : index
    %69 = vector.load %arg0[%c0_82, %c1_83, %c4_84, %c0_85] : memref<1x2x32x256xbf16, #tpu.memory_space<vmem>>, vector<1x1x26x256xbf16>
    %70 = vector.shape_cast %69 : vector<1x1x26x256xbf16> to vector<26x256xbf16>
    %c4_86 = arith.constant 4 : index
    %c0_87 = arith.constant 0 : index
    %c0_88 = arith.constant 0 : index
    %71 = vector.load %arg1[%c4_86, %c0_87, %c0_88] : memref<7x256x256xbf16, #tpu.memory_space<vmem>>, vector<1x256x256xbf16>
    %72 = vector.shape_cast %71 : vector<1x256x256xbf16> to vector<256x256xbf16>
    %cst_89 = arith.constant dense<0.000000e+00> : vector<26x256xf32>
    %73 = tpu.matmul %70, %72, %cst_89 {dimension_numbers = #tpu.dot_dimension_numbers<[1], [0], [0], [1], [0, 0, 1, 1], [], []>} : vector<26x256xbf16>, vector<256x256xbf16>, vector<26x256xf32> -> vector<26x256xf32>
    %74 = arith.addf %68, %73 : vector<26x256xf32>
    %c0_90 = arith.constant 0 : index
    %c1_91 = arith.constant 1 : index
    %c5_92 = arith.constant 5 : index
    %c0_93 = arith.constant 0 : index
    %75 = vector.load %arg0[%c0_90, %c1_91, %c5_92, %c0_93] : memref<1x2x32x256xbf16, #tpu.memory_space<vmem>>, vector<1x1x26x256xbf16>
    %76 = vector.shape_cast %75 : vector<1x1x26x256xbf16> to vector<26x256xbf16>
    %c5_94 = arith.constant 5 : index
    %c0_95 = arith.constant 0 : index
    %c0_96 = arith.constant 0 : index
    %77 = vector.load %arg1[%c5_94, %c0_95, %c0_96] : memref<7x256x256xbf16, #tpu.memory_space<vmem>>, vector<1x256x256xbf16>
    %78 = vector.shape_cast %77 : vector<1x256x256xbf16> to vector<256x256xbf16>
    %cst_97 = arith.constant dense<0.000000e+00> : vector<26x256xf32>
    %79 = tpu.matmul %76, %78, %cst_97 {dimension_numbers = #tpu.dot_dimension_numbers<[1], [0], [0], [1], [0, 0, 1, 1], [], []>} : vector<26x256xbf16>, vector<256x256xbf16>, vector<26x256xf32> -> vector<26x256xf32>
    %80 = arith.addf %74, %79 : vector<26x256xf32>
    %c0_98 = arith.constant 0 : index
    %c1_99 = arith.constant 1 : index
    %c6_100 = arith.constant 6 : index
    %c0_101 = arith.constant 0 : index
    %81 = vector.load %arg0[%c0_98, %c1_99, %c6_100, %c0_101] : memref<1x2x32x256xbf16, #tpu.memory_space<vmem>>, vector<1x1x26x256xbf16>
    %82 = vector.shape_cast %81 : vector<1x1x26x256xbf16> to vector<26x256xbf16>
    %c6_102 = arith.constant 6 : index
    %c0_103 = arith.constant 0 : index
    %c0_104 = arith.constant 0 : index
    %83 = vector.load %arg1[%c6_102, %c0_103, %c0_104] : memref<7x256x256xbf16, #tpu.memory_space<vmem>>, vector<1x256x256xbf16>
    %84 = vector.shape_cast %83 : vector<1x256x256xbf16> to vector<256x256xbf16>
    %cst_105 = arith.constant dense<0.000000e+00> : vector<26x256xf32>
    %85 = tpu.matmul %82, %84, %cst_105 {dimension_numbers = #tpu.dot_dimension_numbers<[1], [0], [0], [1], [0, 0, 1, 1], [], []>} : vector<26x256xbf16>, vector<256x256xbf16>, vector<26x256xf32> -> vector<26x256xf32>
    %86 = arith.addf %80, %85 : vector<26x256xf32>
    %cst_106 = arith.constant 0.000000e+00 : f32
    %87 = vector.broadcast %cst_106 : f32 to vector<26x256xf32>
    %88 = arith.cmpf oge, %86, %87 : vector<26x256xf32>
    %cst_107 = arith.constant 2.000000e-01 : f32
    %89 = vector.broadcast %cst_107 : f32 to vector<26x256xf32>
    %90 = arith.mulf %89, %86 : vector<26x256xf32>
    %91 = arith.select %88, %86, %90 : vector<26x256xi1>, vector<26x256xf32>
    %cst_108 = arith.constant dense<0.000000e+00> : vector<256xf32>
    %92 = vector.multi_reduction <add>, %45, %cst_108 [0] : vector<26x256xf32> to vector<256xf32>
    %93 = vector.shape_cast %92 : vector<256xf32> to vector<1x256xf32>
    %cst_109 = arith.constant 0.000000e+00 : f32
    %94 = vector.broadcast %cst_109 : f32 to vector<1x256xf32>
    %95 = arith.addf %94, %93 : vector<1x256xf32>
    %cst_110 = arith.constant dense<0.000000e+00> : vector<256xf32>
    %96 = vector.multi_reduction <add>, %91, %cst_110 [0] : vector<26x256xf32> to vector<256xf32>
    %97 = vector.shape_cast %96 : vector<256xf32> to vector<1x256xf32>
    %98 = arith.addf %95, %97 : vector<1x256xf32>
    %cst_111 = arith.constant 5.200000e+01 : f32
    %99 = vector.broadcast %cst_111 : f32 to vector<1x256xf32>
    %100 = arith.divf %98, %99 : vector<1x256xf32>
    %101 = vector.broadcast %100 : vector<1x256xf32> to vector<26x256xf32>
    %102 = arith.subf %45, %101 : vector<26x256xf32>
    %103 = vector.broadcast %100 : vector<1x256xf32> to vector<26x256xf32>
    %104 = arith.subf %45, %103 : vector<26x256xf32>
    %105 = arith.mulf %102, %104 : vector<26x256xf32>
    %cst_112 = arith.constant dense<0.000000e+00> : vector<256xf32>
    %106 = vector.multi_reduction <add>, %105, %cst_112 [0] : vector<26x256xf32> to vector<256xf32>
    %107 = vector.shape_cast %106 : vector<256xf32> to vector<1x256xf32>
    %cst_113 = arith.constant 0.000000e+00 : f32
    %108 = vector.broadcast %cst_113 : f32 to vector<1x256xf32>
    %109 = arith.addf %108, %107 : vector<1x256xf32>
    %110 = vector.broadcast %100 : vector<1x256xf32> to vector<26x256xf32>
    %111 = arith.subf %91, %110 : vector<26x256xf32>
    %112 = vector.broadcast %100 : vector<1x256xf32> to vector<26x256xf32>
    %113 = arith.subf %91, %112 : vector<26x256xf32>
    %114 = arith.mulf %111, %113 : vector<26x256xf32>
    %cst_114 = arith.constant dense<0.000000e+00> : vector<256xf32>
    %115 = vector.multi_reduction <add>, %114, %cst_114 [0] : vector<26x256xf32> to vector<256xf32>
    %116 = vector.shape_cast %115 : vector<256xf32> to vector<1x256xf32>
    %117 = arith.addf %109, %116 : vector<1x256xf32>
    %cst_115 = arith.constant 5.200000e+01 : f32
    %118 = vector.broadcast %cst_115 : f32 to vector<1x256xf32>
    %119 = arith.divf %117, %118 : vector<1x256xf32>
    %cst_116 = arith.constant 9.99999974E-6 : f32
    %120 = vector.broadcast %cst_116 : f32 to vector<1x256xf32>
    %121 = arith.addf %119, %120 : vector<1x256xf32>
    %122 = math.rsqrt %121 : vector<1x256xf32>
    %c0_117 = arith.constant 0 : index
    %c0_118 = arith.constant 0 : index
    %123 = vector.load %arg2[%c0_117, %c0_118] : memref<1x256xf32, #tpu.memory_space<vmem>>, vector<1x256xf32>
    %124 = arith.mulf %122, %123 : vector<1x256xf32>
    %c0_119 = arith.constant 0 : index
    %c0_120 = arith.constant 0 : index
    %125 = vector.load %arg3[%c0_119, %c0_120] : memref<1x256xf32, #tpu.memory_space<vmem>>, vector<1x256xf32>
    %126 = arith.mulf %100, %124 : vector<1x256xf32>
    %127 = arith.subf %125, %126 : vector<1x256xf32>
    %128 = vector.broadcast %124 : vector<1x256xf32> to vector<26x256xf32>
    %129 = arith.mulf %45, %128 : vector<26x256xf32>
    %130 = vector.broadcast %127 : vector<1x256xf32> to vector<26x256xf32>
    %131 = arith.addf %129, %130 : vector<26x256xf32>
    %132 = vector.broadcast %124 : vector<1x256xf32> to vector<26x256xf32>
    %133 = arith.mulf %91, %132 : vector<26x256xf32>
    %134 = vector.broadcast %127 : vector<1x256xf32> to vector<26x256xf32>
    %135 = arith.addf %133, %134 : vector<26x256xf32>
    %136 = arith.truncf %131 : vector<26x256xf32> to vector<26x256xbf16>
    %c0_121 = arith.constant 0 : index
    %c0_122 = arith.constant 0 : index
    %c0_123 = arith.constant 0 : index
    %137 = vector.load %arg4[%c0_121, %c0_122, %c0_123] : memref<2x26x256xbf16, #tpu.memory_space<vmem>>, vector<1x26x256xbf16>
    %138 = vector.shape_cast %137 : vector<1x26x256xbf16> to vector<26x256xbf16>
    %139 = vector.shape_cast %136 : vector<26x256xbf16> to vector<1x26x256xbf16>
    tpu.vector_store %arg4[%c0_121, %c0_122, %c0_123], %139 {strides = array<i32>} : memref<2x26x256xbf16, #tpu.memory_space<vmem>>, vector<1x26x256xbf16>,
    %140 = arith.truncf %135 : vector<26x256xf32> to vector<26x256xbf16>
    %c1_124 = arith.constant 1 : index
    %c0_125 = arith.constant 0 : index
    %c0_126 = arith.constant 0 : index
    %141 = vector.load %arg4[%c1_124, %c0_125, %c0_126] : memref<2x26x256xbf16, #tpu.memory_space<vmem>>, vector<1x26x256xbf16>
    %142 = vector.shape_cast %141 : vector<1x26x256xbf16> to vector<26x256xbf16>
    %143 = vector.shape_cast %140 : vector<26x256xbf16> to vector<1x26x256xbf16>
    tpu.vector_store %arg4[%c1_124, %c0_125, %c0_126], %143 {strides = array<i32>} : memref<2x26x256xbf16, #tpu.memory_space<vmem>>, vector<1x26x256xbf16>,
    return
  }
}

module attributes {stable_mosaic.version = 11 : i64} {
  func.func @kernel(%arg0: memref<1x2x86x256xbf16, #tpu.memory_space<vmem>>, %arg1: memref<9x256x256xbf16, #tpu.memory_space<vmem>>, %arg2: memref<2x78x256xbf16, #tpu.memory_space<vmem>>) attributes {dimension_semantics = [], scalar_prefetch = 0 : i64, scratch_operands = 0 : i64, tpu.core_type = #tpu.core_type<tc>} {
    %c0 = arith.constant 0 : index
    %c0_0 = arith.constant 0 : index
    %c0_1 = arith.constant 0 : index
    %c0_2 = arith.constant 0 : index
    %0 = vector.load %arg0[%c0, %c0_0, %c0_1, %c0_2] : memref<1x2x86x256xbf16, #tpu.memory_space<vmem>>, vector<1x1x78x256xbf16>
    %1 = vector.shape_cast %0 : vector<1x1x78x256xbf16> to vector<78x256xbf16>
    %c0_3 = arith.constant 0 : index
    %c0_4 = arith.constant 0 : index
    %c0_5 = arith.constant 0 : index
    %2 = vector.load %arg1[%c0_3, %c0_4, %c0_5] : memref<9x256x256xbf16, #tpu.memory_space<vmem>>, vector<1x256x256xbf16>
    %3 = vector.shape_cast %2 : vector<1x256x256xbf16> to vector<256x256xbf16>
    %cst = arith.constant dense<0.000000e+00> : vector<78x256xf32>
    %4 = tpu.matmul %1, %3, %cst {dimension_numbers = #tpu.dot_dimension_numbers<[1], [0], [0], [1], [0, 0, 1, 1], [], []>} : vector<78x256xbf16>, vector<256x256xbf16>, vector<78x256xf32> -> vector<78x256xf32>
    %c0_6 = arith.constant 0 : index
    %c0_7 = arith.constant 0 : index
    %c1 = arith.constant 1 : index
    %c0_8 = arith.constant 0 : index
    %5 = vector.load %arg0[%c0_6, %c0_7, %c1, %c0_8] : memref<1x2x86x256xbf16, #tpu.memory_space<vmem>>, vector<1x1x78x256xbf16>
    %6 = vector.shape_cast %5 : vector<1x1x78x256xbf16> to vector<78x256xbf16>
    %c1_9 = arith.constant 1 : index
    %c0_10 = arith.constant 0 : index
    %c0_11 = arith.constant 0 : index
    %7 = vector.load %arg1[%c1_9, %c0_10, %c0_11] : memref<9x256x256xbf16, #tpu.memory_space<vmem>>, vector<1x256x256xbf16>
    %8 = vector.shape_cast %7 : vector<1x256x256xbf16> to vector<256x256xbf16>
    %cst_12 = arith.constant dense<0.000000e+00> : vector<78x256xf32>
    %9 = tpu.matmul %6, %8, %cst_12 {dimension_numbers = #tpu.dot_dimension_numbers<[1], [0], [0], [1], [0, 0, 1, 1], [], []>} : vector<78x256xbf16>, vector<256x256xbf16>, vector<78x256xf32> -> vector<78x256xf32>
    %10 = arith.addf %4, %9 : vector<78x256xf32>
    %c0_13 = arith.constant 0 : index
    %c0_14 = arith.constant 0 : index
    %c2 = arith.constant 2 : index
    %c0_15 = arith.constant 0 : index
    %11 = vector.load %arg0[%c0_13, %c0_14, %c2, %c0_15] : memref<1x2x86x256xbf16, #tpu.memory_space<vmem>>, vector<1x1x78x256xbf16>
    %12 = vector.shape_cast %11 : vector<1x1x78x256xbf16> to vector<78x256xbf16>
    %c2_16 = arith.constant 2 : index
    %c0_17 = arith.constant 0 : index
    %c0_18 = arith.constant 0 : index
    %13 = vector.load %arg1[%c2_16, %c0_17, %c0_18] : memref<9x256x256xbf16, #tpu.memory_space<vmem>>, vector<1x256x256xbf16>
    %14 = vector.shape_cast %13 : vector<1x256x256xbf16> to vector<256x256xbf16>
    %cst_19 = arith.constant dense<0.000000e+00> : vector<78x256xf32>
    %15 = tpu.matmul %12, %14, %cst_19 {dimension_numbers = #tpu.dot_dimension_numbers<[1], [0], [0], [1], [0, 0, 1, 1], [], []>} : vector<78x256xbf16>, vector<256x256xbf16>, vector<78x256xf32> -> vector<78x256xf32>
    %16 = arith.addf %10, %15 : vector<78x256xf32>
    %c0_20 = arith.constant 0 : index
    %c0_21 = arith.constant 0 : index
    %c3 = arith.constant 3 : index
    %c0_22 = arith.constant 0 : index
    %17 = vector.load %arg0[%c0_20, %c0_21, %c3, %c0_22] : memref<1x2x86x256xbf16, #tpu.memory_space<vmem>>, vector<1x1x78x256xbf16>
    %18 = vector.shape_cast %17 : vector<1x1x78x256xbf16> to vector<78x256xbf16>
    %c3_23 = arith.constant 3 : index
    %c0_24 = arith.constant 0 : index
    %c0_25 = arith.constant 0 : index
    %19 = vector.load %arg1[%c3_23, %c0_24, %c0_25] : memref<9x256x256xbf16, #tpu.memory_space<vmem>>, vector<1x256x256xbf16>
    %20 = vector.shape_cast %19 : vector<1x256x256xbf16> to vector<256x256xbf16>
    %cst_26 = arith.constant dense<0.000000e+00> : vector<78x256xf32>
    %21 = tpu.matmul %18, %20, %cst_26 {dimension_numbers = #tpu.dot_dimension_numbers<[1], [0], [0], [1], [0, 0, 1, 1], [], []>} : vector<78x256xbf16>, vector<256x256xbf16>, vector<78x256xf32> -> vector<78x256xf32>
    %22 = arith.addf %16, %21 : vector<78x256xf32>
    %c0_27 = arith.constant 0 : index
    %c0_28 = arith.constant 0 : index
    %c4 = arith.constant 4 : index
    %c0_29 = arith.constant 0 : index
    %23 = vector.load %arg0[%c0_27, %c0_28, %c4, %c0_29] : memref<1x2x86x256xbf16, #tpu.memory_space<vmem>>, vector<1x1x78x256xbf16>
    %24 = vector.shape_cast %23 : vector<1x1x78x256xbf16> to vector<78x256xbf16>
    %c4_30 = arith.constant 4 : index
    %c0_31 = arith.constant 0 : index
    %c0_32 = arith.constant 0 : index
    %25 = vector.load %arg1[%c4_30, %c0_31, %c0_32] : memref<9x256x256xbf16, #tpu.memory_space<vmem>>, vector<1x256x256xbf16>
    %26 = vector.shape_cast %25 : vector<1x256x256xbf16> to vector<256x256xbf16>
    %cst_33 = arith.constant dense<0.000000e+00> : vector<78x256xf32>
    %27 = tpu.matmul %24, %26, %cst_33 {dimension_numbers = #tpu.dot_dimension_numbers<[1], [0], [0], [1], [0, 0, 1, 1], [], []>} : vector<78x256xbf16>, vector<256x256xbf16>, vector<78x256xf32> -> vector<78x256xf32>
    %28 = arith.addf %22, %27 : vector<78x256xf32>
    %c0_34 = arith.constant 0 : index
    %c0_35 = arith.constant 0 : index
    %c5 = arith.constant 5 : index
    %c0_36 = arith.constant 0 : index
    %29 = vector.load %arg0[%c0_34, %c0_35, %c5, %c0_36] : memref<1x2x86x256xbf16, #tpu.memory_space<vmem>>, vector<1x1x78x256xbf16>
    %30 = vector.shape_cast %29 : vector<1x1x78x256xbf16> to vector<78x256xbf16>
    %c5_37 = arith.constant 5 : index
    %c0_38 = arith.constant 0 : index
    %c0_39 = arith.constant 0 : index
    %31 = vector.load %arg1[%c5_37, %c0_38, %c0_39] : memref<9x256x256xbf16, #tpu.memory_space<vmem>>, vector<1x256x256xbf16>
    %32 = vector.shape_cast %31 : vector<1x256x256xbf16> to vector<256x256xbf16>
    %cst_40 = arith.constant dense<0.000000e+00> : vector<78x256xf32>
    %33 = tpu.matmul %30, %32, %cst_40 {dimension_numbers = #tpu.dot_dimension_numbers<[1], [0], [0], [1], [0, 0, 1, 1], [], []>} : vector<78x256xbf16>, vector<256x256xbf16>, vector<78x256xf32> -> vector<78x256xf32>
    %34 = arith.addf %28, %33 : vector<78x256xf32>
    %c0_41 = arith.constant 0 : index
    %c0_42 = arith.constant 0 : index
    %c6 = arith.constant 6 : index
    %c0_43 = arith.constant 0 : index
    %35 = vector.load %arg0[%c0_41, %c0_42, %c6, %c0_43] : memref<1x2x86x256xbf16, #tpu.memory_space<vmem>>, vector<1x1x78x256xbf16>
    %36 = vector.shape_cast %35 : vector<1x1x78x256xbf16> to vector<78x256xbf16>
    %c6_44 = arith.constant 6 : index
    %c0_45 = arith.constant 0 : index
    %c0_46 = arith.constant 0 : index
    %37 = vector.load %arg1[%c6_44, %c0_45, %c0_46] : memref<9x256x256xbf16, #tpu.memory_space<vmem>>, vector<1x256x256xbf16>
    %38 = vector.shape_cast %37 : vector<1x256x256xbf16> to vector<256x256xbf16>
    %cst_47 = arith.constant dense<0.000000e+00> : vector<78x256xf32>
    %39 = tpu.matmul %36, %38, %cst_47 {dimension_numbers = #tpu.dot_dimension_numbers<[1], [0], [0], [1], [0, 0, 1, 1], [], []>} : vector<78x256xbf16>, vector<256x256xbf16>, vector<78x256xf32> -> vector<78x256xf32>
    %40 = arith.addf %34, %39 : vector<78x256xf32>
    %c0_48 = arith.constant 0 : index
    %c0_49 = arith.constant 0 : index
    %c7 = arith.constant 7 : index
    %c0_50 = arith.constant 0 : index
    %41 = vector.load %arg0[%c0_48, %c0_49, %c7, %c0_50] : memref<1x2x86x256xbf16, #tpu.memory_space<vmem>>, vector<1x1x78x256xbf16>
    %42 = vector.shape_cast %41 : vector<1x1x78x256xbf16> to vector<78x256xbf16>
    %c7_51 = arith.constant 7 : index
    %c0_52 = arith.constant 0 : index
    %c0_53 = arith.constant 0 : index
    %43 = vector.load %arg1[%c7_51, %c0_52, %c0_53] : memref<9x256x256xbf16, #tpu.memory_space<vmem>>, vector<1x256x256xbf16>
    %44 = vector.shape_cast %43 : vector<1x256x256xbf16> to vector<256x256xbf16>
    %cst_54 = arith.constant dense<0.000000e+00> : vector<78x256xf32>
    %45 = tpu.matmul %42, %44, %cst_54 {dimension_numbers = #tpu.dot_dimension_numbers<[1], [0], [0], [1], [0, 0, 1, 1], [], []>} : vector<78x256xbf16>, vector<256x256xbf16>, vector<78x256xf32> -> vector<78x256xf32>
    %46 = arith.addf %40, %45 : vector<78x256xf32>
    %c0_55 = arith.constant 0 : index
    %c0_56 = arith.constant 0 : index
    %c8 = arith.constant 8 : index
    %c0_57 = arith.constant 0 : index
    %47 = vector.load %arg0[%c0_55, %c0_56, %c8, %c0_57] : memref<1x2x86x256xbf16, #tpu.memory_space<vmem>>, vector<1x1x78x256xbf16>
    %48 = vector.shape_cast %47 : vector<1x1x78x256xbf16> to vector<78x256xbf16>
    %c8_58 = arith.constant 8 : index
    %c0_59 = arith.constant 0 : index
    %c0_60 = arith.constant 0 : index
    %49 = vector.load %arg1[%c8_58, %c0_59, %c0_60] : memref<9x256x256xbf16, #tpu.memory_space<vmem>>, vector<1x256x256xbf16>
    %50 = vector.shape_cast %49 : vector<1x256x256xbf16> to vector<256x256xbf16>
    %cst_61 = arith.constant dense<0.000000e+00> : vector<78x256xf32>
    %51 = tpu.matmul %48, %50, %cst_61 {dimension_numbers = #tpu.dot_dimension_numbers<[1], [0], [0], [1], [0, 0, 1, 1], [], []>} : vector<78x256xbf16>, vector<256x256xbf16>, vector<78x256xf32> -> vector<78x256xf32>
    %52 = arith.addf %46, %51 : vector<78x256xf32>
    %cst_62 = arith.constant 0.000000e+00 : f32
    %53 = vector.broadcast %cst_62 : f32 to vector<78x256xf32>
    %54 = arith.cmpf oge, %52, %53 : vector<78x256xf32>
    %cst_63 = arith.constant 2.000000e-01 : f32
    %55 = vector.broadcast %cst_63 : f32 to vector<78x256xf32>
    %56 = arith.mulf %55, %52 : vector<78x256xf32>
    %57 = arith.select %54, %52, %56 : vector<78x256xi1>, vector<78x256xf32>
    %c0_64 = arith.constant 0 : index
    %c1_65 = arith.constant 1 : index
    %c0_66 = arith.constant 0 : index
    %c0_67 = arith.constant 0 : index
    %58 = vector.load %arg0[%c0_64, %c1_65, %c0_66, %c0_67] : memref<1x2x86x256xbf16, #tpu.memory_space<vmem>>, vector<1x1x78x256xbf16>
    %59 = vector.shape_cast %58 : vector<1x1x78x256xbf16> to vector<78x256xbf16>
    %c0_68 = arith.constant 0 : index
    %c0_69 = arith.constant 0 : index
    %c0_70 = arith.constant 0 : index
    %60 = vector.load %arg1[%c0_68, %c0_69, %c0_70] : memref<9x256x256xbf16, #tpu.memory_space<vmem>>, vector<1x256x256xbf16>
    %61 = vector.shape_cast %60 : vector<1x256x256xbf16> to vector<256x256xbf16>
    %cst_71 = arith.constant dense<0.000000e+00> : vector<78x256xf32>
    %62 = tpu.matmul %59, %61, %cst_71 {dimension_numbers = #tpu.dot_dimension_numbers<[1], [0], [0], [1], [0, 0, 1, 1], [], []>} : vector<78x256xbf16>, vector<256x256xbf16>, vector<78x256xf32> -> vector<78x256xf32>
    %c0_72 = arith.constant 0 : index
    %c1_73 = arith.constant 1 : index
    %c1_74 = arith.constant 1 : index
    %c0_75 = arith.constant 0 : index
    %63 = vector.load %arg0[%c0_72, %c1_73, %c1_74, %c0_75] : memref<1x2x86x256xbf16, #tpu.memory_space<vmem>>, vector<1x1x78x256xbf16>
    %64 = vector.shape_cast %63 : vector<1x1x78x256xbf16> to vector<78x256xbf16>
    %c1_76 = arith.constant 1 : index
    %c0_77 = arith.constant 0 : index
    %c0_78 = arith.constant 0 : index
    %65 = vector.load %arg1[%c1_76, %c0_77, %c0_78] : memref<9x256x256xbf16, #tpu.memory_space<vmem>>, vector<1x256x256xbf16>
    %66 = vector.shape_cast %65 : vector<1x256x256xbf16> to vector<256x256xbf16>
    %cst_79 = arith.constant dense<0.000000e+00> : vector<78x256xf32>
    %67 = tpu.matmul %64, %66, %cst_79 {dimension_numbers = #tpu.dot_dimension_numbers<[1], [0], [0], [1], [0, 0, 1, 1], [], []>} : vector<78x256xbf16>, vector<256x256xbf16>, vector<78x256xf32> -> vector<78x256xf32>
    %68 = arith.addf %62, %67 : vector<78x256xf32>
    %c0_80 = arith.constant 0 : index
    %c1_81 = arith.constant 1 : index
    %c2_82 = arith.constant 2 : index
    %c0_83 = arith.constant 0 : index
    %69 = vector.load %arg0[%c0_80, %c1_81, %c2_82, %c0_83] : memref<1x2x86x256xbf16, #tpu.memory_space<vmem>>, vector<1x1x78x256xbf16>
    %70 = vector.shape_cast %69 : vector<1x1x78x256xbf16> to vector<78x256xbf16>
    %c2_84 = arith.constant 2 : index
    %c0_85 = arith.constant 0 : index
    %c0_86 = arith.constant 0 : index
    %71 = vector.load %arg1[%c2_84, %c0_85, %c0_86] : memref<9x256x256xbf16, #tpu.memory_space<vmem>>, vector<1x256x256xbf16>
    %72 = vector.shape_cast %71 : vector<1x256x256xbf16> to vector<256x256xbf16>
    %cst_87 = arith.constant dense<0.000000e+00> : vector<78x256xf32>
    %73 = tpu.matmul %70, %72, %cst_87 {dimension_numbers = #tpu.dot_dimension_numbers<[1], [0], [0], [1], [0, 0, 1, 1], [], []>} : vector<78x256xbf16>, vector<256x256xbf16>, vector<78x256xf32> -> vector<78x256xf32>
    %74 = arith.addf %68, %73 : vector<78x256xf32>
    %c0_88 = arith.constant 0 : index
    %c1_89 = arith.constant 1 : index
    %c3_90 = arith.constant 3 : index
    %c0_91 = arith.constant 0 : index
    %75 = vector.load %arg0[%c0_88, %c1_89, %c3_90, %c0_91] : memref<1x2x86x256xbf16, #tpu.memory_space<vmem>>, vector<1x1x78x256xbf16>
    %76 = vector.shape_cast %75 : vector<1x1x78x256xbf16> to vector<78x256xbf16>
    %c3_92 = arith.constant 3 : index
    %c0_93 = arith.constant 0 : index
    %c0_94 = arith.constant 0 : index
    %77 = vector.load %arg1[%c3_92, %c0_93, %c0_94] : memref<9x256x256xbf16, #tpu.memory_space<vmem>>, vector<1x256x256xbf16>
    %78 = vector.shape_cast %77 : vector<1x256x256xbf16> to vector<256x256xbf16>
    %cst_95 = arith.constant dense<0.000000e+00> : vector<78x256xf32>
    %79 = tpu.matmul %76, %78, %cst_95 {dimension_numbers = #tpu.dot_dimension_numbers<[1], [0], [0], [1], [0, 0, 1, 1], [], []>} : vector<78x256xbf16>, vector<256x256xbf16>, vector<78x256xf32> -> vector<78x256xf32>
    %80 = arith.addf %74, %79 : vector<78x256xf32>
    %c0_96 = arith.constant 0 : index
    %c1_97 = arith.constant 1 : index
    %c4_98 = arith.constant 4 : index
    %c0_99 = arith.constant 0 : index
    %81 = vector.load %arg0[%c0_96, %c1_97, %c4_98, %c0_99] : memref<1x2x86x256xbf16, #tpu.memory_space<vmem>>, vector<1x1x78x256xbf16>
    %82 = vector.shape_cast %81 : vector<1x1x78x256xbf16> to vector<78x256xbf16>
    %c4_100 = arith.constant 4 : index
    %c0_101 = arith.constant 0 : index
    %c0_102 = arith.constant 0 : index
    %83 = vector.load %arg1[%c4_100, %c0_101, %c0_102] : memref<9x256x256xbf16, #tpu.memory_space<vmem>>, vector<1x256x256xbf16>
    %84 = vector.shape_cast %83 : vector<1x256x256xbf16> to vector<256x256xbf16>
    %cst_103 = arith.constant dense<0.000000e+00> : vector<78x256xf32>
    %85 = tpu.matmul %82, %84, %cst_103 {dimension_numbers = #tpu.dot_dimension_numbers<[1], [0], [0], [1], [0, 0, 1, 1], [], []>} : vector<78x256xbf16>, vector<256x256xbf16>, vector<78x256xf32> -> vector<78x256xf32>
    %86 = arith.addf %80, %85 : vector<78x256xf32>
    %c0_104 = arith.constant 0 : index
    %c1_105 = arith.constant 1 : index
    %c5_106 = arith.constant 5 : index
    %c0_107 = arith.constant 0 : index
    %87 = vector.load %arg0[%c0_104, %c1_105, %c5_106, %c0_107] : memref<1x2x86x256xbf16, #tpu.memory_space<vmem>>, vector<1x1x78x256xbf16>
    %88 = vector.shape_cast %87 : vector<1x1x78x256xbf16> to vector<78x256xbf16>
    %c5_108 = arith.constant 5 : index
    %c0_109 = arith.constant 0 : index
    %c0_110 = arith.constant 0 : index
    %89 = vector.load %arg1[%c5_108, %c0_109, %c0_110] : memref<9x256x256xbf16, #tpu.memory_space<vmem>>, vector<1x256x256xbf16>
    %90 = vector.shape_cast %89 : vector<1x256x256xbf16> to vector<256x256xbf16>
    %cst_111 = arith.constant dense<0.000000e+00> : vector<78x256xf32>
    %91 = tpu.matmul %88, %90, %cst_111 {dimension_numbers = #tpu.dot_dimension_numbers<[1], [0], [0], [1], [0, 0, 1, 1], [], []>} : vector<78x256xbf16>, vector<256x256xbf16>, vector<78x256xf32> -> vector<78x256xf32>
    %92 = arith.addf %86, %91 : vector<78x256xf32>
    %c0_112 = arith.constant 0 : index
    %c1_113 = arith.constant 1 : index
    %c6_114 = arith.constant 6 : index
    %c0_115 = arith.constant 0 : index
    %93 = vector.load %arg0[%c0_112, %c1_113, %c6_114, %c0_115] : memref<1x2x86x256xbf16, #tpu.memory_space<vmem>>, vector<1x1x78x256xbf16>
    %94 = vector.shape_cast %93 : vector<1x1x78x256xbf16> to vector<78x256xbf16>
    %c6_116 = arith.constant 6 : index
    %c0_117 = arith.constant 0 : index
    %c0_118 = arith.constant 0 : index
    %95 = vector.load %arg1[%c6_116, %c0_117, %c0_118] : memref<9x256x256xbf16, #tpu.memory_space<vmem>>, vector<1x256x256xbf16>
    %96 = vector.shape_cast %95 : vector<1x256x256xbf16> to vector<256x256xbf16>
    %cst_119 = arith.constant dense<0.000000e+00> : vector<78x256xf32>
    %97 = tpu.matmul %94, %96, %cst_119 {dimension_numbers = #tpu.dot_dimension_numbers<[1], [0], [0], [1], [0, 0, 1, 1], [], []>} : vector<78x256xbf16>, vector<256x256xbf16>, vector<78x256xf32> -> vector<78x256xf32>
    %98 = arith.addf %92, %97 : vector<78x256xf32>
    %c0_120 = arith.constant 0 : index
    %c1_121 = arith.constant 1 : index
    %c7_122 = arith.constant 7 : index
    %c0_123 = arith.constant 0 : index
    %99 = vector.load %arg0[%c0_120, %c1_121, %c7_122, %c0_123] : memref<1x2x86x256xbf16, #tpu.memory_space<vmem>>, vector<1x1x78x256xbf16>
    %100 = vector.shape_cast %99 : vector<1x1x78x256xbf16> to vector<78x256xbf16>
    %c7_124 = arith.constant 7 : index
    %c0_125 = arith.constant 0 : index
    %c0_126 = arith.constant 0 : index
    %101 = vector.load %arg1[%c7_124, %c0_125, %c0_126] : memref<9x256x256xbf16, #tpu.memory_space<vmem>>, vector<1x256x256xbf16>
    %102 = vector.shape_cast %101 : vector<1x256x256xbf16> to vector<256x256xbf16>
    %cst_127 = arith.constant dense<0.000000e+00> : vector<78x256xf32>
    %103 = tpu.matmul %100, %102, %cst_127 {dimension_numbers = #tpu.dot_dimension_numbers<[1], [0], [0], [1], [0, 0, 1, 1], [], []>} : vector<78x256xbf16>, vector<256x256xbf16>, vector<78x256xf32> -> vector<78x256xf32>
    %104 = arith.addf %98, %103 : vector<78x256xf32>
    %c0_128 = arith.constant 0 : index
    %c1_129 = arith.constant 1 : index
    %c8_130 = arith.constant 8 : index
    %c0_131 = arith.constant 0 : index
    %105 = vector.load %arg0[%c0_128, %c1_129, %c8_130, %c0_131] : memref<1x2x86x256xbf16, #tpu.memory_space<vmem>>, vector<1x1x78x256xbf16>
    %106 = vector.shape_cast %105 : vector<1x1x78x256xbf16> to vector<78x256xbf16>
    %c8_132 = arith.constant 8 : index
    %c0_133 = arith.constant 0 : index
    %c0_134 = arith.constant 0 : index
    %107 = vector.load %arg1[%c8_132, %c0_133, %c0_134] : memref<9x256x256xbf16, #tpu.memory_space<vmem>>, vector<1x256x256xbf16>
    %108 = vector.shape_cast %107 : vector<1x256x256xbf16> to vector<256x256xbf16>
    %cst_135 = arith.constant dense<0.000000e+00> : vector<78x256xf32>
    %109 = tpu.matmul %106, %108, %cst_135 {dimension_numbers = #tpu.dot_dimension_numbers<[1], [0], [0], [1], [0, 0, 1, 1], [], []>} : vector<78x256xbf16>, vector<256x256xbf16>, vector<78x256xf32> -> vector<78x256xf32>
    %110 = arith.addf %104, %109 : vector<78x256xf32>
    %cst_136 = arith.constant 0.000000e+00 : f32
    %111 = vector.broadcast %cst_136 : f32 to vector<78x256xf32>
    %112 = arith.cmpf oge, %110, %111 : vector<78x256xf32>
    %cst_137 = arith.constant 2.000000e-01 : f32
    %113 = vector.broadcast %cst_137 : f32 to vector<78x256xf32>
    %114 = arith.mulf %113, %110 : vector<78x256xf32>
    %115 = arith.select %112, %110, %114 : vector<78x256xi1>, vector<78x256xf32>
    %116 = arith.truncf %57 : vector<78x256xf32> to vector<78x256xbf16>
    %c0_138 = arith.constant 0 : index
    %c0_139 = arith.constant 0 : index
    %c0_140 = arith.constant 0 : index
    %117 = vector.load %arg2[%c0_138, %c0_139, %c0_140] : memref<2x78x256xbf16, #tpu.memory_space<vmem>>, vector<1x78x256xbf16>
    %118 = vector.shape_cast %117 : vector<1x78x256xbf16> to vector<78x256xbf16>
    %119 = vector.shape_cast %116 : vector<78x256xbf16> to vector<1x78x256xbf16>
    tpu.vector_store %arg2[%c0_138, %c0_139, %c0_140], %119 {strides = array<i32>} : memref<2x78x256xbf16, #tpu.memory_space<vmem>>, vector<1x78x256xbf16>,
    %120 = arith.truncf %115 : vector<78x256xf32> to vector<78x256xbf16>
    %c1_141 = arith.constant 1 : index
    %c0_142 = arith.constant 0 : index
    %c0_143 = arith.constant 0 : index
    %121 = vector.load %arg2[%c1_141, %c0_142, %c0_143] : memref<2x78x256xbf16, #tpu.memory_space<vmem>>, vector<1x78x256xbf16>
    %122 = vector.shape_cast %121 : vector<1x78x256xbf16> to vector<78x256xbf16>
    %123 = vector.shape_cast %120 : vector<78x256xbf16> to vector<1x78x256xbf16>
    tpu.vector_store %arg2[%c1_141, %c0_142, %c0_143], %123 {strides = array<i32>} : memref<2x78x256xbf16, #tpu.memory_space<vmem>>, vector<1x78x256xbf16>,
    return
  }
}

module attributes {stable_mosaic.version = 11 : i64} {
  func.func @kernel(%arg0: memref<1x2x25x256xbf16, #tpu.memory_space<vmem>>, %arg1: memref<2x256x16xbf16, #tpu.memory_space<vmem>>, %arg2: memref<2x24x16xf32, #tpu.memory_space<vmem>>) attributes {dimension_semantics = [], scalar_prefetch = 0 : i64, scratch_operands = 0 : i64, tpu.core_type = #tpu.core_type<tc>} {
    %c0 = arith.constant 0 : index
    %c0_0 = arith.constant 0 : index
    %c0_1 = arith.constant 0 : index
    %c0_2 = arith.constant 0 : index
    %0 = vector.load %arg0[%c0, %c0_0, %c0_1, %c0_2] : memref<1x2x25x256xbf16, #tpu.memory_space<vmem>>, vector<1x1x24x256xbf16>
    %1 = vector.shape_cast %0 : vector<1x1x24x256xbf16> to vector<24x256xbf16>
    %c0_3 = arith.constant 0 : index
    %c0_4 = arith.constant 0 : index
    %c0_5 = arith.constant 0 : index
    %2 = vector.load %arg1[%c0_3, %c0_4, %c0_5] : memref<2x256x16xbf16, #tpu.memory_space<vmem>>, vector<1x256x16xbf16>
    %3 = vector.shape_cast %2 : vector<1x256x16xbf16> to vector<256x16xbf16>
    %cst = arith.constant dense<0.000000e+00> : vector<24x16xf32>
    %4 = tpu.matmul %1, %3, %cst {dimension_numbers = #tpu.dot_dimension_numbers<[1], [0], [0], [1], [0, 0, 1, 1], [], []>} : vector<24x256xbf16>, vector<256x16xbf16>, vector<24x16xf32> -> vector<24x16xf32>
    %c0_6 = arith.constant 0 : index
    %c0_7 = arith.constant 0 : index
    %c1 = arith.constant 1 : index
    %c0_8 = arith.constant 0 : index
    %5 = vector.load %arg0[%c0_6, %c0_7, %c1, %c0_8] : memref<1x2x25x256xbf16, #tpu.memory_space<vmem>>, vector<1x1x24x256xbf16>
    %6 = vector.shape_cast %5 : vector<1x1x24x256xbf16> to vector<24x256xbf16>
    %c1_9 = arith.constant 1 : index
    %c0_10 = arith.constant 0 : index
    %c0_11 = arith.constant 0 : index
    %7 = vector.load %arg1[%c1_9, %c0_10, %c0_11] : memref<2x256x16xbf16, #tpu.memory_space<vmem>>, vector<1x256x16xbf16>
    %8 = vector.shape_cast %7 : vector<1x256x16xbf16> to vector<256x16xbf16>
    %cst_12 = arith.constant dense<0.000000e+00> : vector<24x16xf32>
    %9 = tpu.matmul %6, %8, %cst_12 {dimension_numbers = #tpu.dot_dimension_numbers<[1], [0], [0], [1], [0, 0, 1, 1], [], []>} : vector<24x256xbf16>, vector<256x16xbf16>, vector<24x16xf32> -> vector<24x16xf32>
    %10 = arith.addf %4, %9 : vector<24x16xf32>
    %11 = math.tanh %10 : vector<24x16xf32>
    %c0_13 = arith.constant 0 : index
    %c1_14 = arith.constant 1 : index
    %c0_15 = arith.constant 0 : index
    %c0_16 = arith.constant 0 : index
    %12 = vector.load %arg0[%c0_13, %c1_14, %c0_15, %c0_16] : memref<1x2x25x256xbf16, #tpu.memory_space<vmem>>, vector<1x1x24x256xbf16>
    %13 = vector.shape_cast %12 : vector<1x1x24x256xbf16> to vector<24x256xbf16>
    %c0_17 = arith.constant 0 : index
    %c0_18 = arith.constant 0 : index
    %c0_19 = arith.constant 0 : index
    %14 = vector.load %arg1[%c0_17, %c0_18, %c0_19] : memref<2x256x16xbf16, #tpu.memory_space<vmem>>, vector<1x256x16xbf16>
    %15 = vector.shape_cast %14 : vector<1x256x16xbf16> to vector<256x16xbf16>
    %cst_20 = arith.constant dense<0.000000e+00> : vector<24x16xf32>
    %16 = tpu.matmul %13, %15, %cst_20 {dimension_numbers = #tpu.dot_dimension_numbers<[1], [0], [0], [1], [0, 0, 1, 1], [], []>} : vector<24x256xbf16>, vector<256x16xbf16>, vector<24x16xf32> -> vector<24x16xf32>
    %c0_21 = arith.constant 0 : index
    %c1_22 = arith.constant 1 : index
    %c1_23 = arith.constant 1 : index
    %c0_24 = arith.constant 0 : index
    %17 = vector.load %arg0[%c0_21, %c1_22, %c1_23, %c0_24] : memref<1x2x25x256xbf16, #tpu.memory_space<vmem>>, vector<1x1x24x256xbf16>
    %18 = vector.shape_cast %17 : vector<1x1x24x256xbf16> to vector<24x256xbf16>
    %c1_25 = arith.constant 1 : index
    %c0_26 = arith.constant 0 : index
    %c0_27 = arith.constant 0 : index
    %19 = vector.load %arg1[%c1_25, %c0_26, %c0_27] : memref<2x256x16xbf16, #tpu.memory_space<vmem>>, vector<1x256x16xbf16>
    %20 = vector.shape_cast %19 : vector<1x256x16xbf16> to vector<256x16xbf16>
    %cst_28 = arith.constant dense<0.000000e+00> : vector<24x16xf32>
    %21 = tpu.matmul %18, %20, %cst_28 {dimension_numbers = #tpu.dot_dimension_numbers<[1], [0], [0], [1], [0, 0, 1, 1], [], []>} : vector<24x256xbf16>, vector<256x16xbf16>, vector<24x16xf32> -> vector<24x16xf32>
    %22 = arith.addf %16, %21 : vector<24x16xf32>
    %23 = math.tanh %22 : vector<24x16xf32>
    %c0_29 = arith.constant 0 : index
    %c0_30 = arith.constant 0 : index
    %c0_31 = arith.constant 0 : index
    %24 = vector.load %arg2[%c0_29, %c0_30, %c0_31] : memref<2x24x16xf32, #tpu.memory_space<vmem>>, vector<1x24x16xf32>
    %25 = vector.shape_cast %24 : vector<1x24x16xf32> to vector<24x16xf32>
    %26 = vector.shape_cast %11 : vector<24x16xf32> to vector<1x24x16xf32>
    tpu.vector_store %arg2[%c0_29, %c0_30, %c0_31], %26 {strides = array<i32>} : memref<2x24x16xf32, #tpu.memory_space<vmem>>, vector<1x24x16xf32>,
    %c1_32 = arith.constant 1 : index
    %c0_33 = arith.constant 0 : index
    %c0_34 = arith.constant 0 : index
    %27 = vector.load %arg2[%c1_32, %c0_33, %c0_34] : memref<2x24x16xf32, #tpu.memory_space<vmem>>, vector<1x24x16xf32>
    %28 = vector.shape_cast %27 : vector<1x24x16xf32> to vector<24x16xf32>
    %29 = vector.shape_cast %23 : vector<24x16xf32> to vector<1x24x16xf32>
    tpu.vector_store %arg2[%c1_32, %c0_33, %c0_34], %29 {strides = array<i32>} : memref<2x24x16xf32, #tpu.memory_space<vmem>>, vector<1x24x16xf32>,
    return
  }
}

</mosaic_0001>

<bundles_post_ra>
// kernel: generator_forward.6
= control target key start
LH: loop header
LB: loop body
LE: loop exit
PB: predicated region body
PF: predicated region fallthrough
CT: control target
= control target key end

     0   :  { %9 = vsyncpa [#allocation3], 0  ;;  %s941_s0 = inlined_call_operand.vmem [shape: bf16[1,2,16,16], index: 0, kind: input, shape index: {}]   ;;  %s942_s1 = inlined_call_operand.vmem [shape: bf16[3,16,256], index: 1, kind: input, shape index: {}]   ;;  %s943_s2 = inlined_call_operand.hbm [shape: f32[1,256], index: 2, kind: input, shape index: {}]   ;;  %s944_s3 = inlined_call_operand.hbm [shape: f32[1,256], index: 3, kind: input, shape index: {}]   ;;  %s945_s4 = inlined_call_operand.vmem [shape: bf16[2,14,256], index: 4, kind: output, shape index: {}]  }
   0x1   :  { %10 = vsyncpa [#allocation5], 0  ;;  %s763_s15 = smov [#allocation2]   ;;  %s764_s17 = smov [#allocation4]  }
   0x2   :  { %s21_s16 = sshll.u32 %s763_s15, 4  ;;  %s31_s18 = sshll.u32 %s764_s17, 4  ;;  %s22_s16 = int_to_ptr.vmem [resolvable:$true] %s21_s16  ;;  %s32_s18 = int_to_ptr.vmem [resolvable:$true] %s31_s18 }
   0x3   :  { %s715_s21 = scalar_lea.hbm %s943_s2, 32 }
   0x4   :  { %p716_p0 = scmp.ne.s32.totalorder %s943_s2, %s715_s21  ;;  %p719_p1 = scmp.lt.u32.totalorder %s715_s21, %s943_s2 }
   0x6   :  { %p721_p2 = pnand %p719_p1, %p716_p0 }
   0x8   :  { %724 = shalt.err (!%p721_p2)
}
   0x9   :  { %s725_s26 = scalar_lea.vmem %s22_s16, 32  ;;  %p730_p4 = scmp.lt.s32.totalorder %s22_s16, %s22_s16 }
   0xa   :  { %p726_p3 = scmp.ne.s32.totalorder %s22_s16, %s725_s26  ;;  %p731_p5 = scmp.lt.s32.totalorder %s725_s26, %s725_s26 }
   0xc   :  { %p732_p6 = por %p731_p5, %p730_p4 }
   0xe   :  { %p733_p7 = pnand %p732_p6, %p726_p3 }
  0x10   :  { %736 = shalt.err (!%p733_p7)
}
  0x11   :  { %24 = dma.hbm_to_vmem [thread:$0]  %s943_s2, 32, %s22_s16, [#allocation3]  }
  0x12   :  { %s737_s5 = scalar_lea.hbm %s944_s3, 32 }
  0x13   :  { %p738_p8 = scmp.ne.s32.totalorder %s944_s3, %s737_s5  ;;  %p741_p9 = scmp.lt.u32.totalorder %s737_s5, %s944_s3 }
  0x15   :  { %p743_p10 = pnand %p741_p9, %p738_p8 }
  0x17   :  { %746 = shalt.err (!%p743_p10)
}
  0x18   :  { %s747_s10 = scalar_lea.vmem %s32_s18, 32  ;;  %p752_p12 = scmp.lt.s32.totalorder %s32_s18, %s32_s18 }
  0x19   :  { %p748_p11 = scmp.ne.s32.totalorder %s32_s18, %s747_s10  ;;  %p753_p13 = scmp.lt.s32.totalorder %s747_s10, %s747_s10 }
  0x1b   :  { %p754_p0 = por %p753_p13, %p752_p12 }
  0x1d   :  { %p755_p1 = pnand %p754_p0, %p748_p11 }
  0x1f   :  { %758 = shalt.err (!%p755_p1)
}
  0x20   :  { %34 = dma.hbm_to_vmem [thread:$0]  %s944_s3, 32, %s32_s18, [#allocation5]  }
  0x21   :  { %759 = dma.done.wait [#allocation3], 32  }
  0x22   :  { %760 = vsyncadd [#allocation3], 4294967264 }
  0x23   :  { %761 = dma.done.wait [#allocation5], 32  }
  0x24   :  { %762 = vsyncadd [#allocation5], 4294967264  ;;  %v765_v0 = vmov 0   ;;  %v696_v1 = vld [vmem:[%s942_s1 + $0x14] ss:$8 sps:$4 sm:$0xff]   ;;  %vm72_vm0 = vcmask 130048  }
  0x25   :  { %108 = vmatprep.mubr.bf16.mxu0 %v765_v0  ;;  %309 = vmatprep.mubr.bf16.mxu1 %v765_v0  ;;  %v698_v2 = vld [vmem:[%s942_s1 + $0x10] ss:$8 sps:$4 sm:$0xff]   ;;  %v701_v3 = vld [vmem:[%s942_s1 + $0x4] ss:$8 sps:$4 sm:$0xff]   ;;  %v42_v4 = vld [vmem:[%s941_s0] sm:$0xf] }
  0x26   :  { %76 = vmatprep.subr.bf16.mxu0 %v696_v1  ;;  %277 = vmatprep.subr.bf16.mxu1 %v696_v1  ;;  %v46_v5 = vld [vmem:[%s941_s0 + $0x4] sm:$0xf]  ;;  %v656_v6 = vld [vmem:[%s941_s0 + $0x8] sm:$0xf]  ;;  %v658_v7 = vld [vmem:[%s941_s0 + $0xc] sm:$0xf] }
  0x27   :  { %77 = vmatpush1.bf16.msra.mxu0 %v698_v2  ;;  %278 = vmatpush1.bf16.msra.mxu1 %v698_v2  ;;  %v642_v8 = vcombine.low %v42_v4, %v46_v5  ;;  %v659_v9 = vcombine.low %v656_v6, %v658_v7  ;;  %v699_v16 = vld [vmem:[%s942_s1] ss:$8 sps:$4 sm:$0xff]   ;;  %v706_v19 = vld [vmem:[%s942_s1 + $0x24] ss:$8 sps:$4 sm:$0xff]   ;;  %vm436_vm3 = vcmask 1045504  }
  0x28   :  { %135 = vmatprep.subr.bf16.mxu0 %v701_v3  ;;  %326 = vmatprep.subr.bf16.mxu1 %v701_v3  ;;  %v43_v20 = vld [vmem:[%s941_s0 + $0x4] sm:$0x7]  ;;  %v657_v21 = vld [vmem:[%s941_s0 + $0xc] sm:$0x7]  ;;  %v704_v24 = vld [vmem:[%s942_s1 + $0x20] ss:$8 sps:$4 sm:$0xff]  }
  0x29   :  { %v56_v10 = vshrl.u32 %v642_v8, 16  ;;  %v58_v11 = vshll.u32 %v642_v8, 16  ;;  %v268_v12 = vshrl.u32 %v659_v9, 16  ;;  %v270_v13 = vshll.u32 %v659_v9, 16  ;;  %v178_v25 = vld [vmem:[%s941_s0] sm:$0xe] }
  0x2a   :  { %v646_v22 = vcombine.low %v42_v4, %v43_v20  ;;  %v661_v23 = vcombine.low %v656_v6, %v657_v21  ;;  %v663_v26 = vld [vmem:[%s941_s0 + $0x8] sm:$0xe]  ;;  %v652_v27 = vcombine.low %v178_v25, %v46_v5 }
  0x2b   :  { %v60_v14 = vrot.slane %v58_v11, 1  ;;  %v272_v15 = vrot.slane %v270_v13, 1  ;;  %v664_v28 = vcombine.low %v663_v26, %v658_v7 }
  0x2c   :  { %v185_v29 = vrot.slane %v652_v27, 1 }
  0x2d   :  { %v61_v17 = vor.u32 %v60_v14, %v56_v10  ;;  %v273_v18 = vor.u32 %v272_v15, %v268_v12  ;;  %v373_v30 = vrot.slane %v664_v28, 1 }
  0x2f   :  { %645 = vmatmul.mubr.msk.bf16.vlgmr.msra.gmra.mrb[0].mxu0 %vm72_vm0, %v61_v17  ;;  %660 = vmatmul.mubr.msk.bf16.vlgmr.msra.gmra.mrb[0].mxu1 %vm72_vm0, %v273_v18 }
  0x30   :  { %136 = vmatpush1.bf16.msra.mxu0 %v699_v16  ;;  %327 = vmatpush1.bf16.msra.mxu1 %v699_v16 }
  0x31   :  { %167 = vmatprep.mubr.bf16.mxu0 %v765_v0  ;;  %199 = vmatprep.subr.bf16.mxu0 %v706_v19 }
  0x32   :  { %358 = vmatprep.mubr.bf16.mxu1 %v765_v0  ;;  %377 = vmatprep.subr.bf16.mxu1 %v706_v19 }
  0x3b   :  { %649 = vmatmul.mubr.msk.bf16.vlgmr.msra.gmra.mrb[0].mxu0 %vm72_vm0, %v646_v22  ;;  %662 = vmatmul.mubr.msk.bf16.vlgmr.msra.gmra.mrb[0].mxu1 %vm72_vm0, %v661_v23 }
  0x3c   :  { %200 = vmatpush1.bf16.msra.mxu0 %v704_v24  ;;  %378 = vmatpush1.bf16.msra.mxu1 %v704_v24 }
  0x3d   :  { %231 = vmatprep.mubr.bf16.mxu0 %v765_v0  ;;  %409 = vmatprep.mubr.bf16.mxu1 %v765_v0 }
  0x47   :  { %655 = vmatmul.mubr.msk.bf16.vlgmr.msra.gmra.mrb[0].mxu0 %vm72_vm0, %v185_v29  ;;  %665 = vmatmul.mubr.msk.bf16.vlgmr.msra.gmra.mrb[0].mxu1 %vm72_vm0, %v373_v30 }
 0x11a   :  { %v233_v31 = vpop.f32.mrb[0].mxu0  ;;  %v411_v32 = vpop.f32.mrb[0].mxu1 }
 0x11b   :  { %v250_v33 = vmul.f32 0.2, %v233_v31  ;;  %vm246_vm1 = vcmp.ge.f32.partialorder %v233_v31, 0.0  ;;  %v235_v34 = vpop.f32.mrb[1].mxu0  ;;  %v413_v35 = vpop.f32.mrb[1].mxu1  ;;  %vm424_vm2 = vcmp.ge.f32.partialorder %v411_v32, 0.0 }
 0x11c   :  { %v428_v36 = vmul.f32 0.2, %v411_v32  ;;  %v237_v37 = vpop.f32.mrb[2].mxu0  ;;  %v415_v38 = vpop.f32.mrb[2].mxu1  ;;  %vm247_vm4 = vcmp.ge.f32.partialorder %v235_v34, 0.0  ;;  %vm425_vm6 = vcmp.ge.f32.partialorder %v413_v35, 0.0 }
 0x11d   :  { %v251_v39 = vmul.f32 0.2, %v235_v34  ;;  %vm248_vm5 = vcmp.ge.f32.partialorder %v237_v37, 0.0  ;;  %v252_v40 = vmul.f32 0.2, %v237_v37  ;;  %v864_v41 = vsel %vm246_vm1, %v233_v31, %v250_v33  ;;  %v239_v43 = vpop.f32.mrb[3].mxu0 }
 0x11e   :  { %vm426_vm7 = vcmp.ge.f32.partialorder %v415_v38, 0.0  ;;  %v430_v42 = vmul.f32 0.2, %v415_v38  ;;  %v417_v44 = vpop.f32.mrb[3].mxu1  ;;  %v429_v45 = vmul.f32 0.2, %v413_v35  ;;  %v873_v51 = vsel %vm424_vm2, %v411_v32, %v428_v36 }
 0x11f   :  { %v866_v46 = vsel %vm248_vm5, %v237_v37, %v252_v40  ;;  %vm249_vm8 = vcmp.ge.f32.partialorder %v239_v43, 0.0  ;;  %v253_v47 = vmul.f32 0.2, %v239_v43  ;;  %vm427_vm9 = vcmp.ge.f32.partialorder %v417_v44, 0.0 }
 0x120   :  { %v437_v48 = vsel %vm436_vm3, %v866_v46, 0.0  ;;  %v870_v49 = vsel %vm426_vm7, %v415_v38, %v430_v42  ;;  %v431_v50 = vmul.f32 0.2, %v417_v44  ;;  %v881_v55 = vsel %vm247_vm4, %v235_v34, %v251_v39 }
 0x121   :  { %v438_v52 = vadd.f32 %v437_v48, %v864_v41  ;;  %v455_v53 = vsel %vm436_vm3, %v870_v49, 0.0  ;;  %v878_v54 = vsel %vm249_vm8, %v239_v43, %v253_v47  ;;  %v889_v59 = vsel %vm425_vm6, %v413_v35, %v429_v45 }
 0x122   :  { %v456_v56 = vadd.f32 %v455_v53, %v873_v51  ;;  %v445_v57 = vsel %vm436_vm3, %v878_v54, 0.0  ;;  %v886_v58 = vsel %vm427_vm9, %v417_v44, %v431_v50 }
 0x123   :  { %v439_v60 = vrot.slane %v438_v52, 4  ;;  %v446_v61 = vadd.f32 %v445_v57, %v881_v55  ;;  %v463_v62 = vsel %vm436_vm3, %v886_v58, 0.0 }
 0x124   :  { %v457_v63 = vrot.slane %v456_v56, 4  ;;  %v464_v0 = vadd.f32 %v463_v62, %v889_v59 }
 0x125   :  { %v440_v1 = vadd.f32 %v439_v60, %v438_v52  ;;  %v447_v2 = vrot.slane %v446_v61, 4 }
 0x126   :  { %v458_v3 = vadd.f32 %v457_v63, %v456_v56  ;;  %v465_v4 = vrot.slane %v464_v0, 4 }
 0x127   :  { %v441_v5 = vrot.slane %v440_v1, 2  ;;  %v448_v6 = vadd.f32 %v447_v2, %v446_v61 }
 0x128   :  { %v459_v7 = vrot.slane %v458_v3, 2  ;;  %v466_v8 = vadd.f32 %v465_v4, %v464_v0 }
 0x129   :  { %v442_v9 = vadd.f32 %v441_v5, %v440_v1  ;;  %v449_v10 = vrot.slane %v448_v6, 2 }
 0x12a   :  { %v460_v11 = vadd.f32 %v459_v7, %v458_v3  ;;  %v467_v12 = vrot.slane %v466_v8, 2 }
 0x12b   :  { %v443_v13 = vrot.slane %v442_v9, 1  ;;  %v450_v14 = vadd.f32 %v449_v10, %v448_v6 }
 0x12c   :  { %v461_v15 = vrot.slane %v460_v11, 1  ;;  %v468_v16 = vadd.f32 %v467_v12, %v466_v8 }
 0x12d   :  { %v444_v17 = vadd.f32 %v443_v13, %v442_v9  ;;  %v451_v18 = vrot.slane %v450_v14, 1 }
 0x12e   :  { %v462_v19 = vadd.f32 %v461_v15, %v460_v11  ;;  %v469_v20 = vrot.slane %v468_v16, 1 }
 0x12f   :  { %v452_v21 = vadd.f32 %v451_v18, %v450_v14  ;;  %v536_v18 = vlaneseq }
 0x130   :  { %v471_v22 = vadd.f32 %v462_v19, %v444_v17  ;;  %v470_v23 = vadd.f32 %v469_v20, %v468_v16 }
 0x132   :  { %v895_v24 = vmul.f32 0.035714287, %v471_v22  ;;  %v472_v25 = vadd.f32 %v470_v23, %v452_v21 }
 0x134   :  { %v476_v26 = vsub.f32 %v864_v41, %v895_v24  ;;  %v478_v27 = vsub.f32 %v866_v46, %v895_v24  ;;  %v502_v28 = vsub.f32 %v873_v51, %v895_v24  ;;  %v504_v29 = vsub.f32 %v870_v49, %v895_v24 }
 0x135   :  { %v905_v30 = vmul.f32 0.035714287, %v472_v25  ;;  %v537_v25 = vshrl.u32 %v536_v18, 7 }
 0x136   :  { %v480_v31 = vmul.f32 %v476_v26, %v476_v26  ;;  %v482_v32 = vmul.f32 %v478_v27, %v478_v27  ;;  %v506_v33 = vmul.f32 %v502_v28, %v502_v28  ;;  %v508_v34 = vmul.f32 %v504_v29, %v504_v29  ;;  %v534_v29 = vld [vmem:[#allocation2] sm:$0x3] }
 0x137   :  { %v477_v35 = vsub.f32 %v881_v55, %v905_v30  ;;  %v479_v36 = vsub.f32 %v878_v54, %v905_v30  ;;  %v503_v37 = vsub.f32 %v889_v59, %v905_v30  ;;  %v505_v38 = vsub.f32 %v886_v58, %v905_v30 }
 0x138   :  { %v484_v39 = vsel %vm436_vm3, %v482_v32, 0.0  ;;  %v510_v40 = vsel %vm436_vm3, %v508_v34, 0.0  ;;  %v538_v28 = vsub.s32 0, %v537_v25  ;;  %v542_v32 = vsub.s32 1, %v537_v25 }
 0x139   :  { %v485_v42 = vadd.f32 %v484_v39, %v480_v31  ;;  %v511_v43 = vadd.f32 %v510_v40, %v506_v33  ;;  %v481_v44 = vmul.f32 %v477_v35, %v477_v35  ;;  %v483_v45 = vmul.f32 %v479_v36, %v479_v36 }
 0x13a   :  { %v507_v47 = vmul.f32 %v503_v37, %v503_v37  ;;  %v509_v48 = vmul.f32 %v505_v38, %v505_v38  ;;  %v539_v31 = vrot.slane %v534_v29, %v538_v28  ;;  %v766_v34 = vmov 1966171168  }
 0x13b   :  { %v486_v50 = vrot.slane %v485_v42, 4  ;;  %v512_v52 = vrot.slane %v511_v43, 4  ;;  %v492_v53 = vsel %vm436_vm3, %v483_v45, 0.0  ;;  %v555_v35 = vunpack.c.l.s4 %v766_v34 }
 0x13c   :  { %v493_v56 = vadd.f32 %v492_v53, %v481_v44  ;;  %v518_v57 = vsel %vm436_vm3, %v509_v48, 0.0  ;;  %v543_v37 = vrot.slane %v534_v29, %v542_v32 }
 0x13d   :  { %v487_v60 = vadd.f32 %v486_v50, %v485_v42  ;;  %v513_v61 = vadd.f32 %v512_v52, %v511_v43  ;;  %v519_v62 = vadd.f32 %v518_v57, %v507_v47  ;;  %v556_v42 = vunpack.c.0.s8 %v555_v35 }
 0x13e   :  { %v494_v63 = vrot.slane %v493_v56, 4 }
 0x13f   :  { %v488_v0 = vrot.slane %v487_v60, 2  ;;  %v514_v1 = vrot.slane %v513_v61, 2  ;;  %v520_v2 = vrot.slane %v519_v62, 4  ;;  %v559_v52 = vsub.s32 %v556_v42, %v537_v25 }
 0x140   :  { %v495_v3 = vadd.f32 %v494_v63, %v493_v56 }
 0x141   :  { %v489_v4 = vadd.f32 %v488_v0, %v487_v60  ;;  %v515_v5 = vadd.f32 %v514_v1, %v513_v61  ;;  %v521_v6 = vadd.f32 %v520_v2, %v519_v62 }
 0x142   :  { %v496_v7 = vrot.slane %v495_v3, 2 }
 0x143   :  { %v490_v8 = vrot.slane %v489_v4, 1  ;;  %v516_v9 = vrot.slane %v515_v5, 1  ;;  %v522_v10 = vrot.slane %v521_v6, 2 }
 0x144   :  { %v497_v11 = vadd.f32 %v496_v7, %v495_v3 }
 0x145   :  { %v491_v12 = vadd.f32 %v490_v8, %v489_v4  ;;  %v517_v13 = vadd.f32 %v516_v9, %v515_v5  ;;  %v523_v14 = vadd.f32 %v522_v10, %v521_v6 }
 0x146   :  { %v498_v15 = vrot.slane %v497_v11, 1 }
 0x147   :  { %v526_v16 = vadd.f32 %v517_v13, %v491_v12  ;;  %v524_v17 = vrot.slane %v523_v14, 1 }
 0x148   :  { %v499_v19 = vadd.f32 %v498_v15, %v497_v11 }
 0x149   :  { %v528_v20 = vmul.f32 0.035714287, %v526_v16  ;;  %v525_v21 = vadd.f32 %v524_v17, %v523_v14 }
 0x14b   :  { %v530_v22 = vadd.f32 1e-05, %v528_v20  ;;  %v527_v23 = vadd.f32 %v525_v21, %v499_v19 }
 0x14d   :  { %711 = vrsqrt.f32 %v530_v22  ;;  %v529_v26 = vmul.f32 0.035714287, %v527_v23 }
 0x14f   :  { %v531_v27 = vadd.f32 1e-05, %v529_v26 }
 0x151   :  { %713 = vrsqrt.f32 %v531_v27 }
 0x157   :  { %v712_v33 = vpop.eup %711 }
 0x158   :  { %v546_v36 = vmul.f32 %v712_v33, %v539_v31 }
 0x15a   :  { %v549_v38 = vmul.f32 %v546_v36, %v895_v24  ;;  %v573_v39 = vrot.slane %v546_v36, %v538_v28 }
 0x15b   :  { %v714_v40 = vpop.eup %713 }
 0x15c   :  { %v578_v43 = vmul.f32 %v573_v39, %v864_v41  ;;  %v580_v44 = vmul.f32 %v573_v39, %v866_v46  ;;  %v597_v45 = vmul.f32 %v573_v39, %v873_v51  ;;  %v599_v47 = vmul.f32 %v573_v39, %v870_v49  ;;  %v548_v46 = vld [vmem:[#allocation4] sm:$0x3] }
 0x15d   :  { %v547_v48 = vmul.f32 %v714_v40, %v543_v37 }
 0x15f   :  { %v550_v50 = vmul.f32 %v547_v48, %v905_v30  ;;  %v577_v53 = vrot.slane %v547_v48, %v538_v28 }
 0x161   :  { %v553_v56 = vcombine.low %v549_v38, %v550_v50  ;;  %v579_v57 = vmul.f32 %v577_v53, %v881_v55  ;;  %v581_v24 = vmul.f32 %v577_v53, %v878_v54  ;;  %v598_v60 = vmul.f32 %v577_v53, %v889_v59 }
 0x162   :  { %v600_v41 = vmul.f32 %v577_v53, %v886_v58 }
 0x163   :  { %v560_v61 = vrot.slane %v553_v56, %v559_v52 }
 0x165   :  { %v567_v62 = vrot.slane %v560_v61, %v559_v52 }
 0x167   :  { %v569_v51 = vsub.f32 %v548_v46, %v567_v62 }
 0x169   :  { %v586_v63 = vrot.slane %v569_v51, %v538_v28  ;;  %v590_v49 = vrot.slane %v569_v51, %v542_v32 }
 0x16b   :  { %v593_v0 = vadd.f32 %v586_v63, %v578_v43  ;;  %v594_v1 = vadd.f32 %v590_v49, %v579_v57  ;;  %v595_v30 = vadd.f32 %v586_v63, %v580_v44  ;;  %v596_v2 = vadd.f32 %v590_v49, %v581_v24 }
 0x16c   :  { %v601_v3 = vadd.f32 %v597_v45, %v586_v63  ;;  %v602_v4 = vadd.f32 %v598_v60, %v590_v49  ;;  %v603_v5 = vadd.f32 %v599_v47, %v586_v63  ;;  %v604_v55 = vadd.f32 %v600_v41, %v590_v49 }
 0x16d   :  { %v672_v6 = vpack.c.bf16 %v594_v1, %v593_v0  ;;  %v673_v54 = vpack.c.bf16 %v596_v2, %v595_v30 }
 0x16e   :  { %v674_v7 = vpack.c.bf16 %v602_v4, %v601_v3  ;;  %v675_v59 = vpack.c.bf16 %v604_v55, %v603_v5 }
 0x16f   :  { %617 = vst [vmem:[%s945_s4] sm:$0xff] %v672_v6  ;;  %618 = vst [vmem:[%s945_s4 + $0x8] sm:$0x77] %v673_v54 }
 0x170   :  { %670 = vst [vmem:[%s945_s4 + $0x10] sm:$0xff] %v674_v7  ;;  %671 = vst [vmem:[%s945_s4 + $0x18] sm:$0x77] %v675_v59 }
 0x171   :  { %638 = vsyncpa [#allocation3], 1 }
 0x172   :  { %639 = vsyncpa [#allocation5], 1 }

// kernel: generator_forward.7
= control target key start
LH: loop header
LB: loop body
LE: loop exit
PB: predicated region body
PF: predicated region fallthrough
CT: control target
= control target key end

     0   :  { %vm2098_vm0 = vcmask 1045504   ;;  %vm2899_vm3 = vcmask 1044480   ;;  %vm3081_vm10 = vcmask 1042432   ;;  %vm3082_vm11 = vsmask.f32 2304  ;;  %s5390_s1 = inlined_call_operand.vmem [shape: bf16[9,256,256], index: 1, kind: input, shape index: {}]   ;;  %s5391_s0 = inlined_call_operand.vmem [shape: bf16[2,2,17,256], index: 0, kind: input, shape index: {}]   ;;  %s5392_s2 = inlined_call_operand.vmem [shape: f32[1,256], index: 2, kind: input, shape index: {}]   ;;  %s5393_s3 = inlined_call_operand.vmem [shape: f32[1,256], index: 3, kind: input, shape index: {}]   ;;  %s5394_s4 = inlined_call_operand.vmem [shape: bf16[2,13,256], index: 4, kind: output, shape index: {}]  }
   0x1   :  { %v3771_v0 = vld [vmem:[%s5390_s1 + $0x104] ss:$8 sps:$4 sm:$0xff]   ;;  %v3773_v1 = vld [vmem:[%s5390_s1 + $0x100] ss:$8 sps:$4 sm:$0xff]   ;;  %v3774_v2 = vld [vmem:[%s5390_s1 + $0x114] ss:$8 sps:$4 sm:$0xff]  }
   0x2   :  { %257 = vmatprep.subr.bf16.mxu0 %v3771_v0  ;;  %2342 = vmatprep.subr.bf16.mxu1 %v3771_v0  ;;  %v3776_v3 = vld [vmem:[%s5390_s1 + $0x110] ss:$8 sps:$4 sm:$0xff]   ;;  %v3777_v4 = vld [vmem:[%s5390_s1 + $0x124] ss:$8 sps:$4 sm:$0xff]   ;;  %v3779_v5 = vld [vmem:[%s5390_s1 + $0x120] ss:$8 sps:$4 sm:$0xff]  }
   0x3   :  { %258 = vmatpush1.bf16.msra.mxu0 %v3773_v1  ;;  %2343 = vmatpush1.bf16.msra.mxu1 %v3773_v1  ;;  %v3780_v6 = vld [vmem:[%s5390_s1 + $0x134] ss:$8 sps:$4 sm:$0xff]   ;;  %v3782_v7 = vld [vmem:[%s5390_s1 + $0x130] ss:$8 sps:$4 sm:$0xff]   ;;  %v3783_v8 = vld [vmem:[%s5390_s1 + $0x144] ss:$8 sps:$4 sm:$0xff]  }
   0x4   :  { %259 = vmatprep.subr.bf16.mxu0 %v3774_v2  ;;  %2344 = vmatprep.subr.bf16.mxu1 %v3774_v2  ;;  %v3785_v9 = vld [vmem:[%s5390_s1 + $0x140] ss:$8 sps:$4 sm:$0xff]   ;;  %v3786_v10 = vld [vmem:[%s5390_s1 + $0x154] ss:$8 sps:$4 sm:$0xff]   ;;  %v3788_v11 = vld [vmem:[%s5390_s1 + $0x150] ss:$8 sps:$4 sm:$0xff]  }
   0x5   :  { %v3789_v12 = vld [vmem:[%s5390_s1 + $0x164] ss:$8 sps:$4 sm:$0xff]   ;;  %v3819_v13 = vld [vmem:[%s5391_s0 + $0x34] ss:$8 sps:$4 sm:$0x7f]   ;;  %vm3084_vm12 = vcmask 1046532   ;;  %vm5360_vm14 = vmand %vm3081_vm10, %vm3082_vm11 }
   0x6   :  { %v3791_v14 = vld [vmem:[%s5390_s1 + $0x160] ss:$8 sps:$4 sm:$0xff]   ;;  %v3792_v15 = vld [vmem:[%s5390_s1 + $0x174] ss:$8 sps:$4 sm:$0xff]   ;;  %289 = vmatprep.mubr.bf16.mxu0 %v3819_v13  ;;  %v3794_v17 = vld [vmem:[%s5390_s1 + $0x170] ss:$8 sps:$4 sm:$0xff]  }
   0x7   :  { %260 = vmatpush1.bf16.msra.mxu0 %v3776_v3  ;;  %2345 = vmatpush1.bf16.msra.mxu1 %v3776_v3  ;;  %v3824_v16 = vld [vmem:[%s5391_s0 + $0x4c] ss:$8 sps:$4 sm:$0x7f]   ;;  %v3797_v19 = vld [vmem:[%s5390_s1 + $0x180] ss:$8 sps:$4 sm:$0xff]  }
   0x8   :  { %261 = vmatprep.subr.bf16.mxu0 %v3777_v4  ;;  %2346 = vmatprep.subr.bf16.mxu1 %v3777_v4  ;;  %v3795_v18 = vld [vmem:[%s5390_s1 + $0x184] ss:$8 sps:$4 sm:$0xff]   ;;  %v3798_v20 = vld [vmem:[%s5390_s1 + $0x194] ss:$8 sps:$4 sm:$0xff]   ;;  %v3800_v21 = vld [vmem:[%s5390_s1 + $0x190] ss:$8 sps:$4 sm:$0xff]  }
   0x9   :  { %2374 = vmatprep.mubr.bf16.mxu1 %v3824_v16  ;;  %v3801_v22 = vld [vmem:[%s5390_s1 + $0x1a4] ss:$8 sps:$4 sm:$0xff]   ;;  %v3803_v23 = vld [vmem:[%s5390_s1 + $0x1a0] ss:$8 sps:$4 sm:$0xff]   ;;  %v3804_v24 = vld [vmem:[%s5390_s1 + $0x1b4] ss:$8 sps:$4 sm:$0xff]  }
   0xa   :  { %v3806_v25 = vld [vmem:[%s5390_s1 + $0x1b0] ss:$8 sps:$4 sm:$0xff]   ;;  %v3807_v26 = vld [vmem:[%s5390_s1 + $0x1c4] ss:$8 sps:$4 sm:$0xff]   ;;  %v3809_v27 = vld [vmem:[%s5390_s1 + $0x1c0] ss:$8 sps:$4 sm:$0xff]  }
   0xb   :  { %262 = vmatpush1.bf16.msra.mxu0 %v3779_v5  ;;  %2347 = vmatpush1.bf16.msra.mxu1 %v3779_v5  ;;  %v3810_v28 = vld [vmem:[%s5390_s1 + $0x1d4] ss:$8 sps:$4 sm:$0xff]   ;;  %v3812_v29 = vld [vmem:[%s5390_s1 + $0x1d0] ss:$8 sps:$4 sm:$0xff]   ;;  %v3813_v30 = vld [vmem:[%s5390_s1 + $0x1e4] ss:$8 sps:$4 sm:$0xff]  }
   0xc   :  { %263 = vmatprep.subr.bf16.mxu0 %v3780_v6  ;;  %2348 = vmatprep.subr.bf16.mxu1 %v3780_v6  ;;  %v3815_v31 = vld [vmem:[%s5390_s1 + $0x1e0] ss:$8 sps:$4 sm:$0xff]   ;;  %v3816_v32 = vld [vmem:[%s5390_s1 + $0x1f4] ss:$8 sps:$4 sm:$0xff]   ;;  %v3818_v33 = vld [vmem:[%s5390_s1 + $0x1f0] ss:$8 sps:$4 sm:$0xff]  }
   0xd   :  { %v3823_v34 = vld [vmem:[%s5390_s1 + $0x4] ss:$8 sps:$4 sm:$0xff]   ;;  %v3826_v35 = vld [vmem:[%s5391_s0 + $0x30] ss:$8 sps:$4 sm:$0x7f]  }
   0xe   :  { %v3827_v36 = vld [vmem:[%s5391_s0 + $0x48] ss:$8 sps:$4 sm:$0x7f]   ;;  %v3830_v38 = vld [vmem:[%s5390_s1 + $0x14] ss:$8 sps:$4 sm:$0xff]  }
   0xf   :  { %264 = vmatpush1.bf16.msra.mxu0 %v3782_v7  ;;  %2349 = vmatpush1.bf16.msra.mxu1 %v3782_v7  ;;  %v3821_v37 = vld [vmem:[%s5390_s1] ss:$8 sps:$4 sm:$0xff]   ;;  %v4391_v39 = vld [vmem:[%s5391_s0 + $0x4] ss:$8 sps:$4 sm:$0x7f]  }
  0x10   :  { %265 = vmatprep.subr.bf16.mxu0 %v3783_v8  ;;  %2350 = vmatprep.subr.bf16.mxu1 %v3783_v8  ;;  %v4396_v40 = vld [vmem:[%s5391_s0 + $0x1c] ss:$8 sps:$4 sm:$0x7f]   ;;  %v3828_v41 = vld [vmem:[%s5390_s1 + $0x10] ss:$8 sps:$4 sm:$0xff]   ;;  %v556_v5 = vshll.u32 %v4391_v39, 16 }
  0x11   :  { %v3833_v42 = vld [vmem:[%s5390_s1 + $0x24] ss:$8 sps:$4 sm:$0xff]   ;;  %v3831_v43 = vld [vmem:[%s5390_s1 + $0x20] ss:$8 sps:$4 sm:$0xff]   ;;  %v3836_v44 = vld [vmem:[%s5390_s1 + $0x34] ss:$8 sps:$4 sm:$0xff]  }
  0x12   :  { %v3834_v45 = vld [vmem:[%s5390_s1 + $0x30] ss:$8 sps:$4 sm:$0xff]   ;;  %v3839_v46 = vld [vmem:[%s5390_s1 + $0x44] ss:$8 sps:$4 sm:$0xff]   ;;  %v3837_v47 = vld [vmem:[%s5390_s1 + $0x40] ss:$8 sps:$4 sm:$0xff]  }
  0x13   :  { %266 = vmatpush1.bf16.msra.mxu0 %v3785_v9  ;;  %2351 = vmatpush1.bf16.msra.mxu1 %v3785_v9  ;;  %v3842_v48 = vld [vmem:[%s5390_s1 + $0x54] ss:$8 sps:$4 sm:$0xff]   ;;  %v3840_v49 = vld [vmem:[%s5390_s1 + $0x50] ss:$8 sps:$4 sm:$0xff]   ;;  %v3845_v50 = vld [vmem:[%s5390_s1 + $0x64] ss:$8 sps:$4 sm:$0xff]  }
  0x14   :  { %267 = vmatprep.subr.bf16.mxu0 %v3786_v10  ;;  %2352 = vmatprep.subr.bf16.mxu1 %v3786_v10  ;;  %v3843_v51 = vld [vmem:[%s5390_s1 + $0x60] ss:$8 sps:$4 sm:$0xff]   ;;  %v3848_v52 = vld [vmem:[%s5390_s1 + $0x74] ss:$8 sps:$4 sm:$0xff]   ;;  %v3846_v53 = vld [vmem:[%s5390_s1 + $0x70] ss:$8 sps:$4 sm:$0xff]  }
  0x15   :  { %v3851_v54 = vld [vmem:[%s5390_s1 + $0x84] ss:$8 sps:$4 sm:$0xff]   ;;  %v3849_v55 = vld [vmem:[%s5390_s1 + $0x80] ss:$8 sps:$4 sm:$0xff]   ;;  %v3854_v56 = vld [vmem:[%s5390_s1 + $0x94] ss:$8 sps:$4 sm:$0xff]  }
  0x16   :  { %v3852_v57 = vld [vmem:[%s5390_s1 + $0x90] ss:$8 sps:$4 sm:$0xff]   ;;  %v3857_v58 = vld [vmem:[%s5390_s1 + $0xa4] ss:$8 sps:$4 sm:$0xff]   ;;  %v3855_v59 = vld [vmem:[%s5390_s1 + $0xa0] ss:$8 sps:$4 sm:$0xff]  }
  0x17   :  { %268 = vmatpush1.bf16.msra.mxu0 %v3788_v11  ;;  %2353 = vmatpush1.bf16.msra.mxu1 %v3788_v11  ;;  %v3860_v60 = vld [vmem:[%s5390_s1 + $0xb4] ss:$8 sps:$4 sm:$0xff]   ;;  %v3858_v61 = vld [vmem:[%s5390_s1 + $0xb0] ss:$8 sps:$4 sm:$0xff]   ;;  %v3863_v62 = vld [vmem:[%s5390_s1 + $0xc4] ss:$8 sps:$4 sm:$0xff]  }
  0x18   :  { %269 = vmatprep.subr.bf16.mxu0 %v3789_v12  ;;  %2354 = vmatprep.subr.bf16.mxu1 %v3789_v12  ;;  %v3861_v63 = vld [vmem:[%s5390_s1 + $0xc0] ss:$8 sps:$4 sm:$0xff]   ;;  %v3866_v0 = vld [vmem:[%s5390_s1 + $0xd4] ss:$8 sps:$4 sm:$0xff]   ;;  %v3864_v1 = vld [vmem:[%s5390_s1 + $0xd0] ss:$8 sps:$4 sm:$0xff]  }
  0x19   :  { %v3869_v2 = vld [vmem:[%s5390_s1 + $0xe4] ss:$8 sps:$4 sm:$0xff]   ;;  %v3867_v3 = vld [vmem:[%s5390_s1 + $0xe0] ss:$8 sps:$4 sm:$0xff]   ;;  %v3872_v4 = vld [vmem:[%s5390_s1 + $0xf4] ss:$8 sps:$4 sm:$0xff]  }
  0x1a   :  { %v2448_v6 = vshll.u32 %v4396_v40, 16  ;;  %v3870_v7 = vld [vmem:[%s5390_s1 + $0xf0] ss:$8 sps:$4 sm:$0xff]   ;;  %v3878_v8 = vld [vmem:[%s5390_s1 + $0x204] ss:$8 sps:$4 sm:$0xff]   ;;  %v554_v10 = vshrl.u32 %v4391_v39, 16 }
  0x1b   :  { %270 = vmatpush1.bf16.msra.mxu0 %v3791_v14  ;;  %2355 = vmatpush1.bf16.msra.mxu1 %v3791_v14  ;;  %v4495_v9 = vld [vmem:[%s5391_s0] ss:$8 sps:$4 sm:$0x7f]   ;;  %v558_v11 = vrot.slane %v556_v5, 1  ;;  %v2446_v12 = vshrl.u32 %v4396_v40, 16 }
  0x1c   :  { %271 = vmatprep.subr.bf16.mxu0 %v3792_v15  ;;  %2356 = vmatprep.subr.bf16.mxu1 %v3792_v15  ;;  %v2450_v13 = vrot.slane %v2448_v6, 1  ;;  %v4502_v14 = vld [vmem:[%s5391_s0 + $0x18] ss:$8 sps:$4 sm:$0x7f]   ;;  %v3884_v16 = vld [vmem:[%s5390_s1 + $0x214] ss:$8 sps:$4 sm:$0xff]  }
  0x1d   :  { %v3876_v15 = vld [vmem:[%s5390_s1 + $0x200] ss:$8 sps:$4 sm:$0xff]   ;;  %v3930_v5 = vld [vmem:[%s5390_s1 + $0x310] ss:$8 sps:$4 sm:$0xff]   ;;  %v3935_v6 = vld [vmem:[%s5390_s1 + $0x324] ss:$8 sps:$4 sm:$0xff]  }
  0x1e   :  { %vm3085_vm13 = vsmask.f32 6400 }
  0x1f   :  { %272 = vmatpush1.bf16.msra.mxu0 %v3794_v17  ;;  %2357 = vmatpush1.bf16.msra.mxu1 %v3794_v17  ;;  %v559_v17 = vor.u32 %v558_v11, %v554_v10  ;;  %v3941_v10 = vld [vmem:[%s5390_s1 + $0x344] ss:$8 sps:$4 sm:$0xff]   ;;  %v3939_v11 = vld [vmem:[%s5390_s1 + $0x340] ss:$8 sps:$4 sm:$0xff]   ;;  %vm5364_vm15 = vmand %vm3084_vm12, %vm3085_vm13 }
  0x20   :  { %273 = vmatprep.subr.bf16.mxu0 %v3795_v18  ;;  %2358 = vmatprep.subr.bf16.mxu1 %v3795_v18  ;;  %v2451_v18 = vor.u32 %v2450_v13, %v2446_v12  ;;  %v3944_v12 = vld [vmem:[%s5390_s1 + $0x354] ss:$8 sps:$4 sm:$0xff]   ;;  %v3942_v13 = vld [vmem:[%s5390_s1 + $0x350] ss:$8 sps:$4 sm:$0xff]  }
  0x23   :  { %274 = vmatpush1.bf16.msra.mxu0 %v3797_v19  ;;  %2359 = vmatpush1.bf16.msra.mxu1 %v3797_v19  ;;  %v3882_v19 = vld [vmem:[%s5390_s1 + $0x210] ss:$8 sps:$4 sm:$0xff]  }
  0x24   :  { %275 = vmatprep.subr.bf16.mxu0 %v3798_v20  ;;  %2360 = vmatprep.subr.bf16.mxu1 %v3798_v20  ;;  %v3887_v20 = vld [vmem:[%s5390_s1 + $0x224] ss:$8 sps:$4 sm:$0xff]  }
  0x27   :  { %276 = vmatpush1.bf16.msra.mxu0 %v3800_v21  ;;  %2361 = vmatpush1.bf16.msra.mxu1 %v3800_v21  ;;  %v3885_v21 = vld [vmem:[%s5390_s1 + $0x220] ss:$8 sps:$4 sm:$0xff]  }
  0x28   :  { %277 = vmatprep.subr.bf16.mxu0 %v3801_v22  ;;  %2362 = vmatprep.subr.bf16.mxu1 %v3801_v22  ;;  %v3890_v22 = vld [vmem:[%s5390_s1 + $0x234] ss:$8 sps:$4 sm:$0xff]  }
  0x2b   :  { %278 = vmatpush1.bf16.msra.mxu0 %v3803_v23  ;;  %2363 = vmatpush1.bf16.msra.mxu1 %v3803_v23  ;;  %v3888_v23 = vld [vmem:[%s5390_s1 + $0x230] ss:$8 sps:$4 sm:$0xff]  }
  0x2c   :  { %279 = vmatprep.subr.bf16.mxu0 %v3804_v24  ;;  %2364 = vmatprep.subr.bf16.mxu1 %v3804_v24  ;;  %v3893_v24 = vld [vmem:[%s5390_s1 + $0x244] ss:$8 sps:$4 sm:$0xff]  }
  0x2f   :  { %280 = vmatpush1.bf16.msra.mxu0 %v3806_v25  ;;  %2365 = vmatpush1.bf16.msra.mxu1 %v3806_v25  ;;  %v3891_v25 = vld [vmem:[%s5390_s1 + $0x240] ss:$8 sps:$4 sm:$0xff]  }
  0x30   :  { %281 = vmatprep.subr.bf16.mxu0 %v3807_v26  ;;  %2366 = vmatprep.subr.bf16.mxu1 %v3807_v26  ;;  %v3896_v26 = vld [vmem:[%s5390_s1 + $0x254] ss:$8 sps:$4 sm:$0xff]  }
  0x33   :  { %282 = vmatpush1.bf16.msra.mxu0 %v3809_v27  ;;  %2367 = vmatpush1.bf16.msra.mxu1 %v3809_v27  ;;  %v3894_v27 = vld [vmem:[%s5390_s1 + $0x250] ss:$8 sps:$4 sm:$0xff]  }
  0x34   :  { %283 = vmatprep.subr.bf16.mxu0 %v3810_v28  ;;  %2368 = vmatprep.subr.bf16.mxu1 %v3810_v28  ;;  %v3899_v28 = vld [vmem:[%s5390_s1 + $0x264] ss:$8 sps:$4 sm:$0xff]  }
  0x37   :  { %284 = vmatpush1.bf16.msra.mxu0 %v3812_v29  ;;  %2369 = vmatpush1.bf16.msra.mxu1 %v3812_v29  ;;  %v3897_v29 = vld [vmem:[%s5390_s1 + $0x260] ss:$8 sps:$4 sm:$0xff]  }
  0x38   :  { %285 = vmatprep.subr.bf16.mxu0 %v3813_v30  ;;  %2370 = vmatprep.subr.bf16.mxu1 %v3813_v30  ;;  %v3902_v30 = vld [vmem:[%s5390_s1 + $0x274] ss:$8 sps:$4 sm:$0xff]  }
  0x3b   :  { %286 = vmatpush1.bf16.msra.mxu0 %v3815_v31  ;;  %2371 = vmatpush1.bf16.msra.mxu1 %v3815_v31  ;;  %v3900_v31 = vld [vmem:[%s5390_s1 + $0x270] ss:$8 sps:$4 sm:$0xff]  }
  0x3c   :  { %287 = vmatprep.subr.bf16.mxu0 %v3816_v32  ;;  %2372 = vmatprep.subr.bf16.mxu1 %v3816_v32  ;;  %v3905_v32 = vld [vmem:[%s5390_s1 + $0x284] ss:$8 sps:$4 sm:$0xff]  }
  0x3f   :  { %288 = vmatpush1.bf16.msra.mxu0 %v3818_v33  ;;  %2373 = vmatpush1.bf16.msra.mxu1 %v3818_v33  ;;  %v3903_v33 = vld [vmem:[%s5390_s1 + $0x280] ss:$8 sps:$4 sm:$0xff]  }
  0x40   :  { %470 = vmatprep.subr.bf16.mxu0 %v3823_v34  ;;  %2395 = vmatprep.subr.bf16.mxu1 %v3823_v34  ;;  %v3908_v34 = vld [vmem:[%s5390_s1 + $0x294] ss:$8 sps:$4 sm:$0xff]  }
  0x42   :  { %290 = vmatmul.mubr.bf16.vlgmr.msra.gmra.mrb[0].mxu0 %v3826_v35  ;;  %2375 = vmatmul.mubr.bf16.vlgmr.msra.gmra.mrb[0].mxu1 %v3827_v36  ;;  %v3906_v35 = vld [vmem:[%s5390_s1 + $0x290] ss:$8 sps:$4 sm:$0xff]   ;;  %v3911_v36 = vld [vmem:[%s5390_s1 + $0x2a4] ss:$8 sps:$4 sm:$0xff]  }
  0x43   :  { %471 = vmatpush1.bf16.msra.mxu0 %v3821_v37  ;;  %2396 = vmatpush1.bf16.msra.mxu1 %v3821_v37  ;;  %v3909_v37 = vld [vmem:[%s5390_s1 + $0x2a0] ss:$8 sps:$4 sm:$0xff]  }
  0x44   :  { %472 = vmatprep.subr.bf16.mxu0 %v3830_v38  ;;  %2397 = vmatprep.subr.bf16.mxu1 %v3830_v38  ;;  %v3914_v38 = vld [vmem:[%s5390_s1 + $0x2b4] ss:$8 sps:$4 sm:$0xff]  }
  0x45   :  { %502 = vmatprep.mubr.bf16.mxu0 %v4391_v39  ;;  %2427 = vmatprep.mubr.bf16.mxu1 %v4396_v40  ;;  %v3912_v39 = vld [vmem:[%s5390_s1 + $0x2b0] ss:$8 sps:$4 sm:$0xff]   ;;  %v3917_v40 = vld [vmem:[%s5390_s1 + $0x2c4] ss:$8 sps:$4 sm:$0xff]  }
  0x47   :  { %473 = vmatpush1.bf16.msra.mxu0 %v3828_v41  ;;  %2398 = vmatpush1.bf16.msra.mxu1 %v3828_v41  ;;  %v3915_v41 = vld [vmem:[%s5390_s1 + $0x2c0] ss:$8 sps:$4 sm:$0xff]  }
  0x48   :  { %474 = vmatprep.subr.bf16.mxu0 %v3833_v42  ;;  %2399 = vmatprep.subr.bf16.mxu1 %v3833_v42  ;;  %v3920_v42 = vld [vmem:[%s5390_s1 + $0x2d4] ss:$8 sps:$4 sm:$0xff]  }
  0x4b   :  { %475 = vmatpush1.bf16.msra.mxu0 %v3831_v43  ;;  %2400 = vmatpush1.bf16.msra.mxu1 %v3831_v43  ;;  %v3918_v43 = vld [vmem:[%s5390_s1 + $0x2d0] ss:$8 sps:$4 sm:$0xff]  }
  0x4c   :  { %476 = vmatprep.subr.bf16.mxu0 %v3836_v44  ;;  %2401 = vmatprep.subr.bf16.mxu1 %v3836_v44  ;;  %v3923_v44 = vld [vmem:[%s5390_s1 + $0x2e4] ss:$8 sps:$4 sm:$0xff]  }
  0x4f   :  { %477 = vmatpush1.bf16.msra.mxu0 %v3834_v45  ;;  %2402 = vmatpush1.bf16.msra.mxu1 %v3834_v45  ;;  %v549_v45 = vshll.u32 %v4495_v9, 16 }
  0x50   :  { %478 = vmatprep.subr.bf16.mxu0 %v3839_v46  ;;  %2403 = vmatprep.subr.bf16.mxu1 %v3839_v46  ;;  %v2441_v46 = vshll.u32 %v4502_v14, 16 }
  0x53   :  { %479 = vmatpush1.bf16.msra.mxu0 %v3837_v47  ;;  %2404 = vmatpush1.bf16.msra.mxu1 %v3837_v47  ;;  %v3921_v47 = vld [vmem:[%s5390_s1 + $0x2e0] ss:$8 sps:$4 sm:$0xff]  }
  0x54   :  { %480 = vmatprep.subr.bf16.mxu0 %v3842_v48  ;;  %2405 = vmatprep.subr.bf16.mxu1 %v3842_v48  ;;  %v3926_v48 = vld [vmem:[%s5390_s1 + $0x2f4] ss:$8 sps:$4 sm:$0xff]  }
  0x57   :  { %481 = vmatpush1.bf16.msra.mxu0 %v3840_v49  ;;  %2406 = vmatpush1.bf16.msra.mxu1 %v3840_v49  ;;  %v4241_v49 = vld [vmem:[%s5391_s0 + $0x34] ss:$8 sps:$4 sm:$0x7f]  }
  0x58   :  { %482 = vmatprep.subr.bf16.mxu0 %v3845_v50  ;;  %2407 = vmatprep.subr.bf16.mxu1 %v3845_v50  ;;  %v812_v50 = vshll.u32 %v4241_v49, 16 }
  0x5b   :  { %483 = vmatpush1.bf16.msra.mxu0 %v3843_v51  ;;  %2408 = vmatpush1.bf16.msra.mxu1 %v3843_v51  ;;  %v4242_v51 = vld [vmem:[%s5391_s0 + $0x4c] ss:$8 sps:$4 sm:$0x7f]  }
  0x5c   :  { %484 = vmatprep.subr.bf16.mxu0 %v3848_v52  ;;  %2409 = vmatprep.subr.bf16.mxu1 %v3848_v52  ;;  %v2511_v52 = vshll.u32 %v4242_v51, 16 }
  0x5f   :  { %485 = vmatpush1.bf16.msra.mxu0 %v3846_v53  ;;  %2410 = vmatpush1.bf16.msra.mxu1 %v3846_v53  ;;  %v547_v53 = vshrl.u32 %v4495_v9, 16 }
  0x60   :  { %486 = vmatprep.subr.bf16.mxu0 %v3851_v54  ;;  %2411 = vmatprep.subr.bf16.mxu1 %v3851_v54  ;;  %v551_v54 = vrot.slane %v549_v45, 1 }
  0x63   :  { %487 = vmatpush1.bf16.msra.mxu0 %v3849_v55  ;;  %2412 = vmatpush1.bf16.msra.mxu1 %v3849_v55  ;;  %v2439_v55 = vshrl.u32 %v4502_v14, 16 }
  0x64   :  { %488 = vmatprep.subr.bf16.mxu0 %v3854_v56  ;;  %2413 = vmatprep.subr.bf16.mxu1 %v3854_v56  ;;  %v2443_v56 = vrot.slane %v2441_v46, 1 }
  0x67   :  { %489 = vmatpush1.bf16.msra.mxu0 %v3852_v57  ;;  %2414 = vmatpush1.bf16.msra.mxu1 %v3852_v57  ;;  %v3924_v57 = vld [vmem:[%s5390_s1 + $0x2f0] ss:$8 sps:$4 sm:$0xff]  }
  0x68   :  { %490 = vmatprep.subr.bf16.mxu0 %v3857_v58  ;;  %2415 = vmatprep.subr.bf16.mxu1 %v3857_v58  ;;  %v3929_v58 = vld [vmem:[%s5390_s1 + $0x304] ss:$8 sps:$4 sm:$0xff]  }
  0x6b   :  { %491 = vmatpush1.bf16.msra.mxu0 %v3855_v59  ;;  %2416 = vmatpush1.bf16.msra.mxu1 %v3855_v59  ;;  %v810_v59 = vshrl.u32 %v4241_v49, 16 }
  0x6c   :  { %492 = vmatprep.subr.bf16.mxu0 %v3860_v60  ;;  %2417 = vmatprep.subr.bf16.mxu1 %v3860_v60  ;;  %v814_v60 = vrot.slane %v812_v50, 1 }
  0x6f   :  { %493 = vmatpush1.bf16.msra.mxu0 %v3858_v61  ;;  %2418 = vmatpush1.bf16.msra.mxu1 %v3858_v61  ;;  %v2509_v61 = vshrl.u32 %v4242_v51, 16  ;;  %v3978_v51 = vld [vmem:[%s5390_s1 + $0x410] ss:$8 sps:$4 sm:$0xff]  }
  0x70   :  { %494 = vmatprep.subr.bf16.mxu0 %v3863_v62  ;;  %2419 = vmatprep.subr.bf16.mxu1 %v3863_v62  ;;  %v2513_v62 = vrot.slane %v2511_v52, 1  ;;  %v3983_v52 = vld [vmem:[%s5390_s1 + $0x424] ss:$8 sps:$4 sm:$0xff]  }
  0x73   :  { %495 = vmatpush1.bf16.msra.mxu0 %v3861_v63  ;;  %2420 = vmatpush1.bf16.msra.mxu1 %v3861_v63  ;;  %v552_v63 = vor.u32 %v551_v54, %v547_v53  ;;  %v3981_v53 = vld [vmem:[%s5390_s1 + $0x420] ss:$8 sps:$4 sm:$0xff]   ;;  %v3986_v54 = vld [vmem:[%s5390_s1 + $0x434] ss:$8 sps:$4 sm:$0xff]  }
  0x74   :  { %496 = vmatprep.subr.bf16.mxu0 %v3866_v0  ;;  %2421 = vmatprep.subr.bf16.mxu1 %v3866_v0  ;;  %v2444_v0 = vor.u32 %v2443_v56, %v2439_v55  ;;  %v3984_v55 = vld [vmem:[%s5390_s1 + $0x430] ss:$8 sps:$4 sm:$0xff]   ;;  %v3989_v56 = vld [vmem:[%s5390_s1 + $0x444] ss:$8 sps:$4 sm:$0xff]  }
  0x77   :  { %497 = vmatpush1.bf16.msra.mxu0 %v3864_v1  ;;  %2422 = vmatpush1.bf16.msra.mxu1 %v3864_v1  ;;  %v3927_v1 = vld [vmem:[%s5390_s1 + $0x300] ss:$8 sps:$4 sm:$0xff]  }
  0x78   :  { %498 = vmatprep.subr.bf16.mxu0 %v3869_v2  ;;  %2423 = vmatprep.subr.bf16.mxu1 %v3869_v2  ;;  %v3932_v2 = vld [vmem:[%s5390_s1 + $0x314] ss:$8 sps:$4 sm:$0xff]  }
  0x7b   :  { %499 = vmatpush1.bf16.msra.mxu0 %v3867_v3  ;;  %2424 = vmatpush1.bf16.msra.mxu1 %v3867_v3  ;;  %v815_v3 = vor.u32 %v814_v60, %v810_v59  ;;  %v3990_v59 = vld [vmem:[%s5390_s1 + $0x450] ss:$8 sps:$4 sm:$0xff]   ;;  %v3995_v60 = vld [vmem:[%s5390_s1 + $0x464] ss:$8 sps:$4 sm:$0xff]  }
  0x7c   :  { %500 = vmatprep.subr.bf16.mxu0 %v3872_v4  ;;  %2425 = vmatprep.subr.bf16.mxu1 %v3872_v4  ;;  %v2514_v4 = vor.u32 %v2513_v62, %v2509_v61  ;;  %v3993_v61 = vld [vmem:[%s5390_s1 + $0x460] ss:$8 sps:$4 sm:$0xff]   ;;  %v3998_v62 = vld [vmem:[%s5390_s1 + $0x474] ss:$8 sps:$4 sm:$0xff]  }
  0x7f   :  { %501 = vmatpush1.bf16.msra.mxu0 %v3870_v7  ;;  %2426 = vmatpush1.bf16.msra.mxu1 %v3870_v7  ;;  %v3933_v7 = vld [vmem:[%s5390_s1 + $0x320] ss:$8 sps:$4 sm:$0xff]  }
  0x80   :  { %722 = vmatprep.subr.bf16.mxu0 %v3878_v8  ;;  %2454 = vmatprep.subr.bf16.mxu1 %v3878_v8  ;;  %v3938_v8 = vld [vmem:[%s5390_s1 + $0x334] ss:$8 sps:$4 sm:$0xff]  }
  0x82   :  { %503 = vmatmul.mubr.bf16.vlgmr.msra.gmra.mrb[0].mxu0 %v4495_v9  ;;  %2428 = vmatmul.mubr.bf16.vlgmr.msra.gmra.mrb[0].mxu1 %v4502_v14  ;;  %v3936_v9 = vld [vmem:[%s5390_s1 + $0x330] ss:$8 sps:$4 sm:$0xff]   ;;  %v3947_v14 = vld [vmem:[%s5390_s1 + $0x364] ss:$8 sps:$4 sm:$0xff]  }
  0x83   :  { %723 = vmatpush1.bf16.msra.mxu0 %v3876_v15  ;;  %2455 = vmatpush1.bf16.msra.mxu1 %v3876_v15  ;;  %v3945_v15 = vld [vmem:[%s5390_s1 + $0x360] ss:$8 sps:$4 sm:$0xff]  }
  0x84   :  { %724 = vmatprep.subr.bf16.mxu0 %v3884_v16  ;;  %2456 = vmatprep.subr.bf16.mxu1 %v3884_v16  ;;  %v3950_v16 = vld [vmem:[%s5390_s1 + $0x374] ss:$8 sps:$4 sm:$0xff]  }
  0x85   :  { %754 = vmatprep.mubr.bf16.mxu0 %v559_v17  ;;  %2486 = vmatprep.mubr.bf16.mxu1 %v2451_v18  ;;  %v3948_v17 = vld [vmem:[%s5390_s1 + $0x370] ss:$8 sps:$4 sm:$0xff]   ;;  %v3953_v18 = vld [vmem:[%s5390_s1 + $0x384] ss:$8 sps:$4 sm:$0xff]  }
  0x87   :  { %725 = vmatpush1.bf16.msra.mxu0 %v3882_v19  ;;  %2457 = vmatpush1.bf16.msra.mxu1 %v3882_v19  ;;  %v3951_v19 = vld [vmem:[%s5390_s1 + $0x380] ss:$8 sps:$4 sm:$0xff]  }
  0x88   :  { %726 = vmatprep.subr.bf16.mxu0 %v3887_v20  ;;  %2458 = vmatprep.subr.bf16.mxu1 %v3887_v20  ;;  %v3956_v20 = vld [vmem:[%s5390_s1 + $0x394] ss:$8 sps:$4 sm:$0xff]  }
  0x8b   :  { %727 = vmatpush1.bf16.msra.mxu0 %v3885_v21  ;;  %2459 = vmatpush1.bf16.msra.mxu1 %v3885_v21  ;;  %v3954_v21 = vld [vmem:[%s5390_s1 + $0x390] ss:$8 sps:$4 sm:$0xff]  }
  0x8c   :  { %728 = vmatprep.subr.bf16.mxu0 %v3890_v22  ;;  %2460 = vmatprep.subr.bf16.mxu1 %v3890_v22  ;;  %v3959_v22 = vld [vmem:[%s5390_s1 + $0x3a4] ss:$8 sps:$4 sm:$0xff]  }
  0x8f   :  { %729 = vmatpush1.bf16.msra.mxu0 %v3888_v23  ;;  %2461 = vmatpush1.bf16.msra.mxu1 %v3888_v23  ;;  %v3957_v23 = vld [vmem:[%s5390_s1 + $0x3a0] ss:$8 sps:$4 sm:$0xff]  }
  0x90   :  { %730 = vmatprep.subr.bf16.mxu0 %v3893_v24  ;;  %2462 = vmatprep.subr.bf16.mxu1 %v3893_v24  ;;  %v3962_v24 = vld [vmem:[%s5390_s1 + $0x3b4] ss:$8 sps:$4 sm:$0xff]  }
  0x93   :  { %731 = vmatpush1.bf16.msra.mxu0 %v3891_v25  ;;  %2463 = vmatpush1.bf16.msra.mxu1 %v3891_v25  ;;  %v3960_v25 = vld [vmem:[%s5390_s1 + $0x3b0] ss:$8 sps:$4 sm:$0xff]  }
  0x94   :  { %732 = vmatprep.subr.bf16.mxu0 %v3896_v26  ;;  %2464 = vmatprep.subr.bf16.mxu1 %v3896_v26  ;;  %v3965_v26 = vld [vmem:[%s5390_s1 + $0x3c4] ss:$8 sps:$4 sm:$0xff]  }
  0x97   :  { %733 = vmatpush1.bf16.msra.mxu0 %v3894_v27  ;;  %2465 = vmatpush1.bf16.msra.mxu1 %v3894_v27  ;;  %v3963_v27 = vld [vmem:[%s5390_s1 + $0x3c0] ss:$8 sps:$4 sm:$0xff]  }
  0x98   :  { %734 = vmatprep.subr.bf16.mxu0 %v3899_v28  ;;  %2466 = vmatprep.subr.bf16.mxu1 %v3899_v28  ;;  %v3968_v28 = vld [vmem:[%s5390_s1 + $0x3d4] ss:$8 sps:$4 sm:$0xff]  }
  0x9b   :  { %735 = vmatpush1.bf16.msra.mxu0 %v3897_v29  ;;  %2467 = vmatpush1.bf16.msra.mxu1 %v3897_v29  ;;  %v3966_v29 = vld [vmem:[%s5390_s1 + $0x3d0] ss:$8 sps:$4 sm:$0xff]  }
  0x9c   :  { %736 = vmatprep.subr.bf16.mxu0 %v3902_v30  ;;  %2468 = vmatprep.subr.bf16.mxu1 %v3902_v30  ;;  %v3971_v30 = vld [vmem:[%s5390_s1 + $0x3e4] ss:$8 sps:$4 sm:$0xff]  }
  0x9f   :  { %737 = vmatpush1.bf16.msra.mxu0 %v3900_v31  ;;  %2469 = vmatpush1.bf16.msra.mxu1 %v3900_v31  ;;  %v4243_v31 = vld [vmem:[%s5391_s0 + $0x30] ss:$8 sps:$4 sm:$0x7f]  }
  0xa0   :  { %738 = vmatprep.subr.bf16.mxu0 %v3905_v32  ;;  %2470 = vmatprep.subr.bf16.mxu1 %v3905_v32  ;;  %v805_v32 = vshll.u32 %v4243_v31, 16 }
  0xa3   :  { %739 = vmatpush1.bf16.msra.mxu0 %v3903_v33  ;;  %2471 = vmatpush1.bf16.msra.mxu1 %v3903_v33  ;;  %v4244_v33 = vld [vmem:[%s5391_s0 + $0x48] ss:$8 sps:$4 sm:$0x7f]  }
  0xa4   :  { %740 = vmatprep.subr.bf16.mxu0 %v3908_v34  ;;  %2472 = vmatprep.subr.bf16.mxu1 %v3908_v34  ;;  %v2504_v34 = vshll.u32 %v4244_v33, 16 }
  0xa7   :  { %741 = vmatpush1.bf16.msra.mxu0 %v3906_v35  ;;  %2473 = vmatpush1.bf16.msra.mxu1 %v3906_v35  ;;  %v3969_v35 = vld [vmem:[%s5390_s1 + $0x3e0] ss:$8 sps:$4 sm:$0xff]  }
  0xa8   :  { %742 = vmatprep.subr.bf16.mxu0 %v3911_v36  ;;  %2474 = vmatprep.subr.bf16.mxu1 %v3911_v36  ;;  %v3974_v36 = vld [vmem:[%s5390_s1 + $0x3f4] ss:$8 sps:$4 sm:$0xff]  }
  0xab   :  { %743 = vmatpush1.bf16.msra.mxu0 %v3909_v37  ;;  %2475 = vmatpush1.bf16.msra.mxu1 %v3909_v37  ;;  %v803_v37 = vshrl.u32 %v4243_v31, 16  ;;  %v4038_v31 = vld [vmem:[%s5390_s1 + $0x530] ss:$8 sps:$4 sm:$0xff]  }
  0xac   :  { %744 = vmatprep.subr.bf16.mxu0 %v3914_v38  ;;  %2476 = vmatprep.subr.bf16.mxu1 %v3914_v38  ;;  %v807_v38 = vrot.slane %v805_v32, 1  ;;  %v4043_v32 = vld [vmem:[%s5390_s1 + $0x544] ss:$8 sps:$4 sm:$0xff]  }
  0xae   :  { %v808_v45 = vor.u32 %v807_v38, %v803_v37  ;;  %v4047_v37 = vld [vmem:[%s5390_s1 + $0x560] ss:$8 sps:$4 sm:$0xff]   ;;  %v4052_v38 = vld [vmem:[%s5390_s1 + $0x574] ss:$8 sps:$4 sm:$0xff]  }
  0xaf   :  { %745 = vmatpush1.bf16.msra.mxu0 %v3912_v39  ;;  %2477 = vmatpush1.bf16.msra.mxu1 %v3912_v39  ;;  %v2502_v39 = vshrl.u32 %v4244_v33, 16  ;;  %v4041_v33 = vld [vmem:[%s5390_s1 + $0x540] ss:$8 sps:$4 sm:$0xff]  }
  0xb0   :  { %746 = vmatprep.subr.bf16.mxu0 %v3917_v40  ;;  %2478 = vmatprep.subr.bf16.mxu1 %v3917_v40  ;;  %v2506_v40 = vrot.slane %v2504_v34, 1  ;;  %v4046_v34 = vld [vmem:[%s5390_s1 + $0x554] ss:$8 sps:$4 sm:$0xff]  }
  0xb2   :  { %v2507_v46 = vor.u32 %v2506_v40, %v2502_v39  ;;  %v4050_v39 = vld [vmem:[%s5390_s1 + $0x570] ss:$8 sps:$4 sm:$0xff]   ;;  %v4055_v40 = vld [vmem:[%s5390_s1 + $0x584] ss:$8 sps:$4 sm:$0xff]  }
  0xb3   :  { %747 = vmatpush1.bf16.msra.mxu0 %v3915_v41  ;;  %2479 = vmatpush1.bf16.msra.mxu1 %v3915_v41  ;;  %v3972_v41 = vld [vmem:[%s5390_s1 + $0x3f0] ss:$8 sps:$4 sm:$0xff]  }
  0xb4   :  { %748 = vmatprep.subr.bf16.mxu0 %v3920_v42  ;;  %2480 = vmatprep.subr.bf16.mxu1 %v3920_v42  ;;  %v3977_v42 = vld [vmem:[%s5390_s1 + $0x404] ss:$8 sps:$4 sm:$0xff]  }
  0xb7   :  { %749 = vmatpush1.bf16.msra.mxu0 %v3918_v43  ;;  %2481 = vmatpush1.bf16.msra.mxu1 %v3918_v43  ;;  %v4717_v43 = vld [vmem:[%s5391_s0 + $0x4] ss:$8 sps:$4 sm:$0xfe]  }
  0xb8   :  { %750 = vmatprep.subr.bf16.mxu0 %v3923_v44  ;;  %2482 = vmatprep.subr.bf16.mxu1 %v3923_v44  ;;  %v4722_v44 = vld [vmem:[%s5391_s0 + $0x1c] ss:$8 sps:$4 sm:$0xfe]   ;;  %v1069_v49 = vrot.slane %v4717_v43, 1 }
  0xb9   :  { %v2575_v50 = vrot.slane %v4722_v44, 1 }
  0xbb   :  { %751 = vmatpush1.bf16.msra.mxu0 %v3921_v47  ;;  %2483 = vmatpush1.bf16.msra.mxu1 %v3921_v47  ;;  %v3975_v47 = vld [vmem:[%s5390_s1 + $0x400] ss:$8 sps:$4 sm:$0xff]  }
  0xbc   :  { %752 = vmatprep.subr.bf16.mxu0 %v3926_v48  ;;  %2484 = vmatprep.subr.bf16.mxu1 %v3926_v48  ;;  %v3980_v48 = vld [vmem:[%s5390_s1 + $0x414] ss:$8 sps:$4 sm:$0xff]  }
  0xbf   :  { %753 = vmatpush1.bf16.msra.mxu0 %v3924_v57  ;;  %2485 = vmatpush1.bf16.msra.mxu1 %v3924_v57  ;;  %v3987_v57 = vld [vmem:[%s5390_s1 + $0x440] ss:$8 sps:$4 sm:$0xff]  }
  0xc0   :  { %978 = vmatprep.subr.bf16.mxu0 %v3929_v58  ;;  %2517 = vmatprep.subr.bf16.mxu1 %v3929_v58  ;;  %v3992_v58 = vld [vmem:[%s5390_s1 + $0x454] ss:$8 sps:$4 sm:$0xff]  }
  0xc2   :  { %755 = vmatmul.mubr.bf16.vlgmr.msra.gmra.mrb[0].mxu0 %v552_v63  ;;  %2487 = vmatmul.mubr.bf16.vlgmr.msra.gmra.mrb[0].mxu1 %v2444_v0  ;;  %v3996_v63 = vld [vmem:[%s5390_s1 + $0x470] ss:$8 sps:$4 sm:$0xff]   ;;  %v4001_v0 = vld [vmem:[%s5390_s1 + $0x484] ss:$8 sps:$4 sm:$0xff]  }
  0xc3   :  { %979 = vmatpush1.bf16.msra.mxu0 %v3927_v1  ;;  %2518 = vmatpush1.bf16.msra.mxu1 %v3927_v1  ;;  %v3999_v1 = vld [vmem:[%s5390_s1 + $0x480] ss:$8 sps:$4 sm:$0xff]  }
  0xc4   :  { %980 = vmatprep.subr.bf16.mxu0 %v3932_v2  ;;  %2519 = vmatprep.subr.bf16.mxu1 %v3932_v2  ;;  %v4004_v2 = vld [vmem:[%s5390_s1 + $0x494] ss:$8 sps:$4 sm:$0xff]  }
  0xc5   :  { %1010 = vmatprep.mubr.bf16.mxu0 %v815_v3  ;;  %2549 = vmatprep.mubr.bf16.mxu1 %v2514_v4  ;;  %v4002_v3 = vld [vmem:[%s5390_s1 + $0x490] ss:$8 sps:$4 sm:$0xff]   ;;  %v4007_v4 = vld [vmem:[%s5390_s1 + $0x4a4] ss:$8 sps:$4 sm:$0xff]  }
  0xc7   :  { %981 = vmatpush1.bf16.msra.mxu0 %v3930_v5  ;;  %2520 = vmatpush1.bf16.msra.mxu1 %v3930_v5  ;;  %v4005_v5 = vld [vmem:[%s5390_s1 + $0x4a0] ss:$8 sps:$4 sm:$0xff]  }
  0xc8   :  { %982 = vmatprep.subr.bf16.mxu0 %v3935_v6  ;;  %2521 = vmatprep.subr.bf16.mxu1 %v3935_v6  ;;  %v4010_v6 = vld [vmem:[%s5390_s1 + $0x4b4] ss:$8 sps:$4 sm:$0xff]  }
  0xcb   :  { %983 = vmatpush1.bf16.msra.mxu0 %v3933_v7  ;;  %2522 = vmatpush1.bf16.msra.mxu1 %v3933_v7  ;;  %v4008_v7 = vld [vmem:[%s5390_s1 + $0x4b0] ss:$8 sps:$4 sm:$0xff]  }
  0xcc   :  { %984 = vmatprep.subr.bf16.mxu0 %v3938_v8  ;;  %2523 = vmatprep.subr.bf16.mxu1 %v3938_v8  ;;  %v4013_v8 = vld [vmem:[%s5390_s1 + $0x4c4] ss:$8 sps:$4 sm:$0xff]  }
  0xcf   :  { %985 = vmatpush1.bf16.msra.mxu0 %v3936_v9  ;;  %2524 = vmatpush1.bf16.msra.mxu1 %v3936_v9  ;;  %v4011_v9 = vld [vmem:[%s5390_s1 + $0x4c0] ss:$8 sps:$4 sm:$0xff]  }
  0xd0   :  { %986 = vmatprep.subr.bf16.mxu0 %v3941_v10  ;;  %2525 = vmatprep.subr.bf16.mxu1 %v3941_v10  ;;  %v4016_v10 = vld [vmem:[%s5390_s1 + $0x4d4] ss:$8 sps:$4 sm:$0xff]  }
  0xd3   :  { %987 = vmatpush1.bf16.msra.mxu0 %v3939_v11  ;;  %2526 = vmatpush1.bf16.msra.mxu1 %v3939_v11  ;;  %v4014_v11 = vld [vmem:[%s5390_s1 + $0x4d0] ss:$8 sps:$4 sm:$0xff]  }
  0xd4   :  { %988 = vmatprep.subr.bf16.mxu0 %v3944_v12  ;;  %2527 = vmatprep.subr.bf16.mxu1 %v3944_v12  ;;  %v4019_v12 = vld [vmem:[%s5390_s1 + $0x4e4] ss:$8 sps:$4 sm:$0xff]  }
  0xd7   :  { %989 = vmatpush1.bf16.msra.mxu0 %v3942_v13  ;;  %2528 = vmatpush1.bf16.msra.mxu1 %v3942_v13  ;;  %v4017_v13 = vld [vmem:[%s5390_s1 + $0x4e0] ss:$8 sps:$4 sm:$0xff]  }
  0xd8   :  { %990 = vmatprep.subr.bf16.mxu0 %v3947_v14  ;;  %2529 = vmatprep.subr.bf16.mxu1 %v3947_v14  ;;  %v4022_v14 = vld [vmem:[%s5390_s1 + $0x4f4] ss:$8 sps:$4 sm:$0xff]  }
  0xdb   :  { %991 = vmatpush1.bf16.msra.mxu0 %v3945_v15  ;;  %2530 = vmatpush1.bf16.msra.mxu1 %v3945_v15  ;;  %v4819_v15 = vld [vmem:[%s5391_s0] ss:$8 sps:$4 sm:$0xfe]  }
  0xdc   :  { %992 = vmatprep.subr.bf16.mxu0 %v3950_v16  ;;  %2531 = vmatprep.subr.bf16.mxu1 %v3950_v16  ;;  %v4824_v16 = vld [vmem:[%s5391_s0 + $0x18] ss:$8 sps:$4 sm:$0xfe]  }
  0xdf   :  { %993 = vmatpush1.bf16.msra.mxu0 %v3948_v17  ;;  %2532 = vmatpush1.bf16.msra.mxu1 %v3948_v17  ;;  %v4020_v17 = vld [vmem:[%s5390_s1 + $0x4f0] ss:$8 sps:$4 sm:$0xff]  }
  0xe0   :  { %994 = vmatprep.subr.bf16.mxu0 %v3953_v18  ;;  %2533 = vmatprep.subr.bf16.mxu1 %v3953_v18  ;;  %v4028_v18 = vld [vmem:[%s5390_s1 + $0x504] ss:$8 sps:$4 sm:$0xff]  }
  0xe3   :  { %995 = vmatpush1.bf16.msra.mxu0 %v3951_v19  ;;  %2534 = vmatpush1.bf16.msra.mxu1 %v3951_v19  ;;  %v4835_v19 = vld [vmem:[%s5391_s0 + $0x34] ss:$8 sps:$4 sm:$0xfe]  }
  0xe4   :  { %996 = vmatprep.subr.bf16.mxu0 %v3956_v20  ;;  %2535 = vmatprep.subr.bf16.mxu1 %v3956_v20  ;;  %v4840_v20 = vld [vmem:[%s5391_s0 + $0x4c] ss:$8 sps:$4 sm:$0xfe]  }
  0xe7   :  { %997 = vmatpush1.bf16.msra.mxu0 %v3954_v21  ;;  %2536 = vmatpush1.bf16.msra.mxu1 %v3954_v21  ;;  %v1068_v21 = vrot.slane %v4819_v15, 1 }
  0xe8   :  { %998 = vmatprep.subr.bf16.mxu0 %v3959_v22  ;;  %2537 = vmatprep.subr.bf16.mxu1 %v3959_v22  ;;  %v2574_v22 = vrot.slane %v4824_v16, 1 }
  0xeb   :  { %999 = vmatpush1.bf16.msra.mxu0 %v3957_v23  ;;  %2538 = vmatpush1.bf16.msra.mxu1 %v3957_v23  ;;  %v4026_v23 = vld [vmem:[%s5390_s1 + $0x500] ss:$8 sps:$4 sm:$0xff]  }
  0xec   :  { %1000 = vmatprep.subr.bf16.mxu0 %v3962_v24  ;;  %2539 = vmatprep.subr.bf16.mxu1 %v3962_v24  ;;  %v4034_v24 = vld [vmem:[%s5390_s1 + $0x514] ss:$8 sps:$4 sm:$0xff]  }
  0xef   :  { %1001 = vmatpush1.bf16.msra.mxu0 %v3960_v25  ;;  %2540 = vmatpush1.bf16.msra.mxu1 %v3960_v25  ;;  %v1323_v25 = vrot.slane %v4835_v19, 1 }
  0xf0   :  { %1002 = vmatprep.subr.bf16.mxu0 %v3965_v26  ;;  %2541 = vmatprep.subr.bf16.mxu1 %v3965_v26  ;;  %v2636_v26 = vrot.slane %v4840_v20, 1 }
  0xf3   :  { %1003 = vmatpush1.bf16.msra.mxu0 %v3963_v27  ;;  %2542 = vmatpush1.bf16.msra.mxu1 %v3963_v27  ;;  %v4032_v27 = vld [vmem:[%s5390_s1 + $0x510] ss:$8 sps:$4 sm:$0xff]  }
  0xf4   :  { %1004 = vmatprep.subr.bf16.mxu0 %v3968_v28  ;;  %2543 = vmatprep.subr.bf16.mxu1 %v3968_v28  ;;  %v4037_v28 = vld [vmem:[%s5390_s1 + $0x524] ss:$8 sps:$4 sm:$0xff]  }
  0xf7   :  { %1005 = vmatpush1.bf16.msra.mxu0 %v3966_v29  ;;  %2544 = vmatpush1.bf16.msra.mxu1 %v3966_v29  ;;  %v4035_v29 = vld [vmem:[%s5390_s1 + $0x520] ss:$8 sps:$4 sm:$0xff]  }
  0xf8   :  { %1006 = vmatprep.subr.bf16.mxu0 %v3971_v30  ;;  %2545 = vmatprep.subr.bf16.mxu1 %v3971_v30  ;;  %v4040_v30 = vld [vmem:[%s5390_s1 + $0x534] ss:$8 sps:$4 sm:$0xff]  }
  0xfb   :  { %1007 = vmatpush1.bf16.msra.mxu0 %v3969_v35  ;;  %2546 = vmatpush1.bf16.msra.mxu1 %v3969_v35  ;;  %v4044_v35 = vld [vmem:[%s5390_s1 + $0x550] ss:$8 sps:$4 sm:$0xff]  }
  0xfc   :  { %1008 = vmatprep.subr.bf16.mxu0 %v3974_v36  ;;  %2547 = vmatprep.subr.bf16.mxu1 %v3974_v36  ;;  %v4049_v36 = vld [vmem:[%s5390_s1 + $0x564] ss:$8 sps:$4 sm:$0xff]  }
  0xff   :  { %1009 = vmatpush1.bf16.msra.mxu0 %v3972_v41  ;;  %2548 = vmatpush1.bf16.msra.mxu1 %v3972_v41  ;;  %v4053_v41 = vld [vmem:[%s5390_s1 + $0x580] ss:$8 sps:$4 sm:$0xff]  }
 0x100   :  { %1232 = vmatprep.subr.bf16.mxu0 %v3977_v42  ;;  %2578 = vmatprep.subr.bf16.mxu1 %v3977_v42  ;;  %v4058_v42 = vld [vmem:[%s5390_s1 + $0x594] ss:$8 sps:$4 sm:$0xff]  }
 0x102   :  { %1011 = vmatmul.mubr.bf16.vlgmr.msra.gmra.mrb[0].mxu0 %v808_v45  ;;  %2550 = vmatmul.mubr.bf16.vlgmr.msra.gmra.mrb[0].mxu1 %v2507_v46  ;;  %v4056_v45 = vld [vmem:[%s5390_s1 + $0x590] ss:$8 sps:$4 sm:$0xff]   ;;  %v4061_v46 = vld [vmem:[%s5390_s1 + $0x5a4] ss:$8 sps:$4 sm:$0xff]  }
 0x103   :  { %1233 = vmatpush1.bf16.msra.mxu0 %v3975_v47  ;;  %2579 = vmatpush1.bf16.msra.mxu1 %v3975_v47  ;;  %v4059_v47 = vld [vmem:[%s5390_s1 + $0x5a0] ss:$8 sps:$4 sm:$0xff]  }
 0x104   :  { %1234 = vmatprep.subr.bf16.mxu0 %v3980_v48  ;;  %2580 = vmatprep.subr.bf16.mxu1 %v3980_v48  ;;  %v4064_v48 = vld [vmem:[%s5390_s1 + $0x5b4] ss:$8 sps:$4 sm:$0xff]  }
 0x105   :  { %1264 = vmatprep.mubr.bf16.mxu0 %v1069_v49  ;;  %2610 = vmatprep.mubr.bf16.mxu1 %v2575_v50  ;;  %v4062_v49 = vld [vmem:[%s5390_s1 + $0x5b0] ss:$8 sps:$4 sm:$0xff]   ;;  %v4067_v50 = vld [vmem:[%s5390_s1 + $0x5c4] ss:$8 sps:$4 sm:$0xff]  }
 0x107   :  { %1235 = vmatpush1.bf16.msra.mxu0 %v3978_v51  ;;  %2581 = vmatpush1.bf16.msra.mxu1 %v3978_v51  ;;  %v4065_v51 = vld [vmem:[%s5390_s1 + $0x5c0] ss:$8 sps:$4 sm:$0xff]  }
 0x108   :  { %1236 = vmatprep.subr.bf16.mxu0 %v3983_v52  ;;  %2582 = vmatprep.subr.bf16.mxu1 %v3983_v52  ;;  %v4070_v52 = vld [vmem:[%s5390_s1 + $0x5d4] ss:$8 sps:$4 sm:$0xff]  }
 0x10b   :  { %1237 = vmatpush1.bf16.msra.mxu0 %v3981_v53  ;;  %2583 = vmatpush1.bf16.msra.mxu1 %v3981_v53  ;;  %v4068_v53 = vld [vmem:[%s5390_s1 + $0x5d0] ss:$8 sps:$4 sm:$0xff]  }
 0x10c   :  { %1238 = vmatprep.subr.bf16.mxu0 %v3986_v54  ;;  %2584 = vmatprep.subr.bf16.mxu1 %v3986_v54  ;;  %v4073_v54 = vld [vmem:[%s5390_s1 + $0x5e4] ss:$8 sps:$4 sm:$0xff]  }
 0x10f   :  { %1239 = vmatpush1.bf16.msra.mxu0 %v3984_v55  ;;  %2585 = vmatpush1.bf16.msra.mxu1 %v3984_v55  ;;  %v4071_v55 = vld [vmem:[%s5390_s1 + $0x5e0] ss:$8 sps:$4 sm:$0xff]  }
 0x110   :  { %1240 = vmatprep.subr.bf16.mxu0 %v3989_v56  ;;  %2586 = vmatprep.subr.bf16.mxu1 %v3989_v56  ;;  %v4076_v56 = vld [vmem:[%s5390_s1 + $0x5f4] ss:$8 sps:$4 sm:$0xff]  }
 0x113   :  { %1241 = vmatpush1.bf16.msra.mxu0 %v3987_v57  ;;  %2587 = vmatpush1.bf16.msra.mxu1 %v3987_v57  ;;  %v1575_v57 = vshrl.u32 %v4717_v43, 16 }
 0x114   :  { %1242 = vmatprep.subr.bf16.mxu0 %v3992_v58  ;;  %2588 = vmatprep.subr.bf16.mxu1 %v3992_v58  ;;  %v1578_v58 = vshll.u32 %v4717_v43, 16  ;;  %v4074_v43 = vld [vmem:[%s5390_s1 + $0x5f0] ss:$8 sps:$4 sm:$0xff]  }
 0x117   :  { %1243 = vmatpush1.bf16.msra.mxu0 %v3990_v59  ;;  %2589 = vmatpush1.bf16.msra.mxu1 %v3990_v59  ;;  %v2695_v59 = vshrl.u32 %v4722_v44, 16 }
 0x118   :  { %1244 = vmatprep.subr.bf16.mxu0 %v3995_v60  ;;  %2590 = vmatprep.subr.bf16.mxu1 %v3995_v60  ;;  %v2698_v60 = vshll.u32 %v4722_v44, 16  ;;  %v4082_v44 = vld [vmem:[%s5390_s1 + $0x604] ss:$8 sps:$4 sm:$0xff]  }
 0x11b   :  { %1245 = vmatpush1.bf16.msra.mxu0 %v3993_v61  ;;  %2591 = vmatpush1.bf16.msra.mxu1 %v3993_v61  ;;  %v4943_v61 = vld [vmem:[%s5391_s0 + $0x30] ss:$8 sps:$4 sm:$0xfe]  }
 0x11c   :  { %1246 = vmatprep.subr.bf16.mxu0 %v3998_v62  ;;  %2592 = vmatprep.subr.bf16.mxu1 %v3998_v62  ;;  %v4948_v62 = vld [vmem:[%s5391_s0 + $0x48] ss:$8 sps:$4 sm:$0xfe]  }
 0x11f   :  { %1247 = vmatpush1.bf16.msra.mxu0 %v3996_v63  ;;  %2593 = vmatpush1.bf16.msra.mxu1 %v3996_v63  ;;  %v1577_v63 = vrot.slane %v1575_v57, 1 }
 0x120   :  { %1248 = vmatprep.subr.bf16.mxu0 %v4001_v0  ;;  %2594 = vmatprep.subr.bf16.mxu1 %v4001_v0  ;;  %v1580_v0 = vrot.slane %v1578_v58, 2 }
 0x123   :  { %1249 = vmatpush1.bf16.msra.mxu0 %v3999_v1  ;;  %2595 = vmatpush1.bf16.msra.mxu1 %v3999_v1  ;;  %v2697_v1 = vrot.slane %v2695_v59, 1  ;;  %v4131_v59 = vld [vmem:[%s5390_s1 + $0x700] ss:$8 sps:$4 sm:$0xff]  }
 0x124   :  { %1250 = vmatprep.subr.bf16.mxu0 %v4004_v2  ;;  %2596 = vmatprep.subr.bf16.mxu1 %v4004_v2  ;;  %v2700_v2 = vrot.slane %v2698_v60, 2  ;;  %v4136_v60 = vld [vmem:[%s5390_s1 + $0x714] ss:$8 sps:$4 sm:$0xff]  }
 0x127   :  { %1251 = vmatpush1.bf16.msra.mxu0 %v4002_v3  ;;  %2597 = vmatpush1.bf16.msra.mxu1 %v4002_v3  ;;  %v1322_v3 = vrot.slane %v4943_v61, 1 }
 0x128   :  { %1252 = vmatprep.subr.bf16.mxu0 %v4007_v4  ;;  %2598 = vmatprep.subr.bf16.mxu1 %v4007_v4  ;;  %v2635_v4 = vrot.slane %v4948_v62, 1 }
 0x12b   :  { %1253 = vmatpush1.bf16.msra.mxu0 %v4005_v5  ;;  %2599 = vmatpush1.bf16.msra.mxu1 %v4005_v5  ;;  %v4080_v5 = vld [vmem:[%s5390_s1 + $0x600] ss:$8 sps:$4 sm:$0xff]  }
 0x12c   :  { %1254 = vmatprep.subr.bf16.mxu0 %v4010_v6  ;;  %2600 = vmatprep.subr.bf16.mxu1 %v4010_v6  ;;  %v4088_v6 = vld [vmem:[%s5390_s1 + $0x614] ss:$8 sps:$4 sm:$0xff]  }
 0x12f   :  { %1255 = vmatpush1.bf16.msra.mxu0 %v4008_v7  ;;  %2601 = vmatpush1.bf16.msra.mxu1 %v4008_v7  ;;  %v1581_v7 = vor.u32 %v1580_v0, %v1577_v63  ;;  %v4134_v63 = vld [vmem:[%s5390_s1 + $0x710] ss:$8 sps:$4 sm:$0xff]   ;;  %v4139_v0 = vld [vmem:[%s5390_s1 + $0x724] ss:$8 sps:$4 sm:$0xff]  }
 0x130   :  { %1256 = vmatprep.subr.bf16.mxu0 %v4013_v8  ;;  %2602 = vmatprep.subr.bf16.mxu1 %v4013_v8  ;;  %v2701_v8 = vor.u32 %v2700_v2, %v2697_v1  ;;  %v4137_v1 = vld [vmem:[%s5390_s1 + $0x720] ss:$8 sps:$4 sm:$0xff]   ;;  %v4142_v2 = vld [vmem:[%s5390_s1 + $0x734] ss:$8 sps:$4 sm:$0xff]  }
 0x133   :  { %1257 = vmatpush1.bf16.msra.mxu0 %v4011_v9  ;;  %2603 = vmatpush1.bf16.msra.mxu1 %v4011_v9  ;;  %v4086_v9 = vld [vmem:[%s5390_s1 + $0x610] ss:$8 sps:$4 sm:$0xff]  }
 0x134   :  { %1258 = vmatprep.subr.bf16.mxu0 %v4016_v10  ;;  %2604 = vmatprep.subr.bf16.mxu1 %v4016_v10  ;;  %v4091_v10 = vld [vmem:[%s5390_s1 + $0x624] ss:$8 sps:$4 sm:$0xff]  }
 0x137   :  { %1259 = vmatpush1.bf16.msra.mxu0 %v4014_v11  ;;  %2605 = vmatpush1.bf16.msra.mxu1 %v4014_v11  ;;  %v4089_v11 = vld [vmem:[%s5390_s1 + $0x620] ss:$8 sps:$4 sm:$0xff]  }
 0x138   :  { %1260 = vmatprep.subr.bf16.mxu0 %v4019_v12  ;;  %2606 = vmatprep.subr.bf16.mxu1 %v4019_v12  ;;  %v4094_v12 = vld [vmem:[%s5390_s1 + $0x634] ss:$8 sps:$4 sm:$0xff]  }
 0x13b   :  { %1261 = vmatpush1.bf16.msra.mxu0 %v4017_v13  ;;  %2607 = vmatpush1.bf16.msra.mxu1 %v4017_v13  ;;  %v4092_v13 = vld [vmem:[%s5390_s1 + $0x630] ss:$8 sps:$4 sm:$0xff]  }
 0x13c   :  { %1262 = vmatprep.subr.bf16.mxu0 %v4022_v14  ;;  %2608 = vmatprep.subr.bf16.mxu1 %v4022_v14  ;;  %v4097_v14 = vld [vmem:[%s5390_s1 + $0x644] ss:$8 sps:$4 sm:$0xff]  }
 0x13f   :  { %1263 = vmatpush1.bf16.msra.mxu0 %v4020_v17  ;;  %2609 = vmatpush1.bf16.msra.mxu1 %v4020_v17  ;;  %v4095_v17 = vld [vmem:[%s5390_s1 + $0x640] ss:$8 sps:$4 sm:$0xff]  }
 0x140   :  { %1486 = vmatprep.subr.bf16.mxu0 %v4028_v18  ;;  %2639 = vmatprep.subr.bf16.mxu1 %v4028_v18  ;;  %v4100_v18 = vld [vmem:[%s5390_s1 + $0x654] ss:$8 sps:$4 sm:$0xff]  }
 0x142   :  { %1265 = vmatmul.mubr.bf16.vlgmr.msra.gmra.mrb[0].mxu0 %v1068_v21  ;;  %2611 = vmatmul.mubr.bf16.vlgmr.msra.gmra.mrb[0].mxu1 %v2574_v22  ;;  %v4098_v21 = vld [vmem:[%s5390_s1 + $0x650] ss:$8 sps:$4 sm:$0xff]   ;;  %v4103_v22 = vld [vmem:[%s5390_s1 + $0x664] ss:$8 sps:$4 sm:$0xff]  }
 0x143   :  { %1487 = vmatpush1.bf16.msra.mxu0 %v4026_v23  ;;  %2640 = vmatpush1.bf16.msra.mxu1 %v4026_v23  ;;  %v4101_v23 = vld [vmem:[%s5390_s1 + $0x660] ss:$8 sps:$4 sm:$0xff]  }
 0x144   :  { %1488 = vmatprep.subr.bf16.mxu0 %v4034_v24  ;;  %2641 = vmatprep.subr.bf16.mxu1 %v4034_v24  ;;  %v4106_v24 = vld [vmem:[%s5390_s1 + $0x674] ss:$8 sps:$4 sm:$0xff]  }
 0x145   :  { %1518 = vmatprep.mubr.bf16.mxu0 %v1323_v25  ;;  %2671 = vmatprep.mubr.bf16.mxu1 %v2636_v26  ;;  %v4104_v25 = vld [vmem:[%s5390_s1 + $0x670] ss:$8 sps:$4 sm:$0xff]   ;;  %v4109_v26 = vld [vmem:[%s5390_s1 + $0x684] ss:$8 sps:$4 sm:$0xff]  }
 0x147   :  { %1489 = vmatpush1.bf16.msra.mxu0 %v4032_v27  ;;  %2642 = vmatpush1.bf16.msra.mxu1 %v4032_v27  ;;  %v4107_v27 = vld [vmem:[%s5390_s1 + $0x680] ss:$8 sps:$4 sm:$0xff]  }
 0x148   :  { %1490 = vmatprep.subr.bf16.mxu0 %v4037_v28  ;;  %2643 = vmatprep.subr.bf16.mxu1 %v4037_v28  ;;  %v4112_v28 = vld [vmem:[%s5390_s1 + $0x694] ss:$8 sps:$4 sm:$0xff]  }
 0x14b   :  { %1491 = vmatpush1.bf16.msra.mxu0 %v4035_v29  ;;  %2644 = vmatpush1.bf16.msra.mxu1 %v4035_v29  ;;  %v4110_v29 = vld [vmem:[%s5390_s1 + $0x690] ss:$8 sps:$4 sm:$0xff]  }
 0x14c   :  { %1492 = vmatprep.subr.bf16.mxu0 %v4040_v30  ;;  %2645 = vmatprep.subr.bf16.mxu1 %v4040_v30  ;;  %v4115_v30 = vld [vmem:[%s5390_s1 + $0x6a4] ss:$8 sps:$4 sm:$0xff]  }
 0x14f   :  { %1493 = vmatpush1.bf16.msra.mxu0 %v4038_v31  ;;  %2646 = vmatpush1.bf16.msra.mxu1 %v4038_v31  ;;  %v4113_v31 = vld [vmem:[%s5390_s1 + $0x6a0] ss:$8 sps:$4 sm:$0xff]  }
 0x150   :  { %1494 = vmatprep.subr.bf16.mxu0 %v4043_v32  ;;  %2647 = vmatprep.subr.bf16.mxu1 %v4043_v32  ;;  %v4118_v32 = vld [vmem:[%s5390_s1 + $0x6b4] ss:$8 sps:$4 sm:$0xff]  }
 0x153   :  { %1495 = vmatpush1.bf16.msra.mxu0 %v4041_v33  ;;  %2648 = vmatpush1.bf16.msra.mxu1 %v4041_v33  ;;  %v4116_v33 = vld [vmem:[%s5390_s1 + $0x6b0] ss:$8 sps:$4 sm:$0xff]  }
 0x154   :  { %1496 = vmatprep.subr.bf16.mxu0 %v4046_v34  ;;  %2649 = vmatprep.subr.bf16.mxu1 %v4046_v34  ;;  %v4121_v34 = vld [vmem:[%s5390_s1 + $0x6c4] ss:$8 sps:$4 sm:$0xff]  }
 0x157   :  { %1497 = vmatpush1.bf16.msra.mxu0 %v4044_v35  ;;  %2650 = vmatpush1.bf16.msra.mxu1 %v4044_v35  ;;  %v4119_v35 = vld [vmem:[%s5390_s1 + $0x6c0] ss:$8 sps:$4 sm:$0xff]  }
 0x158   :  { %1498 = vmatprep.subr.bf16.mxu0 %v4049_v36  ;;  %2651 = vmatprep.subr.bf16.mxu1 %v4049_v36  ;;  %v4124_v36 = vld [vmem:[%s5390_s1 + $0x6d4] ss:$8 sps:$4 sm:$0xff]  }
 0x15b   :  { %1499 = vmatpush1.bf16.msra.mxu0 %v4047_v37  ;;  %2652 = vmatpush1.bf16.msra.mxu1 %v4047_v37  ;;  %v4122_v37 = vld [vmem:[%s5390_s1 + $0x6d0] ss:$8 sps:$4 sm:$0xff]  }
 0x15c   :  { %1500 = vmatprep.subr.bf16.mxu0 %v4052_v38  ;;  %2653 = vmatprep.subr.bf16.mxu1 %v4052_v38  ;;  %v4127_v38 = vld [vmem:[%s5390_s1 + $0x6e4] ss:$8 sps:$4 sm:$0xff]  }
 0x15f   :  { %1501 = vmatpush1.bf16.msra.mxu0 %v4050_v39  ;;  %2654 = vmatpush1.bf16.msra.mxu1 %v4050_v39  ;;  %v1567_v39 = vshrl.u32 %v4819_v15, 16 }
 0x160   :  { %1502 = vmatprep.subr.bf16.mxu0 %v4055_v40  ;;  %2655 = vmatprep.subr.bf16.mxu1 %v4055_v40  ;;  %v1570_v40 = vshll.u32 %v4819_v15, 16  ;;  %v1836_v15 = vshll.u32 %v4835_v19, 16 }
 0x163   :  { %1503 = vmatpush1.bf16.msra.mxu0 %v4053_v41  ;;  %2656 = vmatpush1.bf16.msra.mxu1 %v4053_v41  ;;  %v2687_v41 = vshrl.u32 %v4824_v16, 16 }
 0x164   :  { %1504 = vmatprep.subr.bf16.mxu0 %v4058_v42  ;;  %2657 = vmatprep.subr.bf16.mxu1 %v4058_v42  ;;  %v2690_v42 = vshll.u32 %v4824_v16, 16  ;;  %v2763_v16 = vshll.u32 %v4840_v20, 16 }
 0x167   :  { %1505 = vmatpush1.bf16.msra.mxu0 %v4056_v45  ;;  %2658 = vmatpush1.bf16.msra.mxu1 %v4056_v45  ;;  %v4125_v45 = vld [vmem:[%s5390_s1 + $0x6e0] ss:$8 sps:$4 sm:$0xff]  }
 0x168   :  { %1506 = vmatprep.subr.bf16.mxu0 %v4061_v46  ;;  %2659 = vmatprep.subr.bf16.mxu1 %v4061_v46  ;;  %v4130_v46 = vld [vmem:[%s5390_s1 + $0x6f4] ss:$8 sps:$4 sm:$0xff]  }
 0x16b   :  { %1507 = vmatpush1.bf16.msra.mxu0 %v4059_v47  ;;  %2660 = vmatpush1.bf16.msra.mxu1 %v4059_v47  ;;  %v1833_v47 = vshrl.u32 %v4835_v19, 16  ;;  %v4133_v19 = vld [vmem:[%s5390_s1 + $0x704] ss:$8 sps:$4 sm:$0xff]  }
 0x16c   :  { %1508 = vmatprep.subr.bf16.mxu0 %v4064_v48  ;;  %2661 = vmatprep.subr.bf16.mxu1 %v4064_v48  ;;  %v2760_v48 = vshrl.u32 %v4840_v20, 16  ;;  %v2765_v20 = vrot.slane %v2763_v16, 2 }
 0x16f   :  { %1509 = vmatpush1.bf16.msra.mxu0 %v4062_v49  ;;  %2662 = vmatpush1.bf16.msra.mxu1 %v4062_v49  ;;  %v1569_v49 = vrot.slane %v1567_v39, 1  ;;  %v4227_v39 = vld [vmem:[%s5391_s0 + $0x4] ss:$8 sps:$4 sm:$0xfc]  }
 0x170   :  { %1510 = vmatprep.subr.bf16.mxu0 %v4067_v50  ;;  %2663 = vmatprep.subr.bf16.mxu1 %v4067_v50  ;;  %v1572_v50 = vrot.slane %v1570_v40, 2 }
 0x172   :  { %v1573_v57 = vor.u32 %v1572_v50, %v1569_v49 }
 0x173   :  { %1511 = vmatpush1.bf16.msra.mxu0 %v4065_v51  ;;  %2664 = vmatpush1.bf16.msra.mxu1 %v4065_v51  ;;  %v2689_v51 = vrot.slane %v2687_v41, 1  ;;  %v4230_v41 = vld [vmem:[%s5391_s0 + $0x1c] ss:$8 sps:$4 sm:$0xfc]  }
 0x174   :  { %1512 = vmatprep.subr.bf16.mxu0 %v4070_v52  ;;  %2665 = vmatprep.subr.bf16.mxu1 %v4070_v52  ;;  %v2692_v52 = vrot.slane %v2690_v42, 2  ;;  %v2835_v49 = vrot.slane %v4230_v41, 2 }
 0x176   :  { %v2693_v58 = vor.u32 %v2692_v52, %v2689_v51  ;;  %v4179_v51 = vld [vmem:[%s5390_s1 + $0x800] ss:$8 sps:$4 sm:$0xff]   ;;  %v4184_v52 = vld [vmem:[%s5390_s1 + $0x814] ss:$8 sps:$4 sm:$0xff]  }
 0x177   :  { %1513 = vmatpush1.bf16.msra.mxu0 %v4068_v53  ;;  %2666 = vmatpush1.bf16.msra.mxu1 %v4068_v53  ;;  %v4128_v53 = vld [vmem:[%s5390_s1 + $0x6f0] ss:$8 sps:$4 sm:$0xff]  }
 0x178   :  { %1514 = vmatprep.subr.bf16.mxu0 %v4073_v54  ;;  %2667 = vmatprep.subr.bf16.mxu1 %v4073_v54  ;;  %v1835_v54 = vrot.slane %v1833_v47, 1 }
 0x17b   :  { %1515 = vmatpush1.bf16.msra.mxu0 %v4071_v55  ;;  %2668 = vmatpush1.bf16.msra.mxu1 %v4071_v55  ;;  %v1838_v55 = vrot.slane %v1836_v15, 2 }
 0x17c   :  { %1516 = vmatprep.subr.bf16.mxu0 %v4076_v56  ;;  %2669 = vmatprep.subr.bf16.mxu1 %v4076_v56  ;;  %v2762_v56 = vrot.slane %v2760_v48, 1  ;;  %v2102_v48 = vrot.slane %v4227_v39, 2 }
 0x17f   :  { %1517 = vmatpush1.bf16.msra.mxu0 %v4074_v43  ;;  %2670 = vmatpush1.bf16.msra.mxu1 %v4074_v43  ;;  %v1839_v43 = vor.u32 %v1838_v55, %v1835_v54  ;;  %v4182_v54 = vld [vmem:[%s5390_s1 + $0x810] ss:$8 sps:$4 sm:$0xff]   ;;  %v4187_v55 = vld [vmem:[%s5390_s1 + $0x824] ss:$8 sps:$4 sm:$0xff]  }
 0x180   :  { %1744 = vmatprep.subr.bf16.mxu0 %v4082_v44  ;;  %2704 = vmatprep.subr.bf16.mxu1 %v4082_v44  ;;  %v2766_v44 = vor.u32 %v2765_v20, %v2762_v56  ;;  %v4185_v56 = vld [vmem:[%s5390_s1 + $0x820] ss:$8 sps:$4 sm:$0xff]   ;;  %v4190_v20 = vld [vmem:[%s5390_s1 + $0x834] ss:$8 sps:$4 sm:$0xff]  }
 0x182   :  { %1519 = vmatmul.mubr.bf16.vlgmr.msra.gmra.mrb[0].mxu0 %v1322_v3  ;;  %2672 = vmatmul.mubr.bf16.vlgmr.msra.gmra.mrb[0].mxu1 %v2635_v4  ;;  %v4140_v3 = vld [vmem:[%s5390_s1 + $0x730] ss:$8 sps:$4 sm:$0xff]   ;;  %v4145_v4 = vld [vmem:[%s5390_s1 + $0x744] ss:$8 sps:$4 sm:$0xff]  }
 0x183   :  { %1745 = vmatpush1.bf16.msra.mxu0 %v4080_v5  ;;  %2705 = vmatpush1.bf16.msra.mxu1 %v4080_v5  ;;  %v4143_v5 = vld [vmem:[%s5390_s1 + $0x740] ss:$8 sps:$4 sm:$0xff]  }
 0x184   :  { %1746 = vmatprep.subr.bf16.mxu0 %v4088_v6  ;;  %2706 = vmatprep.subr.bf16.mxu1 %v4088_v6  ;;  %v4148_v6 = vld [vmem:[%s5390_s1 + $0x754] ss:$8 sps:$4 sm:$0xff]  }
 0x185   :  { %1776 = vmatprep.mubr.bf16.mxu0 %v1581_v7  ;;  %2736 = vmatprep.mubr.bf16.mxu1 %v2701_v8  ;;  %v4146_v7 = vld [vmem:[%s5390_s1 + $0x750] ss:$8 sps:$4 sm:$0xff]   ;;  %v4151_v8 = vld [vmem:[%s5390_s1 + $0x764] ss:$8 sps:$4 sm:$0xff]  }
 0x187   :  { %1747 = vmatpush1.bf16.msra.mxu0 %v4086_v9  ;;  %2707 = vmatpush1.bf16.msra.mxu1 %v4086_v9  ;;  %v4149_v9 = vld [vmem:[%s5390_s1 + $0x760] ss:$8 sps:$4 sm:$0xff]  }
 0x188   :  { %1748 = vmatprep.subr.bf16.mxu0 %v4091_v10  ;;  %2708 = vmatprep.subr.bf16.mxu1 %v4091_v10  ;;  %v4154_v10 = vld [vmem:[%s5390_s1 + $0x774] ss:$8 sps:$4 sm:$0xff]  }
 0x18b   :  { %1749 = vmatpush1.bf16.msra.mxu0 %v4089_v11  ;;  %2709 = vmatpush1.bf16.msra.mxu1 %v4089_v11  ;;  %v4152_v11 = vld [vmem:[%s5390_s1 + $0x770] ss:$8 sps:$4 sm:$0xff]  }
 0x18c   :  { %1750 = vmatprep.subr.bf16.mxu0 %v4094_v12  ;;  %2710 = vmatprep.subr.bf16.mxu1 %v4094_v12  ;;  %v4157_v12 = vld [vmem:[%s5390_s1 + $0x784] ss:$8 sps:$4 sm:$0xff]  }
 0x18f   :  { %1751 = vmatpush1.bf16.msra.mxu0 %v4092_v13  ;;  %2711 = vmatpush1.bf16.msra.mxu1 %v4092_v13  ;;  %v4155_v13 = vld [vmem:[%s5390_s1 + $0x780] ss:$8 sps:$4 sm:$0xff]  }
 0x190   :  { %1752 = vmatprep.subr.bf16.mxu0 %v4097_v14  ;;  %2712 = vmatprep.subr.bf16.mxu1 %v4097_v14  ;;  %v4160_v14 = vld [vmem:[%s5390_s1 + $0x794] ss:$8 sps:$4 sm:$0xff]  }
 0x193   :  { %1753 = vmatpush1.bf16.msra.mxu0 %v4095_v17  ;;  %2713 = vmatpush1.bf16.msra.mxu1 %v4095_v17  ;;  %v4158_v17 = vld [vmem:[%s5390_s1 + $0x790] ss:$8 sps:$4 sm:$0xff]  }
 0x194   :  { %1754 = vmatprep.subr.bf16.mxu0 %v4100_v18  ;;  %2714 = vmatprep.subr.bf16.mxu1 %v4100_v18  ;;  %v4163_v18 = vld [vmem:[%s5390_s1 + $0x7a4] ss:$8 sps:$4 sm:$0xff]  }
 0x197   :  { %1755 = vmatpush1.bf16.msra.mxu0 %v4098_v21  ;;  %2715 = vmatpush1.bf16.msra.mxu1 %v4098_v21  ;;  %v4161_v21 = vld [vmem:[%s5390_s1 + $0x7a0] ss:$8 sps:$4 sm:$0xff]  }
 0x198   :  { %1756 = vmatprep.subr.bf16.mxu0 %v4103_v22  ;;  %2716 = vmatprep.subr.bf16.mxu1 %v4103_v22  ;;  %v4166_v22 = vld [vmem:[%s5390_s1 + $0x7b4] ss:$8 sps:$4 sm:$0xff]  }
 0x19b   :  { %1757 = vmatpush1.bf16.msra.mxu0 %v4101_v23  ;;  %2717 = vmatpush1.bf16.msra.mxu1 %v4101_v23  ;;  %v4164_v23 = vld [vmem:[%s5390_s1 + $0x7b0] ss:$8 sps:$4 sm:$0xff]  }
 0x19c   :  { %1758 = vmatprep.subr.bf16.mxu0 %v4106_v24  ;;  %2718 = vmatprep.subr.bf16.mxu1 %v4106_v24  ;;  %v4169_v24 = vld [vmem:[%s5390_s1 + $0x7c4] ss:$8 sps:$4 sm:$0xff]  }
 0x19f   :  { %1759 = vmatpush1.bf16.msra.mxu0 %v4104_v25  ;;  %2719 = vmatpush1.bf16.msra.mxu1 %v4104_v25  ;;  %v4167_v25 = vld [vmem:[%s5390_s1 + $0x7c0] ss:$8 sps:$4 sm:$0xff]  }
 0x1a0   :  { %1760 = vmatprep.subr.bf16.mxu0 %v4109_v26  ;;  %2720 = vmatprep.subr.bf16.mxu1 %v4109_v26  ;;  %v4172_v26 = vld [vmem:[%s5390_s1 + $0x7d4] ss:$8 sps:$4 sm:$0xff]  }
 0x1a3   :  { %1761 = vmatpush1.bf16.msra.mxu0 %v4107_v27  ;;  %2721 = vmatpush1.bf16.msra.mxu1 %v4107_v27  ;;  %v4170_v27 = vld [vmem:[%s5390_s1 + $0x7d0] ss:$8 sps:$4 sm:$0xff]  }
 0x1a4   :  { %1762 = vmatprep.subr.bf16.mxu0 %v4112_v28  ;;  %2722 = vmatprep.subr.bf16.mxu1 %v4112_v28  ;;  %v4175_v28 = vld [vmem:[%s5390_s1 + $0x7e4] ss:$8 sps:$4 sm:$0xff]  }
 0x1a7   :  { %1763 = vmatpush1.bf16.msra.mxu0 %v4110_v29  ;;  %2723 = vmatpush1.bf16.msra.mxu1 %v4110_v29  ;;  %v1825_v29 = vshrl.u32 %v4943_v61, 16 }
 0x1a8   :  { %1764 = vmatprep.subr.bf16.mxu0 %v4115_v30  ;;  %2724 = vmatprep.subr.bf16.mxu1 %v4115_v30  ;;  %v1828_v30 = vshll.u32 %v4943_v61, 16  ;;  %v4178_v61 = vld [vmem:[%s5390_s1 + $0x7f4] ss:$8 sps:$4 sm:$0xff]  }
 0x1ab   :  { %1765 = vmatpush1.bf16.msra.mxu0 %v4113_v31  ;;  %2725 = vmatpush1.bf16.msra.mxu1 %v4113_v31  ;;  %v2752_v31 = vshrl.u32 %v4948_v62, 16 }
 0x1ac   :  { %1766 = vmatprep.subr.bf16.mxu0 %v4118_v32  ;;  %2726 = vmatprep.subr.bf16.mxu1 %v4118_v32  ;;  %v2755_v32 = vshll.u32 %v4948_v62, 16  ;;  %v1827_v62 = vrot.slane %v1825_v29, 1 }
 0x1af   :  { %1767 = vmatpush1.bf16.msra.mxu0 %v4116_v33  ;;  %2727 = vmatpush1.bf16.msra.mxu1 %v4116_v33  ;;  %v4173_v33 = vld [vmem:[%s5390_s1 + $0x7e0] ss:$8 sps:$4 sm:$0xff]  }
 0x1b0   :  { %1768 = vmatprep.subr.bf16.mxu0 %v4121_v34  ;;  %2728 = vmatprep.subr.bf16.mxu1 %v4121_v34  ;;  %v5156_v34 = vld [vmem:[%s5391_s0 + $0x10] sm:$0x11] }
 0x1b1   :  { %v3639_v40 = vcombine.high %v5156_v34, %v5156_v34 }
 0x1b3   :  { %1769 = vmatpush1.bf16.msra.mxu0 %v4119_v35  ;;  %2729 = vmatpush1.bf16.msra.mxu1 %v4119_v35  ;;  %v5161_v35 = vld [vmem:[%s5391_s0 + $0x28] sm:$0x11]  ;;  %v2103_v16 = vrot.slane %v3639_v40, 2 }
 0x1b4   :  { %1770 = vmatprep.subr.bf16.mxu0 %v4124_v36  ;;  %2730 = vmatprep.subr.bf16.mxu1 %v4124_v36  ;;  %v1830_v36 = vrot.slane %v1828_v30, 2  ;;  %v3694_v42 = vcombine.high %v5161_v35, %v5161_v35 }
 0x1b6   :  { %v1831_v47 = vor.u32 %v1830_v36, %v1827_v62  ;;  %v2836_v50 = vrot.slane %v3694_v42, 2 }
 0x1b7   :  { %1771 = vmatpush1.bf16.msra.mxu0 %v4122_v37  ;;  %2731 = vmatpush1.bf16.msra.mxu1 %v4122_v37  ;;  %v2754_v37 = vrot.slane %v2752_v31, 1 }
 0x1b8   :  { %1772 = vmatprep.subr.bf16.mxu0 %v4127_v38  ;;  %2732 = vmatprep.subr.bf16.mxu1 %v4127_v38  ;;  %v2757_v38 = vrot.slane %v2755_v32, 2 }
 0x1ba   :  { %v2758_v15 = vor.u32 %v2757_v38, %v2754_v37 }
 0x1bb   :  { %1773 = vmatpush1.bf16.msra.mxu0 %v4125_v45  ;;  %2733 = vmatpush1.bf16.msra.mxu1 %v4125_v45  ;;  %v4176_v45 = vld [vmem:[%s5390_s1 + $0x7f0] ss:$8 sps:$4 sm:$0xff]  }
 0x1bc   :  { %1774 = vmatprep.subr.bf16.mxu0 %v4130_v46  ;;  %2734 = vmatprep.subr.bf16.mxu1 %v4130_v46  ;;  %v4181_v46 = vld [vmem:[%s5390_s1 + $0x804] ss:$8 sps:$4 sm:$0xff]  }
 0x1bf   :  { %1775 = vmatpush1.bf16.msra.mxu0 %v4128_v53  ;;  %2735 = vmatpush1.bf16.msra.mxu1 %v4128_v53  ;;  %v2104_v53 = vsel %vm2098_vm0, %v2102_v48, %v2103_v16 }
 0x1c0   :  { %2002 = vmatprep.subr.bf16.mxu0 %v4133_v19  ;;  %2769 = vmatprep.subr.bf16.mxu1 %v4133_v19  ;;  %v2837_v19 = vsel %vm2098_vm0, %v2835_v49, %v2836_v50 }
 0x1c2   :  { %1777 = vmatmul.mubr.bf16.vlgmr.msra.gmra.mrb[0].mxu0 %v1573_v57  ;;  %2737 = vmatmul.mubr.bf16.vlgmr.msra.gmra.mrb[0].mxu1 %v2693_v58  ;;  %v4188_v57 = vld [vmem:[%s5390_s1 + $0x830] ss:$8 sps:$4 sm:$0xff]   ;;  %v4193_v58 = vld [vmem:[%s5390_s1 + $0x844] ss:$8 sps:$4 sm:$0xff]  }
 0x1c3   :  { %2003 = vmatpush1.bf16.msra.mxu0 %v4131_v59  ;;  %2770 = vmatpush1.bf16.msra.mxu1 %v4131_v59  ;;  %v4191_v59 = vld [vmem:[%s5390_s1 + $0x840] ss:$8 sps:$4 sm:$0xff]  }
 0x1c4   :  { %2004 = vmatprep.subr.bf16.mxu0 %v4136_v60  ;;  %2771 = vmatprep.subr.bf16.mxu1 %v4136_v60  ;;  %v4196_v60 = vld [vmem:[%s5390_s1 + $0x854] ss:$8 sps:$4 sm:$0xff]  }
 0x1c5   :  { %2034 = vmatprep.mubr.bf16.mxu0 %v1839_v43  ;;  %2801 = vmatprep.mubr.bf16.mxu1 %v2766_v44  ;;  %v4194_v43 = vld [vmem:[%s5390_s1 + $0x850] ss:$8 sps:$4 sm:$0xff]   ;;  %v4199_v44 = vld [vmem:[%s5390_s1 + $0x864] ss:$8 sps:$4 sm:$0xff]  }
 0x1c7   :  { %2005 = vmatpush1.bf16.msra.mxu0 %v4134_v63  ;;  %2772 = vmatpush1.bf16.msra.mxu1 %v4134_v63  ;;  %v4197_v63 = vld [vmem:[%s5390_s1 + $0x860] ss:$8 sps:$4 sm:$0xff]  }
 0x1c8   :  { %2006 = vmatprep.subr.bf16.mxu0 %v4139_v0  ;;  %2773 = vmatprep.subr.bf16.mxu1 %v4139_v0  ;;  %v4202_v0 = vld [vmem:[%s5390_s1 + $0x874] ss:$8 sps:$4 sm:$0xff]  }
 0x1cb   :  { %2007 = vmatpush1.bf16.msra.mxu0 %v4137_v1  ;;  %2774 = vmatpush1.bf16.msra.mxu1 %v4137_v1  ;;  %v4200_v1 = vld [vmem:[%s5390_s1 + $0x870] ss:$8 sps:$4 sm:$0xff]  }
 0x1cc   :  { %2008 = vmatprep.subr.bf16.mxu0 %v4142_v2  ;;  %2775 = vmatprep.subr.bf16.mxu1 %v4142_v2  ;;  %v4205_v2 = vld [vmem:[%s5390_s1 + $0x884] ss:$8 sps:$4 sm:$0xff]  }
 0x1cf   :  { %2009 = vmatpush1.bf16.msra.mxu0 %v4140_v3  ;;  %2776 = vmatpush1.bf16.msra.mxu1 %v4140_v3  ;;  %v4203_v3 = vld [vmem:[%s5390_s1 + $0x880] ss:$8 sps:$4 sm:$0xff]  }
 0x1d0   :  { %2010 = vmatprep.subr.bf16.mxu0 %v4145_v4  ;;  %2777 = vmatprep.subr.bf16.mxu1 %v4145_v4  ;;  %v4208_v4 = vld [vmem:[%s5390_s1 + $0x894] ss:$8 sps:$4 sm:$0xff]  }
 0x1d3   :  { %2011 = vmatpush1.bf16.msra.mxu0 %v4143_v5  ;;  %2778 = vmatpush1.bf16.msra.mxu1 %v4143_v5  ;;  %v4206_v5 = vld [vmem:[%s5390_s1 + $0x890] ss:$8 sps:$4 sm:$0xff]  }
 0x1d4   :  { %2012 = vmatprep.subr.bf16.mxu0 %v4148_v6  ;;  %2779 = vmatprep.subr.bf16.mxu1 %v4148_v6  ;;  %v4211_v6 = vld [vmem:[%s5390_s1 + $0x8a4] ss:$8 sps:$4 sm:$0xff]  }
 0x1d7   :  { %2013 = vmatpush1.bf16.msra.mxu0 %v4146_v7  ;;  %2780 = vmatpush1.bf16.msra.mxu1 %v4146_v7  ;;  %v4209_v7 = vld [vmem:[%s5390_s1 + $0x8a0] ss:$8 sps:$4 sm:$0xff]  }
 0x1d8   :  { %2014 = vmatprep.subr.bf16.mxu0 %v4151_v8  ;;  %2781 = vmatprep.subr.bf16.mxu1 %v4151_v8  ;;  %v4214_v8 = vld [vmem:[%s5390_s1 + $0x8b4] ss:$8 sps:$4 sm:$0xff]  }
 0x1db   :  { %2015 = vmatpush1.bf16.msra.mxu0 %v4149_v9  ;;  %2782 = vmatpush1.bf16.msra.mxu1 %v4149_v9  ;;  %v4212_v9 = vld [vmem:[%s5390_s1 + $0x8b0] ss:$8 sps:$4 sm:$0xff]  }
 0x1dc   :  { %2016 = vmatprep.subr.bf16.mxu0 %v4154_v10  ;;  %2783 = vmatprep.subr.bf16.mxu1 %v4154_v10  ;;  %v4217_v10 = vld [vmem:[%s5390_s1 + $0x8c4] ss:$8 sps:$4 sm:$0xff]  }
 0x1df   :  { %2017 = vmatpush1.bf16.msra.mxu0 %v4152_v11  ;;  %2784 = vmatpush1.bf16.msra.mxu1 %v4152_v11  ;;  %v4215_v11 = vld [vmem:[%s5390_s1 + $0x8c0] ss:$8 sps:$4 sm:$0xff]  }
 0x1e0   :  { %2018 = vmatprep.subr.bf16.mxu0 %v4157_v12  ;;  %2785 = vmatprep.subr.bf16.mxu1 %v4157_v12  ;;  %v4220_v12 = vld [vmem:[%s5390_s1 + $0x8d4] ss:$8 sps:$4 sm:$0xff]  }
 0x1e3   :  { %2019 = vmatpush1.bf16.msra.mxu0 %v4155_v13  ;;  %2786 = vmatpush1.bf16.msra.mxu1 %v4155_v13  ;;  %v4218_v13 = vld [vmem:[%s5390_s1 + $0x8d0] ss:$8 sps:$4 sm:$0xff]  }
 0x1e4   :  { %2020 = vmatprep.subr.bf16.mxu0 %v4160_v14  ;;  %2787 = vmatprep.subr.bf16.mxu1 %v4160_v14  ;;  %v4223_v14 = vld [vmem:[%s5390_s1 + $0x8e4] ss:$8 sps:$4 sm:$0xff]  }
 0x1e7   :  { %2021 = vmatpush1.bf16.msra.mxu0 %v4158_v17  ;;  %2788 = vmatpush1.bf16.msra.mxu1 %v4158_v17  ;;  %v4221_v17 = vld [vmem:[%s5390_s1 + $0x8e0] ss:$8 sps:$4 sm:$0xff]  }
 0x1e8   :  { %2022 = vmatprep.subr.bf16.mxu0 %v4163_v18  ;;  %2789 = vmatprep.subr.bf16.mxu1 %v4163_v18  ;;  %v4233_v18 = vld [vmem:[%s5391_s0] ss:$8 sps:$4 sm:$0xfc]  }
 0x1eb   :  { %2023 = vmatpush1.bf16.msra.mxu0 %v4161_v21  ;;  %2790 = vmatpush1.bf16.msra.mxu1 %v4161_v21  ;;  %v3638_v21 = vcombine.low %v5156_v34, %v5156_v34 }
 0x1ec   :  { %2024 = vmatprep.subr.bf16.mxu0 %v4166_v22  ;;  %2791 = vmatprep.subr.bf16.mxu1 %v4166_v22  ;;  %v4235_v22 = vld [vmem:[%s5391_s0 + $0x18] ss:$8 sps:$4 sm:$0xfc]  }
 0x1ef   :  { %2025 = vmatpush1.bf16.msra.mxu0 %v4164_v23  ;;  %2792 = vmatpush1.bf16.msra.mxu1 %v4164_v23  ;;  %v3693_v23 = vcombine.low %v5161_v35, %v5161_v35 }
 0x1f0   :  { %2026 = vmatprep.subr.bf16.mxu0 %v4169_v24  ;;  %2793 = vmatprep.subr.bf16.mxu1 %v4169_v24  ;;  %v4226_v24 = vld [vmem:[%s5390_s1 + $0x8f4] ss:$8 sps:$4 sm:$0xff]  }
 0x1f1   :  { %v2833_v29 = vrot.slane %v3693_v23, 2 }
 0x1f3   :  { %2027 = vmatpush1.bf16.msra.mxu0 %v4167_v25  ;;  %2794 = vmatpush1.bf16.msra.mxu1 %v4167_v25  ;;  %v4224_v25 = vld [vmem:[%s5390_s1 + $0x8f0] ss:$8 sps:$4 sm:$0xff]  }
 0x1f4   :  { %2028 = vmatprep.subr.bf16.mxu0 %v4172_v26  ;;  %2795 = vmatprep.subr.bf16.mxu1 %v4172_v26  ;;  %v2099_v26 = vrot.slane %v4233_v18, 2 }
 0x1f7   :  { %2029 = vmatpush1.bf16.msra.mxu0 %v4170_v27  ;;  %2796 = vmatpush1.bf16.msra.mxu1 %v4170_v27  ;;  %v2100_v27 = vrot.slane %v3638_v21, 2 }
 0x1f8   :  { %2030 = vmatprep.subr.bf16.mxu0 %v4175_v28  ;;  %2797 = vmatprep.subr.bf16.mxu1 %v4175_v28  ;;  %v2832_v28 = vrot.slane %v4235_v22, 2 }
 0x1f9   :  { %v2101_v30 = vsel %vm2098_vm0, %v2099_v26, %v2100_v27 }
 0x1fa   :  { %v2834_v31 = vsel %vm2098_vm0, %v2832_v28, %v2833_v29  ;;  %vm3087_vm0 = vmor %vm5364_vm15, %vm5360_vm14 }
 0x1fb   :  { %2031 = vmatpush1.bf16.msra.mxu0 %v4173_v33  ;;  %2798 = vmatpush1.bf16.msra.mxu1 %v4173_v33 }
 0x1fc   :  { %2032 = vmatprep.subr.bf16.mxu0 %v4178_v61  ;;  %2799 = vmatprep.subr.bf16.mxu1 %v4178_v61 }
 0x1ff   :  { %2033 = vmatpush1.bf16.msra.mxu0 %v4176_v45  ;;  %2800 = vmatpush1.bf16.msra.mxu1 %v4176_v45 }
 0x200   :  { %2267 = vmatprep.subr.bf16.mxu0 %v4181_v46  ;;  %2840 = vmatprep.subr.bf16.mxu1 %v4181_v46 }
 0x202   :  { %2035 = vmatmul.mubr.bf16.vlgmr.msra.gmra.mrb[0].mxu0 %v1831_v47  ;;  %2802 = vmatmul.mubr.bf16.vlgmr.msra.gmra.mrb[0].mxu1 %v2758_v15 }
 0x203   :  { %2268 = vmatpush1.bf16.msra.mxu0 %v4179_v51  ;;  %2841 = vmatpush1.bf16.msra.mxu1 %v4179_v51 }
 0x204   :  { %2269 = vmatprep.subr.bf16.mxu0 %v4184_v52  ;;  %2842 = vmatprep.subr.bf16.mxu1 %v4184_v52 }
 0x205   :  { %2299 = vmatprep.mubr.bf16.mxu0 %v2104_v53  ;;  %2872 = vmatprep.mubr.bf16.mxu1 %v2837_v19 }
 0x207   :  { %2270 = vmatpush1.bf16.msra.mxu0 %v4182_v54  ;;  %2843 = vmatpush1.bf16.msra.mxu1 %v4182_v54 }
 0x208   :  { %2271 = vmatprep.subr.bf16.mxu0 %v4187_v55  ;;  %2844 = vmatprep.subr.bf16.mxu1 %v4187_v55 }
 0x20b   :  { %2272 = vmatpush1.bf16.msra.mxu0 %v4185_v56  ;;  %2845 = vmatpush1.bf16.msra.mxu1 %v4185_v56 }
 0x20c   :  { %2273 = vmatprep.subr.bf16.mxu0 %v4190_v20  ;;  %2846 = vmatprep.subr.bf16.mxu1 %v4190_v20 }
 0x20f   :  { %2274 = vmatpush1.bf16.msra.mxu0 %v4188_v57  ;;  %2847 = vmatpush1.bf16.msra.mxu1 %v4188_v57 }
 0x210   :  { %2275 = vmatprep.subr.bf16.mxu0 %v4193_v58  ;;  %2848 = vmatprep.subr.bf16.mxu1 %v4193_v58 }
 0x213   :  { %2276 = vmatpush1.bf16.msra.mxu0 %v4191_v59  ;;  %2849 = vmatpush1.bf16.msra.mxu1 %v4191_v59 }
 0x214   :  { %2277 = vmatprep.subr.bf16.mxu0 %v4196_v60  ;;  %2850 = vmatprep.subr.bf16.mxu1 %v4196_v60 }
 0x217   :  { %2278 = vmatpush1.bf16.msra.mxu0 %v4194_v43  ;;  %2851 = vmatpush1.bf16.msra.mxu1 %v4194_v43 }
 0x218   :  { %2279 = vmatprep.subr.bf16.mxu0 %v4199_v44  ;;  %2852 = vmatprep.subr.bf16.mxu1 %v4199_v44 }
 0x21b   :  { %2280 = vmatpush1.bf16.msra.mxu0 %v4197_v63  ;;  %2853 = vmatpush1.bf16.msra.mxu1 %v4197_v63 }
 0x21c   :  { %2281 = vmatprep.subr.bf16.mxu0 %v4202_v0  ;;  %2854 = vmatprep.subr.bf16.mxu1 %v4202_v0 }
 0x21f   :  { %2282 = vmatpush1.bf16.msra.mxu0 %v4200_v1  ;;  %2855 = vmatpush1.bf16.msra.mxu1 %v4200_v1 }
 0x220   :  { %2283 = vmatprep.subr.bf16.mxu0 %v4205_v2  ;;  %2856 = vmatprep.subr.bf16.mxu1 %v4205_v2 }
 0x223   :  { %2284 = vmatpush1.bf16.msra.mxu0 %v4203_v3  ;;  %2857 = vmatpush1.bf16.msra.mxu1 %v4203_v3 }
 0x224   :  { %2285 = vmatprep.subr.bf16.mxu0 %v4208_v4  ;;  %2858 = vmatprep.subr.bf16.mxu1 %v4208_v4 }
 0x227   :  { %2286 = vmatpush1.bf16.msra.mxu0 %v4206_v5  ;;  %2859 = vmatpush1.bf16.msra.mxu1 %v4206_v5 }
 0x228   :  { %2287 = vmatprep.subr.bf16.mxu0 %v4211_v6  ;;  %2860 = vmatprep.subr.bf16.mxu1 %v4211_v6 }
 0x22b   :  { %2288 = vmatpush1.bf16.msra.mxu0 %v4209_v7  ;;  %2861 = vmatpush1.bf16.msra.mxu1 %v4209_v7 }
 0x22c   :  { %2289 = vmatprep.subr.bf16.mxu0 %v4214_v8  ;;  %2862 = vmatprep.subr.bf16.mxu1 %v4214_v8 }
 0x22f   :  { %2290 = vmatpush1.bf16.msra.mxu0 %v4212_v9  ;;  %2863 = vmatpush1.bf16.msra.mxu1 %v4212_v9 }
 0x230   :  { %2291 = vmatprep.subr.bf16.mxu0 %v4217_v10  ;;  %2864 = vmatprep.subr.bf16.mxu1 %v4217_v10 }
 0x233   :  { %2292 = vmatpush1.bf16.msra.mxu0 %v4215_v11  ;;  %2865 = vmatpush1.bf16.msra.mxu1 %v4215_v11 }
 0x234   :  { %2293 = vmatprep.subr.bf16.mxu0 %v4220_v12  ;;  %2866 = vmatprep.subr.bf16.mxu1 %v4220_v12 }
 0x237   :  { %2294 = vmatpush1.bf16.msra.mxu0 %v4218_v13  ;;  %2867 = vmatpush1.bf16.msra.mxu1 %v4218_v13 }
 0x238   :  { %2295 = vmatprep.subr.bf16.mxu0 %v4223_v14  ;;  %2868 = vmatprep.subr.bf16.mxu1 %v4223_v14 }
 0x23b   :  { %2296 = vmatpush1.bf16.msra.mxu0 %v4221_v17  ;;  %2869 = vmatpush1.bf16.msra.mxu1 %v4221_v17 }
 0x23c   :  { %2297 = vmatprep.subr.bf16.mxu0 %v4226_v24  ;;  %2870 = vmatprep.subr.bf16.mxu1 %v4226_v24 }
 0x23f   :  { %2298 = vmatpush1.bf16.msra.mxu0 %v4224_v25  ;;  %2871 = vmatpush1.bf16.msra.mxu1 %v4224_v25 }
 0x242   :  { %2300 = vmatmul.mubr.bf16.vlgmr.msra.gmra.mrb[0].mxu0 %v2101_v30  ;;  %2873 = vmatmul.mubr.bf16.vlgmr.msra.gmra.mrb[0].mxu1 %v2834_v31 }
 0x315   :  { %v2301_v32 = vpop.f32.mrb[0].mxu0  ;;  %v2874_v33 = vpop.f32.mrb[0].mxu1 }
 0x316   :  { %v2318_v34 = vmul.f32 0.2, %v2301_v32  ;;  %vm2314_vm1 = vcmp.ge.f32.partialorder %v2301_v32, 0.0  ;;  %v2303_v35 = vpop.f32.mrb[1].mxu0  ;;  %v2876_v61 = vpop.f32.mrb[1].mxu1  ;;  %vm2887_vm2 = vcmp.ge.f32.partialorder %v2874_v33, 0.0 }
 0x317   :  { %v2891_v62 = vmul.f32 0.2, %v2874_v33  ;;  %v2305_v36 = vpop.f32.mrb[2].mxu0  ;;  %v2878_v37 = vpop.f32.mrb[2].mxu1  ;;  %vm2315_vm4 = vcmp.ge.f32.partialorder %v2303_v35, 0.0  ;;  %vm2888_vm6 = vcmp.ge.f32.partialorder %v2876_v61, 0.0 }
 0x318   :  { %v2319_v38 = vmul.f32 0.2, %v2303_v35  ;;  %vm2316_vm5 = vcmp.ge.f32.partialorder %v2305_v36, 0.0  ;;  %v2320_v39 = vmul.f32 0.2, %v2305_v36  ;;  %v5289_v40 = vsel %vm2314_vm1, %v2301_v32, %v2318_v34  ;;  %v2307_v42 = vpop.f32.mrb[3].mxu0 }
 0x319   :  { %vm2889_vm7 = vcmp.ge.f32.partialorder %v2878_v37, 0.0  ;;  %v2893_v41 = vmul.f32 0.2, %v2878_v37  ;;  %v2880_v45 = vpop.f32.mrb[3].mxu1  ;;  %v2892_v46 = vmul.f32 0.2, %v2876_v61  ;;  %v5298_v50 = vsel %vm2887_vm2, %v2874_v33, %v2891_v62 }
 0x31a   :  { %v5291_v47 = vsel %vm2316_vm5, %v2305_v36, %v2320_v39  ;;  %vm2317_vm8 = vcmp.ge.f32.partialorder %v2307_v42, 0.0  ;;  %v2321_v15 = vmul.f32 0.2, %v2307_v42  ;;  %vm2890_vm9 = vcmp.ge.f32.partialorder %v2880_v45, 0.0 }
 0x31b   :  { %v2900_v48 = vsel %vm2899_vm3, %v5291_v47, 0.0  ;;  %v5295_v16 = vsel %vm2889_vm7, %v2878_v37, %v2893_v41  ;;  %v2894_v49 = vmul.f32 0.2, %v2880_v45  ;;  %v5306_v19 = vsel %vm2315_vm4, %v2303_v35, %v2319_v38 }
 0x31c   :  { %v2901_v51 = vadd.f32 %v2900_v48, %v5289_v40  ;;  %v2918_v52 = vsel %vm2899_vm3, %v5295_v16, 0.0  ;;  %v5303_v53 = vsel %vm2317_vm8, %v2307_v42, %v2321_v15  ;;  %v5314_v20 = vsel %vm2888_vm6, %v2876_v61, %v2892_v46 }
 0x31d   :  { %v2919_v54 = vadd.f32 %v2918_v52, %v5298_v50  ;;  %v2908_v55 = vsel %vm2899_vm3, %v5303_v53, 0.0  ;;  %v5311_v56 = vsel %vm2890_vm9, %v2880_v45, %v2894_v49 }
 0x31e   :  { %v2902_v57 = vrot.slane %v2901_v51, 4  ;;  %v2909_v58 = vadd.f32 %v2908_v55, %v5306_v19  ;;  %v2926_v59 = vsel %vm2899_vm3, %v5311_v56, 0.0 }
 0x31f   :  { %v2920_v60 = vrot.slane %v2919_v54, 4  ;;  %v2927_v43 = vadd.f32 %v2926_v59, %v5314_v20 }
 0x320   :  { %v2903_v44 = vadd.f32 %v2902_v57, %v2901_v51  ;;  %v2910_v63 = vrot.slane %v2909_v58, 4 }
 0x321   :  { %v2921_v0 = vadd.f32 %v2920_v60, %v2919_v54  ;;  %v2928_v1 = vrot.slane %v2927_v43, 4 }
 0x322   :  { %v2904_v2 = vrot.slane %v2903_v44, 2  ;;  %v2911_v3 = vadd.f32 %v2910_v63, %v2909_v58 }
 0x323   :  { %v2922_v4 = vrot.slane %v2921_v0, 2  ;;  %v2929_v5 = vadd.f32 %v2928_v1, %v2927_v43 }
 0x324   :  { %v2905_v6 = vadd.f32 %v2904_v2, %v2903_v44  ;;  %v2912_v7 = vrot.slane %v2911_v3, 2 }
 0x325   :  { %v2923_v8 = vadd.f32 %v2922_v4, %v2921_v0  ;;  %v2930_v9 = vrot.slane %v2929_v5, 2 }
 0x326   :  { %v2906_v10 = vrot.slane %v2905_v6, 1  ;;  %v2913_v11 = vadd.f32 %v2912_v7, %v2911_v3 }
 0x327   :  { %v2924_v12 = vrot.slane %v2923_v8, 1  ;;  %v2931_v13 = vadd.f32 %v2930_v9, %v2929_v5 }
 0x328   :  { %v2907_v14 = vadd.f32 %v2906_v10, %v2905_v6  ;;  %v2914_v17 = vrot.slane %v2913_v11, 1 }
 0x329   :  { %v2925_v18 = vadd.f32 %v2924_v12, %v2923_v8  ;;  %v2932_v21 = vrot.slane %v2931_v13, 1 }
 0x32a   :  { %v2915_v22 = vadd.f32 %v2914_v17, %v2913_v11  ;;  %v2999_v17 = vlaneseq }
 0x32b   :  { %v2934_v23 = vadd.f32 %v2925_v18, %v2907_v14  ;;  %v2933_v24 = vadd.f32 %v2932_v21, %v2931_v13 }
 0x32d   :  { %v5320_v25 = vmul.f32 0.03846154, %v2934_v23  ;;  %v2935_v26 = vadd.f32 %v2933_v24, %v2915_v22 }
 0x32f   :  { %v2939_v27 = vsub.f32 %v5289_v40, %v5320_v25  ;;  %v2941_v28 = vsub.f32 %v5291_v47, %v5320_v25  ;;  %v2965_v29 = vsub.f32 %v5298_v50, %v5320_v25  ;;  %v2967_v30 = vsub.f32 %v5295_v16, %v5320_v25 }
 0x330   :  { %v5330_v31 = vmul.f32 0.03846154, %v2935_v26  ;;  %v3000_v26 = vshrl.u32 %v2999_v17, 7 }
 0x331   :  { %v2943_v32 = vmul.f32 %v2939_v27, %v2939_v27  ;;  %v2945_v33 = vmul.f32 %v2941_v28, %v2941_v28  ;;  %v2969_v34 = vmul.f32 %v2965_v29, %v2965_v29  ;;  %v2971_v35 = vmul.f32 %v2967_v30, %v2967_v30  ;;  %v2997_v30 = vld [vmem:[%s5392_s2] sm:$0x3] }
 0x332   :  { %v2940_v61 = vsub.f32 %v5306_v19, %v5330_v31  ;;  %v2942_v62 = vsub.f32 %v5303_v53, %v5330_v31  ;;  %v2966_v36 = vsub.f32 %v5314_v20, %v5330_v31  ;;  %v2968_v37 = vsub.f32 %v5311_v56, %v5330_v31 }
 0x333   :  { %v2947_v38 = vsel %vm2899_vm3, %v2945_v33, 0.0  ;;  %v2973_v39 = vsel %vm2899_vm3, %v2971_v35, 0.0  ;;  %v3001_v29 = vsub.s32 0, %v3000_v26  ;;  %v3005_v33 = vsub.s32 1, %v3000_v26 }
 0x334   :  { %v2948_v41 = vadd.f32 %v2947_v38, %v2943_v32  ;;  %v2974_v42 = vadd.f32 %v2973_v39, %v2969_v34  ;;  %v2944_v45 = vmul.f32 %v2940_v61, %v2940_v61  ;;  %v2946_v46 = vmul.f32 %v2942_v62, %v2942_v62 }
 0x335   :  { %v2970_v15 = vmul.f32 %v2966_v36, %v2966_v36  ;;  %v2972_v48 = vmul.f32 %v2968_v37, %v2968_v37  ;;  %v3002_v32 = vrot.slane %v2997_v30, %v3001_v29  ;;  %v4245_v35 = vmov 1966171168  }
 0x336   :  { %v2949_v49 = vrot.slane %v2948_v41, 4  ;;  %v2975_v51 = vrot.slane %v2974_v42, 4  ;;  %v2955_v52 = vsel %vm2899_vm3, %v2946_v46, 0.0  ;;  %v3018_v61 = vunpack.c.l.s4 %v4245_v35 }
 0x337   :  { %v2956_v54 = vadd.f32 %v2955_v52, %v2944_v45  ;;  %v2981_v55 = vsel %vm2899_vm3, %v2972_v48, 0.0  ;;  %v3006_v36 = vrot.slane %v2997_v30, %v3005_v33 }
 0x338   :  { %v2950_v57 = vadd.f32 %v2949_v49, %v2948_v41  ;;  %v2976_v58 = vadd.f32 %v2975_v51, %v2974_v42  ;;  %v2982_v59 = vadd.f32 %v2981_v55, %v2970_v15  ;;  %v3019_v41 = vunpack.c.0.s8 %v3018_v61 }
 0x339   :  { %v2957_v60 = vrot.slane %v2956_v54, 4 }
 0x33a   :  { %v2951_v43 = vrot.slane %v2950_v57, 2  ;;  %v2977_v44 = vrot.slane %v2976_v58, 2  ;;  %v2983_v63 = vrot.slane %v2982_v59, 4  ;;  %v3022_v51 = vsub.s32 %v3019_v41, %v3000_v26 }
 0x33b   :  { %v2958_v0 = vadd.f32 %v2957_v60, %v2956_v54 }
 0x33c   :  { %v2952_v1 = vadd.f32 %v2951_v43, %v2950_v57  ;;  %v2978_v2 = vadd.f32 %v2977_v44, %v2976_v58  ;;  %v2984_v3 = vadd.f32 %v2983_v63, %v2982_v59 }
 0x33d   :  { %v2959_v4 = vrot.slane %v2958_v0, 2 }
 0x33e   :  { %v2953_v5 = vrot.slane %v2952_v1, 1  ;;  %v2979_v6 = vrot.slane %v2978_v2, 1  ;;  %v2985_v7 = vrot.slane %v2984_v3, 2 }
 0x33f   :  { %v2960_v8 = vadd.f32 %v2959_v4, %v2958_v0 }
 0x340   :  { %v2954_v9 = vadd.f32 %v2953_v5, %v2952_v1  ;;  %v2980_v10 = vadd.f32 %v2979_v6, %v2978_v2  ;;  %v2986_v11 = vadd.f32 %v2985_v7, %v2984_v3  ;;  %v3088_v2 = vld [vmem:[%s5394_s4 + $0x8] sm:$0x77]  ;;  %v3700_v5 = vld [vmem:[%s5394_s4 + $0x18] sm:$0x77] }
 0x341   :  { %v2961_v12 = vrot.slane %v2960_v8, 1 }
 0x342   :  { %v2989_v13 = vadd.f32 %v2980_v10, %v2954_v9  ;;  %v2987_v14 = vrot.slane %v2986_v11, 1 }
 0x343   :  { %v2962_v18 = vadd.f32 %v2961_v12, %v2960_v8 }
 0x344   :  { %v2991_v21 = vmul.f32 0.03846154, %v2989_v13  ;;  %v2988_v22 = vadd.f32 %v2987_v14, %v2986_v11 }
 0x346   :  { %v2993_v23 = vadd.f32 1e-05, %v2991_v21  ;;  %v2990_v24 = vadd.f32 %v2988_v22, %v2962_v18 }
 0x348   :  { %4237 = vrsqrt.f32 %v2993_v23  ;;  %v2992_v27 = vmul.f32 0.03846154, %v2990_v24 }
 0x34a   :  { %v2994_v28 = vadd.f32 1e-05, %v2992_v27 }
 0x34c   :  { %4239 = vrsqrt.f32 %v2994_v28 }
 0x352   :  { %v4238_v34 = vpop.eup %4237 }
 0x353   :  { %v3009_v62 = vmul.f32 %v4238_v34, %v3002_v32 }
 0x355   :  { %v3012_v37 = vmul.f32 %v3009_v62, %v5320_v25  ;;  %v3036_v38 = vrot.slane %v3009_v62, %v3001_v29 }
 0x356   :  { %v4240_v39 = vpop.eup %4239 }
 0x357   :  { %v3041_v42 = vmul.f32 %v3036_v38, %v5289_v40  ;;  %v3043_v45 = vmul.f32 %v3036_v38, %v5291_v47  ;;  %v3060_v46 = vmul.f32 %v3036_v38, %v5298_v50  ;;  %v3062_v15 = vmul.f32 %v3036_v38, %v5295_v16  ;;  %v3011_v47 = vld [vmem:[%s5393_s3] sm:$0x3] }
 0x358   :  { %v3010_v48 = vmul.f32 %v4240_v39, %v3006_v36 }
 0x35a   :  { %v3013_v49 = vmul.f32 %v3010_v48, %v5330_v31  ;;  %v3040_v52 = vrot.slane %v3010_v48, %v3001_v29 }
 0x35c   :  { %v3016_v54 = vcombine.low %v3012_v37, %v3013_v49  ;;  %v3042_v55 = vmul.f32 %v3040_v52, %v5306_v19  ;;  %v3044_v25 = vmul.f32 %v3040_v52, %v5303_v53  ;;  %v3061_v57 = vmul.f32 %v3040_v52, %v5314_v20 }
 0x35d   :  { %v3063_v40 = vmul.f32 %v3040_v52, %v5311_v56 }
 0x35e   :  { %v3023_v58 = vrot.slane %v3016_v54, %v3022_v51 }
 0x360   :  { %v3030_v16 = vrot.slane %v3023_v58, %v3022_v51 }
 0x362   :  { %v3032_v50 = vsub.f32 %v3011_v47, %v3030_v16 }
 0x364   :  { %v3049_v53 = vrot.slane %v3032_v50, %v3001_v29  ;;  %v3053_v19 = vrot.slane %v3032_v50, %v3005_v33 }
 0x366   :  { %v3056_v56 = vadd.f32 %v3049_v53, %v3041_v42  ;;  %v3057_v59 = vadd.f32 %v3053_v19, %v3042_v55  ;;  %v3058_v60 = vadd.f32 %v3049_v53, %v3043_v45  ;;  %v3059_v43 = vadd.f32 %v3053_v19, %v3044_v25 }
 0x367   :  { %v3064_v44 = vadd.f32 %v3060_v46, %v3049_v53  ;;  %v3065_v63 = vadd.f32 %v3061_v57, %v3053_v19  ;;  %v3066_v0 = vadd.f32 %v3062_v15, %v3049_v53  ;;  %v3067_v1 = vadd.f32 %v3063_v40, %v3053_v19 }
 0x368   :  { %v3702_v3 = vpack.c.bf16 %v3057_v59, %v3056_v56  ;;  %v3703_v4 = vpack.c.bf16 %v3059_v43, %v3058_v60 }
 0x369   :  { %v3704_v6 = vpack.c.bf16 %v3065_v63, %v3064_v44  ;;  %v3705_v7 = vpack.c.bf16 %v3067_v1, %v3066_v0 }
 0x36a   :  { %3080 = vst [vmem:[%s5394_s4] sm:$0xff] %v3702_v3  ;;  %v3089_v8 = vsel %vm3087_vm0, %v3703_v4, %v3088_v2 }
 0x36b   :  { %3090 = vst [vmem:[%s5394_s4 + $0x8] sm:$0x77] %v3089_v8  ;;  %3699 = vst [vmem:[%s5394_s4 + $0x10] sm:$0xff] %v3704_v6  ;;  %v3106_v9 = vsel %vm3087_vm0, %v3705_v7, %v3700_v5 }
 0x36c   :  { %3701 = vst [vmem:[%s5394_s4 + $0x18] sm:$0x77] %v3106_v9 }

// kernel: generator_forward.8
= control target key start
LH: loop header
LB: loop body
LE: loop exit
PB: predicated region body
PF: predicated region fallthrough
CT: control target
= control target key end

     0   :  { %vm2240_vm2 = vcmask 1044480   ;;  %vm2422_vm9 = vcmask 1042432   ;;  %vm2423_vm10 = vsmask.f32 2304  ;;  %vm2425_vm11 = vcmask 1046532   ;;  %s4228_s1 = inlined_call_operand.vmem [shape: bf16[7,256,256], index: 1, kind: input, shape index: {}]   ;;  %s4229_s0 = inlined_call_operand.vmem [shape: bf16[2,2,16,256], index: 0, kind: input, shape index: {}]   ;;  %s4230_s2 = inlined_call_operand.vmem [shape: f32[1,256], index: 2, kind: input, shape index: {}]   ;;  %s4231_s3 = inlined_call_operand.vmem [shape: f32[1,256], index: 3, kind: input, shape index: {}]   ;;  %s4232_s4 = inlined_call_operand.vmem [shape: bf16[2,13,256], index: 4, kind: output, shape index: {}]  }
   0x1   :  { %v2957_v0 = vld [vmem:[%s4228_s1 + $0x104] ss:$8 sps:$4 sm:$0xff]   ;;  %v2959_v1 = vld [vmem:[%s4228_s1 + $0x100] ss:$8 sps:$4 sm:$0xff]   ;;  %v2960_v2 = vld [vmem:[%s4228_s1 + $0x114] ss:$8 sps:$4 sm:$0xff]  }
   0x2   :  { %257 = vmatprep.subr.bf16.mxu0 %v2957_v0  ;;  %1819 = vmatprep.subr.bf16.mxu1 %v2957_v0  ;;  %v2962_v3 = vld [vmem:[%s4228_s1 + $0x110] ss:$8 sps:$4 sm:$0xff]   ;;  %v2963_v4 = vld [vmem:[%s4228_s1 + $0x124] ss:$8 sps:$4 sm:$0xff]   ;;  %v2965_v5 = vld [vmem:[%s4228_s1 + $0x120] ss:$8 sps:$4 sm:$0xff]  }
   0x3   :  { %258 = vmatpush1.bf16.msra.mxu0 %v2959_v1  ;;  %1820 = vmatpush1.bf16.msra.mxu1 %v2959_v1  ;;  %v2966_v6 = vld [vmem:[%s4228_s1 + $0x134] ss:$8 sps:$4 sm:$0xff]   ;;  %v2968_v7 = vld [vmem:[%s4228_s1 + $0x130] ss:$8 sps:$4 sm:$0xff]   ;;  %v2969_v8 = vld [vmem:[%s4228_s1 + $0x144] ss:$8 sps:$4 sm:$0xff]  }
   0x4   :  { %259 = vmatprep.subr.bf16.mxu0 %v2960_v2  ;;  %1821 = vmatprep.subr.bf16.mxu1 %v2960_v2  ;;  %v2971_v9 = vld [vmem:[%s4228_s1 + $0x140] ss:$8 sps:$4 sm:$0xff]   ;;  %v2972_v10 = vld [vmem:[%s4228_s1 + $0x154] ss:$8 sps:$4 sm:$0xff]   ;;  %v2974_v11 = vld [vmem:[%s4228_s1 + $0x150] ss:$8 sps:$4 sm:$0xff]  }
   0x5   :  { %v2975_v12 = vld [vmem:[%s4228_s1 + $0x164] ss:$8 sps:$4 sm:$0xff]   ;;  %v2977_v14 = vld [vmem:[%s4228_s1 + $0x160] ss:$8 sps:$4 sm:$0xff]   ;;  %v2978_v15 = vld [vmem:[%s4228_s1 + $0x174] ss:$8 sps:$4 sm:$0xff]  }
   0x6   :  { %v3389_v13 = vld [vmem:[%s4229_s0 + $0x24] ss:$8 sps:$4 sm:$0x7f]   ;;  %v3400_v16 = vld [vmem:[%s4229_s0 + $0x34] ss:$8 sps:$4 sm:$0x7f]   ;;  %vm4198_vm13 = vmand %vm2422_vm9, %vm2423_vm10 }
   0x7   :  { %260 = vmatpush1.bf16.msra.mxu0 %v2962_v3  ;;  %1822 = vmatpush1.bf16.msra.mxu1 %v2962_v3  ;;  %v2980_v17 = vld [vmem:[%s4228_s1 + $0x170] ss:$8 sps:$4 sm:$0xff]   ;;  %v2981_v18 = vld [vmem:[%s4228_s1 + $0x184] ss:$8 sps:$4 sm:$0xff]   ;;  %v2983_v19 = vld [vmem:[%s4228_s1 + $0x180] ss:$8 sps:$4 sm:$0xff]  }
   0x8   :  { %261 = vmatprep.subr.bf16.mxu0 %v2963_v4  ;;  %1823 = vmatprep.subr.bf16.mxu1 %v2963_v4  ;;  %v2984_v20 = vld [vmem:[%s4228_s1 + $0x194] ss:$8 sps:$4 sm:$0xff]   ;;  %v2986_v21 = vld [vmem:[%s4228_s1 + $0x190] ss:$8 sps:$4 sm:$0xff]   ;;  %v2987_v22 = vld [vmem:[%s4228_s1 + $0x1a4] ss:$8 sps:$4 sm:$0xff]  }
   0x9   :  { %289 = vmatprep.mubr.bf16.mxu0 %v3389_v13  ;;  %1851 = vmatprep.mubr.bf16.mxu1 %v3400_v16  ;;  %v2989_v23 = vld [vmem:[%s4228_s1 + $0x1a0] ss:$8 sps:$4 sm:$0xff]   ;;  %v2990_v24 = vld [vmem:[%s4228_s1 + $0x1b4] ss:$8 sps:$4 sm:$0xff]   ;;  %v2992_v25 = vld [vmem:[%s4228_s1 + $0x1b0] ss:$8 sps:$4 sm:$0xff]  }
   0xa   :  { %v2993_v26 = vld [vmem:[%s4228_s1 + $0x1c4] ss:$8 sps:$4 sm:$0xff]   ;;  %v2995_v27 = vld [vmem:[%s4228_s1 + $0x1c0] ss:$8 sps:$4 sm:$0xff]   ;;  %v2996_v28 = vld [vmem:[%s4228_s1 + $0x1d4] ss:$8 sps:$4 sm:$0xff]  }
   0xb   :  { %262 = vmatpush1.bf16.msra.mxu0 %v2965_v5  ;;  %1824 = vmatpush1.bf16.msra.mxu1 %v2965_v5  ;;  %v2998_v29 = vld [vmem:[%s4228_s1 + $0x1d0] ss:$8 sps:$4 sm:$0xff]   ;;  %v2999_v30 = vld [vmem:[%s4228_s1 + $0x1e4] ss:$8 sps:$4 sm:$0xff]   ;;  %v3001_v31 = vld [vmem:[%s4228_s1 + $0x1e0] ss:$8 sps:$4 sm:$0xff]  }
   0xc   :  { %263 = vmatprep.subr.bf16.mxu0 %v2966_v6  ;;  %1825 = vmatprep.subr.bf16.mxu1 %v2966_v6  ;;  %v3002_v32 = vld [vmem:[%s4228_s1 + $0x1f4] ss:$8 sps:$4 sm:$0xff]   ;;  %v3004_v33 = vld [vmem:[%s4228_s1 + $0x1f0] ss:$8 sps:$4 sm:$0xff]   ;;  %v3009_v34 = vld [vmem:[%s4228_s1 + $0x4] ss:$8 sps:$4 sm:$0xff]  }
   0xd   :  { %v3461_v35 = vld [vmem:[%s4229_s0 + $0x20] ss:$8 sps:$4 sm:$0x7f]   ;;  %v3466_v36 = vld [vmem:[%s4229_s0 + $0x30] ss:$8 sps:$4 sm:$0x7f]  }
   0xe   :  { %v3007_v37 = vld [vmem:[%s4228_s1] ss:$8 sps:$4 sm:$0xff]   ;;  %v3016_v38 = vld [vmem:[%s4228_s1 + $0x14] ss:$8 sps:$4 sm:$0xff]   ;;  %v3014_v41 = vld [vmem:[%s4228_s1 + $0x10] ss:$8 sps:$4 sm:$0xff]  }
   0xf   :  { %264 = vmatpush1.bf16.msra.mxu0 %v2968_v7  ;;  %1826 = vmatpush1.bf16.msra.mxu1 %v2968_v7  ;;  %v3477_v39 = vld [vmem:[%s4229_s0 + $0x4] ss:$8 sps:$4 sm:$0x7f]   ;;  %v3482_v40 = vld [vmem:[%s4229_s0 + $0x14] ss:$8 sps:$4 sm:$0x7f]  }
  0x10   :  { %265 = vmatprep.subr.bf16.mxu0 %v2969_v8  ;;  %1827 = vmatprep.subr.bf16.mxu1 %v2969_v8  ;;  %v3019_v42 = vld [vmem:[%s4228_s1 + $0x24] ss:$8 sps:$4 sm:$0xff]   ;;  %v3017_v43 = vld [vmem:[%s4228_s1 + $0x20] ss:$8 sps:$4 sm:$0xff]   ;;  %v3022_v44 = vld [vmem:[%s4228_s1 + $0x34] ss:$8 sps:$4 sm:$0xff]  }
  0x11   :  { %v3020_v45 = vld [vmem:[%s4228_s1 + $0x30] ss:$8 sps:$4 sm:$0xff]   ;;  %v3025_v46 = vld [vmem:[%s4228_s1 + $0x44] ss:$8 sps:$4 sm:$0xff]   ;;  %v3023_v47 = vld [vmem:[%s4228_s1 + $0x40] ss:$8 sps:$4 sm:$0xff]  }
  0x12   :  { %v3028_v48 = vld [vmem:[%s4228_s1 + $0x54] ss:$8 sps:$4 sm:$0xff]   ;;  %v3026_v49 = vld [vmem:[%s4228_s1 + $0x50] ss:$8 sps:$4 sm:$0xff]   ;;  %v3031_v50 = vld [vmem:[%s4228_s1 + $0x64] ss:$8 sps:$4 sm:$0xff]  }
  0x13   :  { %266 = vmatpush1.bf16.msra.mxu0 %v2971_v9  ;;  %1828 = vmatpush1.bf16.msra.mxu1 %v2971_v9  ;;  %v3029_v51 = vld [vmem:[%s4228_s1 + $0x60] ss:$8 sps:$4 sm:$0xff]   ;;  %v3034_v52 = vld [vmem:[%s4228_s1 + $0x74] ss:$8 sps:$4 sm:$0xff]   ;;  %v3032_v53 = vld [vmem:[%s4228_s1 + $0x70] ss:$8 sps:$4 sm:$0xff]  }
  0x14   :  { %267 = vmatprep.subr.bf16.mxu0 %v2972_v10  ;;  %1829 = vmatprep.subr.bf16.mxu1 %v2972_v10  ;;  %v3037_v54 = vld [vmem:[%s4228_s1 + $0x84] ss:$8 sps:$4 sm:$0xff]   ;;  %v3035_v55 = vld [vmem:[%s4228_s1 + $0x80] ss:$8 sps:$4 sm:$0xff]   ;;  %v3040_v56 = vld [vmem:[%s4228_s1 + $0x94] ss:$8 sps:$4 sm:$0xff]  }
  0x15   :  { %v3038_v57 = vld [vmem:[%s4228_s1 + $0x90] ss:$8 sps:$4 sm:$0xff]   ;;  %v3043_v58 = vld [vmem:[%s4228_s1 + $0xa4] ss:$8 sps:$4 sm:$0xff]   ;;  %v3041_v59 = vld [vmem:[%s4228_s1 + $0xa0] ss:$8 sps:$4 sm:$0xff]  }
  0x16   :  { %v3046_v60 = vld [vmem:[%s4228_s1 + $0xb4] ss:$8 sps:$4 sm:$0xff]   ;;  %v3044_v61 = vld [vmem:[%s4228_s1 + $0xb0] ss:$8 sps:$4 sm:$0xff]   ;;  %v3049_v62 = vld [vmem:[%s4228_s1 + $0xc4] ss:$8 sps:$4 sm:$0xff]  }
  0x17   :  { %268 = vmatpush1.bf16.msra.mxu0 %v2974_v11  ;;  %1830 = vmatpush1.bf16.msra.mxu1 %v2974_v11  ;;  %v3047_v63 = vld [vmem:[%s4228_s1 + $0xc0] ss:$8 sps:$4 sm:$0xff]   ;;  %v3052_v0 = vld [vmem:[%s4228_s1 + $0xd4] ss:$8 sps:$4 sm:$0xff]   ;;  %v3050_v1 = vld [vmem:[%s4228_s1 + $0xd0] ss:$8 sps:$4 sm:$0xff]  }
  0x18   :  { %269 = vmatprep.subr.bf16.mxu0 %v2975_v12  ;;  %1831 = vmatprep.subr.bf16.mxu1 %v2975_v12  ;;  %v3055_v2 = vld [vmem:[%s4228_s1 + $0xe4] ss:$8 sps:$4 sm:$0xff]   ;;  %v3053_v3 = vld [vmem:[%s4228_s1 + $0xe0] ss:$8 sps:$4 sm:$0xff]   ;;  %v3058_v4 = vld [vmem:[%s4228_s1 + $0xf4] ss:$8 sps:$4 sm:$0xff]  }
  0x19   :  { %v556_v5 = vshll.u32 %v3477_v39, 16  ;;  %v1925_v6 = vshll.u32 %v3482_v40, 16  ;;  %v3056_v7 = vld [vmem:[%s4228_s1 + $0xf0] ss:$8 sps:$4 sm:$0xff]   ;;  %v3064_v8 = vld [vmem:[%s4228_s1 + $0x204] ss:$8 sps:$4 sm:$0xff]  }
  0x1a   :  { %v554_v9 = vshrl.u32 %v3477_v39, 16  ;;  %v1923_v11 = vshrl.u32 %v3482_v40, 16  ;;  %vm2426_vm12 = vsmask.f32 6400 }
  0x1b   :  { %270 = vmatpush1.bf16.msra.mxu0 %v2977_v14  ;;  %1832 = vmatpush1.bf16.msra.mxu1 %v2977_v14  ;;  %v558_v10 = vrot.slane %v556_v5, 1  ;;  %v1927_v12 = vrot.slane %v1925_v6, 1  ;;  %v3585_v14 = vld [vmem:[%s4229_s0] ss:$8 sps:$4 sm:$0x7f]   ;;  %vm4202_vm14 = vmand %vm2425_vm11, %vm2426_vm12 }
  0x1c   :  { %271 = vmatprep.subr.bf16.mxu0 %v2978_v15  ;;  %1833 = vmatprep.subr.bf16.mxu1 %v2978_v15  ;;  %v3590_v15 = vld [vmem:[%s4229_s0 + $0x10] ss:$8 sps:$4 sm:$0x7f]   ;;  %v3121_v6 = vld [vmem:[%s4228_s1 + $0x324] ss:$8 sps:$4 sm:$0xff]   ;;  %vm2428_vm15 = vmor %vm4202_vm14, %vm4198_vm13 }
  0x1f   :  { %272 = vmatpush1.bf16.msra.mxu0 %v2980_v17  ;;  %1834 = vmatpush1.bf16.msra.mxu1 %v2980_v17  ;;  %v3062_v17 = vld [vmem:[%s4228_s1 + $0x200] ss:$8 sps:$4 sm:$0xff]  }
  0x20   :  { %273 = vmatprep.subr.bf16.mxu0 %v2981_v18  ;;  %1835 = vmatprep.subr.bf16.mxu1 %v2981_v18  ;;  %v3070_v18 = vld [vmem:[%s4228_s1 + $0x214] ss:$8 sps:$4 sm:$0xff]  }
  0x23   :  { %274 = vmatpush1.bf16.msra.mxu0 %v2983_v19  ;;  %1836 = vmatpush1.bf16.msra.mxu1 %v2983_v19  ;;  %v559_v19 = vor.u32 %v558_v10, %v554_v9  ;;  %v3122_v9 = vld [vmem:[%s4228_s1 + $0x330] ss:$8 sps:$4 sm:$0xff]   ;;  %v3127_v10 = vld [vmem:[%s4228_s1 + $0x344] ss:$8 sps:$4 sm:$0xff]  }
  0x24   :  { %275 = vmatprep.subr.bf16.mxu0 %v2984_v20  ;;  %1837 = vmatprep.subr.bf16.mxu1 %v2984_v20  ;;  %v1928_v20 = vor.u32 %v1927_v12, %v1923_v11  ;;  %v3125_v11 = vld [vmem:[%s4228_s1 + $0x340] ss:$8 sps:$4 sm:$0xff]   ;;  %v3130_v12 = vld [vmem:[%s4228_s1 + $0x354] ss:$8 sps:$4 sm:$0xff]  }
  0x27   :  { %276 = vmatpush1.bf16.msra.mxu0 %v2986_v21  ;;  %1838 = vmatpush1.bf16.msra.mxu1 %v2986_v21  ;;  %v3068_v21 = vld [vmem:[%s4228_s1 + $0x210] ss:$8 sps:$4 sm:$0xff]  }
  0x28   :  { %277 = vmatprep.subr.bf16.mxu0 %v2987_v22  ;;  %1839 = vmatprep.subr.bf16.mxu1 %v2987_v22  ;;  %v3073_v22 = vld [vmem:[%s4228_s1 + $0x224] ss:$8 sps:$4 sm:$0xff]  }
  0x2b   :  { %278 = vmatpush1.bf16.msra.mxu0 %v2989_v23  ;;  %1840 = vmatpush1.bf16.msra.mxu1 %v2989_v23  ;;  %v3071_v23 = vld [vmem:[%s4228_s1 + $0x220] ss:$8 sps:$4 sm:$0xff]  }
  0x2c   :  { %279 = vmatprep.subr.bf16.mxu0 %v2990_v24  ;;  %1841 = vmatprep.subr.bf16.mxu1 %v2990_v24  ;;  %v3076_v24 = vld [vmem:[%s4228_s1 + $0x234] ss:$8 sps:$4 sm:$0xff]  }
  0x2f   :  { %280 = vmatpush1.bf16.msra.mxu0 %v2992_v25  ;;  %1842 = vmatpush1.bf16.msra.mxu1 %v2992_v25  ;;  %v3074_v25 = vld [vmem:[%s4228_s1 + $0x230] ss:$8 sps:$4 sm:$0xff]  }
  0x30   :  { %281 = vmatprep.subr.bf16.mxu0 %v2993_v26  ;;  %1843 = vmatprep.subr.bf16.mxu1 %v2993_v26  ;;  %v3079_v26 = vld [vmem:[%s4228_s1 + $0x244] ss:$8 sps:$4 sm:$0xff]  }
  0x33   :  { %282 = vmatpush1.bf16.msra.mxu0 %v2995_v27  ;;  %1844 = vmatpush1.bf16.msra.mxu1 %v2995_v27  ;;  %v3077_v27 = vld [vmem:[%s4228_s1 + $0x240] ss:$8 sps:$4 sm:$0xff]  }
  0x34   :  { %283 = vmatprep.subr.bf16.mxu0 %v2996_v28  ;;  %1845 = vmatprep.subr.bf16.mxu1 %v2996_v28  ;;  %v3082_v28 = vld [vmem:[%s4228_s1 + $0x254] ss:$8 sps:$4 sm:$0xff]  }
  0x37   :  { %284 = vmatpush1.bf16.msra.mxu0 %v2998_v29  ;;  %1846 = vmatpush1.bf16.msra.mxu1 %v2998_v29  ;;  %v3080_v29 = vld [vmem:[%s4228_s1 + $0x250] ss:$8 sps:$4 sm:$0xff]  }
  0x38   :  { %285 = vmatprep.subr.bf16.mxu0 %v2999_v30  ;;  %1847 = vmatprep.subr.bf16.mxu1 %v2999_v30  ;;  %v3085_v30 = vld [vmem:[%s4228_s1 + $0x264] ss:$8 sps:$4 sm:$0xff]  }
  0x3b   :  { %286 = vmatpush1.bf16.msra.mxu0 %v3001_v31  ;;  %1848 = vmatpush1.bf16.msra.mxu1 %v3001_v31  ;;  %v3083_v31 = vld [vmem:[%s4228_s1 + $0x260] ss:$8 sps:$4 sm:$0xff]  }
  0x3c   :  { %287 = vmatprep.subr.bf16.mxu0 %v3002_v32  ;;  %1849 = vmatprep.subr.bf16.mxu1 %v3002_v32  ;;  %v3088_v32 = vld [vmem:[%s4228_s1 + $0x274] ss:$8 sps:$4 sm:$0xff]  }
  0x3f   :  { %288 = vmatpush1.bf16.msra.mxu0 %v3004_v33  ;;  %1850 = vmatpush1.bf16.msra.mxu1 %v3004_v33  ;;  %v3086_v33 = vld [vmem:[%s4228_s1 + $0x270] ss:$8 sps:$4 sm:$0xff]  }
  0x40   :  { %470 = vmatprep.subr.bf16.mxu0 %v3009_v34  ;;  %1872 = vmatprep.subr.bf16.mxu1 %v3009_v34  ;;  %v3091_v34 = vld [vmem:[%s4228_s1 + $0x284] ss:$8 sps:$4 sm:$0xff]  }
  0x42   :  { %290 = vmatmul.mubr.bf16.vlgmr.msra.gmra.mrb[0].mxu0 %v3461_v35  ;;  %1852 = vmatmul.mubr.bf16.vlgmr.msra.gmra.mrb[0].mxu1 %v3466_v36 }
  0x43   :  { %471 = vmatpush1.bf16.msra.mxu0 %v3007_v37  ;;  %1873 = vmatpush1.bf16.msra.mxu1 %v3007_v37  ;;  %v3089_v37 = vld [vmem:[%s4228_s1 + $0x280] ss:$8 sps:$4 sm:$0xff]  }
  0x44   :  { %472 = vmatprep.subr.bf16.mxu0 %v3016_v38  ;;  %1874 = vmatprep.subr.bf16.mxu1 %v3016_v38  ;;  %v3094_v38 = vld [vmem:[%s4228_s1 + $0x294] ss:$8 sps:$4 sm:$0xff]  }
  0x45   :  { %502 = vmatprep.mubr.bf16.mxu0 %v3477_v39  ;;  %1904 = vmatprep.mubr.bf16.mxu1 %v3482_v40  ;;  %v3092_v39 = vld [vmem:[%s4228_s1 + $0x290] ss:$8 sps:$4 sm:$0xff]   ;;  %v3097_v40 = vld [vmem:[%s4228_s1 + $0x2a4] ss:$8 sps:$4 sm:$0xff]  }
  0x47   :  { %473 = vmatpush1.bf16.msra.mxu0 %v3014_v41  ;;  %1875 = vmatpush1.bf16.msra.mxu1 %v3014_v41  ;;  %v3095_v41 = vld [vmem:[%s4228_s1 + $0x2a0] ss:$8 sps:$4 sm:$0xff]  }
  0x48   :  { %474 = vmatprep.subr.bf16.mxu0 %v3019_v42  ;;  %1876 = vmatprep.subr.bf16.mxu1 %v3019_v42  ;;  %v3100_v42 = vld [vmem:[%s4228_s1 + $0x2b4] ss:$8 sps:$4 sm:$0xff]  }
  0x4b   :  { %475 = vmatpush1.bf16.msra.mxu0 %v3017_v43  ;;  %1877 = vmatpush1.bf16.msra.mxu1 %v3017_v43  ;;  %v3098_v43 = vld [vmem:[%s4228_s1 + $0x2b0] ss:$8 sps:$4 sm:$0xff]  }
  0x4c   :  { %476 = vmatprep.subr.bf16.mxu0 %v3022_v44  ;;  %1878 = vmatprep.subr.bf16.mxu1 %v3022_v44  ;;  %v3103_v44 = vld [vmem:[%s4228_s1 + $0x2c4] ss:$8 sps:$4 sm:$0xff]  }
  0x4f   :  { %477 = vmatpush1.bf16.msra.mxu0 %v3020_v45  ;;  %1879 = vmatpush1.bf16.msra.mxu1 %v3020_v45  ;;  %v3101_v45 = vld [vmem:[%s4228_s1 + $0x2c0] ss:$8 sps:$4 sm:$0xff]  }
  0x50   :  { %478 = vmatprep.subr.bf16.mxu0 %v3025_v46  ;;  %1880 = vmatprep.subr.bf16.mxu1 %v3025_v46  ;;  %v3106_v46 = vld [vmem:[%s4228_s1 + $0x2d4] ss:$8 sps:$4 sm:$0xff]  }
  0x53   :  { %479 = vmatpush1.bf16.msra.mxu0 %v3023_v47  ;;  %1881 = vmatpush1.bf16.msra.mxu1 %v3023_v47  ;;  %v3104_v47 = vld [vmem:[%s4228_s1 + $0x2d0] ss:$8 sps:$4 sm:$0xff]  }
  0x54   :  { %480 = vmatprep.subr.bf16.mxu0 %v3028_v48  ;;  %1882 = vmatprep.subr.bf16.mxu1 %v3028_v48  ;;  %v3109_v48 = vld [vmem:[%s4228_s1 + $0x2e4] ss:$8 sps:$4 sm:$0xff]  }
  0x57   :  { %481 = vmatpush1.bf16.msra.mxu0 %v3026_v49  ;;  %1883 = vmatpush1.bf16.msra.mxu1 %v3026_v49  ;;  %v549_v49 = vshll.u32 %v3585_v14, 16 }
  0x58   :  { %482 = vmatprep.subr.bf16.mxu0 %v3031_v50  ;;  %1884 = vmatprep.subr.bf16.mxu1 %v3031_v50  ;;  %v1918_v50 = vshll.u32 %v3590_v15, 16 }
  0x5b   :  { %483 = vmatpush1.bf16.msra.mxu0 %v3029_v51  ;;  %1885 = vmatpush1.bf16.msra.mxu1 %v3029_v51  ;;  %v3107_v51 = vld [vmem:[%s4228_s1 + $0x2e0] ss:$8 sps:$4 sm:$0xff]  }
  0x5c   :  { %484 = vmatprep.subr.bf16.mxu0 %v3034_v52  ;;  %1886 = vmatprep.subr.bf16.mxu1 %v3034_v52  ;;  %v3112_v52 = vld [vmem:[%s4228_s1 + $0x2f4] ss:$8 sps:$4 sm:$0xff]  }
  0x5f   :  { %485 = vmatpush1.bf16.msra.mxu0 %v3032_v53  ;;  %1887 = vmatpush1.bf16.msra.mxu1 %v3032_v53  ;;  %v812_v53 = vshll.u32 %v3389_v13, 16 }
  0x60   :  { %486 = vmatprep.subr.bf16.mxu0 %v3037_v54  ;;  %1888 = vmatprep.subr.bf16.mxu1 %v3037_v54  ;;  %v1988_v54 = vshll.u32 %v3400_v16, 16 }
  0x63   :  { %487 = vmatpush1.bf16.msra.mxu0 %v3035_v55  ;;  %1889 = vmatpush1.bf16.msra.mxu1 %v3035_v55  ;;  %v547_v55 = vshrl.u32 %v3585_v14, 16 }
  0x64   :  { %488 = vmatprep.subr.bf16.mxu0 %v3040_v56  ;;  %1890 = vmatprep.subr.bf16.mxu1 %v3040_v56  ;;  %v551_v56 = vrot.slane %v549_v49, 1 }
  0x67   :  { %489 = vmatpush1.bf16.msra.mxu0 %v3038_v57  ;;  %1891 = vmatpush1.bf16.msra.mxu1 %v3038_v57  ;;  %v1916_v57 = vshrl.u32 %v3590_v15, 16 }
  0x68   :  { %490 = vmatprep.subr.bf16.mxu0 %v3043_v58  ;;  %1892 = vmatprep.subr.bf16.mxu1 %v3043_v58  ;;  %v1920_v58 = vrot.slane %v1918_v50, 1 }
  0x6b   :  { %491 = vmatpush1.bf16.msra.mxu0 %v3041_v59  ;;  %1893 = vmatpush1.bf16.msra.mxu1 %v3041_v59  ;;  %v3110_v59 = vld [vmem:[%s4228_s1 + $0x2f0] ss:$8 sps:$4 sm:$0xff]  }
  0x6c   :  { %492 = vmatprep.subr.bf16.mxu0 %v3046_v60  ;;  %1894 = vmatprep.subr.bf16.mxu1 %v3046_v60  ;;  %v3115_v60 = vld [vmem:[%s4228_s1 + $0x304] ss:$8 sps:$4 sm:$0xff]  }
  0x6f   :  { %493 = vmatpush1.bf16.msra.mxu0 %v3044_v61  ;;  %1895 = vmatpush1.bf16.msra.mxu1 %v3044_v61  ;;  %v810_v61 = vshrl.u32 %v3389_v13, 16 }
  0x70   :  { %494 = vmatprep.subr.bf16.mxu0 %v3049_v62  ;;  %1896 = vmatprep.subr.bf16.mxu1 %v3049_v62  ;;  %v814_v62 = vrot.slane %v812_v53, 1  ;;  %v3167_v53 = vld [vmem:[%s4228_s1 + $0x420] ss:$8 sps:$4 sm:$0xff]  }
  0x72   :  { %v815_v5 = vor.u32 %v814_v62, %v810_v61  ;;  %v3179_v61 = vld [vmem:[%s4228_s1 + $0x460] ss:$8 sps:$4 sm:$0xff]   ;;  %v3184_v62 = vld [vmem:[%s4228_s1 + $0x474] ss:$8 sps:$4 sm:$0xff]  }
  0x73   :  { %495 = vmatpush1.bf16.msra.mxu0 %v3047_v63  ;;  %1897 = vmatpush1.bf16.msra.mxu1 %v3047_v63  ;;  %v1986_v63 = vshrl.u32 %v3400_v16, 16  ;;  %v3116_v16 = vld [vmem:[%s4228_s1 + $0x310] ss:$8 sps:$4 sm:$0xff]  }
  0x74   :  { %496 = vmatprep.subr.bf16.mxu0 %v3052_v0  ;;  %1898 = vmatprep.subr.bf16.mxu1 %v3052_v0  ;;  %v1990_v0 = vrot.slane %v1988_v54, 1  ;;  %v3172_v54 = vld [vmem:[%s4228_s1 + $0x434] ss:$8 sps:$4 sm:$0xff]  }
  0x76   :  { %v1991_v13 = vor.u32 %v1990_v0, %v1986_v63  ;;  %v3182_v63 = vld [vmem:[%s4228_s1 + $0x470] ss:$8 sps:$4 sm:$0xff]   ;;  %v3187_v0 = vld [vmem:[%s4228_s1 + $0x484] ss:$8 sps:$4 sm:$0xff]  }
  0x77   :  { %497 = vmatpush1.bf16.msra.mxu0 %v3050_v1  ;;  %1899 = vmatpush1.bf16.msra.mxu1 %v3050_v1  ;;  %v552_v1 = vor.u32 %v551_v56, %v547_v55  ;;  %v3170_v55 = vld [vmem:[%s4228_s1 + $0x430] ss:$8 sps:$4 sm:$0xff]   ;;  %v3175_v56 = vld [vmem:[%s4228_s1 + $0x444] ss:$8 sps:$4 sm:$0xff]  }
  0x78   :  { %498 = vmatprep.subr.bf16.mxu0 %v3055_v2  ;;  %1900 = vmatprep.subr.bf16.mxu1 %v3055_v2  ;;  %v1921_v2 = vor.u32 %v1920_v58, %v1916_v57  ;;  %v3173_v57 = vld [vmem:[%s4228_s1 + $0x440] ss:$8 sps:$4 sm:$0xff]   ;;  %v3178_v58 = vld [vmem:[%s4228_s1 + $0x454] ss:$8 sps:$4 sm:$0xff]  }
  0x7b   :  { %499 = vmatpush1.bf16.msra.mxu0 %v3053_v3  ;;  %1901 = vmatpush1.bf16.msra.mxu1 %v3053_v3  ;;  %v3113_v3 = vld [vmem:[%s4228_s1 + $0x300] ss:$8 sps:$4 sm:$0xff]  }
  0x7c   :  { %500 = vmatprep.subr.bf16.mxu0 %v3058_v4  ;;  %1902 = vmatprep.subr.bf16.mxu1 %v3058_v4  ;;  %v3118_v4 = vld [vmem:[%s4228_s1 + $0x314] ss:$8 sps:$4 sm:$0xff]  }
  0x7f   :  { %501 = vmatpush1.bf16.msra.mxu0 %v3056_v7  ;;  %1903 = vmatpush1.bf16.msra.mxu1 %v3056_v7  ;;  %v3119_v7 = vld [vmem:[%s4228_s1 + $0x320] ss:$8 sps:$4 sm:$0xff]  }
  0x80   :  { %722 = vmatprep.subr.bf16.mxu0 %v3064_v8  ;;  %1931 = vmatprep.subr.bf16.mxu1 %v3064_v8  ;;  %v3124_v8 = vld [vmem:[%s4228_s1 + $0x334] ss:$8 sps:$4 sm:$0xff]  }
  0x82   :  { %503 = vmatmul.mubr.bf16.vlgmr.msra.gmra.mrb[0].mxu0 %v3585_v14  ;;  %1905 = vmatmul.mubr.bf16.vlgmr.msra.gmra.mrb[0].mxu1 %v3590_v15  ;;  %v3128_v14 = vld [vmem:[%s4228_s1 + $0x350] ss:$8 sps:$4 sm:$0xff]   ;;  %v3133_v15 = vld [vmem:[%s4228_s1 + $0x364] ss:$8 sps:$4 sm:$0xff]  }
  0x83   :  { %723 = vmatpush1.bf16.msra.mxu0 %v3062_v17  ;;  %1932 = vmatpush1.bf16.msra.mxu1 %v3062_v17  ;;  %v3131_v17 = vld [vmem:[%s4228_s1 + $0x360] ss:$8 sps:$4 sm:$0xff]  }
  0x84   :  { %724 = vmatprep.subr.bf16.mxu0 %v3070_v18  ;;  %1933 = vmatprep.subr.bf16.mxu1 %v3070_v18  ;;  %v3136_v18 = vld [vmem:[%s4228_s1 + $0x374] ss:$8 sps:$4 sm:$0xff]  }
  0x85   :  { %754 = vmatprep.mubr.bf16.mxu0 %v559_v19  ;;  %1963 = vmatprep.mubr.bf16.mxu1 %v1928_v20  ;;  %v3134_v19 = vld [vmem:[%s4228_s1 + $0x370] ss:$8 sps:$4 sm:$0xff]   ;;  %v3139_v20 = vld [vmem:[%s4228_s1 + $0x384] ss:$8 sps:$4 sm:$0xff]  }
  0x87   :  { %725 = vmatpush1.bf16.msra.mxu0 %v3068_v21  ;;  %1934 = vmatpush1.bf16.msra.mxu1 %v3068_v21  ;;  %v3137_v21 = vld [vmem:[%s4228_s1 + $0x380] ss:$8 sps:$4 sm:$0xff]  }
  0x88   :  { %726 = vmatprep.subr.bf16.mxu0 %v3073_v22  ;;  %1935 = vmatprep.subr.bf16.mxu1 %v3073_v22  ;;  %v3142_v22 = vld [vmem:[%s4228_s1 + $0x394] ss:$8 sps:$4 sm:$0xff]  }
  0x8b   :  { %727 = vmatpush1.bf16.msra.mxu0 %v3071_v23  ;;  %1936 = vmatpush1.bf16.msra.mxu1 %v3071_v23  ;;  %v3140_v23 = vld [vmem:[%s4228_s1 + $0x390] ss:$8 sps:$4 sm:$0xff]  }
  0x8c   :  { %728 = vmatprep.subr.bf16.mxu0 %v3076_v24  ;;  %1937 = vmatprep.subr.bf16.mxu1 %v3076_v24  ;;  %v3145_v24 = vld [vmem:[%s4228_s1 + $0x3a4] ss:$8 sps:$4 sm:$0xff]  }
  0x8f   :  { %729 = vmatpush1.bf16.msra.mxu0 %v3074_v25  ;;  %1938 = vmatpush1.bf16.msra.mxu1 %v3074_v25  ;;  %v3143_v25 = vld [vmem:[%s4228_s1 + $0x3a0] ss:$8 sps:$4 sm:$0xff]  }
  0x90   :  { %730 = vmatprep.subr.bf16.mxu0 %v3079_v26  ;;  %1939 = vmatprep.subr.bf16.mxu1 %v3079_v26  ;;  %v3148_v26 = vld [vmem:[%s4228_s1 + $0x3b4] ss:$8 sps:$4 sm:$0xff]  }
  0x93   :  { %731 = vmatpush1.bf16.msra.mxu0 %v3077_v27  ;;  %1940 = vmatpush1.bf16.msra.mxu1 %v3077_v27  ;;  %v3146_v27 = vld [vmem:[%s4228_s1 + $0x3b0] ss:$8 sps:$4 sm:$0xff]  }
  0x94   :  { %732 = vmatprep.subr.bf16.mxu0 %v3082_v28  ;;  %1941 = vmatprep.subr.bf16.mxu1 %v3082_v28  ;;  %v3151_v28 = vld [vmem:[%s4228_s1 + $0x3c4] ss:$8 sps:$4 sm:$0xff]  }
  0x97   :  { %733 = vmatpush1.bf16.msra.mxu0 %v3080_v29  ;;  %1942 = vmatpush1.bf16.msra.mxu1 %v3080_v29  ;;  %v3149_v29 = vld [vmem:[%s4228_s1 + $0x3c0] ss:$8 sps:$4 sm:$0xff]  }
  0x98   :  { %734 = vmatprep.subr.bf16.mxu0 %v3085_v30  ;;  %1943 = vmatprep.subr.bf16.mxu1 %v3085_v30  ;;  %v3154_v30 = vld [vmem:[%s4228_s1 + $0x3d4] ss:$8 sps:$4 sm:$0xff]  }
  0x9b   :  { %735 = vmatpush1.bf16.msra.mxu0 %v3083_v31  ;;  %1944 = vmatpush1.bf16.msra.mxu1 %v3083_v31  ;;  %v3152_v31 = vld [vmem:[%s4228_s1 + $0x3d0] ss:$8 sps:$4 sm:$0xff]  }
  0x9c   :  { %736 = vmatprep.subr.bf16.mxu0 %v3088_v32  ;;  %1945 = vmatprep.subr.bf16.mxu1 %v3088_v32  ;;  %v3157_v32 = vld [vmem:[%s4228_s1 + $0x3e4] ss:$8 sps:$4 sm:$0xff]  }
  0x9f   :  { %737 = vmatpush1.bf16.msra.mxu0 %v3086_v33  ;;  %1946 = vmatpush1.bf16.msra.mxu1 %v3086_v33  ;;  %v805_v33 = vshll.u32 %v3461_v35, 16 }
  0xa0   :  { %738 = vmatprep.subr.bf16.mxu0 %v3091_v34  ;;  %1947 = vmatprep.subr.bf16.mxu1 %v3091_v34  ;;  %v1981_v34 = vshll.u32 %v3466_v36, 16 }
  0xa3   :  { %739 = vmatpush1.bf16.msra.mxu0 %v3089_v37  ;;  %1948 = vmatpush1.bf16.msra.mxu1 %v3089_v37  ;;  %v3155_v37 = vld [vmem:[%s4228_s1 + $0x3e0] ss:$8 sps:$4 sm:$0xff]  }
  0xa4   :  { %740 = vmatprep.subr.bf16.mxu0 %v3094_v38  ;;  %1949 = vmatprep.subr.bf16.mxu1 %v3094_v38  ;;  %v3160_v38 = vld [vmem:[%s4228_s1 + $0x3f4] ss:$8 sps:$4 sm:$0xff]  }
  0xa7   :  { %741 = vmatpush1.bf16.msra.mxu0 %v3092_v39  ;;  %1950 = vmatpush1.bf16.msra.mxu1 %v3092_v39  ;;  %v803_v39 = vshrl.u32 %v3461_v35, 16  ;;  %v3801_v35 = vld [vmem:[%s4229_s0 + $0x4] ss:$8 sps:$4 sm:$0xfe]  }
  0xa8   :  { %742 = vmatprep.subr.bf16.mxu0 %v3097_v40  ;;  %1951 = vmatprep.subr.bf16.mxu1 %v3097_v40  ;;  %v807_v40 = vrot.slane %v805_v33, 1  ;;  %v1069_v49 = vrot.slane %v3801_v35, 1  ;;  %v3227_v33 = vld [vmem:[%s4228_s1 + $0x540] ss:$8 sps:$4 sm:$0xff]  }
  0xab   :  { %743 = vmatpush1.bf16.msra.mxu0 %v3095_v41  ;;  %1952 = vmatpush1.bf16.msra.mxu1 %v3095_v41  ;;  %v1979_v41 = vshrl.u32 %v3466_v36, 16  ;;  %v3806_v36 = vld [vmem:[%s4229_s0 + $0x14] ss:$8 sps:$4 sm:$0xfe]  }
  0xac   :  { %744 = vmatprep.subr.bf16.mxu0 %v3100_v42  ;;  %1953 = vmatprep.subr.bf16.mxu1 %v3100_v42  ;;  %v1983_v42 = vrot.slane %v1981_v34, 1  ;;  %v2052_v50 = vrot.slane %v3806_v36, 1  ;;  %v3232_v34 = vld [vmem:[%s4228_s1 + $0x554] ss:$8 sps:$4 sm:$0xff]  }
  0xaf   :  { %745 = vmatpush1.bf16.msra.mxu0 %v3098_v43  ;;  %1954 = vmatpush1.bf16.msra.mxu1 %v3098_v43  ;;  %v3158_v43 = vld [vmem:[%s4228_s1 + $0x3f0] ss:$8 sps:$4 sm:$0xff]  }
  0xb0   :  { %746 = vmatprep.subr.bf16.mxu0 %v3103_v44  ;;  %1955 = vmatprep.subr.bf16.mxu1 %v3103_v44  ;;  %v3163_v44 = vld [vmem:[%s4228_s1 + $0x404] ss:$8 sps:$4 sm:$0xff]  }
  0xb3   :  { %747 = vmatpush1.bf16.msra.mxu0 %v3101_v45  ;;  %1956 = vmatpush1.bf16.msra.mxu1 %v3101_v45  ;;  %v808_v45 = vor.u32 %v807_v40, %v803_v39  ;;  %v3233_v39 = vld [vmem:[%s4228_s1 + $0x560] ss:$8 sps:$4 sm:$0xff]   ;;  %v3238_v40 = vld [vmem:[%s4228_s1 + $0x574] ss:$8 sps:$4 sm:$0xff]  }
  0xb4   :  { %748 = vmatprep.subr.bf16.mxu0 %v3106_v46  ;;  %1957 = vmatprep.subr.bf16.mxu1 %v3106_v46  ;;  %v1984_v46 = vor.u32 %v1983_v42, %v1979_v41  ;;  %v3236_v41 = vld [vmem:[%s4228_s1 + $0x570] ss:$8 sps:$4 sm:$0xff]   ;;  %v3241_v42 = vld [vmem:[%s4228_s1 + $0x584] ss:$8 sps:$4 sm:$0xff]  }
  0xb7   :  { %749 = vmatpush1.bf16.msra.mxu0 %v3104_v47  ;;  %1958 = vmatpush1.bf16.msra.mxu1 %v3104_v47  ;;  %v3161_v47 = vld [vmem:[%s4228_s1 + $0x400] ss:$8 sps:$4 sm:$0xff]  }
  0xb8   :  { %750 = vmatprep.subr.bf16.mxu0 %v3109_v48  ;;  %1959 = vmatprep.subr.bf16.mxu1 %v3109_v48  ;;  %v3166_v48 = vld [vmem:[%s4228_s1 + $0x414] ss:$8 sps:$4 sm:$0xff]  }
  0xbb   :  { %751 = vmatpush1.bf16.msra.mxu0 %v3107_v51  ;;  %1960 = vmatpush1.bf16.msra.mxu1 %v3107_v51  ;;  %v3164_v51 = vld [vmem:[%s4228_s1 + $0x410] ss:$8 sps:$4 sm:$0xff]  }
  0xbc   :  { %752 = vmatprep.subr.bf16.mxu0 %v3112_v52  ;;  %1961 = vmatprep.subr.bf16.mxu1 %v3112_v52  ;;  %v3169_v52 = vld [vmem:[%s4228_s1 + $0x424] ss:$8 sps:$4 sm:$0xff]  }
  0xbf   :  { %753 = vmatpush1.bf16.msra.mxu0 %v3110_v59  ;;  %1962 = vmatpush1.bf16.msra.mxu1 %v3110_v59  ;;  %v3176_v59 = vld [vmem:[%s4228_s1 + $0x450] ss:$8 sps:$4 sm:$0xff]  }
  0xc0   :  { %978 = vmatprep.subr.bf16.mxu0 %v3115_v60  ;;  %1994 = vmatprep.subr.bf16.mxu1 %v3115_v60  ;;  %v3181_v60 = vld [vmem:[%s4228_s1 + $0x464] ss:$8 sps:$4 sm:$0xff]  }
  0xc2   :  { %755 = vmatmul.mubr.bf16.vlgmr.msra.gmra.mrb[0].mxu0 %v552_v1  ;;  %1964 = vmatmul.mubr.bf16.vlgmr.msra.gmra.mrb[0].mxu1 %v1921_v2  ;;  %v3185_v1 = vld [vmem:[%s4228_s1 + $0x480] ss:$8 sps:$4 sm:$0xff]   ;;  %v3190_v2 = vld [vmem:[%s4228_s1 + $0x494] ss:$8 sps:$4 sm:$0xff]  }
  0xc3   :  { %979 = vmatpush1.bf16.msra.mxu0 %v3113_v3  ;;  %1995 = vmatpush1.bf16.msra.mxu1 %v3113_v3  ;;  %v3188_v3 = vld [vmem:[%s4228_s1 + $0x490] ss:$8 sps:$4 sm:$0xff]  }
  0xc4   :  { %980 = vmatprep.subr.bf16.mxu0 %v3118_v4  ;;  %1996 = vmatprep.subr.bf16.mxu1 %v3118_v4  ;;  %v3193_v4 = vld [vmem:[%s4228_s1 + $0x4a4] ss:$8 sps:$4 sm:$0xff]  }
  0xc5   :  { %1010 = vmatprep.mubr.bf16.mxu0 %v815_v5  ;;  %2026 = vmatprep.mubr.bf16.mxu1 %v1991_v13  ;;  %v3191_v5 = vld [vmem:[%s4228_s1 + $0x4a0] ss:$8 sps:$4 sm:$0xff]   ;;  %v3196_v13 = vld [vmem:[%s4228_s1 + $0x4b4] ss:$8 sps:$4 sm:$0xff]  }
  0xc7   :  { %981 = vmatpush1.bf16.msra.mxu0 %v3116_v16  ;;  %1997 = vmatpush1.bf16.msra.mxu1 %v3116_v16  ;;  %v3194_v16 = vld [vmem:[%s4228_s1 + $0x4b0] ss:$8 sps:$4 sm:$0xff]  }
  0xc8   :  { %982 = vmatprep.subr.bf16.mxu0 %v3121_v6  ;;  %1998 = vmatprep.subr.bf16.mxu1 %v3121_v6  ;;  %v3199_v6 = vld [vmem:[%s4228_s1 + $0x4c4] ss:$8 sps:$4 sm:$0xff]  }
  0xcb   :  { %983 = vmatpush1.bf16.msra.mxu0 %v3119_v7  ;;  %1999 = vmatpush1.bf16.msra.mxu1 %v3119_v7  ;;  %v3197_v7 = vld [vmem:[%s4228_s1 + $0x4c0] ss:$8 sps:$4 sm:$0xff]  }
  0xcc   :  { %984 = vmatprep.subr.bf16.mxu0 %v3124_v8  ;;  %2000 = vmatprep.subr.bf16.mxu1 %v3124_v8  ;;  %v3202_v8 = vld [vmem:[%s4228_s1 + $0x4d4] ss:$8 sps:$4 sm:$0xff]  }
  0xcf   :  { %985 = vmatpush1.bf16.msra.mxu0 %v3122_v9  ;;  %2001 = vmatpush1.bf16.msra.mxu1 %v3122_v9  ;;  %v3200_v9 = vld [vmem:[%s4228_s1 + $0x4d0] ss:$8 sps:$4 sm:$0xff]  }
  0xd0   :  { %986 = vmatprep.subr.bf16.mxu0 %v3127_v10  ;;  %2002 = vmatprep.subr.bf16.mxu1 %v3127_v10  ;;  %v3205_v10 = vld [vmem:[%s4228_s1 + $0x4e4] ss:$8 sps:$4 sm:$0xff]  }
  0xd3   :  { %987 = vmatpush1.bf16.msra.mxu0 %v3125_v11  ;;  %2003 = vmatpush1.bf16.msra.mxu1 %v3125_v11  ;;  %v3203_v11 = vld [vmem:[%s4228_s1 + $0x4e0] ss:$8 sps:$4 sm:$0xff]  }
  0xd4   :  { %988 = vmatprep.subr.bf16.mxu0 %v3130_v12  ;;  %2004 = vmatprep.subr.bf16.mxu1 %v3130_v12  ;;  %v3208_v12 = vld [vmem:[%s4228_s1 + $0x4f4] ss:$8 sps:$4 sm:$0xff]  }
  0xd7   :  { %989 = vmatpush1.bf16.msra.mxu0 %v3128_v14  ;;  %2005 = vmatpush1.bf16.msra.mxu1 %v3128_v14  ;;  %v3903_v14 = vld [vmem:[%s4229_s0] ss:$8 sps:$4 sm:$0xfe]  }
  0xd8   :  { %990 = vmatprep.subr.bf16.mxu0 %v3133_v15  ;;  %2006 = vmatprep.subr.bf16.mxu1 %v3133_v15  ;;  %v3908_v15 = vld [vmem:[%s4229_s0 + $0x10] ss:$8 sps:$4 sm:$0xfe]  }
  0xdb   :  { %991 = vmatpush1.bf16.msra.mxu0 %v3131_v17  ;;  %2007 = vmatpush1.bf16.msra.mxu1 %v3131_v17  ;;  %v3206_v17 = vld [vmem:[%s4228_s1 + $0x4f0] ss:$8 sps:$4 sm:$0xff]  }
  0xdc   :  { %992 = vmatprep.subr.bf16.mxu0 %v3136_v18  ;;  %2008 = vmatprep.subr.bf16.mxu1 %v3136_v18  ;;  %v3214_v18 = vld [vmem:[%s4228_s1 + $0x504] ss:$8 sps:$4 sm:$0xff]  }
  0xdf   :  { %993 = vmatpush1.bf16.msra.mxu0 %v3134_v19  ;;  %2009 = vmatpush1.bf16.msra.mxu1 %v3134_v19  ;;  %v3265_v19 = vld [vmem:[%s4229_s0 + $0x24] ss:$8 sps:$4 sm:$0xfe]  }
  0xe0   :  { %994 = vmatprep.subr.bf16.mxu0 %v3139_v20  ;;  %2010 = vmatprep.subr.bf16.mxu1 %v3139_v20  ;;  %v3271_v20 = vld [vmem:[%s4229_s0 + $0x34] ss:$8 sps:$4 sm:$0xfe]  }
  0xe3   :  { %995 = vmatpush1.bf16.msra.mxu0 %v3137_v21  ;;  %2011 = vmatpush1.bf16.msra.mxu1 %v3137_v21  ;;  %v1068_v21 = vrot.slane %v3903_v14, 1 }
  0xe4   :  { %996 = vmatprep.subr.bf16.mxu0 %v3142_v22  ;;  %2012 = vmatprep.subr.bf16.mxu1 %v3142_v22  ;;  %v2051_v22 = vrot.slane %v3908_v15, 1 }
  0xe7   :  { %997 = vmatpush1.bf16.msra.mxu0 %v3140_v23  ;;  %2013 = vmatpush1.bf16.msra.mxu1 %v3140_v23  ;;  %v3212_v23 = vld [vmem:[%s4228_s1 + $0x500] ss:$8 sps:$4 sm:$0xff]  }
  0xe8   :  { %998 = vmatprep.subr.bf16.mxu0 %v3145_v24  ;;  %2014 = vmatprep.subr.bf16.mxu1 %v3145_v24  ;;  %v3220_v24 = vld [vmem:[%s4228_s1 + $0x514] ss:$8 sps:$4 sm:$0xff]  }
  0xeb   :  { %999 = vmatpush1.bf16.msra.mxu0 %v3143_v25  ;;  %2015 = vmatpush1.bf16.msra.mxu1 %v3143_v25  ;;  %v1323_v25 = vrot.slane %v3265_v19, 1  ;;  %v3284_v19 = vld [vmem:[%s4228_s1 + $0x650] ss:$8 sps:$4 sm:$0xff]  }
  0xec   :  { %1000 = vmatprep.subr.bf16.mxu0 %v3148_v26  ;;  %2016 = vmatprep.subr.bf16.mxu1 %v3148_v26  ;;  %v2113_v26 = vrot.slane %v3271_v20, 1  ;;  %v3289_v20 = vld [vmem:[%s4228_s1 + $0x664] ss:$8 sps:$4 sm:$0xff]  }
  0xef   :  { %1001 = vmatpush1.bf16.msra.mxu0 %v3146_v27  ;;  %2017 = vmatpush1.bf16.msra.mxu1 %v3146_v27  ;;  %v3218_v27 = vld [vmem:[%s4228_s1 + $0x510] ss:$8 sps:$4 sm:$0xff]  }
  0xf0   :  { %1002 = vmatprep.subr.bf16.mxu0 %v3151_v28  ;;  %2018 = vmatprep.subr.bf16.mxu1 %v3151_v28  ;;  %v3223_v28 = vld [vmem:[%s4228_s1 + $0x524] ss:$8 sps:$4 sm:$0xff]  }
  0xf3   :  { %1003 = vmatpush1.bf16.msra.mxu0 %v3149_v29  ;;  %2019 = vmatpush1.bf16.msra.mxu1 %v3149_v29  ;;  %v3221_v29 = vld [vmem:[%s4228_s1 + $0x520] ss:$8 sps:$4 sm:$0xff]  }
  0xf4   :  { %1004 = vmatprep.subr.bf16.mxu0 %v3154_v30  ;;  %2020 = vmatprep.subr.bf16.mxu1 %v3154_v30  ;;  %v3226_v30 = vld [vmem:[%s4228_s1 + $0x534] ss:$8 sps:$4 sm:$0xff]  }
  0xf7   :  { %1005 = vmatpush1.bf16.msra.mxu0 %v3152_v31  ;;  %2021 = vmatpush1.bf16.msra.mxu1 %v3152_v31  ;;  %v3224_v31 = vld [vmem:[%s4228_s1 + $0x530] ss:$8 sps:$4 sm:$0xff]  }
  0xf8   :  { %1006 = vmatprep.subr.bf16.mxu0 %v3157_v32  ;;  %2022 = vmatprep.subr.bf16.mxu1 %v3157_v32  ;;  %v3229_v32 = vld [vmem:[%s4228_s1 + $0x544] ss:$8 sps:$4 sm:$0xff]  }
  0xfb   :  { %1007 = vmatpush1.bf16.msra.mxu0 %v3155_v37  ;;  %2023 = vmatpush1.bf16.msra.mxu1 %v3155_v37  ;;  %v3230_v37 = vld [vmem:[%s4228_s1 + $0x550] ss:$8 sps:$4 sm:$0xff]  }
  0xfc   :  { %1008 = vmatprep.subr.bf16.mxu0 %v3160_v38  ;;  %2024 = vmatprep.subr.bf16.mxu1 %v3160_v38  ;;  %v3235_v38 = vld [vmem:[%s4228_s1 + $0x564] ss:$8 sps:$4 sm:$0xff]  }
  0xff   :  { %1009 = vmatpush1.bf16.msra.mxu0 %v3158_v43  ;;  %2025 = vmatpush1.bf16.msra.mxu1 %v3158_v43  ;;  %v3239_v43 = vld [vmem:[%s4228_s1 + $0x580] ss:$8 sps:$4 sm:$0xff]  }
 0x100   :  { %1232 = vmatprep.subr.bf16.mxu0 %v3163_v44  ;;  %2055 = vmatprep.subr.bf16.mxu1 %v3163_v44  ;;  %v3244_v44 = vld [vmem:[%s4228_s1 + $0x594] ss:$8 sps:$4 sm:$0xff]  }
 0x102   :  { %1011 = vmatmul.mubr.bf16.vlgmr.msra.gmra.mrb[0].mxu0 %v808_v45  ;;  %2027 = vmatmul.mubr.bf16.vlgmr.msra.gmra.mrb[0].mxu1 %v1984_v46  ;;  %v3242_v45 = vld [vmem:[%s4228_s1 + $0x590] ss:$8 sps:$4 sm:$0xff]   ;;  %v3247_v46 = vld [vmem:[%s4228_s1 + $0x5a4] ss:$8 sps:$4 sm:$0xff]  }
 0x103   :  { %1233 = vmatpush1.bf16.msra.mxu0 %v3161_v47  ;;  %2056 = vmatpush1.bf16.msra.mxu1 %v3161_v47  ;;  %v3245_v47 = vld [vmem:[%s4228_s1 + $0x5a0] ss:$8 sps:$4 sm:$0xff]  }
 0x104   :  { %1234 = vmatprep.subr.bf16.mxu0 %v3166_v48  ;;  %2057 = vmatprep.subr.bf16.mxu1 %v3166_v48  ;;  %v3250_v48 = vld [vmem:[%s4228_s1 + $0x5b4] ss:$8 sps:$4 sm:$0xff]  }
 0x105   :  { %1264 = vmatprep.mubr.bf16.mxu0 %v1069_v49  ;;  %2087 = vmatprep.mubr.bf16.mxu1 %v2052_v50  ;;  %v3248_v49 = vld [vmem:[%s4228_s1 + $0x5b0] ss:$8 sps:$4 sm:$0xff]   ;;  %v3253_v50 = vld [vmem:[%s4228_s1 + $0x5c4] ss:$8 sps:$4 sm:$0xff]  }
 0x107   :  { %1235 = vmatpush1.bf16.msra.mxu0 %v3164_v51  ;;  %2058 = vmatpush1.bf16.msra.mxu1 %v3164_v51  ;;  %v3251_v51 = vld [vmem:[%s4228_s1 + $0x5c0] ss:$8 sps:$4 sm:$0xff]  }
 0x108   :  { %1236 = vmatprep.subr.bf16.mxu0 %v3169_v52  ;;  %2059 = vmatprep.subr.bf16.mxu1 %v3169_v52  ;;  %v3256_v52 = vld [vmem:[%s4228_s1 + $0x5d4] ss:$8 sps:$4 sm:$0xff]  }
 0x10b   :  { %1237 = vmatpush1.bf16.msra.mxu0 %v3167_v53  ;;  %2060 = vmatpush1.bf16.msra.mxu1 %v3167_v53  ;;  %v3254_v53 = vld [vmem:[%s4228_s1 + $0x5d0] ss:$8 sps:$4 sm:$0xff]  }
 0x10c   :  { %1238 = vmatprep.subr.bf16.mxu0 %v3172_v54  ;;  %2061 = vmatprep.subr.bf16.mxu1 %v3172_v54  ;;  %v3259_v54 = vld [vmem:[%s4228_s1 + $0x5e4] ss:$8 sps:$4 sm:$0xff]  }
 0x10f   :  { %1239 = vmatpush1.bf16.msra.mxu0 %v3170_v55  ;;  %2062 = vmatpush1.bf16.msra.mxu1 %v3170_v55  ;;  %v3257_v55 = vld [vmem:[%s4228_s1 + $0x5e0] ss:$8 sps:$4 sm:$0xff]  }
 0x110   :  { %1240 = vmatprep.subr.bf16.mxu0 %v3175_v56  ;;  %2063 = vmatprep.subr.bf16.mxu1 %v3175_v56  ;;  %v3262_v56 = vld [vmem:[%s4228_s1 + $0x5f4] ss:$8 sps:$4 sm:$0xff]  }
 0x113   :  { %1241 = vmatpush1.bf16.msra.mxu0 %v3173_v57  ;;  %2064 = vmatpush1.bf16.msra.mxu1 %v3173_v57  ;;  %v1575_v57 = vshrl.u32 %v3801_v35, 16 }
 0x114   :  { %1242 = vmatprep.subr.bf16.mxu0 %v3178_v58  ;;  %2065 = vmatprep.subr.bf16.mxu1 %v3178_v58  ;;  %v1578_v58 = vshll.u32 %v3801_v35, 16  ;;  %v3268_v35 = vld [vmem:[%s4228_s1 + $0x604] ss:$8 sps:$4 sm:$0xff]  }
 0x117   :  { %1243 = vmatpush1.bf16.msra.mxu0 %v3176_v59  ;;  %2066 = vmatpush1.bf16.msra.mxu1 %v3176_v59  ;;  %v2172_v59 = vshrl.u32 %v3806_v36, 16 }
 0x118   :  { %1244 = vmatprep.subr.bf16.mxu0 %v3181_v60  ;;  %2067 = vmatprep.subr.bf16.mxu1 %v3181_v60  ;;  %v2175_v60 = vshll.u32 %v3806_v36, 16  ;;  %v1577_v36 = vrot.slane %v1575_v57, 1 }
 0x11b   :  { %1245 = vmatpush1.bf16.msra.mxu0 %v3179_v61  ;;  %2068 = vmatpush1.bf16.msra.mxu1 %v3179_v61  ;;  %v3263_v61 = vld [vmem:[%s4229_s0 + $0x20] ss:$8 sps:$4 sm:$0xfe]  }
 0x11c   :  { %1246 = vmatprep.subr.bf16.mxu0 %v3184_v62  ;;  %2069 = vmatprep.subr.bf16.mxu1 %v3184_v62  ;;  %v3269_v62 = vld [vmem:[%s4229_s0 + $0x30] ss:$8 sps:$4 sm:$0xfe]  }
 0x11f   :  { %1247 = vmatpush1.bf16.msra.mxu0 %v3182_v63  ;;  %2070 = vmatpush1.bf16.msra.mxu1 %v3182_v63  ;;  %v3260_v63 = vld [vmem:[%s4228_s1 + $0x5f0] ss:$8 sps:$4 sm:$0xff]  }
 0x120   :  { %1248 = vmatprep.subr.bf16.mxu0 %v3187_v0  ;;  %2071 = vmatprep.subr.bf16.mxu1 %v3187_v0  ;;  %v1580_v0 = vrot.slane %v1578_v58, 2 }
 0x123   :  { %1249 = vmatpush1.bf16.msra.mxu0 %v3185_v1  ;;  %2072 = vmatpush1.bf16.msra.mxu1 %v3185_v1  ;;  %v2174_v1 = vrot.slane %v2172_v59, 1 }
 0x124   :  { %1250 = vmatprep.subr.bf16.mxu0 %v3190_v2  ;;  %2073 = vmatprep.subr.bf16.mxu1 %v3190_v2  ;;  %v2177_v2 = vrot.slane %v2175_v60, 2 }
 0x127   :  { %1251 = vmatpush1.bf16.msra.mxu0 %v3188_v3  ;;  %2074 = vmatpush1.bf16.msra.mxu1 %v3188_v3  ;;  %v1322_v3 = vrot.slane %v3263_v61, 1 }
 0x128   :  { %1252 = vmatprep.subr.bf16.mxu0 %v3193_v4  ;;  %2075 = vmatprep.subr.bf16.mxu1 %v3193_v4  ;;  %v2112_v4 = vrot.slane %v3269_v62, 1 }
 0x12b   :  { %1253 = vmatpush1.bf16.msra.mxu0 %v3191_v5  ;;  %2076 = vmatpush1.bf16.msra.mxu1 %v3191_v5  ;;  %v3266_v5 = vld [vmem:[%s4228_s1 + $0x600] ss:$8 sps:$4 sm:$0xff]  }
 0x12c   :  { %1254 = vmatprep.subr.bf16.mxu0 %v3196_v13  ;;  %2077 = vmatprep.subr.bf16.mxu1 %v3196_v13  ;;  %v3274_v13 = vld [vmem:[%s4228_s1 + $0x614] ss:$8 sps:$4 sm:$0xff]  }
 0x12f   :  { %1255 = vmatpush1.bf16.msra.mxu0 %v3194_v16  ;;  %2078 = vmatpush1.bf16.msra.mxu1 %v3194_v16  ;;  %v1581_v16 = vor.u32 %v1580_v0, %v1577_v36 }
 0x130   :  { %1256 = vmatprep.subr.bf16.mxu0 %v3199_v6  ;;  %2079 = vmatprep.subr.bf16.mxu1 %v3199_v6  ;;  %v2178_v6 = vor.u32 %v2177_v2, %v2174_v1 }
 0x133   :  { %1257 = vmatpush1.bf16.msra.mxu0 %v3197_v7  ;;  %2080 = vmatpush1.bf16.msra.mxu1 %v3197_v7  ;;  %v3272_v7 = vld [vmem:[%s4228_s1 + $0x610] ss:$8 sps:$4 sm:$0xff]  }
 0x134   :  { %1258 = vmatprep.subr.bf16.mxu0 %v3202_v8  ;;  %2081 = vmatprep.subr.bf16.mxu1 %v3202_v8  ;;  %v3277_v8 = vld [vmem:[%s4228_s1 + $0x624] ss:$8 sps:$4 sm:$0xff]  }
 0x137   :  { %1259 = vmatpush1.bf16.msra.mxu0 %v3200_v9  ;;  %2082 = vmatpush1.bf16.msra.mxu1 %v3200_v9  ;;  %v3275_v9 = vld [vmem:[%s4228_s1 + $0x620] ss:$8 sps:$4 sm:$0xff]  }
 0x138   :  { %1260 = vmatprep.subr.bf16.mxu0 %v3205_v10  ;;  %2083 = vmatprep.subr.bf16.mxu1 %v3205_v10  ;;  %v3280_v10 = vld [vmem:[%s4228_s1 + $0x634] ss:$8 sps:$4 sm:$0xff]  }
 0x13b   :  { %1261 = vmatpush1.bf16.msra.mxu0 %v3203_v11  ;;  %2084 = vmatpush1.bf16.msra.mxu1 %v3203_v11  ;;  %v3278_v11 = vld [vmem:[%s4228_s1 + $0x630] ss:$8 sps:$4 sm:$0xff]  }
 0x13c   :  { %1262 = vmatprep.subr.bf16.mxu0 %v3208_v12  ;;  %2085 = vmatprep.subr.bf16.mxu1 %v3208_v12  ;;  %v3283_v12 = vld [vmem:[%s4228_s1 + $0x644] ss:$8 sps:$4 sm:$0xff]  }
 0x13f   :  { %1263 = vmatpush1.bf16.msra.mxu0 %v3206_v17  ;;  %2086 = vmatpush1.bf16.msra.mxu1 %v3206_v17  ;;  %v3281_v17 = vld [vmem:[%s4228_s1 + $0x640] ss:$8 sps:$4 sm:$0xff]  }
 0x140   :  { %1486 = vmatprep.subr.bf16.mxu0 %v3214_v18  ;;  %2116 = vmatprep.subr.bf16.mxu1 %v3214_v18  ;;  %v3286_v18 = vld [vmem:[%s4228_s1 + $0x654] ss:$8 sps:$4 sm:$0xff]  }
 0x142   :  { %1265 = vmatmul.mubr.bf16.vlgmr.msra.gmra.mrb[0].mxu0 %v1068_v21  ;;  %2088 = vmatmul.mubr.bf16.vlgmr.msra.gmra.mrb[0].mxu1 %v2051_v22  ;;  %v3287_v21 = vld [vmem:[%s4228_s1 + $0x660] ss:$8 sps:$4 sm:$0xff]   ;;  %v3292_v22 = vld [vmem:[%s4228_s1 + $0x674] ss:$8 sps:$4 sm:$0xff]  }
 0x143   :  { %1487 = vmatpush1.bf16.msra.mxu0 %v3212_v23  ;;  %2117 = vmatpush1.bf16.msra.mxu1 %v3212_v23  ;;  %v3290_v23 = vld [vmem:[%s4228_s1 + $0x670] ss:$8 sps:$4 sm:$0xff]  }
 0x144   :  { %1488 = vmatprep.subr.bf16.mxu0 %v3220_v24  ;;  %2118 = vmatprep.subr.bf16.mxu1 %v3220_v24  ;;  %v3295_v24 = vld [vmem:[%s4228_s1 + $0x684] ss:$8 sps:$4 sm:$0xff]  }
 0x145   :  { %1518 = vmatprep.mubr.bf16.mxu0 %v1323_v25  ;;  %2148 = vmatprep.mubr.bf16.mxu1 %v2113_v26  ;;  %v3293_v25 = vld [vmem:[%s4228_s1 + $0x680] ss:$8 sps:$4 sm:$0xff]   ;;  %v3298_v26 = vld [vmem:[%s4228_s1 + $0x694] ss:$8 sps:$4 sm:$0xff]  }
 0x147   :  { %1489 = vmatpush1.bf16.msra.mxu0 %v3218_v27  ;;  %2119 = vmatpush1.bf16.msra.mxu1 %v3218_v27  ;;  %v3296_v27 = vld [vmem:[%s4228_s1 + $0x690] ss:$8 sps:$4 sm:$0xff]  }
 0x148   :  { %1490 = vmatprep.subr.bf16.mxu0 %v3223_v28  ;;  %2120 = vmatprep.subr.bf16.mxu1 %v3223_v28  ;;  %v3301_v28 = vld [vmem:[%s4228_s1 + $0x6a4] ss:$8 sps:$4 sm:$0xff]  }
 0x14b   :  { %1491 = vmatpush1.bf16.msra.mxu0 %v3221_v29  ;;  %2121 = vmatpush1.bf16.msra.mxu1 %v3221_v29  ;;  %v3299_v29 = vld [vmem:[%s4228_s1 + $0x6a0] ss:$8 sps:$4 sm:$0xff]  }
 0x14c   :  { %1492 = vmatprep.subr.bf16.mxu0 %v3226_v30  ;;  %2122 = vmatprep.subr.bf16.mxu1 %v3226_v30  ;;  %v3304_v30 = vld [vmem:[%s4228_s1 + $0x6b4] ss:$8 sps:$4 sm:$0xff]  }
 0x14f   :  { %1493 = vmatpush1.bf16.msra.mxu0 %v3224_v31  ;;  %2123 = vmatpush1.bf16.msra.mxu1 %v3224_v31  ;;  %v3302_v31 = vld [vmem:[%s4228_s1 + $0x6b0] ss:$8 sps:$4 sm:$0xff]  }
 0x150   :  { %1494 = vmatprep.subr.bf16.mxu0 %v3229_v32  ;;  %2124 = vmatprep.subr.bf16.mxu1 %v3229_v32  ;;  %v3307_v32 = vld [vmem:[%s4228_s1 + $0x6c4] ss:$8 sps:$4 sm:$0xff]  }
 0x153   :  { %1495 = vmatpush1.bf16.msra.mxu0 %v3227_v33  ;;  %2125 = vmatpush1.bf16.msra.mxu1 %v3227_v33  ;;  %v3305_v33 = vld [vmem:[%s4228_s1 + $0x6c0] ss:$8 sps:$4 sm:$0xff]  }
 0x154   :  { %1496 = vmatprep.subr.bf16.mxu0 %v3232_v34  ;;  %2126 = vmatprep.subr.bf16.mxu1 %v3232_v34  ;;  %v3310_v34 = vld [vmem:[%s4228_s1 + $0x6d4] ss:$8 sps:$4 sm:$0xff]  }
 0x157   :  { %1497 = vmatpush1.bf16.msra.mxu0 %v3230_v37  ;;  %2127 = vmatpush1.bf16.msra.mxu1 %v3230_v37  ;;  %v3308_v37 = vld [vmem:[%s4228_s1 + $0x6d0] ss:$8 sps:$4 sm:$0xff]  }
 0x158   :  { %1498 = vmatprep.subr.bf16.mxu0 %v3235_v38  ;;  %2128 = vmatprep.subr.bf16.mxu1 %v3235_v38  ;;  %v3313_v38 = vld [vmem:[%s4228_s1 + $0x6e4] ss:$8 sps:$4 sm:$0xff]  }
 0x15b   :  { %1499 = vmatpush1.bf16.msra.mxu0 %v3233_v39  ;;  %2129 = vmatpush1.bf16.msra.mxu1 %v3233_v39  ;;  %v1567_v39 = vshrl.u32 %v3903_v14, 16 }
 0x15c   :  { %1500 = vmatprep.subr.bf16.mxu0 %v3238_v40  ;;  %2130 = vmatprep.subr.bf16.mxu1 %v3238_v40  ;;  %v1570_v40 = vshll.u32 %v3903_v14, 16 }
 0x15f   :  { %1501 = vmatpush1.bf16.msra.mxu0 %v3236_v41  ;;  %2131 = vmatpush1.bf16.msra.mxu1 %v3236_v41  ;;  %v2164_v41 = vshrl.u32 %v3908_v15, 16 }
 0x160   :  { %1502 = vmatprep.subr.bf16.mxu0 %v3241_v42  ;;  %2132 = vmatprep.subr.bf16.mxu1 %v3241_v42  ;;  %v2167_v42 = vshll.u32 %v3908_v15, 16  ;;  %v3314_v15 = vld [vmem:[%s4228_s1 + $0x6f0] ss:$8 sps:$4 sm:$0xff]  }
 0x162   :  { %v2169_v14 = vrot.slane %v2167_v42, 2 }
 0x163   :  { %1503 = vmatpush1.bf16.msra.mxu0 %v3239_v43  ;;  %2133 = vmatpush1.bf16.msra.mxu1 %v3239_v43  ;;  %v3311_v43 = vld [vmem:[%s4228_s1 + $0x6e0] ss:$8 sps:$4 sm:$0xff]  }
 0x164   :  { %1504 = vmatprep.subr.bf16.mxu0 %v3244_v44  ;;  %2134 = vmatprep.subr.bf16.mxu1 %v3244_v44  ;;  %v3316_v44 = vld [vmem:[%s4228_s1 + $0x6f4] ss:$8 sps:$4 sm:$0xff]  }
 0x167   :  { %1505 = vmatpush1.bf16.msra.mxu0 %v3242_v45  ;;  %2135 = vmatpush1.bf16.msra.mxu1 %v3242_v45  ;;  %v1569_v45 = vrot.slane %v1567_v39, 1 }
 0x168   :  { %1506 = vmatprep.subr.bf16.mxu0 %v3247_v46  ;;  %2136 = vmatprep.subr.bf16.mxu1 %v3247_v46  ;;  %v1572_v46 = vrot.slane %v1570_v40, 2 }
 0x16b   :  { %1507 = vmatpush1.bf16.msra.mxu0 %v3245_v47  ;;  %2137 = vmatpush1.bf16.msra.mxu1 %v3245_v47  ;;  %v2166_v47 = vrot.slane %v2164_v41, 1 }
 0x16c   :  { %1508 = vmatprep.subr.bf16.mxu0 %v3250_v48  ;;  %2138 = vmatprep.subr.bf16.mxu1 %v3250_v48  ;;  %v1573_v48 = vor.u32 %v1572_v46, %v1569_v45 }
 0x16f   :  { %1509 = vmatpush1.bf16.msra.mxu0 %v3248_v49  ;;  %2139 = vmatpush1.bf16.msra.mxu1 %v3248_v49  ;;  %v2170_v49 = vor.u32 %v2169_v14, %v2166_v47 }
 0x170   :  { %1510 = vmatprep.subr.bf16.mxu0 %v3253_v50  ;;  %2140 = vmatprep.subr.bf16.mxu1 %v3253_v50 }
 0x173   :  { %1511 = vmatpush1.bf16.msra.mxu0 %v3251_v51  ;;  %2141 = vmatpush1.bf16.msra.mxu1 %v3251_v51 }
 0x174   :  { %1512 = vmatprep.subr.bf16.mxu0 %v3256_v52  ;;  %2142 = vmatprep.subr.bf16.mxu1 %v3256_v52 }
 0x177   :  { %1513 = vmatpush1.bf16.msra.mxu0 %v3254_v53  ;;  %2143 = vmatpush1.bf16.msra.mxu1 %v3254_v53 }
 0x178   :  { %1514 = vmatprep.subr.bf16.mxu0 %v3259_v54  ;;  %2144 = vmatprep.subr.bf16.mxu1 %v3259_v54 }
 0x17b   :  { %1515 = vmatpush1.bf16.msra.mxu0 %v3257_v55  ;;  %2145 = vmatpush1.bf16.msra.mxu1 %v3257_v55 }
 0x17c   :  { %1516 = vmatprep.subr.bf16.mxu0 %v3262_v56  ;;  %2146 = vmatprep.subr.bf16.mxu1 %v3262_v56 }
 0x17f   :  { %1517 = vmatpush1.bf16.msra.mxu0 %v3260_v63  ;;  %2147 = vmatpush1.bf16.msra.mxu1 %v3260_v63 }
 0x180   :  { %1744 = vmatprep.subr.bf16.mxu0 %v3268_v35  ;;  %2181 = vmatprep.subr.bf16.mxu1 %v3268_v35 }
 0x182   :  { %1519 = vmatmul.mubr.bf16.vlgmr.msra.gmra.mrb[0].mxu0 %v1322_v3  ;;  %2149 = vmatmul.mubr.bf16.vlgmr.msra.gmra.mrb[0].mxu1 %v2112_v4 }
 0x183   :  { %1745 = vmatpush1.bf16.msra.mxu0 %v3266_v5  ;;  %2182 = vmatpush1.bf16.msra.mxu1 %v3266_v5 }
 0x184   :  { %1746 = vmatprep.subr.bf16.mxu0 %v3274_v13  ;;  %2183 = vmatprep.subr.bf16.mxu1 %v3274_v13 }
 0x185   :  { %1776 = vmatprep.mubr.bf16.mxu0 %v1581_v16  ;;  %2213 = vmatprep.mubr.bf16.mxu1 %v2178_v6 }
 0x187   :  { %1747 = vmatpush1.bf16.msra.mxu0 %v3272_v7  ;;  %2184 = vmatpush1.bf16.msra.mxu1 %v3272_v7 }
 0x188   :  { %1748 = vmatprep.subr.bf16.mxu0 %v3277_v8  ;;  %2185 = vmatprep.subr.bf16.mxu1 %v3277_v8 }
 0x18b   :  { %1749 = vmatpush1.bf16.msra.mxu0 %v3275_v9  ;;  %2186 = vmatpush1.bf16.msra.mxu1 %v3275_v9 }
 0x18c   :  { %1750 = vmatprep.subr.bf16.mxu0 %v3280_v10  ;;  %2187 = vmatprep.subr.bf16.mxu1 %v3280_v10 }
 0x18f   :  { %1751 = vmatpush1.bf16.msra.mxu0 %v3278_v11  ;;  %2188 = vmatpush1.bf16.msra.mxu1 %v3278_v11 }
 0x190   :  { %1752 = vmatprep.subr.bf16.mxu0 %v3283_v12  ;;  %2189 = vmatprep.subr.bf16.mxu1 %v3283_v12 }
 0x193   :  { %1753 = vmatpush1.bf16.msra.mxu0 %v3281_v17  ;;  %2190 = vmatpush1.bf16.msra.mxu1 %v3281_v17 }
 0x194   :  { %1754 = vmatprep.subr.bf16.mxu0 %v3286_v18  ;;  %2191 = vmatprep.subr.bf16.mxu1 %v3286_v18 }
 0x197   :  { %1755 = vmatpush1.bf16.msra.mxu0 %v3284_v19  ;;  %2192 = vmatpush1.bf16.msra.mxu1 %v3284_v19 }
 0x198   :  { %1756 = vmatprep.subr.bf16.mxu0 %v3289_v20  ;;  %2193 = vmatprep.subr.bf16.mxu1 %v3289_v20 }
 0x19b   :  { %1757 = vmatpush1.bf16.msra.mxu0 %v3287_v21  ;;  %2194 = vmatpush1.bf16.msra.mxu1 %v3287_v21 }
 0x19c   :  { %1758 = vmatprep.subr.bf16.mxu0 %v3292_v22  ;;  %2195 = vmatprep.subr.bf16.mxu1 %v3292_v22 }
 0x19f   :  { %1759 = vmatpush1.bf16.msra.mxu0 %v3290_v23  ;;  %2196 = vmatpush1.bf16.msra.mxu1 %v3290_v23 }
 0x1a0   :  { %1760 = vmatprep.subr.bf16.mxu0 %v3295_v24  ;;  %2197 = vmatprep.subr.bf16.mxu1 %v3295_v24 }
 0x1a3   :  { %1761 = vmatpush1.bf16.msra.mxu0 %v3293_v25  ;;  %2198 = vmatpush1.bf16.msra.mxu1 %v3293_v25 }
 0x1a4   :  { %1762 = vmatprep.subr.bf16.mxu0 %v3298_v26  ;;  %2199 = vmatprep.subr.bf16.mxu1 %v3298_v26 }
 0x1a7   :  { %1763 = vmatpush1.bf16.msra.mxu0 %v3296_v27  ;;  %2200 = vmatpush1.bf16.msra.mxu1 %v3296_v27 }
 0x1a8   :  { %1764 = vmatprep.subr.bf16.mxu0 %v3301_v28  ;;  %2201 = vmatprep.subr.bf16.mxu1 %v3301_v28 }
 0x1ab   :  { %1765 = vmatpush1.bf16.msra.mxu0 %v3299_v29  ;;  %2202 = vmatpush1.bf16.msra.mxu1 %v3299_v29 }
 0x1ac   :  { %1766 = vmatprep.subr.bf16.mxu0 %v3304_v30  ;;  %2203 = vmatprep.subr.bf16.mxu1 %v3304_v30 }
 0x1af   :  { %1767 = vmatpush1.bf16.msra.mxu0 %v3302_v31  ;;  %2204 = vmatpush1.bf16.msra.mxu1 %v3302_v31 }
 0x1b0   :  { %1768 = vmatprep.subr.bf16.mxu0 %v3307_v32  ;;  %2205 = vmatprep.subr.bf16.mxu1 %v3307_v32 }
 0x1b3   :  { %1769 = vmatpush1.bf16.msra.mxu0 %v3305_v33  ;;  %2206 = vmatpush1.bf16.msra.mxu1 %v3305_v33 }
 0x1b4   :  { %1770 = vmatprep.subr.bf16.mxu0 %v3310_v34  ;;  %2207 = vmatprep.subr.bf16.mxu1 %v3310_v34 }
 0x1b7   :  { %1771 = vmatpush1.bf16.msra.mxu0 %v3308_v37  ;;  %2208 = vmatpush1.bf16.msra.mxu1 %v3308_v37 }
 0x1b8   :  { %1772 = vmatprep.subr.bf16.mxu0 %v3313_v38  ;;  %2209 = vmatprep.subr.bf16.mxu1 %v3313_v38 }
 0x1bb   :  { %1773 = vmatpush1.bf16.msra.mxu0 %v3311_v43  ;;  %2210 = vmatpush1.bf16.msra.mxu1 %v3311_v43 }
 0x1bc   :  { %1774 = vmatprep.subr.bf16.mxu0 %v3316_v44  ;;  %2211 = vmatprep.subr.bf16.mxu1 %v3316_v44 }
 0x1bf   :  { %1775 = vmatpush1.bf16.msra.mxu0 %v3314_v15  ;;  %2212 = vmatpush1.bf16.msra.mxu1 %v3314_v15 }
 0x1c2   :  { %1777 = vmatmul.mubr.bf16.vlgmr.msra.gmra.mrb[0].mxu0 %v1573_v48  ;;  %2214 = vmatmul.mubr.bf16.vlgmr.msra.gmra.mrb[0].mxu1 %v2170_v49 }
 0x295   :  { %v1778_v50 = vpop.f32.mrb[0].mxu0  ;;  %v2215_v51 = vpop.f32.mrb[0].mxu1 }
 0x296   :  { %v1795_v52 = vmul.f32 0.2, %v1778_v50  ;;  %vm1791_vm0 = vcmp.ge.f32.partialorder %v1778_v50, 0.0  ;;  %v1780_v53 = vpop.f32.mrb[1].mxu0  ;;  %v2217_v54 = vpop.f32.mrb[1].mxu1  ;;  %vm2228_vm1 = vcmp.ge.f32.partialorder %v2215_v51, 0.0 }
 0x297   :  { %v2232_v55 = vmul.f32 0.2, %v2215_v51  ;;  %v1782_v56 = vpop.f32.mrb[2].mxu0  ;;  %v2219_v57 = vpop.f32.mrb[2].mxu1  ;;  %vm1792_vm3 = vcmp.ge.f32.partialorder %v1780_v53, 0.0  ;;  %vm2229_vm5 = vcmp.ge.f32.partialorder %v2217_v54, 0.0 }
 0x298   :  { %v1796_v58 = vmul.f32 0.2, %v1780_v53  ;;  %vm1793_vm4 = vcmp.ge.f32.partialorder %v1782_v56, 0.0  ;;  %v1797_v59 = vmul.f32 0.2, %v1782_v56  ;;  %v4127_v60 = vsel %vm1791_vm0, %v1778_v50, %v1795_v52  ;;  %v1784_v62 = vpop.f32.mrb[3].mxu0 }
 0x299   :  { %vm2230_vm6 = vcmp.ge.f32.partialorder %v2219_v57, 0.0  ;;  %v2234_v61 = vmul.f32 0.2, %v2219_v57  ;;  %v2221_v63 = vpop.f32.mrb[3].mxu1  ;;  %v2233_v35 = vmul.f32 0.2, %v2217_v54  ;;  %v4136_v4 = vsel %vm2228_vm1, %v2215_v51, %v2232_v55 }
 0x29a   :  { %v4129_v36 = vsel %vm1793_vm4, %v1782_v56, %v1797_v59  ;;  %vm1794_vm7 = vcmp.ge.f32.partialorder %v1784_v62, 0.0  ;;  %v1798_v0 = vmul.f32 0.2, %v1784_v62  ;;  %vm2231_vm8 = vcmp.ge.f32.partialorder %v2221_v63, 0.0 }
 0x29b   :  { %v2241_v1 = vsel %vm2240_vm2, %v4129_v36, 0.0  ;;  %v4133_v2 = vsel %vm2230_vm6, %v2219_v57, %v2234_v61  ;;  %v2235_v3 = vmul.f32 0.2, %v2221_v63  ;;  %v4144_v6 = vsel %vm1792_vm3, %v1780_v53, %v1796_v58 }
 0x29c   :  { %v2242_v5 = vadd.f32 %v2241_v1, %v4127_v60  ;;  %v2259_v13 = vsel %vm2240_vm2, %v4133_v2, 0.0  ;;  %v4141_v16 = vsel %vm1794_vm7, %v1784_v62, %v1798_v0  ;;  %v4152_v10 = vsel %vm2229_vm5, %v2217_v54, %v2233_v35 }
 0x29d   :  { %v2260_v7 = vadd.f32 %v2259_v13, %v4136_v4  ;;  %v2249_v8 = vsel %vm2240_vm2, %v4141_v16, 0.0  ;;  %v4149_v9 = vsel %vm2231_vm8, %v2221_v63, %v2235_v3 }
 0x29e   :  { %v2243_v11 = vrot.slane %v2242_v5, 4  ;;  %v2250_v12 = vadd.f32 %v2249_v8, %v4144_v6  ;;  %v2267_v17 = vsel %vm2240_vm2, %v4149_v9, 0.0 }
 0x29f   :  { %v2261_v18 = vrot.slane %v2260_v7, 4  ;;  %v2268_v19 = vadd.f32 %v2267_v17, %v4152_v10 }
 0x2a0   :  { %v2244_v20 = vadd.f32 %v2243_v11, %v2242_v5  ;;  %v2251_v21 = vrot.slane %v2250_v12, 4 }
 0x2a1   :  { %v2262_v22 = vadd.f32 %v2261_v18, %v2260_v7  ;;  %v2269_v23 = vrot.slane %v2268_v19, 4 }
 0x2a2   :  { %v2245_v24 = vrot.slane %v2244_v20, 2  ;;  %v2252_v25 = vadd.f32 %v2251_v21, %v2250_v12 }
 0x2a3   :  { %v2263_v26 = vrot.slane %v2262_v22, 2  ;;  %v2270_v27 = vadd.f32 %v2269_v23, %v2268_v19 }
 0x2a4   :  { %v2246_v28 = vadd.f32 %v2245_v24, %v2244_v20  ;;  %v2253_v29 = vrot.slane %v2252_v25, 2 }
 0x2a5   :  { %v2264_v30 = vadd.f32 %v2263_v26, %v2262_v22  ;;  %v2271_v31 = vrot.slane %v2270_v27, 2 }
 0x2a6   :  { %v2247_v32 = vrot.slane %v2246_v28, 1  ;;  %v2254_v33 = vadd.f32 %v2253_v29, %v2252_v25 }
 0x2a7   :  { %v2265_v34 = vrot.slane %v2264_v30, 1  ;;  %v2272_v37 = vadd.f32 %v2271_v31, %v2270_v27 }
 0x2a8   :  { %v2248_v38 = vadd.f32 %v2247_v32, %v2246_v28  ;;  %v2255_v39 = vrot.slane %v2254_v33, 1 }
 0x2a9   :  { %v2266_v40 = vadd.f32 %v2265_v34, %v2264_v30  ;;  %v2273_v41 = vrot.slane %v2272_v37, 1 }
 0x2aa   :  { %v2256_v42 = vadd.f32 %v2255_v39, %v2254_v33  ;;  %v2340_v39 = vlaneseq }
 0x2ab   :  { %v2275_v43 = vadd.f32 %v2266_v40, %v2248_v38  ;;  %v2274_v44 = vadd.f32 %v2273_v41, %v2272_v37 }
 0x2ad   :  { %v4158_v45 = vmul.f32 0.03846154, %v2275_v43  ;;  %v2276_v46 = vadd.f32 %v2274_v44, %v2256_v42 }
 0x2af   :  { %v2280_v47 = vsub.f32 %v4127_v60, %v4158_v45  ;;  %v2282_v14 = vsub.f32 %v4129_v36, %v4158_v45  ;;  %v2306_v15 = vsub.f32 %v4136_v4, %v4158_v45  ;;  %v2308_v48 = vsub.f32 %v4133_v2, %v4158_v45 }
 0x2b0   :  { %v4168_v49 = vmul.f32 0.03846154, %v2276_v46  ;;  %v2341_v46 = vshrl.u32 %v2340_v39, 7 }
 0x2b1   :  { %v2284_v50 = vmul.f32 %v2280_v47, %v2280_v47  ;;  %v2286_v51 = vmul.f32 %v2282_v14, %v2282_v14  ;;  %v2310_v52 = vmul.f32 %v2306_v15, %v2306_v15  ;;  %v2312_v53 = vmul.f32 %v2308_v48, %v2308_v48  ;;  %v2338_v48 = vld [vmem:[%s4230_s2] sm:$0x3] }
 0x2b2   :  { %v2281_v54 = vsub.f32 %v4144_v6, %v4168_v49  ;;  %v2283_v55 = vsub.f32 %v4141_v16, %v4168_v49  ;;  %v2307_v56 = vsub.f32 %v4152_v10, %v4168_v49  ;;  %v2309_v57 = vsub.f32 %v4149_v9, %v4168_v49 }
 0x2b3   :  { %v2288_v58 = vsel %vm2240_vm2, %v2286_v51, 0.0  ;;  %v2314_v59 = vsel %vm2240_vm2, %v2312_v53, 0.0  ;;  %v2342_v15 = vsub.s32 0, %v2341_v46  ;;  %v2346_v51 = vsub.s32 1, %v2341_v46 }
 0x2b4   :  { %v2289_v61 = vadd.f32 %v2288_v58, %v2284_v50  ;;  %v2315_v62 = vadd.f32 %v2314_v59, %v2310_v52  ;;  %v2285_v63 = vmul.f32 %v2281_v54, %v2281_v54  ;;  %v2287_v35 = vmul.f32 %v2283_v55, %v2283_v55 }
 0x2b5   :  { %v2311_v0 = vmul.f32 %v2307_v56, %v2307_v56  ;;  %v2313_v1 = vmul.f32 %v2309_v57, %v2309_v57  ;;  %v2343_v50 = vrot.slane %v2338_v48, %v2342_v15  ;;  %v3321_v53 = vmov 1966171168  }
 0x2b6   :  { %v2290_v3 = vrot.slane %v2289_v61, 4  ;;  %v2316_v5 = vrot.slane %v2315_v62, 4  ;;  %v2296_v13 = vsel %vm2240_vm2, %v2287_v35, 0.0  ;;  %v2359_v54 = vunpack.c.l.s4 %v3321_v53 }
 0x2b7   :  { %v2297_v7 = vadd.f32 %v2296_v13, %v2285_v63  ;;  %v2322_v8 = vsel %vm2240_vm2, %v2313_v1, 0.0  ;;  %v2347_v56 = vrot.slane %v2338_v48, %v2346_v51 }
 0x2b8   :  { %v2291_v11 = vadd.f32 %v2290_v3, %v2289_v61  ;;  %v2317_v12 = vadd.f32 %v2316_v5, %v2315_v62  ;;  %v2323_v17 = vadd.f32 %v2322_v8, %v2311_v0  ;;  %v2360_v61 = vunpack.c.0.s8 %v2359_v54 }
 0x2b9   :  { %v2298_v18 = vrot.slane %v2297_v7, 4 }
 0x2ba   :  { %v2292_v19 = vrot.slane %v2291_v11, 2  ;;  %v2318_v20 = vrot.slane %v2317_v12, 2  ;;  %v2324_v21 = vrot.slane %v2323_v17, 4  ;;  %v2363_v5 = vsub.s32 %v2360_v61, %v2341_v46 }
 0x2bb   :  { %v2299_v22 = vadd.f32 %v2298_v18, %v2297_v7 }
 0x2bc   :  { %v2293_v23 = vadd.f32 %v2292_v19, %v2291_v11  ;;  %v2319_v24 = vadd.f32 %v2318_v20, %v2317_v12  ;;  %v2325_v25 = vadd.f32 %v2324_v21, %v2323_v17 }
 0x2bd   :  { %v2300_v26 = vrot.slane %v2299_v22, 2 }
 0x2be   :  { %v2294_v27 = vrot.slane %v2293_v23, 1  ;;  %v2320_v28 = vrot.slane %v2319_v24, 1  ;;  %v2326_v29 = vrot.slane %v2325_v25, 2 }
 0x2bf   :  { %v2301_v30 = vadd.f32 %v2300_v26, %v2299_v22 }
 0x2c0   :  { %v2295_v31 = vadd.f32 %v2294_v27, %v2293_v23  ;;  %v2321_v32 = vadd.f32 %v2320_v28, %v2319_v24  ;;  %v2327_v33 = vadd.f32 %v2326_v29, %v2325_v25  ;;  %v2429_v24 = vld [vmem:[%s4232_s4 + $0x8] sm:$0x77]  ;;  %v2902_v27 = vld [vmem:[%s4232_s4 + $0x18] sm:$0x77] }
 0x2c1   :  { %v2302_v34 = vrot.slane %v2301_v30, 1 }
 0x2c2   :  { %v2330_v37 = vadd.f32 %v2321_v32, %v2295_v31  ;;  %v2328_v38 = vrot.slane %v2327_v33, 1 }
 0x2c3   :  { %v2303_v40 = vadd.f32 %v2302_v34, %v2301_v30 }
 0x2c4   :  { %v2332_v41 = vmul.f32 0.03846154, %v2330_v37  ;;  %v2329_v42 = vadd.f32 %v2328_v38, %v2327_v33 }
 0x2c6   :  { %v2334_v43 = vadd.f32 1e-05, %v2332_v41  ;;  %v2331_v44 = vadd.f32 %v2329_v42, %v2303_v40 }
 0x2c8   :  { %3317 = vrsqrt.f32 %v2334_v43  ;;  %v2333_v47 = vmul.f32 0.03846154, %v2331_v44 }
 0x2ca   :  { %v2335_v14 = vadd.f32 1e-05, %v2333_v47 }
 0x2cc   :  { %3319 = vrsqrt.f32 %v2335_v14 }
 0x2d2   :  { %v3318_v52 = vpop.eup %3317 }
 0x2d3   :  { %v2350_v55 = vmul.f32 %v3318_v52, %v2343_v50 }
 0x2d5   :  { %v2353_v57 = vmul.f32 %v2350_v55, %v4158_v45  ;;  %v2377_v58 = vrot.slane %v2350_v55, %v2342_v15 }
 0x2d6   :  { %v3320_v59 = vpop.eup %3319 }
 0x2d7   :  { %v2382_v62 = vmul.f32 %v2377_v58, %v4127_v60  ;;  %v2384_v63 = vmul.f32 %v2377_v58, %v4129_v36  ;;  %v2401_v35 = vmul.f32 %v2377_v58, %v4136_v4  ;;  %v2403_v0 = vmul.f32 %v2377_v58, %v4133_v2  ;;  %v2352_v36 = vld [vmem:[%s4231_s3] sm:$0x3] }
 0x2d8   :  { %v2351_v1 = vmul.f32 %v3320_v59, %v2347_v56 }
 0x2da   :  { %v2354_v3 = vmul.f32 %v2351_v1, %v4168_v49  ;;  %v2381_v13 = vrot.slane %v2351_v1, %v2342_v15 }
 0x2dc   :  { %v2357_v7 = vcombine.low %v2353_v57, %v2354_v3  ;;  %v2383_v8 = vmul.f32 %v2381_v13, %v4144_v6  ;;  %v2385_v45 = vmul.f32 %v2381_v13, %v4141_v16  ;;  %v2402_v11 = vmul.f32 %v2381_v13, %v4152_v10 }
 0x2dd   :  { %v2404_v60 = vmul.f32 %v2381_v13, %v4149_v9 }
 0x2de   :  { %v2364_v12 = vrot.slane %v2357_v7, %v2363_v5 }
 0x2e0   :  { %v2371_v2 = vrot.slane %v2364_v12, %v2363_v5 }
 0x2e2   :  { %v2373_v4 = vsub.f32 %v2352_v36, %v2371_v2 }
 0x2e4   :  { %v2390_v16 = vrot.slane %v2373_v4, %v2342_v15  ;;  %v2394_v6 = vrot.slane %v2373_v4, %v2346_v51 }
 0x2e6   :  { %v2397_v9 = vadd.f32 %v2390_v16, %v2382_v62  ;;  %v2398_v17 = vadd.f32 %v2394_v6, %v2383_v8  ;;  %v2399_v18 = vadd.f32 %v2390_v16, %v2384_v63  ;;  %v2400_v19 = vadd.f32 %v2394_v6, %v2385_v45 }
 0x2e7   :  { %v2405_v20 = vadd.f32 %v2401_v35, %v2390_v16  ;;  %v2406_v21 = vadd.f32 %v2402_v11, %v2394_v6  ;;  %v2407_v22 = vadd.f32 %v2403_v0, %v2390_v16  ;;  %v2408_v23 = vadd.f32 %v2404_v60, %v2394_v6 }
 0x2e8   :  { %v2904_v25 = vpack.c.bf16 %v2398_v17, %v2397_v9  ;;  %v2905_v26 = vpack.c.bf16 %v2400_v19, %v2399_v18 }
 0x2e9   :  { %v2906_v28 = vpack.c.bf16 %v2406_v21, %v2405_v20  ;;  %v2907_v29 = vpack.c.bf16 %v2408_v23, %v2407_v22 }
 0x2ea   :  { %2421 = vst [vmem:[%s4232_s4] sm:$0xff] %v2904_v25  ;;  %v2430_v30 = vsel %vm2428_vm15, %v2905_v26, %v2429_v24 }
 0x2eb   :  { %2431 = vst [vmem:[%s4232_s4 + $0x8] sm:$0x77] %v2430_v30  ;;  %2901 = vst [vmem:[%s4232_s4 + $0x10] sm:$0xff] %v2906_v28  ;;  %v2447_v31 = vsel %vm2428_vm15, %v2907_v29, %v2902_v27 }
 0x2ec   :  { %2903 = vst [vmem:[%s4232_s4 + $0x18] sm:$0x77] %v2447_v31 }

// kernel: generator_forward.9
= control target key start
LH: loop header
LB: loop body
LE: loop exit
PB: predicated region body
PF: predicated region fallthrough
CT: control target
= control target key end

     0   :  { %vm103_vm0 = vsmask.f32 7424  ;;  %vm612_vm1 = vcmask 1046528   ;;  %vm883_vm2 = vsmask.f32 6400  ;;  %vm1182_vm3 = vcmask 1045504   ;;  %s5077_s1 = inlined_call_operand.vmem [shape: bf16[7,256,256], index: 1, kind: input, shape index: {}]   ;;  %s5078_s0 = inlined_call_operand.vmem [shape: bf16[1,2,32,256], index: 0, kind: input, shape index: {}]   ;;  %s5079_s2 = inlined_call_operand.vmem [shape: f32[1,256], index: 2, kind: input, shape index: {}]   ;;  %s5080_s3 = inlined_call_operand.vmem [shape: f32[1,256], index: 3, kind: input, shape index: {}]   ;;  %s5081_s4 = inlined_call_operand.vmem [shape: bf16[2,26,256], index: 4, kind: output, shape index: {}]  }
   0x1   :  { %v3497_v0 = vld [vmem:[%s5077_s1 + $0x104] ss:$8 sps:$4 sm:$0xff]   ;;  %v3499_v1 = vld [vmem:[%s5077_s1 + $0x100] ss:$8 sps:$4 sm:$0xff]   ;;  %v3500_v2 = vld [vmem:[%s5077_s1 + $0x114] ss:$8 sps:$4 sm:$0xff]  }
   0x2   :  { %298 = vmatprep.subr.bf16.mxu0 %v3497_v0  ;;  %2064 = vmatprep.subr.bf16.mxu1 %v3497_v0  ;;  %v3502_v3 = vld [vmem:[%s5077_s1 + $0x110] ss:$8 sps:$4 sm:$0xff]   ;;  %v3503_v4 = vld [vmem:[%s5077_s1 + $0x124] ss:$8 sps:$4 sm:$0xff]   ;;  %v3505_v5 = vld [vmem:[%s5077_s1 + $0x120] ss:$8 sps:$4 sm:$0xff]  }
   0x3   :  { %299 = vmatpush1.bf16.msra.mxu0 %v3499_v1  ;;  %2065 = vmatpush1.bf16.msra.mxu1 %v3499_v1  ;;  %v3506_v6 = vld [vmem:[%s5077_s1 + $0x134] ss:$8 sps:$4 sm:$0xff]   ;;  %v3508_v7 = vld [vmem:[%s5077_s1 + $0x130] ss:$8 sps:$4 sm:$0xff]   ;;  %v3509_v8 = vld [vmem:[%s5077_s1 + $0x144] ss:$8 sps:$4 sm:$0xff]  }
   0x4   :  { %300 = vmatprep.subr.bf16.mxu0 %v3500_v2  ;;  %2066 = vmatprep.subr.bf16.mxu1 %v3500_v2  ;;  %v3511_v9 = vld [vmem:[%s5077_s1 + $0x140] ss:$8 sps:$4 sm:$0xff]   ;;  %v3512_v10 = vld [vmem:[%s5077_s1 + $0x154] ss:$8 sps:$4 sm:$0xff]   ;;  %v3514_v11 = vld [vmem:[%s5077_s1 + $0x150] ss:$8 sps:$4 sm:$0xff]  }
   0x5   :  { %v3515_v12 = vld [vmem:[%s5077_s1 + $0x164] ss:$8 sps:$4 sm:$0xff]   ;;  %v3952_v15 = vld [vmem:[%s5078_s0 + $0x10] sm:$0xff]  ;;  %v3957_v16 = vld [vmem:[%s5078_s0 + $0x18] sm:$0x33]  ;;  %vm1752_vm5 = vcmask 1044480  }
   0x6   :  { %v3942_v13 = vld [vmem:[%s5078_s0] sm:$0xff]  ;;  %v3947_v14 = vld [vmem:[%s5078_s0 + $0x8] sm:$0xff]  ;;  %v3518_v19 = vld [vmem:[%s5077_s1 + $0x174] ss:$8 sps:$4 sm:$0xff]   ;;  %v3971_v20 = vcombine.high %v3952_v15, %v3957_v16  ;;  %v4054_v55 = vcombine.low %v3952_v15, %v3957_v16  ;;  %vm1453_vm4 = vsmask.f32 5376 }
   0x7   :  { %301 = vmatpush1.bf16.msra.mxu0 %v3502_v3  ;;  %2067 = vmatpush1.bf16.msra.mxu1 %v3502_v3  ;;  %v3961_v17 = vcombine.high %v3942_v13, %v3947_v14  ;;  %v3517_v18 = vld [vmem:[%s5077_s1 + $0x160] ss:$8 sps:$4 sm:$0xff]   ;;  %v3986_v25 = vld [vmem:[%s5078_s0 + $0x30] sm:$0xff]  ;;  %v3358_v27 = vld [vmem:[%s5078_s0 + $0x38] sm:$0x33]  ;;  %v4044_v52 = vcombine.low %v3942_v13, %v3947_v14  ;;  %vm2646_vm10 = vcmask 1041408  }
   0x8   :  { %302 = vmatprep.subr.bf16.mxu0 %v3503_v4  ;;  %2068 = vmatprep.subr.bf16.mxu1 %v3503_v4  ;;  %v3354_v23 = vld [vmem:[%s5078_s0 + $0x20] sm:$0xff]  ;;  %v3981_v24 = vld [vmem:[%s5078_s0 + $0x28] sm:$0xff]  ;;  %v124_v26 = vshll.u32 %v3971_v20, 16  ;;  %v3520_v29 = vld [vmem:[%s5077_s1 + $0x170] ss:$8 sps:$4 sm:$0xff]   ;;  %v3999_v31 = vcombine.high %v3986_v25, %v3358_v27  ;;  %v4061_v58 = vcombine.low %v3986_v25, %v3358_v27  ;;  %v112_v63 = vshll.u32 %v4054_v55, 16 }
   0x9   :  { %v117_v21 = vshrl.u32 %v3961_v17, 16  ;;  %v119_v22 = vshll.u32 %v3961_v17, 16  ;;  %v3993_v28 = vcombine.high %v3354_v23, %v3981_v24  ;;  %v3521_v35 = vld [vmem:[%s5077_s1 + $0x184] ss:$8 sps:$4 sm:$0xff]   ;;  %v3523_v41 = vld [vmem:[%s5077_s1 + $0x180] ss:$8 sps:$4 sm:$0xff]   ;;  %v4047_v53 = vcombine.low %v3354_v23, %v3981_v24 }
   0xa   :  { %v4001_v32 = vrot.slane %v124_v26, 1  ;;  %v2050_v37 = vshll.u32 %v3999_v31, 16  ;;  %v3524_v43 = vld [vmem:[%s5077_s1 + $0x194] ss:$8 sps:$4 sm:$0xff]   ;;  %v3526_v45 = vld [vmem:[%s5077_s1 + $0x190] ss:$8 sps:$4 sm:$0xff]  }
   0xb   :  { %303 = vmatpush1.bf16.msra.mxu0 %v3505_v5  ;;  %2069 = vmatpush1.bf16.msra.mxu1 %v3505_v5  ;;  %v121_v30 = vrot.slane %v119_v22, 1  ;;  %v2043_v33 = vshrl.u32 %v3993_v28, 16  ;;  %v2045_v34 = vshll.u32 %v3993_v28, 16  ;;  %v3527_v46 = vld [vmem:[%s5077_s1 + $0x1a4] ss:$8 sps:$4 sm:$0xff]   ;;  %v107_v57 = vshll.u32 %v4044_v52, 16 }
   0xc   :  { %304 = vmatprep.subr.bf16.mxu0 %v3506_v6  ;;  %2070 = vmatprep.subr.bf16.mxu1 %v3506_v6  ;;  %v4011_v40 = vrot.slane %v2050_v37, 1  ;;  %v3529_v47 = vld [vmem:[%s5077_s1 + $0x1a0] ss:$8 sps:$4 sm:$0xff]   ;;  %v3530_v48 = vld [vmem:[%s5077_s1 + $0x1b4] ss:$8 sps:$4 sm:$0xff]   ;;  %v2033_v59 = vshll.u32 %v4047_v53, 16 }
   0xd   :  { %v122_v36 = vor.u32 %v121_v30, %v117_v21  ;;  %v2047_v38 = vrot.slane %v2045_v34, 1  ;;  %v3532_v49 = vld [vmem:[%s5077_s1 + $0x1b0] ss:$8 sps:$4 sm:$0xff]   ;;  %v3533_v50 = vld [vmem:[%s5077_s1 + $0x1c4] ss:$8 sps:$4 sm:$0xff]   ;;  %v105_v62 = vshrl.u32 %v4044_v52, 16 }
   0xe   :  { %v3535_v51 = vld [vmem:[%s5077_s1 + $0x1c0] ss:$8 sps:$4 sm:$0xff]   ;;  %v3536_v54 = vld [vmem:[%s5077_s1 + $0x1d4] ss:$8 sps:$4 sm:$0xff]   ;;  %v3538_v56 = vld [vmem:[%s5077_s1 + $0x1d0] ss:$8 sps:$4 sm:$0xff]  }
   0xf   :  { %305 = vmatpush1.bf16.msra.mxu0 %v3508_v7  ;;  %2071 = vmatpush1.bf16.msra.mxu1 %v3508_v7  ;;  %v127_v39 = vsel %vm103_vm0, %v122_v36, %v4001_v32  ;;  %v2048_v42 = vor.u32 %v2047_v38, %v2043_v33  ;;  %v3539_v60 = vld [vmem:[%s5077_s1 + $0x1e4] ss:$8 sps:$4 sm:$0xff]   ;;  %v3541_v61 = vld [vmem:[%s5077_s1 + $0x1e0] ss:$8 sps:$4 sm:$0xff]   ;;  %v109_v0 = vrot.slane %v107_v57, 1  ;;  %v2031_v1 = vshrl.u32 %v4047_v53, 16 }
  0x10   :  { %306 = vmatprep.subr.bf16.mxu0 %v3509_v8  ;;  %2072 = vmatprep.subr.bf16.mxu1 %v3509_v8  ;;  %v2035_v2 = vrot.slane %v2033_v59, 1  ;;  %v2038_v3 = vshll.u32 %v4061_v58, 16  ;;  %v3542_v4 = vld [vmem:[%s5077_s1 + $0x1f4] ss:$8 sps:$4 sm:$0xff]   ;;  %v3544_v5 = vld [vmem:[%s5077_s1 + $0x1f0] ss:$8 sps:$4 sm:$0xff]  }
  0x11   :  { %330 = vmatprep.mubr.bf16.mxu0 %v127_v39  ;;  %v2053_v44 = vsel %vm103_vm0, %v2048_v42, %v4011_v40  ;;  %v110_v6 = vor.u32 %v109_v0, %v105_v62  ;;  %v114_v7 = vrot.slane %v112_v63, 1  ;;  %v3547_v13 = vld [vmem:[%s5077_s1] ss:$8 sps:$4 sm:$0xff]   ;;  %v128_v23 = vshrl.u32 %v4054_v55, 16  ;;  %v3556_v27 = vld [vmem:[%s5077_s1 + $0x10] ss:$8 sps:$4 sm:$0xff]  }
  0x12   :  { %2096 = vmatprep.mubr.bf16.mxu1 %v2053_v44  ;;  %v2036_v8 = vor.u32 %v2035_v2, %v2031_v1  ;;  %v2054_v26 = vshrl.u32 %v4061_v58, 16  ;;  %v3559_v33 = vld [vmem:[%s5077_s1 + $0x20] ss:$8 sps:$4 sm:$0xff]   ;;  %v3564_v34 = vld [vmem:[%s5077_s1 + $0x34] ss:$8 sps:$4 sm:$0xff]  }
  0x13   :  { %307 = vmatpush1.bf16.msra.mxu0 %v3511_v9  ;;  %2073 = vmatpush1.bf16.msra.mxu1 %v3511_v9  ;;  %v2040_v9 = vrot.slane %v2038_v3, 1  ;;  %v115_v16 = vsel %vm103_vm0, %v110_v6, %v114_v7  ;;  %v130_v30 = vor.u32 %v128_v23, %v114_v7  ;;  %v3567_v36 = vld [vmem:[%s5077_s1 + $0x44] ss:$8 sps:$4 sm:$0xff]   ;;  %v3565_v37 = vld [vmem:[%s5077_s1 + $0x40] ss:$8 sps:$4 sm:$0xff]  }
  0x14   :  { %308 = vmatprep.subr.bf16.mxu0 %v3512_v10  ;;  %2074 = vmatprep.subr.bf16.mxu1 %v3512_v10  ;;  %v3549_v10 = vld [vmem:[%s5077_s1 + $0x4] ss:$8 sps:$4 sm:$0xff]   ;;  %v3570_v38 = vld [vmem:[%s5077_s1 + $0x54] ss:$8 sps:$4 sm:$0xff]   ;;  %v3571_v39 = vld [vmem:[%s5077_s1 + $0x60] ss:$8 sps:$4 sm:$0xff]  }
  0x15   :  { %v3579_v42 = vld [vmem:[%s5077_s1 + $0x84] ss:$8 sps:$4 sm:$0xff]   ;;  %v3582_v44 = vld [vmem:[%s5077_s1 + $0x94] ss:$8 sps:$4 sm:$0xff]   ;;  %v3595_v59 = vld [vmem:[%s5077_s1 + $0xe0] ss:$8 sps:$4 sm:$0xff]  }
  0x16   :  { %v3597_v57 = vld [vmem:[%s5077_s1 + $0xe4] ss:$8 sps:$4 sm:$0xff]   ;;  %v20_v63 = vld [vmem:[%s5078_s0 + $0x18] sm:$0x11]  ;;  %v3601_v1 = vld [vmem:[%s5077_s1 + $0x200] ss:$8 sps:$4 sm:$0xff]  }
  0x17   :  { %309 = vmatpush1.bf16.msra.mxu0 %v3514_v11  ;;  %2075 = vmatpush1.bf16.msra.mxu1 %v3514_v11  ;;  %v131_v11 = vshrl.u32 %v3971_v20, 16  ;;  %v3603_v62 = vld [vmem:[%s5077_s1 + $0x204] ss:$8 sps:$4 sm:$0xff]   ;;  %v3357_v0 = vld [vmem:[%s5078_s0 + $0x38] sm:$0x11] }
  0x18   :  { %310 = vmatprep.subr.bf16.mxu0 %v3515_v12  ;;  %2076 = vmatprep.subr.bf16.mxu1 %v3515_v12  ;;  %v2057_v12 = vshrl.u32 %v3999_v31, 16  ;;  %v4201_v2 = vld [vmem:[%s5078_s0] sm:$0xee]  ;;  %v3364_v6 = vcombine.high %v3986_v25, %v3357_v0  ;;  %v3618_v23 = vld [vmem:[%s5077_s1 + $0x254] ss:$8 sps:$4 sm:$0xff]  }
  0x19   :  { %v133_v21 = vor.u32 %v131_v11, %v4001_v32  ;;  %v2056_v32 = vor.u32 %v2054_v26, %v2040_v9  ;;  %v4206_v3 = vld [vmem:[%s5078_s0 + $0x20] sm:$0xee]  ;;  %v4217_v7 = vcombine.high %v4201_v2, %v3947_v14  ;;  %v617_v14 = vrot.slane %v3971_v20, 1  ;;  %v3616_v26 = vld [vmem:[%s5077_s1 + $0x250] ss:$8 sps:$4 sm:$0xff]  }
  0x1a   :  { %v2059_v22 = vor.u32 %v2057_v12, %v4011_v40  ;;  %v3576_v40 = vld [vmem:[%s5077_s1 + $0x74] ss:$8 sps:$4 sm:$0xff]   ;;  %v3363_v11 = vcombine.low %v3986_v25, %v3357_v0 }
  0x1b   :  { %311 = vmatpush1.bf16.msra.mxu0 %v3517_v18  ;;  %2077 = vmatpush1.bf16.msra.mxu1 %v3517_v18  ;;  %v2041_v18 = vsel %vm103_vm0, %v2036_v8, %v2040_v9  ;;  %v4221_v8 = vcombine.high %v4206_v3, %v3981_v24  ;;  %v3604_v9 = vld [vmem:[%s5077_s1 + $0x210] ss:$8 sps:$4 sm:$0xff]   ;;  %v616_v12 = vrot.slane %v4217_v7, 1  ;;  %v902_v0 = vshrl.u32 %v4217_v7, 16  ;;  %v3668_v20 = vld [vmem:[%s5077_s1 + $0x334] ss:$8 sps:$4 sm:$0xff]  }
  0x1c   :  { %312 = vmatprep.subr.bf16.mxu0 %v3518_v19  ;;  %2078 = vmatprep.subr.bf16.mxu1 %v3518_v19  ;;  %v3558_v19 = vld [vmem:[%s5077_s1 + $0x14] ss:$8 sps:$4 sm:$0xff]  }
  0x1f   :  { %313 = vmatpush1.bf16.msra.mxu0 %v3520_v29  ;;  %2079 = vmatpush1.bf16.msra.mxu1 %v3520_v29  ;;  %v3561_v29 = vld [vmem:[%s5077_s1 + $0x24] ss:$8 sps:$4 sm:$0xff]  }
  0x20   :  { %314 = vmatprep.subr.bf16.mxu0 %v3521_v35  ;;  %2080 = vmatprep.subr.bf16.mxu1 %v3521_v35  ;;  %v3562_v35 = vld [vmem:[%s5077_s1 + $0x30] ss:$8 sps:$4 sm:$0xff]  }
  0x23   :  { %315 = vmatpush1.bf16.msra.mxu0 %v3523_v41  ;;  %2081 = vmatpush1.bf16.msra.mxu1 %v3523_v41  ;;  %v3574_v41 = vld [vmem:[%s5077_s1 + $0x70] ss:$8 sps:$4 sm:$0xff]  }
  0x24   :  { %316 = vmatprep.subr.bf16.mxu0 %v3524_v43  ;;  %2082 = vmatprep.subr.bf16.mxu1 %v3524_v43  ;;  %v3577_v43 = vld [vmem:[%s5077_s1 + $0x80] ss:$8 sps:$4 sm:$0xff]  }
  0x27   :  { %317 = vmatpush1.bf16.msra.mxu0 %v3526_v45  ;;  %2083 = vmatpush1.bf16.msra.mxu1 %v3526_v45  ;;  %v3580_v45 = vld [vmem:[%s5077_s1 + $0x90] ss:$8 sps:$4 sm:$0xff]  }
  0x28   :  { %318 = vmatprep.subr.bf16.mxu0 %v3527_v46  ;;  %2084 = vmatprep.subr.bf16.mxu1 %v3527_v46  ;;  %v3585_v46 = vld [vmem:[%s5077_s1 + $0xa4] ss:$8 sps:$4 sm:$0xff]  }
  0x2b   :  { %319 = vmatpush1.bf16.msra.mxu0 %v3529_v47  ;;  %2085 = vmatpush1.bf16.msra.mxu1 %v3529_v47  ;;  %v3583_v47 = vld [vmem:[%s5077_s1 + $0xa0] ss:$8 sps:$4 sm:$0xff]  }
  0x2c   :  { %320 = vmatprep.subr.bf16.mxu0 %v3530_v48  ;;  %2086 = vmatprep.subr.bf16.mxu1 %v3530_v48  ;;  %v3588_v48 = vld [vmem:[%s5077_s1 + $0xb4] ss:$8 sps:$4 sm:$0xff]  }
  0x2f   :  { %321 = vmatpush1.bf16.msra.mxu0 %v3532_v49  ;;  %2087 = vmatpush1.bf16.msra.mxu1 %v3532_v49  ;;  %v3586_v49 = vld [vmem:[%s5077_s1 + $0xb0] ss:$8 sps:$4 sm:$0xff]  }
  0x30   :  { %322 = vmatprep.subr.bf16.mxu0 %v3533_v50  ;;  %2088 = vmatprep.subr.bf16.mxu1 %v3533_v50  ;;  %v3591_v50 = vld [vmem:[%s5077_s1 + $0xc4] ss:$8 sps:$4 sm:$0xff]  }
  0x33   :  { %323 = vmatpush1.bf16.msra.mxu0 %v3535_v51  ;;  %2089 = vmatpush1.bf16.msra.mxu1 %v3535_v51  ;;  %v3589_v51 = vld [vmem:[%s5077_s1 + $0xc0] ss:$8 sps:$4 sm:$0xff]  }
  0x34   :  { %324 = vmatprep.subr.bf16.mxu0 %v3536_v54  ;;  %2090 = vmatprep.subr.bf16.mxu1 %v3536_v54  ;;  %v3594_v54 = vld [vmem:[%s5077_s1 + $0xd4] ss:$8 sps:$4 sm:$0xff]  }
  0x37   :  { %325 = vmatpush1.bf16.msra.mxu0 %v3538_v56  ;;  %2091 = vmatpush1.bf16.msra.mxu1 %v3538_v56  ;;  %v3592_v56 = vld [vmem:[%s5077_s1 + $0xd0] ss:$8 sps:$4 sm:$0xff]  }
  0x38   :  { %326 = vmatprep.subr.bf16.mxu0 %v3539_v60  ;;  %2092 = vmatprep.subr.bf16.mxu1 %v3539_v60  ;;  %v3600_v60 = vld [vmem:[%s5077_s1 + $0xf4] ss:$8 sps:$4 sm:$0xff]  }
  0x3b   :  { %327 = vmatpush1.bf16.msra.mxu0 %v3541_v61  ;;  %2093 = vmatpush1.bf16.msra.mxu1 %v3541_v61  ;;  %v3598_v61 = vld [vmem:[%s5077_s1 + $0xf0] ss:$8 sps:$4 sm:$0xff]  }
  0x3c   :  { %328 = vmatprep.subr.bf16.mxu0 %v3542_v4  ;;  %2094 = vmatprep.subr.bf16.mxu1 %v3542_v4  ;;  %v3606_v4 = vld [vmem:[%s5077_s1 + $0x214] ss:$8 sps:$4 sm:$0xff]  }
  0x3f   :  { %329 = vmatpush1.bf16.msra.mxu0 %v3544_v5  ;;  %2095 = vmatpush1.bf16.msra.mxu1 %v3544_v5  ;;  %v2991_v5 = vcombine.high %v3952_v15, %v20_v63 }
  0x40   :  { %520 = vmatprep.subr.bf16.mxu0 %v3549_v10  ;;  %2126 = vmatprep.subr.bf16.mxu1 %v3549_v10  ;;  %v2990_v10 = vcombine.low %v3952_v15, %v20_v63  ;;  %v618_v15 = vsel %vm612_vm1, %v616_v12, %v617_v14  ;;  %v3657_v63 = vld [vmem:[%s5077_s1 + $0x304] ss:$8 sps:$4 sm:$0xff]  }
  0x42   :  { %331 = vmatmul.mubr.bf16.vlgmr.msra.gmra.mrb[0].mxu0 %v115_v16  ;;  %2097 = vmatmul.mubr.bf16.vlgmr.msra.gmra.mrb[0].mxu1 %v2041_v18  ;;  %v3607_v16 = vld [vmem:[%s5077_s1 + $0x220] ss:$8 sps:$4 sm:$0xff]   ;;  %v3612_v18 = vld [vmem:[%s5077_s1 + $0x234] ss:$8 sps:$4 sm:$0xff]  }
  0x43   :  { %521 = vmatpush1.bf16.msra.mxu0 %v3547_v13  ;;  %2127 = vmatpush1.bf16.msra.mxu1 %v3547_v13  ;;  %v2188_v13 = vrot.slane %v4221_v8, 1 }
  0x44   :  { %522 = vmatprep.subr.bf16.mxu0 %v3558_v19  ;;  %2128 = vmatprep.subr.bf16.mxu1 %v3558_v19  ;;  %v3610_v19 = vld [vmem:[%s5077_s1 + $0x230] ss:$8 sps:$4 sm:$0xff]  }
  0x45   :  { %340 = vmatprep.mubr.bf16.mxu0 %v133_v21  ;;  %2106 = vmatprep.mubr.bf16.mxu1 %v2059_v22  ;;  %v3615_v21 = vld [vmem:[%s5077_s1 + $0x244] ss:$8 sps:$4 sm:$0xff]   ;;  %v3613_v22 = vld [vmem:[%s5077_s1 + $0x240] ss:$8 sps:$4 sm:$0xff]  }
  0x47   :  { %523 = vmatpush1.bf16.msra.mxu0 %v3556_v27  ;;  %2129 = vmatpush1.bf16.msra.mxu1 %v3556_v27  ;;  %v3621_v27 = vld [vmem:[%s5077_s1 + $0x264] ss:$8 sps:$4 sm:$0xff]  }
  0x48   :  { %524 = vmatprep.subr.bf16.mxu0 %v3561_v29  ;;  %2130 = vmatprep.subr.bf16.mxu1 %v3561_v29  ;;  %v3619_v29 = vld [vmem:[%s5077_s1 + $0x260] ss:$8 sps:$4 sm:$0xff]  }
  0x4a   :  { %341 = vmatmul.mubr.bf16.gmra.mrb[4].mxu0 %v130_v30  ;;  %2107 = vmatmul.mubr.bf16.gmra.mrb[4].mxu1 %v2056_v32  ;;  %v3624_v30 = vld [vmem:[%s5077_s1 + $0x274] ss:$8 sps:$4 sm:$0xff]   ;;  %v3622_v32 = vld [vmem:[%s5077_s1 + $0x270] ss:$8 sps:$4 sm:$0xff]  }
  0x4b   :  { %525 = vmatpush1.bf16.msra.mxu0 %v3559_v33  ;;  %2131 = vmatpush1.bf16.msra.mxu1 %v3559_v33  ;;  %v3627_v33 = vld [vmem:[%s5077_s1 + $0x284] ss:$8 sps:$4 sm:$0xff]  }
  0x4c   :  { %526 = vmatprep.subr.bf16.mxu0 %v3564_v34  ;;  %2132 = vmatprep.subr.bf16.mxu1 %v3564_v34  ;;  %v3625_v34 = vld [vmem:[%s5077_s1 + $0x280] ss:$8 sps:$4 sm:$0xff]  }
  0x4d   :  { %552 = vmatprep.mubr.bf16.mxu0 %v3961_v17  ;;  %2158 = vmatprep.mubr.bf16.mxu1 %v3993_v28  ;;  %v3568_v17 = vld [vmem:[%s5077_s1 + $0x50] ss:$8 sps:$4 sm:$0xff]   ;;  %v3573_v28 = vld [vmem:[%s5077_s1 + $0x64] ss:$8 sps:$4 sm:$0xff]  }
  0x4f   :  { %527 = vmatpush1.bf16.msra.mxu0 %v3562_v35  ;;  %2133 = vmatpush1.bf16.msra.mxu1 %v3562_v35  ;;  %v3630_v35 = vld [vmem:[%s5077_s1 + $0x294] ss:$8 sps:$4 sm:$0xff]  }
  0x50   :  { %528 = vmatprep.subr.bf16.mxu0 %v3567_v36  ;;  %2134 = vmatprep.subr.bf16.mxu1 %v3567_v36  ;;  %v3628_v36 = vld [vmem:[%s5077_s1 + $0x290] ss:$8 sps:$4 sm:$0xff]  }
  0x53   :  { %529 = vmatpush1.bf16.msra.mxu0 %v3565_v37  ;;  %2135 = vmatpush1.bf16.msra.mxu1 %v3565_v37  ;;  %v3633_v37 = vld [vmem:[%s5077_s1 + $0x2a4] ss:$8 sps:$4 sm:$0xff]  }
  0x54   :  { %530 = vmatprep.subr.bf16.mxu0 %v3570_v38  ;;  %2136 = vmatprep.subr.bf16.mxu1 %v3570_v38  ;;  %v3631_v38 = vld [vmem:[%s5077_s1 + $0x2a0] ss:$8 sps:$4 sm:$0xff]  }
  0x57   :  { %531 = vmatpush1.bf16.msra.mxu0 %v3568_v17  ;;  %2137 = vmatpush1.bf16.msra.mxu1 %v3568_v17  ;;  %v3636_v17 = vld [vmem:[%s5077_s1 + $0x2b4] ss:$8 sps:$4 sm:$0xff]  }
  0x58   :  { %532 = vmatprep.subr.bf16.mxu0 %v3573_v28  ;;  %2138 = vmatprep.subr.bf16.mxu1 %v3573_v28  ;;  %v3634_v28 = vld [vmem:[%s5077_s1 + $0x2b0] ss:$8 sps:$4 sm:$0xff]  }
  0x5b   :  { %533 = vmatpush1.bf16.msra.mxu0 %v3571_v39  ;;  %2139 = vmatpush1.bf16.msra.mxu1 %v3571_v39  ;;  %v3639_v39 = vld [vmem:[%s5077_s1 + $0x2c4] ss:$8 sps:$4 sm:$0xff]  }
  0x5c   :  { %534 = vmatprep.subr.bf16.mxu0 %v3576_v40  ;;  %2140 = vmatprep.subr.bf16.mxu1 %v3576_v40  ;;  %v3637_v40 = vld [vmem:[%s5077_s1 + $0x2c0] ss:$8 sps:$4 sm:$0xff]  }
  0x5f   :  { %535 = vmatpush1.bf16.msra.mxu0 %v3574_v41  ;;  %2141 = vmatpush1.bf16.msra.mxu1 %v3574_v41  ;;  %v3642_v41 = vld [vmem:[%s5077_s1 + $0x2d4] ss:$8 sps:$4 sm:$0xff]  }
  0x60   :  { %536 = vmatprep.subr.bf16.mxu0 %v3579_v42  ;;  %2142 = vmatprep.subr.bf16.mxu1 %v3579_v42  ;;  %v3640_v42 = vld [vmem:[%s5077_s1 + $0x2d0] ss:$8 sps:$4 sm:$0xff]  }
  0x63   :  { %537 = vmatpush1.bf16.msra.mxu0 %v3577_v43  ;;  %2143 = vmatpush1.bf16.msra.mxu1 %v3577_v43  ;;  %v3646_v43 = vld [vmem:[%s5077_s1 + $0x2e4] ss:$8 sps:$4 sm:$0xff]  }
  0x64   :  { %538 = vmatprep.subr.bf16.mxu0 %v3582_v44  ;;  %2144 = vmatprep.subr.bf16.mxu1 %v3582_v44  ;;  %v4316_v44 = vld [vmem:[%s5078_s0 + $0x18] sm:$0x77] }
  0x67   :  { %539 = vmatpush1.bf16.msra.mxu0 %v3580_v45  ;;  %2145 = vmatpush1.bf16.msra.mxu1 %v3580_v45  ;;  %v3644_v45 = vld [vmem:[%s5077_s1 + $0x2e0] ss:$8 sps:$4 sm:$0xff]  }
  0x68   :  { %540 = vmatprep.subr.bf16.mxu0 %v3585_v46  ;;  %2146 = vmatprep.subr.bf16.mxu1 %v3585_v46  ;;  %v4324_v46 = vld [vmem:[%s5078_s0 + $0x8] sm:$0xff] }
  0x6b   :  { %541 = vmatpush1.bf16.msra.mxu0 %v3583_v47  ;;  %2147 = vmatpush1.bf16.msra.mxu1 %v3583_v47  ;;  %v4328_v47 = vcombine.low %v4201_v2, %v4324_v46 }
  0x6c   :  { %542 = vmatprep.subr.bf16.mxu0 %v3588_v48  ;;  %2148 = vmatprep.subr.bf16.mxu1 %v3588_v48  ;;  %v4332_v48 = vcombine.low %v4206_v3, %v3981_v24 }
  0x6f   :  { %543 = vmatpush1.bf16.msra.mxu0 %v3586_v49  ;;  %2149 = vmatpush1.bf16.msra.mxu1 %v3586_v49  ;;  %v4337_v49 = vld [vmem:[%s5078_s0 + $0x38] sm:$0x77] }
  0x70   :  { %544 = vmatprep.subr.bf16.mxu0 %v3591_v50  ;;  %2150 = vmatprep.subr.bf16.mxu1 %v3591_v50  ;;  %v3652_v50 = vld [vmem:[%s5077_s1 + $0x2f4] ss:$8 sps:$4 sm:$0xff]  }
  0x73   :  { %545 = vmatpush1.bf16.msra.mxu0 %v3589_v51  ;;  %2151 = vmatpush1.bf16.msra.mxu1 %v3589_v51  ;;  %v4345_v51 = vld [vmem:[%s5078_s0 + $0x10] sm:$0xff] }
  0x74   :  { %546 = vmatprep.subr.bf16.mxu0 %v3594_v54  ;;  %2152 = vmatprep.subr.bf16.mxu1 %v3594_v54  ;;  %v4349_v24 = vcombine.high %v4345_v51, %v4316_v44  ;;  %v4354_v54 = vld [vmem:[%s5078_s0 + $0x30] sm:$0xff] }
  0x76   :  { %v910_v2 = vshrl.u32 %v4349_v24, 16  ;;  %v913_v3 = vshll.u32 %v4349_v24, 16 }
  0x77   :  { %547 = vmatpush1.bf16.msra.mxu0 %v3592_v56  ;;  %2153 = vmatpush1.bf16.msra.mxu1 %v3592_v56  ;;  %v4358_v56 = vcombine.high %v4354_v54, %v4337_v49 }
  0x78   :  { %548 = vmatprep.subr.bf16.mxu0 %v3597_v57  ;;  %2154 = vmatprep.subr.bf16.mxu1 %v3597_v57  ;;  %v3650_v57 = vld [vmem:[%s5077_s1 + $0x2f0] ss:$8 sps:$4 sm:$0xff]   ;;  %v915_v12 = vrot.slane %v913_v3, 2 }
  0x7b   :  { %549 = vmatpush1.bf16.msra.mxu0 %v3595_v59  ;;  %2155 = vmatpush1.bf16.msra.mxu1 %v3595_v59  ;;  %v613_v59 = vrot.slane %v4328_v47, 1 }
  0x7c   :  { %550 = vmatprep.subr.bf16.mxu0 %v3600_v60  ;;  %2156 = vmatprep.subr.bf16.mxu1 %v3600_v60  ;;  %v614_v60 = vrot.slane %v4054_v55, 1  ;;  %v2280_v55 = vshrl.u32 %v4221_v8, 16 }
  0x7f   :  { %551 = vmatpush1.bf16.msra.mxu0 %v3598_v61  ;;  %2157 = vmatpush1.bf16.msra.mxu1 %v3598_v61  ;;  %v2185_v61 = vrot.slane %v4332_v48, 1 }
  0x80   :  { %783 = vmatprep.subr.bf16.mxu0 %v3603_v62  ;;  %2195 = vmatprep.subr.bf16.mxu1 %v3603_v62  ;;  %v2186_v62 = vrot.slane %v4061_v58, 1  ;;  %v2288_v58 = vshrl.u32 %v4358_v56, 16 }
  0x82   :  { %553 = vmatmul.mubr.bf16.vlgmr.msra.gmra.mrb[0].mxu0 %v4044_v52  ;;  %2159 = vmatmul.mubr.bf16.vlgmr.msra.gmra.mrb[0].mxu1 %v4047_v53  ;;  %v3609_v52 = vld [vmem:[%s5077_s1 + $0x224] ss:$8 sps:$4 sm:$0xff]   ;;  %v2189_v53 = vrot.slane %v3999_v31, 1 }
  0x83   :  { %784 = vmatpush1.bf16.msra.mxu0 %v3601_v1  ;;  %2196 = vmatpush1.bf16.msra.mxu1 %v3601_v1  ;;  %v905_v1 = vshll.u32 %v4217_v7, 16  ;;  %v615_v7 = vsel %vm612_vm1, %v613_v59, %v614_v60  ;;  %v4473_v59 = vcombine.low %v4354_v54, %v4337_v49  ;;  %v3696_v49 = vld [vmem:[%s5077_s1 + $0x3d0] ss:$8 sps:$4 sm:$0xff]  }
  0x84   :  { %785 = vmatprep.subr.bf16.mxu0 %v3606_v4  ;;  %2197 = vmatprep.subr.bf16.mxu1 %v3606_v4  ;;  %v2190_v25 = vsel %vm612_vm1, %v2188_v13, %v2189_v53  ;;  %v2283_v4 = vshll.u32 %v4221_v8, 16  ;;  %v3662_v8 = vld [vmem:[%s5077_s1 + $0x314] ss:$8 sps:$4 sm:$0xff]   ;;  %v2282_v13 = vrot.slane %v2280_v55, 1 }
  0x85   :  { %562 = vmatprep.mubr.bf16.mxu0 %v2991_v5  ;;  %2168 = vmatprep.mubr.bf16.mxu1 %v3364_v6  ;;  %v2291_v5 = vshll.u32 %v4358_v56, 16  ;;  %v3655_v6 = vld [vmem:[%s5077_s1 + $0x300] ss:$8 sps:$4 sm:$0xff]   ;;  %v2274_v3 = vshll.u32 %v4473_v59, 16 }
  0x87   :  { %786 = vmatpush1.bf16.msra.mxu0 %v3604_v9  ;;  %2198 = vmatpush1.bf16.msra.mxu1 %v3604_v9  ;;  %v2187_v9 = vsel %vm612_vm1, %v2185_v61, %v2186_v62  ;;  %v885_v61 = vshrl.u32 %v4328_v47, 16 }
  0x88   :  { %787 = vmatprep.subr.bf16.mxu0 %v3609_v52  ;;  %2199 = vmatprep.subr.bf16.mxu1 %v3609_v52  ;;  %v904_v52 = vrot.slane %v902_v0, 1  ;;  %v2263_v0 = vshrl.u32 %v4332_v48, 16 }
  0x89   :  { %v887_v55 = vrot.slane %v885_v61, 1  ;;  %v3736_v61 = vld [vmem:[%s5077_s1 + $0x490] ss:$8 sps:$4 sm:$0xff]  }
  0x8a   :  { %563 = vmatmul.mubr.bf16.gmra.mrb[4].mxu0 %v2990_v10  ;;  %2169 = vmatmul.mubr.bf16.gmra.mrb[4].mxu1 %v3363_v11  ;;  %v907_v10 = vrot.slane %v905_v1, 2  ;;  %v912_v11 = vrot.slane %v910_v2, 1  ;;  %v2266_v1 = vshll.u32 %v4332_v48, 16  ;;  %v2271_v2 = vshrl.u32 %v4473_v59, 16  ;;  %v3699_v48 = vld [vmem:[%s5077_s1 + $0x3e0] ss:$8 sps:$4 sm:$0xff]  }
  0x8b   :  { %788 = vmatpush1.bf16.msra.mxu0 %v3607_v16  ;;  %2200 = vmatpush1.bf16.msra.mxu1 %v3607_v16  ;;  %v2285_v16 = vrot.slane %v2283_v4, 2 }
  0x8c   :  { %789 = vmatprep.subr.bf16.mxu0 %v3612_v18  ;;  %2201 = vmatprep.subr.bf16.mxu1 %v3612_v18  ;;  %v2290_v18 = vrot.slane %v2288_v58, 1 }
  0x8d   :  { %815 = vmatprep.mubr.bf16.mxu0 %v618_v15  ;;  %2227 = vmatprep.mubr.bf16.mxu1 %v2190_v25  ;;  %v2293_v15 = vrot.slane %v2291_v5, 2  ;;  %v3660_v25 = vld [vmem:[%s5077_s1 + $0x310] ss:$8 sps:$4 sm:$0xff]  }
  0x8f   :  { %790 = vmatpush1.bf16.msra.mxu0 %v3610_v19  ;;  %2202 = vmatpush1.bf16.msra.mxu1 %v3610_v19  ;;  %v3665_v19 = vld [vmem:[%s5077_s1 + $0x324] ss:$8 sps:$4 sm:$0xff]  }
  0x90   :  { %791 = vmatprep.subr.bf16.mxu0 %v3615_v21  ;;  %2203 = vmatprep.subr.bf16.mxu1 %v3615_v21  ;;  %v908_v21 = vor.u32 %v907_v10, %v904_v52  ;;  %v3704_v52 = vld [vmem:[%s5077_s1 + $0x3f4] ss:$8 sps:$4 sm:$0xff]  }
  0x93   :  { %792 = vmatpush1.bf16.msra.mxu0 %v3613_v22  ;;  %2204 = vmatpush1.bf16.msra.mxu1 %v3613_v22  ;;  %v4396_v22 = vor.u32 %v915_v12, %v912_v11  ;;  %v3702_v11 = vld [vmem:[%s5077_s1 + $0x3f0] ss:$8 sps:$4 sm:$0xff]  }
  0x94   :  { %793 = vmatprep.subr.bf16.mxu0 %v3618_v23  ;;  %2205 = vmatprep.subr.bf16.mxu1 %v3618_v23  ;;  %v2286_v23 = vor.u32 %v2285_v16, %v2282_v13 }
  0x95   :  { %v917_v31 = vsel %vm883_vm2, %v908_v21, %v4396_v22  ;;  %v4512_v21 = vld [vmem:[%s5078_s0] sm:$0xcc] }
  0x97   :  { %794 = vmatpush1.bf16.msra.mxu0 %v3616_v26  ;;  %2206 = vmatpush1.bf16.msra.mxu1 %v3616_v26  ;;  %v4398_v26 = vor.u32 %v2293_v15, %v2290_v18  ;;  %v3709_v18 = vld [vmem:[%s5077_s1 + $0x404] ss:$8 sps:$4 sm:$0xff]   ;;  %v3707_v15 = vld [vmem:[%s5077_s1 + $0x400] ss:$8 sps:$4 sm:$0xff]  }
  0x98   :  { %795 = vmatprep.subr.bf16.mxu0 %v3621_v27  ;;  %2207 = vmatprep.subr.bf16.mxu1 %v3621_v27  ;;  %v3663_v27 = vld [vmem:[%s5077_s1 + $0x320] ss:$8 sps:$4 sm:$0xff]  }
  0x9b   :  { %796 = vmatpush1.bf16.msra.mxu0 %v3619_v29  ;;  %2208 = vmatpush1.bf16.msra.mxu1 %v3619_v29  ;;  %v3671_v29 = vld [vmem:[%s5077_s1 + $0x344] ss:$8 sps:$4 sm:$0xff]  }
  0x9c   :  { %797 = vmatprep.subr.bf16.mxu0 %v3624_v30  ;;  %2209 = vmatprep.subr.bf16.mxu1 %v3624_v30  ;;  %v3669_v30 = vld [vmem:[%s5077_s1 + $0x340] ss:$8 sps:$4 sm:$0xff]  }
  0x9f   :  { %798 = vmatpush1.bf16.msra.mxu0 %v3622_v32  ;;  %2210 = vmatpush1.bf16.msra.mxu1 %v3622_v32  ;;  %v3674_v32 = vld [vmem:[%s5077_s1 + $0x354] ss:$8 sps:$4 sm:$0xff]  }
  0xa0   :  { %799 = vmatprep.subr.bf16.mxu0 %v3627_v33  ;;  %2211 = vmatprep.subr.bf16.mxu1 %v3627_v33  ;;  %v3672_v33 = vld [vmem:[%s5077_s1 + $0x350] ss:$8 sps:$4 sm:$0xff]  }
  0xa3   :  { %800 = vmatpush1.bf16.msra.mxu0 %v3625_v34  ;;  %2212 = vmatpush1.bf16.msra.mxu1 %v3625_v34  ;;  %v3677_v34 = vld [vmem:[%s5077_s1 + $0x364] ss:$8 sps:$4 sm:$0xff]  }
  0xa4   :  { %801 = vmatprep.subr.bf16.mxu0 %v3630_v35  ;;  %2213 = vmatprep.subr.bf16.mxu1 %v3630_v35  ;;  %v3675_v35 = vld [vmem:[%s5077_s1 + $0x360] ss:$8 sps:$4 sm:$0xff]  }
  0xa7   :  { %802 = vmatpush1.bf16.msra.mxu0 %v3628_v36  ;;  %2214 = vmatpush1.bf16.msra.mxu1 %v3628_v36  ;;  %v3680_v36 = vld [vmem:[%s5077_s1 + $0x374] ss:$8 sps:$4 sm:$0xff]  }
  0xa8   :  { %803 = vmatprep.subr.bf16.mxu0 %v3633_v37  ;;  %2215 = vmatprep.subr.bf16.mxu1 %v3633_v37  ;;  %v3678_v37 = vld [vmem:[%s5077_s1 + $0x370] ss:$8 sps:$4 sm:$0xff]  }
  0xab   :  { %804 = vmatpush1.bf16.msra.mxu0 %v3631_v38  ;;  %2216 = vmatpush1.bf16.msra.mxu1 %v3631_v38  ;;  %v3683_v38 = vld [vmem:[%s5077_s1 + $0x384] ss:$8 sps:$4 sm:$0xff]  }
  0xac   :  { %805 = vmatprep.subr.bf16.mxu0 %v3636_v17  ;;  %2217 = vmatprep.subr.bf16.mxu1 %v3636_v17  ;;  %v3681_v17 = vld [vmem:[%s5077_s1 + $0x380] ss:$8 sps:$4 sm:$0xff]  }
  0xaf   :  { %806 = vmatpush1.bf16.msra.mxu0 %v3634_v28  ;;  %2218 = vmatpush1.bf16.msra.mxu1 %v3634_v28  ;;  %v3686_v28 = vld [vmem:[%s5077_s1 + $0x394] ss:$8 sps:$4 sm:$0xff]  }
  0xb0   :  { %807 = vmatprep.subr.bf16.mxu0 %v3639_v39  ;;  %2219 = vmatprep.subr.bf16.mxu1 %v3639_v39  ;;  %v3684_v39 = vld [vmem:[%s5077_s1 + $0x390] ss:$8 sps:$4 sm:$0xff]  }
  0xb3   :  { %808 = vmatpush1.bf16.msra.mxu0 %v3637_v40  ;;  %2220 = vmatpush1.bf16.msra.mxu1 %v3637_v40  ;;  %v3689_v40 = vld [vmem:[%s5077_s1 + $0x3a4] ss:$8 sps:$4 sm:$0xff]  }
  0xb4   :  { %809 = vmatprep.subr.bf16.mxu0 %v3642_v41  ;;  %2221 = vmatprep.subr.bf16.mxu1 %v3642_v41  ;;  %v3687_v41 = vld [vmem:[%s5077_s1 + $0x3a0] ss:$8 sps:$4 sm:$0xff]  }
  0xb7   :  { %810 = vmatpush1.bf16.msra.mxu0 %v3640_v42  ;;  %2222 = vmatpush1.bf16.msra.mxu1 %v3640_v42  ;;  %v3692_v42 = vld [vmem:[%s5077_s1 + $0x3b4] ss:$8 sps:$4 sm:$0xff]  }
  0xb8   :  { %811 = vmatprep.subr.bf16.mxu0 %v3646_v43  ;;  %2223 = vmatprep.subr.bf16.mxu1 %v3646_v43  ;;  %v3690_v43 = vld [vmem:[%s5077_s1 + $0x3b0] ss:$8 sps:$4 sm:$0xff]  }
  0xbb   :  { %812 = vmatpush1.bf16.msra.mxu0 %v3644_v45  ;;  %2224 = vmatpush1.bf16.msra.mxu1 %v3644_v45  ;;  %v3695_v45 = vld [vmem:[%s5077_s1 + $0x3c4] ss:$8 sps:$4 sm:$0xff]  }
  0xbc   :  { %813 = vmatprep.subr.bf16.mxu0 %v3652_v50  ;;  %2225 = vmatprep.subr.bf16.mxu1 %v3652_v50  ;;  %v4466_v50 = vcombine.low %v4345_v51, %v4316_v44  ;;  %v888_v44 = vshll.u32 %v4328_v47, 16  ;;  %v3701_v47 = vld [vmem:[%s5077_s1 + $0x3e4] ss:$8 sps:$4 sm:$0xff]  }
  0xbe   :  { %v890_v4 = vrot.slane %v888_v44, 2  ;;  %v3741_v44 = vld [vmem:[%s5077_s1 + $0x4a4] ss:$8 sps:$4 sm:$0xff]  }
  0xbf   :  { %814 = vmatpush1.bf16.msra.mxu0 %v3650_v57  ;;  %2226 = vmatpush1.bf16.msra.mxu1 %v3650_v57  ;;  %v3693_v57 = vld [vmem:[%s5077_s1 + $0x3c0] ss:$8 sps:$4 sm:$0xff]  }
  0xc0   :  { %1082 = vmatprep.subr.bf16.mxu0 %v3657_v63  ;;  %2300 = vmatprep.subr.bf16.mxu1 %v3657_v63  ;;  %v896_v63 = vshll.u32 %v4466_v50, 16  ;;  %v891_v10 = vor.u32 %v890_v4, %v887_v55  ;;  %v4628_v55 = vld [vmem:[%s5078_s0 + $0x18] sm:$0xff]  ;;  %v3751_v4 = vld [vmem:[%s5077_s1 + $0x4e0] ss:$8 sps:$4 sm:$0xff]  }
  0xc2   :  { %816 = vmatmul.mubr.bf16.vlgmr.msra.gmra.mrb[0].mxu0 %v615_v7  ;;  %2228 = vmatmul.mubr.bf16.vlgmr.msra.gmra.mrb[0].mxu1 %v2187_v9  ;;  %v898_v5 = vrot.slane %v896_v63, 2  ;;  %v2268_v7 = vrot.slane %v2266_v1, 2  ;;  %v2273_v9 = vrot.slane %v2271_v2, 1  ;;  %v3744_v63 = vld [vmem:[%s5077_s1 + $0x4b4] ss:$8 sps:$4 sm:$0xff]  }
  0xc3   :  { %1083 = vmatpush1.bf16.msra.mxu0 %v3655_v6  ;;  %2301 = vmatpush1.bf16.msra.mxu1 %v3655_v6  ;;  %v2265_v6 = vrot.slane %v2263_v0, 1  ;;  %v3747_v0 = vld [vmem:[%s5077_s1 + $0x4c4] ss:$8 sps:$4 sm:$0xff]   ;;  %v3745_v1 = vld [vmem:[%s5077_s1 + $0x4c0] ss:$8 sps:$4 sm:$0xff]  }
  0xc4   :  { %1084 = vmatprep.subr.bf16.mxu0 %v3662_v8  ;;  %2302 = vmatprep.subr.bf16.mxu1 %v3662_v8  ;;  %v2276_v8 = vrot.slane %v2274_v3, 2  ;;  %v3750_v2 = vld [vmem:[%s5077_s1 + $0x4d4] ss:$8 sps:$4 sm:$0xff]   ;;  %v3748_v3 = vld [vmem:[%s5077_s1 + $0x4d0] ss:$8 sps:$4 sm:$0xff]  }
  0xc5   :  { %825 = vmatprep.mubr.bf16.mxu0 %v617_v14  ;;  %2237 = vmatprep.mubr.bf16.mxu1 %v2189_v53  ;;  %v2295_v14 = vsel %vm883_vm2, %v2286_v23, %v4398_v26  ;;  %v3666_v53 = vld [vmem:[%s5077_s1 + $0x330] ss:$8 sps:$4 sm:$0xff]   ;;  %v2269_v13 = vor.u32 %v2268_v7, %v2265_v6  ;;  %v4517_v23 = vld [vmem:[%s5078_s0 + $0x20] sm:$0xcc]  ;;  %v3756_v6 = vld [vmem:[%s5077_s1 + $0x4f4] ss:$8 sps:$4 sm:$0xff]   ;;  %v4651_v7 = vcombine.high %v4345_v51, %v4628_v55 }
  0xc6   :  { %v2277_v16 = vor.u32 %v2276_v8, %v2273_v9  ;;  %v3754_v8 = vld [vmem:[%s5077_s1 + $0x4f0] ss:$8 sps:$4 sm:$0xff]  }
  0xc7   :  { %1085 = vmatpush1.bf16.msra.mxu0 %v3660_v25  ;;  %2303 = vmatpush1.bf16.msra.mxu1 %v3660_v25 }
  0xc8   :  { %1086 = vmatprep.subr.bf16.mxu0 %v3665_v19  ;;  %2304 = vmatprep.subr.bf16.mxu1 %v3665_v19  ;;  %v2278_v19 = vsel %vm883_vm2, %v2269_v13, %v2277_v16  ;;  %v3761_v13 = vld [vmem:[%s5077_s1 + $0x504] ss:$8 sps:$4 sm:$0xff]  }
  0xca   :  { %826 = vmatmul.mubr.bf16.gmra.mrb[4].mxu0 %v614_v60  ;;  %2238 = vmatmul.mubr.bf16.gmra.mrb[4].mxu1 %v2186_v62  ;;  %v3698_v60 = vld [vmem:[%s5077_s1 + $0x3d4] ss:$8 sps:$4 sm:$0xff]   ;;  %v893_v62 = vshrl.u32 %v4466_v50, 16 }
  0xcb   :  { %1087 = vmatpush1.bf16.msra.mxu0 %v3663_v27  ;;  %2305 = vmatpush1.bf16.msra.mxu1 %v3663_v27  ;;  %v3714_v27 = vld [vmem:[%s5077_s1 + $0x414] ss:$8 sps:$4 sm:$0xff]  }
  0xcc   :  { %1088 = vmatprep.subr.bf16.mxu0 %v3668_v20  ;;  %2306 = vmatprep.subr.bf16.mxu1 %v3668_v20  ;;  %v895_v58 = vrot.slane %v893_v62, 1  ;;  %v4524_v20 = vcombine.high %v4512_v21, %v4324_v46  ;;  %v3739_v62 = vld [vmem:[%s5077_s1 + $0x4a0] ss:$8 sps:$4 sm:$0xff]  }
  0xcd   :  { %1114 = vmatprep.mubr.bf16.mxu0 %v917_v31  ;;  %2332 = vmatprep.mubr.bf16.mxu1 %v2295_v14  ;;  %v4529_v31 = vld [vmem:[%s5078_s0 + $0x28] sm:$0xff] }
  0xce   :  { %v899_v12 = vor.u32 %v898_v5, %v895_v58  ;;  %v4533_v14 = vcombine.high %v4517_v23, %v4529_v31  ;;  %v4635_v58 = vcombine.low %v4512_v21, %v4324_v46  ;;  %v4639_v5 = vcombine.low %v4517_v23, %v4529_v31  ;;  %v3759_v23 = vld [vmem:[%s5077_s1 + $0x500] ss:$8 sps:$4 sm:$0xff]  }
  0xcf   :  { %1089 = vmatpush1.bf16.msra.mxu0 %v3666_v53  ;;  %2307 = vmatpush1.bf16.msra.mxu1 %v3666_v53  ;;  %v3712_v53 = vld [vmem:[%s5077_s1 + $0x410] ss:$8 sps:$4 sm:$0xff]  }
  0xd0   :  { %1090 = vmatprep.subr.bf16.mxu0 %v3671_v29  ;;  %2308 = vmatprep.subr.bf16.mxu1 %v3671_v29  ;;  %v900_v25 = vsel %vm883_vm2, %v891_v10, %v899_v12  ;;  %v3717_v29 = vld [vmem:[%s5077_s1 + $0x424] ss:$8 sps:$4 sm:$0xff]   ;;  %v1184_v10 = vrot.slane %v4466_v50, 2  ;;  %v2462_v50 = vshrl.u32 %v4533_v14, 16 }
  0xd3   :  { %1091 = vmatpush1.bf16.msra.mxu0 %v3669_v30  ;;  %2309 = vmatpush1.bf16.msra.mxu1 %v3669_v30  ;;  %v1186_v30 = vrot.slane %v4524_v20, 2 }
  0xd4   :  { %1092 = vmatprep.subr.bf16.mxu0 %v3674_v32  ;;  %2310 = vmatprep.subr.bf16.mxu1 %v3674_v32  ;;  %v1187_v32 = vrot.slane %v4349_v24, 2  ;;  %v3772_v24 = vld [vmem:[%s5077_s1 + $0x534] ss:$8 sps:$4 sm:$0xff]  }
  0xd7   :  { %1093 = vmatpush1.bf16.msra.mxu0 %v3672_v33  ;;  %2311 = vmatpush1.bf16.msra.mxu1 %v3672_v33  ;;  %v2370_v33 = vrot.slane %v4533_v14, 2 }
  0xd8   :  { %1094 = vmatprep.subr.bf16.mxu0 %v3677_v34  ;;  %2312 = vmatprep.subr.bf16.mxu1 %v3677_v34  ;;  %v2371_v34 = vrot.slane %v4358_v56, 2 }
  0xdb   :  { %1095 = vmatpush1.bf16.msra.mxu0 %v3675_v35  ;;  %2313 = vmatpush1.bf16.msra.mxu1 %v3675_v35  ;;  %v3715_v35 = vld [vmem:[%s5077_s1 + $0x420] ss:$8 sps:$4 sm:$0xff]  }
  0xdc   :  { %1096 = vmatprep.subr.bf16.mxu0 %v3680_v36  ;;  %2314 = vmatprep.subr.bf16.mxu1 %v3680_v36  ;;  %v2372_v36 = vsel %vm1182_vm3, %v2370_v33, %v2371_v34 }
  0xdf   :  { %1097 = vmatpush1.bf16.msra.mxu0 %v3678_v37  ;;  %2315 = vmatpush1.bf16.msra.mxu1 %v3678_v37  ;;  %v3718_v37 = vld [vmem:[%s5077_s1 + $0x430] ss:$8 sps:$4 sm:$0xff]  }
  0xe0   :  { %1098 = vmatprep.subr.bf16.mxu0 %v3683_v38  ;;  %2316 = vmatprep.subr.bf16.mxu1 %v3683_v38  ;;  %v3723_v38 = vld [vmem:[%s5077_s1 + $0x444] ss:$8 sps:$4 sm:$0xff]  }
  0xe3   :  { %1099 = vmatpush1.bf16.msra.mxu0 %v3681_v17  ;;  %2317 = vmatpush1.bf16.msra.mxu1 %v3681_v17  ;;  %v3721_v17 = vld [vmem:[%s5077_s1 + $0x440] ss:$8 sps:$4 sm:$0xff]  }
  0xe4   :  { %1100 = vmatprep.subr.bf16.mxu0 %v3686_v28  ;;  %2318 = vmatprep.subr.bf16.mxu1 %v3686_v28  ;;  %v3726_v28 = vld [vmem:[%s5077_s1 + $0x454] ss:$8 sps:$4 sm:$0xff]  }
  0xe7   :  { %1101 = vmatpush1.bf16.msra.mxu0 %v3684_v39  ;;  %2319 = vmatpush1.bf16.msra.mxu1 %v3684_v39  ;;  %v3724_v39 = vld [vmem:[%s5077_s1 + $0x450] ss:$8 sps:$4 sm:$0xff]  }
  0xe8   :  { %1102 = vmatprep.subr.bf16.mxu0 %v3689_v40  ;;  %2320 = vmatprep.subr.bf16.mxu1 %v3689_v40  ;;  %v3729_v40 = vld [vmem:[%s5077_s1 + $0x464] ss:$8 sps:$4 sm:$0xff]  }
  0xeb   :  { %1103 = vmatpush1.bf16.msra.mxu0 %v3687_v41  ;;  %2321 = vmatpush1.bf16.msra.mxu1 %v3687_v41  ;;  %v3727_v41 = vld [vmem:[%s5077_s1 + $0x460] ss:$8 sps:$4 sm:$0xff]  }
  0xec   :  { %1104 = vmatprep.subr.bf16.mxu0 %v3692_v42  ;;  %2322 = vmatprep.subr.bf16.mxu1 %v3692_v42  ;;  %v3732_v42 = vld [vmem:[%s5077_s1 + $0x474] ss:$8 sps:$4 sm:$0xff]  }
  0xef   :  { %1105 = vmatpush1.bf16.msra.mxu0 %v3690_v43  ;;  %2323 = vmatpush1.bf16.msra.mxu1 %v3690_v43  ;;  %v3730_v43 = vld [vmem:[%s5077_s1 + $0x470] ss:$8 sps:$4 sm:$0xff]  }
  0xf0   :  { %1106 = vmatprep.subr.bf16.mxu0 %v3695_v45  ;;  %2324 = vmatprep.subr.bf16.mxu1 %v3695_v45  ;;  %v3735_v45 = vld [vmem:[%s5077_s1 + $0x484] ss:$8 sps:$4 sm:$0xff]  }
  0xf3   :  { %1107 = vmatpush1.bf16.msra.mxu0 %v3693_v57  ;;  %2325 = vmatpush1.bf16.msra.mxu1 %v3693_v57  ;;  %v3733_v57 = vld [vmem:[%s5077_s1 + $0x480] ss:$8 sps:$4 sm:$0xff]  }
  0xf4   :  { %1108 = vmatprep.subr.bf16.mxu0 %v3698_v60  ;;  %2326 = vmatprep.subr.bf16.mxu1 %v3698_v60  ;;  %v3738_v60 = vld [vmem:[%s5077_s1 + $0x494] ss:$8 sps:$4 sm:$0xff]  }
  0xf7   :  { %1109 = vmatpush1.bf16.msra.mxu0 %v3696_v49  ;;  %2327 = vmatpush1.bf16.msra.mxu1 %v3696_v49  ;;  %v3742_v49 = vld [vmem:[%s5077_s1 + $0x4b0] ss:$8 sps:$4 sm:$0xff]  }
  0xf8   :  { %1110 = vmatprep.subr.bf16.mxu0 %v3701_v47  ;;  %2328 = vmatprep.subr.bf16.mxu1 %v3701_v47  ;;  %v3753_v47 = vld [vmem:[%s5077_s1 + $0x4e4] ss:$8 sps:$4 sm:$0xff]  }
  0xfb   :  { %1111 = vmatpush1.bf16.msra.mxu0 %v3699_v48  ;;  %2329 = vmatpush1.bf16.msra.mxu1 %v3699_v48  ;;  %v4644_v48 = vld [vmem:[%s5078_s0 + $0x38] sm:$0xff] }
  0xfc   :  { %1112 = vmatprep.subr.bf16.mxu0 %v3704_v52  ;;  %2330 = vmatprep.subr.bf16.mxu1 %v3704_v52  ;;  %v4655_v9 = vcombine.high %v4354_v54, %v4644_v48  ;;  %v1183_v52 = vrot.slane %v4635_v58, 2 }
  0xfe   :  { %v2473_v21 = vshll.u32 %v4655_v9, 16 }
  0xff   :  { %1113 = vmatpush1.bf16.msra.mxu0 %v3702_v11  ;;  %2331 = vmatpush1.bf16.msra.mxu1 %v3702_v11  ;;  %v2367_v11 = vrot.slane %v4639_v5, 2 }
 0x100   :  { %1353 = vmatprep.subr.bf16.mxu0 %v3709_v18  ;;  %2377 = vmatprep.subr.bf16.mxu1 %v3709_v18  ;;  %v1475_v18 = vshll.u32 %v4524_v20, 16 }
 0x102   :  { %1115 = vmatmul.mubr.bf16.vlgmr.msra.gmra.mrb[0].mxu0 %v900_v25  ;;  %2333 = vmatmul.mubr.bf16.vlgmr.msra.gmra.mrb[0].mxu1 %v2278_v19  ;;  %v1483_v25 = vshll.u32 %v4651_v7, 16  ;;  %v2465_v19 = vshll.u32 %v4533_v14, 16  ;;  %v3766_v14 = vld [vmem:[%s5077_s1 + $0x514] ss:$8 sps:$4 sm:$0xff]  }
 0x103   :  { %1354 = vmatpush1.bf16.msra.mxu0 %v3707_v15  ;;  %2378 = vmatpush1.bf16.msra.mxu1 %v3707_v15  ;;  %v1480_v15 = vshrl.u32 %v4651_v7, 16 }
 0x104   :  { %1355 = vmatprep.subr.bf16.mxu0 %v3714_v27  ;;  %2379 = vmatprep.subr.bf16.mxu1 %v3714_v27  ;;  %v1185_v27 = vsel %vm1182_vm3, %v1183_v52, %v1184_v10  ;;  %v1485_v33 = vrot.slane %v1483_v25, 3  ;;  %v3797_v52 = vld [vmem:[%s5077_s1 + $0x5c0] ss:$8 sps:$4 sm:$0xff]  }
 0x105   :  { %1124 = vmatprep.mubr.bf16.mxu0 %v4396_v22  ;;  %2342 = vmatprep.mubr.bf16.mxu1 %v4398_v26  ;;  %v3720_v22 = vld [vmem:[%s5077_s1 + $0x434] ss:$8 sps:$4 sm:$0xff]   ;;  %v1188_v26 = vsel %vm1182_vm3, %v1186_v30, %v1187_v32  ;;  %v1482_v30 = vrot.slane %v1480_v15, 2 }
 0x107   :  { %1356 = vmatpush1.bf16.msra.mxu0 %v3712_v53  ;;  %2380 = vmatpush1.bf16.msra.mxu1 %v3712_v53 }
 0x108   :  { %1357 = vmatprep.subr.bf16.mxu0 %v3717_v29  ;;  %2381 = vmatprep.subr.bf16.mxu1 %v3717_v29  ;;  %v1477_v29 = vrot.slane %v1475_v18, 3 }
 0x10a   :  { %1125 = vmatmul.mubr.bf16.gmra.mrb[4].mxu0 %v899_v12  ;;  %2343 = vmatmul.mubr.bf16.gmra.mrb[4].mxu1 %v2277_v16  ;;  %v2368_v12 = vrot.slane %v4473_v59, 2  ;;  %v1472_v16 = vshrl.u32 %v4524_v20, 16  ;;  %v2470_v59 = vshrl.u32 %v4655_v9, 16 }
 0x10b   :  { %1358 = vmatpush1.bf16.msra.mxu0 %v3715_v35  ;;  %2382 = vmatpush1.bf16.msra.mxu1 %v3715_v35  ;;  %v2464_v35 = vrot.slane %v2462_v50, 2 }
 0x10c   :  { %1359 = vmatprep.subr.bf16.mxu0 %v3720_v22  ;;  %2383 = vmatprep.subr.bf16.mxu1 %v3720_v22  ;;  %v2369_v20 = vsel %vm1182_vm3, %v2367_v11, %v2368_v12  ;;  %v1474_v53 = vrot.slane %v1472_v16, 2  ;;  %v2467_v22 = vrot.slane %v2465_v19, 3  ;;  %v3802_v11 = vld [vmem:[%s5077_s1 + $0x5d4] ss:$8 sps:$4 sm:$0xff]   ;;  %v2448_v16 = vshll.u32 %v4639_v5, 16 }
 0x10d   :  { %1385 = vmatprep.mubr.bf16.mxu0 %v1188_v26  ;;  %2409 = vmatprep.mubr.bf16.mxu1 %v2372_v36  ;;  %v2472_v26 = vrot.slane %v2470_v59, 2  ;;  %v2475_v36 = vrot.slane %v2473_v21, 3 }
 0x10f   :  { %1360 = vmatpush1.bf16.msra.mxu0 %v3718_v37  ;;  %2384 = vmatpush1.bf16.msra.mxu1 %v3718_v37  ;;  %v3764_v37 = vld [vmem:[%s5077_s1 + $0x510] ss:$8 sps:$4 sm:$0xff]  }
 0x110   :  { %1361 = vmatprep.subr.bf16.mxu0 %v3723_v38  ;;  %2385 = vmatprep.subr.bf16.mxu1 %v3723_v38  ;;  %v3769_v38 = vld [vmem:[%s5077_s1 + $0x524] ss:$8 sps:$4 sm:$0xff]  }
 0x113   :  { %1362 = vmatpush1.bf16.msra.mxu0 %v3721_v17  ;;  %2386 = vmatpush1.bf16.msra.mxu1 %v3721_v17  ;;  %v1478_v17 = vor.u32 %v1477_v29, %v1474_v53  ;;  %v3806_v29 = vld [vmem:[%s5077_s1 + $0x5f0] ss:$8 sps:$4 sm:$0xff]  }
 0x114   :  { %1363 = vmatprep.subr.bf16.mxu0 %v3726_v28  ;;  %2387 = vmatprep.subr.bf16.mxu1 %v3726_v28  ;;  %v4693_v28 = vor.u32 %v1485_v33, %v1482_v30 }
 0x116   :  { %v1487_v56 = vsel %vm1453_vm4, %v1478_v17, %v4693_v28  ;;  %v4814_v17 = vld [vmem:[%s5078_s0 + $0x20] sm:$0x88] }
 0x117   :  { %1364 = vmatpush1.bf16.msra.mxu0 %v3724_v39  ;;  %2388 = vmatpush1.bf16.msra.mxu1 %v3724_v39  ;;  %v2468_v39 = vor.u32 %v2467_v22, %v2464_v35  ;;  %v3813_v22 = vld [vmem:[%s5077_s1 + $0x604] ss:$8 sps:$4 sm:$0xff]  }
 0x118   :  { %1365 = vmatprep.subr.bf16.mxu0 %v3729_v40  ;;  %2389 = vmatprep.subr.bf16.mxu1 %v3729_v40  ;;  %v4695_v40 = vor.u32 %v2475_v36, %v2472_v26  ;;  %v3811_v26 = vld [vmem:[%s5077_s1 + $0x600] ss:$8 sps:$4 sm:$0xff]  }
 0x11b   :  { %1366 = vmatpush1.bf16.msra.mxu0 %v3727_v41  ;;  %2390 = vmatpush1.bf16.msra.mxu1 %v3727_v41  ;;  %v3767_v41 = vld [vmem:[%s5077_s1 + $0x520] ss:$8 sps:$4 sm:$0xff]  }
 0x11c   :  { %1367 = vmatprep.subr.bf16.mxu0 %v3732_v42  ;;  %2391 = vmatprep.subr.bf16.mxu1 %v3732_v42  ;;  %v3775_v42 = vld [vmem:[%s5077_s1 + $0x544] ss:$8 sps:$4 sm:$0xff]  }
 0x11f   :  { %1368 = vmatpush1.bf16.msra.mxu0 %v3730_v43  ;;  %2392 = vmatpush1.bf16.msra.mxu1 %v3730_v43  ;;  %v3773_v43 = vld [vmem:[%s5077_s1 + $0x540] ss:$8 sps:$4 sm:$0xff]  }
 0x120   :  { %1369 = vmatprep.subr.bf16.mxu0 %v3735_v45  ;;  %2393 = vmatprep.subr.bf16.mxu1 %v3735_v45  ;;  %v3778_v45 = vld [vmem:[%s5077_s1 + $0x554] ss:$8 sps:$4 sm:$0xff]  }
 0x123   :  { %1370 = vmatpush1.bf16.msra.mxu0 %v3733_v57  ;;  %2394 = vmatpush1.bf16.msra.mxu1 %v3733_v57  ;;  %v3776_v57 = vld [vmem:[%s5077_s1 + $0x550] ss:$8 sps:$4 sm:$0xff]  }
 0x124   :  { %1371 = vmatprep.subr.bf16.mxu0 %v3738_v60  ;;  %2395 = vmatprep.subr.bf16.mxu1 %v3738_v60  ;;  %v3781_v60 = vld [vmem:[%s5077_s1 + $0x564] ss:$8 sps:$4 sm:$0xff]  }
 0x127   :  { %1372 = vmatpush1.bf16.msra.mxu0 %v3736_v61  ;;  %2396 = vmatpush1.bf16.msra.mxu1 %v3736_v61  ;;  %v3779_v61 = vld [vmem:[%s5077_s1 + $0x560] ss:$8 sps:$4 sm:$0xff]  }
 0x128   :  { %1373 = vmatprep.subr.bf16.mxu0 %v3741_v44  ;;  %2397 = vmatprep.subr.bf16.mxu1 %v3741_v44  ;;  %v3784_v44 = vld [vmem:[%s5077_s1 + $0x574] ss:$8 sps:$4 sm:$0xff]  }
 0x12b   :  { %1374 = vmatpush1.bf16.msra.mxu0 %v3739_v62  ;;  %2398 = vmatpush1.bf16.msra.mxu1 %v3739_v62  ;;  %v3782_v62 = vld [vmem:[%s5077_s1 + $0x570] ss:$8 sps:$4 sm:$0xff]  }
 0x12c   :  { %1375 = vmatprep.subr.bf16.mxu0 %v3744_v63  ;;  %2399 = vmatprep.subr.bf16.mxu1 %v3744_v63  ;;  %v3787_v63 = vld [vmem:[%s5077_s1 + $0x584] ss:$8 sps:$4 sm:$0xff]  }
 0x12f   :  { %1376 = vmatpush1.bf16.msra.mxu0 %v3742_v49  ;;  %2400 = vmatpush1.bf16.msra.mxu1 %v3742_v49  ;;  %v3785_v49 = vld [vmem:[%s5077_s1 + $0x580] ss:$8 sps:$4 sm:$0xff]  }
 0x130   :  { %1377 = vmatprep.subr.bf16.mxu0 %v3747_v0  ;;  %2401 = vmatprep.subr.bf16.mxu1 %v3747_v0  ;;  %v3790_v0 = vld [vmem:[%s5077_s1 + $0x594] ss:$8 sps:$4 sm:$0xff]  }
 0x133   :  { %1378 = vmatpush1.bf16.msra.mxu0 %v3745_v1  ;;  %2402 = vmatpush1.bf16.msra.mxu1 %v3745_v1  ;;  %v3788_v1 = vld [vmem:[%s5077_s1 + $0x590] ss:$8 sps:$4 sm:$0xff]  }
 0x134   :  { %1379 = vmatprep.subr.bf16.mxu0 %v3750_v2  ;;  %2403 = vmatprep.subr.bf16.mxu1 %v3750_v2  ;;  %v3793_v2 = vld [vmem:[%s5077_s1 + $0x5a4] ss:$8 sps:$4 sm:$0xff]  }
 0x137   :  { %1380 = vmatpush1.bf16.msra.mxu0 %v3748_v3  ;;  %2404 = vmatpush1.bf16.msra.mxu1 %v3748_v3  ;;  %v3791_v3 = vld [vmem:[%s5077_s1 + $0x5a0] ss:$8 sps:$4 sm:$0xff]  }
 0x138   :  { %1381 = vmatprep.subr.bf16.mxu0 %v3753_v47  ;;  %2405 = vmatprep.subr.bf16.mxu1 %v3753_v47  ;;  %v3796_v47 = vld [vmem:[%s5077_s1 + $0x5b4] ss:$8 sps:$4 sm:$0xff]  }
 0x13b   :  { %1382 = vmatpush1.bf16.msra.mxu0 %v3751_v4  ;;  %2406 = vmatpush1.bf16.msra.mxu1 %v3751_v4  ;;  %v3794_v4 = vld [vmem:[%s5077_s1 + $0x5b0] ss:$8 sps:$4 sm:$0xff]  }
 0x13c   :  { %1383 = vmatprep.subr.bf16.mxu0 %v3756_v6  ;;  %2407 = vmatprep.subr.bf16.mxu1 %v3756_v6  ;;  %v3799_v6 = vld [vmem:[%s5077_s1 + $0x5c4] ss:$8 sps:$4 sm:$0xff]  }
 0x13f   :  { %1384 = vmatpush1.bf16.msra.mxu0 %v3754_v8  ;;  %2408 = vmatpush1.bf16.msra.mxu1 %v3754_v8  ;;  %v4763_v8 = vcombine.low %v4345_v51, %v4628_v55  ;;  %v1458_v51 = vshll.u32 %v4635_v58, 16 }
 0x140   :  { %1652 = vmatprep.subr.bf16.mxu0 %v3761_v13  ;;  %2482 = vmatprep.subr.bf16.mxu1 %v3761_v13 }
 0x141   :  { %v1463_v55 = vshrl.u32 %v4763_v8, 16  ;;  %v1466_v13 = vshll.u32 %v4763_v8, 16  ;;  %v1460_v50 = vrot.slane %v1458_v51, 3  ;;  %v3846_v51 = vld [vmem:[%s5077_s1 + $0x6b0] ss:$8 sps:$4 sm:$0xff]  }
 0x142   :  { %1386 = vmatmul.mubr.bf16.vlgmr.msra.gmra.mrb[0].mxu0 %v1185_v27  ;;  %2410 = vmatmul.mubr.bf16.vlgmr.msra.gmra.mrb[0].mxu1 %v2369_v20 }
 0x143   :  { %1653 = vmatpush1.bf16.msra.mxu0 %v3759_v23  ;;  %2483 = vmatpush1.bf16.msra.mxu1 %v3759_v23  ;;  %v1465_v19 = vrot.slane %v1463_v55, 2  ;;  %v1468_v59 = vrot.slane %v1466_v13, 3  ;;  %v2450_v23 = vrot.slane %v2448_v16, 3  ;;  %v3851_v55 = vld [vmem:[%s5077_s1 + $0x6c4] ss:$8 sps:$4 sm:$0xff]  }
 0x144   :  { %1654 = vmatprep.subr.bf16.mxu0 %v3766_v14  ;;  %2484 = vmatprep.subr.bf16.mxu1 %v3766_v14  ;;  %v3808_v14 = vld [vmem:[%s5077_s1 + $0x5f4] ss:$8 sps:$4 sm:$0xff]   ;;  %v3849_v13 = vld [vmem:[%s5077_s1 + $0x6c0] ss:$8 sps:$4 sm:$0xff]   ;;  %v3857_v16 = vld [vmem:[%s5077_s1 + $0x6e4] ss:$8 sps:$4 sm:$0xff]  }
 0x145   :  { %1395 = vmatprep.mubr.bf16.mxu0 %v1187_v32  ;;  %2419 = vmatprep.mubr.bf16.mxu1 %v2371_v34  ;;  %v2477_v32 = vsel %vm1453_vm4, %v2468_v39, %v4695_v40  ;;  %v3770_v34 = vld [vmem:[%s5077_s1 + $0x530] ss:$8 sps:$4 sm:$0xff]   ;;  %v1469_v30 = vor.u32 %v1468_v59, %v1465_v19  ;;  %v3818_v39 = vld [vmem:[%s5077_s1 + $0x614] ss:$8 sps:$4 sm:$0xff]  }
 0x146   :  { %v3858_v19 = vld [vmem:[%s5077_s1 + $0x6f0] ss:$8 sps:$4 sm:$0xff]  }
 0x147   :  { %1655 = vmatpush1.bf16.msra.mxu0 %v3764_v37  ;;  %2485 = vmatpush1.bf16.msra.mxu1 %v3764_v37 }
 0x148   :  { %1656 = vmatprep.subr.bf16.mxu0 %v3769_v38  ;;  %2486 = vmatprep.subr.bf16.mxu1 %v3769_v38  ;;  %v4809_v38 = vld [vmem:[%s5078_s0] sm:$0x88] }
 0x14a   :  { %1396 = vmatmul.mubr.bf16.gmra.mrb[4].mxu0 %v1184_v10  ;;  %2420 = vmatmul.mubr.bf16.gmra.mrb[4].mxu1 %v2368_v12  ;;  %v4770_v10 = vcombine.low %v4354_v54, %v4644_v48  ;;  %v1455_v12 = vshrl.u32 %v4635_v58, 16  ;;  %v3800_v54 = vld [vmem:[%s5077_s1 + $0x5d0] ss:$8 sps:$4 sm:$0xff]   ;;  %v2445_v48 = vshrl.u32 %v4639_v5, 16  ;;  %v3805_v58 = vld [vmem:[%s5077_s1 + $0x5e4] ss:$8 sps:$4 sm:$0xff]  }
 0x14b   :  { %1657 = vmatpush1.bf16.msra.mxu0 %v3767_v41  ;;  %2487 = vmatpush1.bf16.msra.mxu1 %v3767_v41  ;;  %v3803_v5 = vld [vmem:[%s5077_s1 + $0x5e0] ss:$8 sps:$4 sm:$0xff]   ;;  %v3321_v41 = vcombine.high %v4809_v38, %v4324_v46 }
 0x14c   :  { %1658 = vmatprep.subr.bf16.mxu0 %v3772_v24  ;;  %2488 = vmatprep.subr.bf16.mxu1 %v3772_v24  ;;  %v2453_v18 = vshrl.u32 %v4770_v10, 16  ;;  %v2456_v15 = vshll.u32 %v4770_v10, 16  ;;  %v1457_v25 = vrot.slane %v1455_v12, 2  ;;  %v2447_v21 = vrot.slane %v2445_v48, 2  ;;  %v3848_v12 = vld [vmem:[%s5077_s1 + $0x6b4] ss:$8 sps:$4 sm:$0xff]  }
 0x14d   :  { %1684 = vmatprep.mubr.bf16.mxu0 %v1487_v56  ;;  %2514 = vmatprep.mubr.bf16.mxu1 %v2477_v32  ;;  %v3379_v24 = vcombine.high %v4814_v17, %v4529_v31  ;;  %v3816_v56 = vld [vmem:[%s5077_s1 + $0x610] ss:$8 sps:$4 sm:$0xff]   ;;  %v3821_v32 = vld [vmem:[%s5077_s1 + $0x624] ss:$8 sps:$4 sm:$0xff]   ;;  %v1756_v46 = vrot.slane %v3321_v41, 3 }
 0x14e   :  { %v2455_v27 = vrot.slane %v2453_v18, 2  ;;  %v2458_v20 = vrot.slane %v2456_v15, 3  ;;  %v1461_v53 = vor.u32 %v1460_v50, %v1457_v25  ;;  %v2451_v33 = vor.u32 %v2450_v23, %v2447_v21  ;;  %v3852_v48 = vld [vmem:[%s5077_s1 + $0x6d0] ss:$8 sps:$4 sm:$0xff]   ;;  %v3855_v18 = vld [vmem:[%s5077_s1 + $0x6e0] ss:$8 sps:$4 sm:$0xff]  }
 0x14f   :  { %1659 = vmatpush1.bf16.msra.mxu0 %v3770_v34  ;;  %2489 = vmatpush1.bf16.msra.mxu1 %v3770_v34  ;;  %v1757_v34 = vrot.slane %v4651_v7, 3  ;;  %v3873_v15 = vld [vmem:[%s5078_s0 + $0x8] sm:$0xff]  ;;  %v3378_v25 = vcombine.low %v4814_v17, %v4529_v31  ;;  %v3860_v50 = vld [vmem:[%s5077_s1 + $0x6f4] ss:$8 sps:$4 sm:$0xff]   ;;  %v1754_v21 = vrot.slane %v4763_v8, 3  ;;  %v2550_v23 = vrot.slane %v4770_v10, 3 }
 0x150   :  { %1660 = vmatprep.subr.bf16.mxu0 %v3775_v42  ;;  %2490 = vmatprep.subr.bf16.mxu1 %v3775_v42  ;;  %v2459_v35 = vor.u32 %v2458_v20, %v2455_v27  ;;  %v1470_v36 = vsel %vm1453_vm4, %v1461_v53, %v1469_v30  ;;  %v2552_v42 = vrot.slane %v3379_v24, 3 }
 0x152   :  { %v2460_v37 = vsel %vm1453_vm4, %v2451_v33, %v2459_v35 }
 0x153   :  { %1661 = vmatpush1.bf16.msra.mxu0 %v3773_v43  ;;  %2491 = vmatpush1.bf16.msra.mxu1 %v3773_v43  ;;  %v2553_v43 = vrot.slane %v4655_v9, 3 }
 0x154   :  { %1662 = vmatprep.subr.bf16.mxu0 %v3778_v45  ;;  %2492 = vmatprep.subr.bf16.mxu1 %v3778_v45  ;;  %v3819_v45 = vld [vmem:[%s5077_s1 + $0x620] ss:$8 sps:$4 sm:$0xff]  }
 0x157   :  { %1663 = vmatpush1.bf16.msra.mxu0 %v3776_v57  ;;  %2493 = vmatpush1.bf16.msra.mxu1 %v3776_v57  ;;  %v2554_v57 = vsel %vm1752_vm5, %v2552_v42, %v2553_v43 }
 0x158   :  { %1664 = vmatprep.subr.bf16.mxu0 %v3781_v60  ;;  %2494 = vmatprep.subr.bf16.mxu1 %v3781_v60  ;;  %v3822_v60 = vld [vmem:[%s5077_s1 + $0x630] ss:$8 sps:$4 sm:$0xff]  }
 0x15b   :  { %1665 = vmatpush1.bf16.msra.mxu0 %v3779_v61  ;;  %2495 = vmatpush1.bf16.msra.mxu1 %v3779_v61  ;;  %v3827_v61 = vld [vmem:[%s5077_s1 + $0x644] ss:$8 sps:$4 sm:$0xff]  }
 0x15c   :  { %1666 = vmatprep.subr.bf16.mxu0 %v3784_v44  ;;  %2496 = vmatprep.subr.bf16.mxu1 %v3784_v44  ;;  %v3825_v44 = vld [vmem:[%s5077_s1 + $0x640] ss:$8 sps:$4 sm:$0xff]  }
 0x15f   :  { %1667 = vmatpush1.bf16.msra.mxu0 %v3782_v62  ;;  %2497 = vmatpush1.bf16.msra.mxu1 %v3782_v62  ;;  %v3830_v62 = vld [vmem:[%s5077_s1 + $0x654] ss:$8 sps:$4 sm:$0xff]  }
 0x160   :  { %1668 = vmatprep.subr.bf16.mxu0 %v3787_v63  ;;  %2498 = vmatprep.subr.bf16.mxu1 %v3787_v63  ;;  %v3828_v63 = vld [vmem:[%s5077_s1 + $0x650] ss:$8 sps:$4 sm:$0xff]  }
 0x163   :  { %1669 = vmatpush1.bf16.msra.mxu0 %v3785_v49  ;;  %2499 = vmatpush1.bf16.msra.mxu1 %v3785_v49  ;;  %v3833_v49 = vld [vmem:[%s5077_s1 + $0x664] ss:$8 sps:$4 sm:$0xff]  }
 0x164   :  { %1670 = vmatprep.subr.bf16.mxu0 %v3790_v0  ;;  %2500 = vmatprep.subr.bf16.mxu1 %v3790_v0  ;;  %v3831_v0 = vld [vmem:[%s5077_s1 + $0x660] ss:$8 sps:$4 sm:$0xff]  }
 0x167   :  { %1671 = vmatpush1.bf16.msra.mxu0 %v3788_v1  ;;  %2501 = vmatpush1.bf16.msra.mxu1 %v3788_v1  ;;  %v3836_v1 = vld [vmem:[%s5077_s1 + $0x674] ss:$8 sps:$4 sm:$0xff]  }
 0x168   :  { %1672 = vmatprep.subr.bf16.mxu0 %v3793_v2  ;;  %2502 = vmatprep.subr.bf16.mxu1 %v3793_v2  ;;  %v3834_v2 = vld [vmem:[%s5077_s1 + $0x670] ss:$8 sps:$4 sm:$0xff]  }
 0x16b   :  { %1673 = vmatpush1.bf16.msra.mxu0 %v3791_v3  ;;  %2503 = vmatpush1.bf16.msra.mxu1 %v3791_v3  ;;  %v3839_v3 = vld [vmem:[%s5077_s1 + $0x684] ss:$8 sps:$4 sm:$0xff]  }
 0x16c   :  { %1674 = vmatprep.subr.bf16.mxu0 %v3796_v47  ;;  %2504 = vmatprep.subr.bf16.mxu1 %v3796_v47  ;;  %v3837_v47 = vld [vmem:[%s5077_s1 + $0x680] ss:$8 sps:$4 sm:$0xff]  }
 0x16f   :  { %1675 = vmatpush1.bf16.msra.mxu0 %v3794_v4  ;;  %2505 = vmatpush1.bf16.msra.mxu1 %v3794_v4  ;;  %v3842_v4 = vld [vmem:[%s5077_s1 + $0x694] ss:$8 sps:$4 sm:$0xff]  }
 0x170   :  { %1676 = vmatprep.subr.bf16.mxu0 %v3799_v6  ;;  %2506 = vmatprep.subr.bf16.mxu1 %v3799_v6  ;;  %v3840_v6 = vld [vmem:[%s5077_s1 + $0x690] ss:$8 sps:$4 sm:$0xff]  }
 0x173   :  { %1677 = vmatpush1.bf16.msra.mxu0 %v3797_v52  ;;  %2507 = vmatpush1.bf16.msra.mxu1 %v3797_v52  ;;  %v3845_v52 = vld [vmem:[%s5077_s1 + $0x6a4] ss:$8 sps:$4 sm:$0xff]  }
 0x174   :  { %1678 = vmatprep.subr.bf16.mxu0 %v3802_v11  ;;  %2508 = vmatprep.subr.bf16.mxu1 %v3802_v11  ;;  %v3843_v11 = vld [vmem:[%s5077_s1 + $0x6a0] ss:$8 sps:$4 sm:$0xff]  }
 0x177   :  { %1679 = vmatpush1.bf16.msra.mxu0 %v3800_v54  ;;  %2509 = vmatpush1.bf16.msra.mxu1 %v3800_v54  ;;  %v3854_v54 = vld [vmem:[%s5077_s1 + $0x6d4] ss:$8 sps:$4 sm:$0xff]  }
 0x178   :  { %1680 = vmatprep.subr.bf16.mxu0 %v3805_v58  ;;  %2510 = vmatprep.subr.bf16.mxu1 %v3805_v58  ;;  %v3320_v58 = vcombine.low %v4809_v38, %v3873_v15 }
 0x17a   :  { %v1753_v59 = vrot.slane %v3320_v58, 3 }
 0x17b   :  { %1681 = vmatpush1.bf16.msra.mxu0 %v3803_v5  ;;  %2511 = vmatpush1.bf16.msra.mxu1 %v3803_v5  ;;  %v2549_v5 = vrot.slane %v3378_v25, 3 }
 0x17c   :  { %1682 = vmatprep.subr.bf16.mxu0 %v3808_v14  ;;  %2512 = vmatprep.subr.bf16.mxu1 %v3808_v14  ;;  %v1755_v31 = vsel %vm1752_vm5, %v1753_v59, %v1754_v21 }
 0x17d   :  { %v2551_v27 = vsel %vm1752_vm5, %v2549_v5, %v2550_v23 }
 0x17f   :  { %1683 = vmatpush1.bf16.msra.mxu0 %v3806_v29  ;;  %2513 = vmatpush1.bf16.msra.mxu1 %v3806_v29 }
 0x180   :  { %1923 = vmatprep.subr.bf16.mxu0 %v3813_v22  ;;  %2559 = vmatprep.subr.bf16.mxu1 %v3813_v22 }
 0x182   :  { %1685 = vmatmul.mubr.bf16.vlgmr.msra.gmra.mrb[0].mxu0 %v1470_v36  ;;  %2515 = vmatmul.mubr.bf16.vlgmr.msra.gmra.mrb[0].mxu1 %v2460_v37 }
 0x183   :  { %1924 = vmatpush1.bf16.msra.mxu0 %v3811_v26  ;;  %2560 = vmatpush1.bf16.msra.mxu1 %v3811_v26 }
 0x184   :  { %1925 = vmatprep.subr.bf16.mxu0 %v3818_v39  ;;  %2561 = vmatprep.subr.bf16.mxu1 %v3818_v39 }
 0x185   :  { %1694 = vmatprep.mubr.bf16.mxu0 %v4693_v28  ;;  %2524 = vmatprep.mubr.bf16.mxu1 %v4695_v40  ;;  %v3824_v28 = vld [vmem:[%s5077_s1 + $0x634] ss:$8 sps:$4 sm:$0xff]   ;;  %v1758_v40 = vsel %vm1752_vm5, %v1756_v46, %v1757_v34 }
 0x187   :  { %1926 = vmatpush1.bf16.msra.mxu0 %v3816_v56  ;;  %2562 = vmatpush1.bf16.msra.mxu1 %v3816_v56 }
 0x188   :  { %1927 = vmatprep.subr.bf16.mxu0 %v3821_v32  ;;  %2563 = vmatprep.subr.bf16.mxu1 %v3821_v32 }
 0x18a   :  { %1695 = vmatmul.mubr.bf16.gmra.mrb[4].mxu0 %v1469_v30  ;;  %2525 = vmatmul.mubr.bf16.gmra.mrb[4].mxu1 %v2459_v35 }
 0x18b   :  { %1928 = vmatpush1.bf16.msra.mxu0 %v3819_v45  ;;  %2564 = vmatpush1.bf16.msra.mxu1 %v3819_v45 }
 0x18c   :  { %1929 = vmatprep.subr.bf16.mxu0 %v3824_v28  ;;  %2565 = vmatprep.subr.bf16.mxu1 %v3824_v28 }
 0x18d   :  { %1955 = vmatprep.mubr.bf16.mxu0 %v1758_v40  ;;  %2591 = vmatprep.mubr.bf16.mxu1 %v2554_v57 }
 0x18f   :  { %1930 = vmatpush1.bf16.msra.mxu0 %v3822_v60  ;;  %2566 = vmatpush1.bf16.msra.mxu1 %v3822_v60 }
 0x190   :  { %1931 = vmatprep.subr.bf16.mxu0 %v3827_v61  ;;  %2567 = vmatprep.subr.bf16.mxu1 %v3827_v61 }
 0x193   :  { %1932 = vmatpush1.bf16.msra.mxu0 %v3825_v44  ;;  %2568 = vmatpush1.bf16.msra.mxu1 %v3825_v44 }
 0x194   :  { %1933 = vmatprep.subr.bf16.mxu0 %v3830_v62  ;;  %2569 = vmatprep.subr.bf16.mxu1 %v3830_v62 }
 0x197   :  { %1934 = vmatpush1.bf16.msra.mxu0 %v3828_v63  ;;  %2570 = vmatpush1.bf16.msra.mxu1 %v3828_v63 }
 0x198   :  { %1935 = vmatprep.subr.bf16.mxu0 %v3833_v49  ;;  %2571 = vmatprep.subr.bf16.mxu1 %v3833_v49 }
 0x19b   :  { %1936 = vmatpush1.bf16.msra.mxu0 %v3831_v0  ;;  %2572 = vmatpush1.bf16.msra.mxu1 %v3831_v0 }
 0x19c   :  { %1937 = vmatprep.subr.bf16.mxu0 %v3836_v1  ;;  %2573 = vmatprep.subr.bf16.mxu1 %v3836_v1 }
 0x19f   :  { %1938 = vmatpush1.bf16.msra.mxu0 %v3834_v2  ;;  %2574 = vmatpush1.bf16.msra.mxu1 %v3834_v2 }
 0x1a0   :  { %1939 = vmatprep.subr.bf16.mxu0 %v3839_v3  ;;  %2575 = vmatprep.subr.bf16.mxu1 %v3839_v3 }
 0x1a3   :  { %1940 = vmatpush1.bf16.msra.mxu0 %v3837_v47  ;;  %2576 = vmatpush1.bf16.msra.mxu1 %v3837_v47 }
 0x1a4   :  { %1941 = vmatprep.subr.bf16.mxu0 %v3842_v4  ;;  %2577 = vmatprep.subr.bf16.mxu1 %v3842_v4 }
 0x1a7   :  { %1942 = vmatpush1.bf16.msra.mxu0 %v3840_v6  ;;  %2578 = vmatpush1.bf16.msra.mxu1 %v3840_v6 }
 0x1a8   :  { %1943 = vmatprep.subr.bf16.mxu0 %v3845_v52  ;;  %2579 = vmatprep.subr.bf16.mxu1 %v3845_v52 }
 0x1ab   :  { %1944 = vmatpush1.bf16.msra.mxu0 %v3843_v11  ;;  %2580 = vmatpush1.bf16.msra.mxu1 %v3843_v11 }
 0x1ac   :  { %1945 = vmatprep.subr.bf16.mxu0 %v3848_v12  ;;  %2581 = vmatprep.subr.bf16.mxu1 %v3848_v12 }
 0x1af   :  { %1946 = vmatpush1.bf16.msra.mxu0 %v3846_v51  ;;  %2582 = vmatpush1.bf16.msra.mxu1 %v3846_v51 }
 0x1b0   :  { %1947 = vmatprep.subr.bf16.mxu0 %v3851_v55  ;;  %2583 = vmatprep.subr.bf16.mxu1 %v3851_v55 }
 0x1b3   :  { %1948 = vmatpush1.bf16.msra.mxu0 %v3849_v13  ;;  %2584 = vmatpush1.bf16.msra.mxu1 %v3849_v13 }
 0x1b4   :  { %1949 = vmatprep.subr.bf16.mxu0 %v3854_v54  ;;  %2585 = vmatprep.subr.bf16.mxu1 %v3854_v54 }
 0x1b7   :  { %1950 = vmatpush1.bf16.msra.mxu0 %v3852_v48  ;;  %2586 = vmatpush1.bf16.msra.mxu1 %v3852_v48 }
 0x1b8   :  { %1951 = vmatprep.subr.bf16.mxu0 %v3857_v16  ;;  %2587 = vmatprep.subr.bf16.mxu1 %v3857_v16 }
 0x1bb   :  { %1952 = vmatpush1.bf16.msra.mxu0 %v3855_v18  ;;  %2588 = vmatpush1.bf16.msra.mxu1 %v3855_v18 }
 0x1bc   :  { %1953 = vmatprep.subr.bf16.mxu0 %v3860_v50  ;;  %2589 = vmatprep.subr.bf16.mxu1 %v3860_v50 }
 0x1bf   :  { %1954 = vmatpush1.bf16.msra.mxu0 %v3858_v19  ;;  %2590 = vmatpush1.bf16.msra.mxu1 %v3858_v19 }
 0x1c2   :  { %1956 = vmatmul.mubr.bf16.vlgmr.msra.gmra.mrb[0].mxu0 %v1755_v31  ;;  %2592 = vmatmul.mubr.bf16.vlgmr.msra.gmra.mrb[0].mxu1 %v2551_v27 }
 0x1c3   :  { %1965 = vmatprep.mubr.bf16.mxu0 %v1757_v34  ;;  %2601 = vmatprep.mubr.bf16.mxu1 %v2553_v43 }
 0x1ca   :  { %1966 = vmatmul.mubr.bf16.gmra.mrb[4].mxu0 %v1754_v21  ;;  %2602 = vmatmul.mubr.bf16.gmra.mrb[4].mxu1 %v2550_v23 }
 0x295   :  { %v1957_v8 = vpop.f32.mrb[0].mxu0  ;;  %v2593_v10 = vpop.f32.mrb[0].mxu1 }
 0x296   :  { %vm1984_vm6 = vcmp.ge.f32.partialorder %v1957_v8, 0.0  ;;  %v1992_v20 = vmul.f32 0.2, %v1957_v8  ;;  %vm2620_vm7 = vcmp.ge.f32.partialorder %v2593_v10, 0.0  ;;  %v1959_v14 = vpop.f32.mrb[1].mxu0  ;;  %v2595_v53 = vpop.f32.mrb[1].mxu1 }
 0x297   :  { %v2628_v29 = vmul.f32 0.2, %v2593_v10  ;;  %v1993_v30 = vmul.f32 0.2, %v1959_v14  ;;  %v1961_v33 = vpop.f32.mrb[2].mxu0  ;;  %v2597_v35 = vpop.f32.mrb[2].mxu1 }
 0x298   :  { %vm1985_vm8 = vcmp.ge.f32.partialorder %v1959_v14, 0.0  ;;  %v2629_v22 = vmul.f32 0.2, %v2595_v53  ;;  %vm1986_vm9 = vcmp.ge.f32.partialorder %v1961_v33, 0.0  ;;  %v1994_v7 = vmul.f32 0.2, %v1961_v33 }
 0x299   :  { %vm2621_vm11 = vcmp.ge.f32.partialorder %v2595_v53, 0.0  ;;  %vm2622_vm12 = vcmp.ge.f32.partialorder %v2597_v35, 0.0  ;;  %v2630_v9 = vmul.f32 0.2, %v2597_v35  ;;  %v1963_v26 = vpop.f32.mrb[3].mxu0  ;;  %v2599_v36 = vpop.f32.mrb[3].mxu1  ;;  %v4935_v37 = vsel %vm1984_vm6, %v1957_v8, %v1992_v20 }
 0x29a   :  { %v4937_v38 = vsel %vm1986_vm9, %v1961_v33, %v1994_v7  ;;  %vm1987_vm13 = vcmp.ge.f32.partialorder %v1963_v26, 0.0  ;;  %v1995_v17 = vmul.f32 0.2, %v1963_v26  ;;  %v4940_v39 = vsel %vm2620_vm7, %v2593_v10, %v2628_v29 }
 0x29b   :  { %v4942_v41 = vsel %vm2622_vm12, %v2597_v35, %v2630_v9  ;;  %vm2623_vm14 = vcmp.ge.f32.partialorder %v2599_v36, 0.0  ;;  %v2631_v24 = vmul.f32 0.2, %v2599_v36  ;;  %v4945_v56 = vsel %vm1985_vm8, %v1959_v14, %v1993_v30 }
 0x29c   :  { %v4947_v32 = vsel %vm2621_vm11, %v2595_v53, %v2629_v22  ;;  %v2644_v46 = vadd.f32 %v4937_v38, %v4935_v37  ;;  %v4951_v34 = vsel %vm1987_vm13, %v1963_v26, %v1995_v17  ;;  %v2667_v45 = vadd.f32 %v4942_v41, %v4940_v39 }
 0x29d   :  { %v1967_v42 = vpop.f32.mrb[4].mxu0  ;;  %v2603_v43 = vpop.f32.mrb[4].mxu1  ;;  %v2655_v28 = vadd.f32 %v4951_v34, %v4945_v56  ;;  %v4957_v61 = vsel %vm2623_vm14, %v2599_v36, %v2631_v24 }
 0x29e   :  { %vm1988_vm15 = vcmp.ge.f32.partialorder %v1967_v42, 0.0  ;;  %v1996_v40 = vmul.f32 0.2, %v1967_v42  ;;  %v1969_v57 = vpop.f32.mrb[5].mxu0  ;;  %v2605_v60 = vpop.f32.mrb[5].mxu1  ;;  %vm2624_vm0 = vcmp.ge.f32.partialorder %v2603_v43, 0.0  ;;  %v2677_v52 = vadd.f32 %v4957_v61, %v4947_v32 }
 0x29f   :  { %v2632_v44 = vmul.f32 0.2, %v2603_v43  ;;  %vm1989_vm1 = vcmp.ge.f32.partialorder %v1969_v57, 0.0  ;;  %v1971_v62 = vpop.f32.mrb[6].mxu0  ;;  %v2607_v63 = vpop.f32.mrb[6].mxu1  ;;  %vm2625_vm2 = vcmp.ge.f32.partialorder %v2605_v60, 0.0 }
 0x2a0   :  { %v4959_v49 = vsel %vm1988_vm15, %v1967_v42, %v1996_v40  ;;  %v1997_v0 = vmul.f32 0.2, %v1969_v57  ;;  %v2633_v1 = vmul.f32 0.2, %v2605_v60  ;;  %v1973_v2 = vpop.f32.mrb[7].mxu0  ;;  %vm1990_vm3 = vcmp.ge.f32.partialorder %v1971_v62, 0.0 }
 0x2a1   :  { %v2645_v3 = vadd.f32 %v2644_v46, %v4959_v49  ;;  %v4962_v47 = vsel %vm2624_vm0, %v2603_v43, %v2632_v44  ;;  %v1998_v4 = vmul.f32 0.2, %v1971_v62  ;;  %v2609_v6 = vpop.f32.mrb[7].mxu1  ;;  %vm2626_vm4 = vcmp.ge.f32.partialorder %v2607_v63, 0.0 }
 0x2a2   :  { %v4966_v11 = vsel %vm1989_vm1, %v1969_v57, %v1997_v0  ;;  %v4968_v12 = vsel %vm2625_vm2, %v2605_v60, %v2633_v1  ;;  %v2668_v51 = vadd.f32 %v2667_v45, %v4962_v47  ;;  %v2634_v54 = vmul.f32 0.2, %v2607_v63 }
 0x2a3   :  { %v2656_v55 = vadd.f32 %v2655_v28, %v4966_v11  ;;  %v4972_v13 = vsel %vm1990_vm3, %v1971_v62, %v1998_v4  ;;  %vm1991_vm5 = vcmp.ge.f32.partialorder %v1973_v2, 0.0  ;;  %v1999_v16 = vmul.f32 0.2, %v1973_v2 }
 0x2a4   :  { %v2647_v48 = vsel %vm2646_vm10, %v4972_v13, 0.0  ;;  %vm2627_vm6 = vcmp.ge.f32.partialorder %v2609_v6, 0.0  ;;  %v2678_v18 = vadd.f32 %v2677_v52, %v4968_v12  ;;  %v4977_v58 = vsel %vm2626_vm4, %v2607_v63, %v2634_v54 }
 0x2a5   :  { %v2648_v15 = vadd.f32 %v2647_v48, %v2645_v3  ;;  %v2635_v25 = vmul.f32 0.2, %v2609_v6  ;;  %v2669_v50 = vsel %vm2646_vm10, %v4977_v58, 0.0  ;;  %v4981_v19 = vsel %vm1991_vm5, %v1973_v2, %v1999_v16 }
 0x2a6   :  { %v2670_v5 = vadd.f32 %v2669_v50, %v2668_v51  ;;  %v2657_v21 = vsel %vm2646_vm10, %v4981_v19, 0.0 }
 0x2a7   :  { %v2649_v59 = vrot.slane %v2648_v15, 4  ;;  %v4985_v23 = vsel %vm2627_vm6, %v2609_v6, %v2635_v25  ;;  %v2658_v31 = vadd.f32 %v2657_v21, %v2656_v55 }
 0x2a8   :  { %v2679_v27 = vsel %vm2646_vm10, %v4985_v23, 0.0  ;;  %v2671_v10 = vrot.slane %v2670_v5, 4 }
 0x2a9   :  { %v2650_v8 = vadd.f32 %v2649_v59, %v2648_v15  ;;  %v2680_v20 = vadd.f32 %v2679_v27, %v2678_v18  ;;  %v2659_v14 = vrot.slane %v2658_v31, 4 }
 0x2aa   :  { %v2672_v29 = vadd.f32 %v2671_v10, %v2670_v5 }
 0x2ab   :  { %v2651_v53 = vrot.slane %v2650_v8, 2  ;;  %v2681_v30 = vrot.slane %v2680_v20, 4  ;;  %v2660_v33 = vadd.f32 %v2659_v14, %v2658_v31 }
 0x2ac   :  { %v2673_v22 = vrot.slane %v2672_v29, 2 }
 0x2ad   :  { %v2652_v35 = vadd.f32 %v2651_v53, %v2650_v8  ;;  %v2682_v7 = vadd.f32 %v2681_v30, %v2680_v20  ;;  %v2661_v9 = vrot.slane %v2660_v33, 2 }
 0x2ae   :  { %v2674_v36 = vadd.f32 %v2673_v22, %v2672_v29 }
 0x2af   :  { %v2653_v26 = vrot.slane %v2652_v35, 1  ;;  %v2683_v17 = vrot.slane %v2682_v7, 2  ;;  %v2662_v24 = vadd.f32 %v2661_v9, %v2660_v33 }
 0x2b0   :  { %v2675_v42 = vrot.slane %v2674_v36, 1 }
 0x2b1   :  { %v2654_v46 = vadd.f32 %v2653_v26, %v2652_v35  ;;  %v2684_v43 = vadd.f32 %v2683_v17, %v2682_v7  ;;  %v2663_v45 = vrot.slane %v2662_v24, 1 }
 0x2b2   :  { %v2676_v28 = vadd.f32 %v2675_v42, %v2674_v36 }
 0x2b3   :  { %v2685_v40 = vrot.slane %v2684_v43, 1  ;;  %v2664_v57 = vadd.f32 %v2663_v45, %v2662_v24 }
 0x2b4   :  { %v2687_v60 = vadd.f32 %v2676_v28, %v2654_v46 }
 0x2b5   :  { %v2686_v44 = vadd.f32 %v2685_v40, %v2684_v43 }
 0x2b6   :  { %v4989_v62 = vmul.f32 0.01923077, %v2687_v60 }
 0x2b7   :  { %v2688_v63 = vadd.f32 %v2686_v44, %v2664_v57 }
 0x2b8   :  { %v2692_v0 = vsub.f32 %v4935_v37, %v4989_v62  ;;  %v2694_v1 = vsub.f32 %v4937_v38, %v4989_v62  ;;  %v2696_v2 = vsub.f32 %v4959_v49, %v4989_v62  ;;  %v2698_v3 = vsub.f32 %v4972_v13, %v4989_v62 }
 0x2b9   :  { %v2730_v4 = vsub.f32 %v4940_v39, %v4989_v62  ;;  %v2732_v6 = vsub.f32 %v4942_v41, %v4989_v62  ;;  %v2734_v52 = vsub.f32 %v4962_v47, %v4989_v62  ;;  %v2736_v51 = vsub.f32 %v4977_v58, %v4989_v62 }
 0x2ba   :  { %v2700_v55 = vmul.f32 %v2692_v0, %v2692_v0  ;;  %v2702_v54 = vmul.f32 %v2694_v1, %v2694_v1  ;;  %v2706_v48 = vmul.f32 %v2698_v3, %v2698_v3  ;;  %v2704_v25 = vmul.f32 %v2696_v2, %v2696_v2 }
 0x2bb   :  { %v2738_v16 = vmul.f32 %v2730_v4, %v2730_v4  ;;  %v2740_v18 = vmul.f32 %v2732_v6, %v2732_v6  ;;  %v2744_v15 = vmul.f32 %v2736_v51, %v2736_v51  ;;  %v5007_v59 = vmul.f32 0.01923077, %v2688_v63 }
 0x2bc   :  { %v2708_v50 = vadd.f32 %v2702_v54, %v2700_v55  ;;  %v2710_v5 = vsel %vm2646_vm10, %v2706_v48, 0.0  ;;  %v2742_v21 = vmul.f32 %v2734_v52, %v2734_v52 }
 0x2bd   :  { %v2746_v31 = vadd.f32 %v2740_v18, %v2738_v16  ;;  %v2748_v27 = vsel %vm2646_vm10, %v2744_v15, 0.0  ;;  %v2693_v10 = vsub.f32 %v4945_v56, %v5007_v59  ;;  %v2695_v20 = vsub.f32 %v4951_v34, %v5007_v59 }
 0x2be   :  { %v2709_v8 = vadd.f32 %v2708_v50, %v2704_v25  ;;  %v2697_v14 = vsub.f32 %v4966_v11, %v5007_v59  ;;  %v2699_v29 = vsub.f32 %v4981_v19, %v5007_v59  ;;  %v2731_v30 = vsub.f32 %v4947_v32, %v5007_v59 }
 0x2bf   :  { %v2747_v53 = vadd.f32 %v2746_v31, %v2742_v21  ;;  %v2733_v33 = vsub.f32 %v4957_v61, %v5007_v59  ;;  %v2701_v22 = vmul.f32 %v2693_v10, %v2693_v10  ;;  %v2703_v7 = vmul.f32 %v2695_v20, %v2695_v20 }
 0x2c0   :  { %v2711_v35 = vadd.f32 %v2710_v5, %v2709_v8  ;;  %v2705_v9 = vmul.f32 %v2697_v14, %v2697_v14  ;;  %v2707_v36 = vmul.f32 %v2699_v29, %v2699_v29  ;;  %v2735_v17 = vsub.f32 %v4968_v12, %v5007_v59 }
 0x2c1   :  { %v2749_v26 = vadd.f32 %v2748_v27, %v2747_v53  ;;  %v2737_v24 = vsub.f32 %v4985_v23, %v5007_v59  ;;  %v2718_v42 = vadd.f32 %v2703_v7, %v2701_v22  ;;  %v2739_v43 = vmul.f32 %v2731_v30, %v2731_v30 }
 0x2c2   :  { %v2712_v46 = vrot.slane %v2711_v35, 4  ;;  %v2741_v45 = vmul.f32 %v2733_v33, %v2733_v33  ;;  %v2743_v44 = vmul.f32 %v2735_v17, %v2735_v17  ;;  %v2720_v1 = vsel %vm2646_vm10, %v2707_v36, 0.0  ;;  %v2774_v17 = vld [vmem:[%s5079_s2] sm:$0x3] }
 0x2c3   :  { %v2750_v28 = vrot.slane %v2749_v26, 4  ;;  %v2745_v40 = vmul.f32 %v2737_v24, %v2737_v24  ;;  %v2719_v60 = vadd.f32 %v2718_v42, %v2705_v9  ;;  %v2776_v20 = vlaneseq }
 0x2c4   :  { %v2713_v57 = vadd.f32 %v2712_v46, %v2711_v35  ;;  %v2756_v63 = vadd.f32 %v2741_v45, %v2739_v43 }
 0x2c5   :  { %v2751_v0 = vadd.f32 %v2750_v28, %v2749_v26  ;;  %v2721_v3 = vadd.f32 %v2720_v1, %v2719_v60  ;;  %v2758_v52 = vsel %vm2646_vm10, %v2745_v40, 0.0  ;;  %v2777_v22 = vshrl.u32 %v2776_v20, 7 }
 0x2c6   :  { %v2714_v2 = vrot.slane %v2713_v57, 2  ;;  %v2757_v4 = vadd.f32 %v2756_v63, %v2743_v44  ;;  %v3874_v28 = vmov 1966171168  }
 0x2c7   :  { %v2752_v6 = vrot.slane %v2751_v0, 2  ;;  %v2722_v55 = vrot.slane %v2721_v3, 4  ;;  %v2778_v26 = vsub.s32 0, %v2777_v22  ;;  %v2782_v43 = vsub.s32 1, %v2777_v22 }
 0x2c8   :  { %v2715_v51 = vadd.f32 %v2714_v2, %v2713_v57  ;;  %v2759_v54 = vadd.f32 %v2758_v52, %v2757_v4  ;;  %v2795_v40 = vunpack.c.l.s4 %v3874_v28 }
 0x2c9   :  { %v2753_v48 = vadd.f32 %v2752_v6, %v2751_v0  ;;  %v2723_v18 = vadd.f32 %v2722_v55, %v2721_v3  ;;  %v2779_v46 = vrot.slane %v2774_v17, %v2778_v26  ;;  %v2783_v60 = vrot.slane %v2774_v17, %v2782_v43 }
 0x2ca   :  { %v2716_v16 = vrot.slane %v2715_v51, 1  ;;  %v2760_v15 = vrot.slane %v2759_v54, 4  ;;  %v2796_v63 = vunpack.c.0.s8 %v2795_v40 }
 0x2cb   :  { %v2754_v25 = vrot.slane %v2753_v48, 1  ;;  %v2724_v5 = vrot.slane %v2723_v18, 2 }
 0x2cc   :  { %v2717_v50 = vadd.f32 %v2716_v16, %v2715_v51  ;;  %v2761_v21 = vadd.f32 %v2760_v15, %v2759_v54  ;;  %v2799_v4 = vsub.s32 %v2796_v63, %v2777_v22  ;;  %v2788_v51 = vld [vmem:[%s5080_s3] sm:$0x3] }
 0x2cd   :  { %v2755_v31 = vadd.f32 %v2754_v25, %v2753_v48  ;;  %v2725_v27 = vadd.f32 %v2724_v5, %v2723_v18 }
 0x2ce   :  { %v2762_v8 = vrot.slane %v2761_v21, 2 }
 0x2cf   :  { %v2766_v10 = vadd.f32 %v2755_v31, %v2717_v50  ;;  %v2726_v14 = vrot.slane %v2725_v27, 1 }
 0x2d0   :  { %v2763_v53 = vadd.f32 %v2762_v8, %v2761_v21 }
 0x2d1   :  { %v2768_v29 = vmul.f32 0.01923077, %v2766_v10  ;;  %v2727_v30 = vadd.f32 %v2726_v14, %v2725_v27 }
 0x2d2   :  { %v2764_v33 = vrot.slane %v2763_v53, 1 }
 0x2d3   :  { %v2770_v35 = vadd.f32 1e-05, %v2768_v29 }
 0x2d4   :  { %v2765_v7 = vadd.f32 %v2764_v33, %v2763_v53 }
 0x2d5   :  { %3865 = vrsqrt.f32 %v2770_v35 }
 0x2d6   :  { %v2767_v9 = vadd.f32 %v2765_v7, %v2727_v30 }
 0x2d8   :  { %v2769_v36 = vmul.f32 0.01923077, %v2767_v9 }
 0x2da   :  { %v2771_v24 = vadd.f32 1e-05, %v2769_v36 }
 0x2dc   :  { %3867 = vrsqrt.f32 %v2771_v24 }
 0x2df   :  { %v3866_v42 = vpop.eup %3865 }
 0x2e0   :  { %v2786_v45 = vmul.f32 %v3866_v42, %v2779_v46 }
 0x2e2   :  { %v2813_v57 = vrot.slane %v2786_v45, %v2778_v26  ;;  %v2789_v1 = vmul.f32 %v2786_v45, %v4989_v62 }
 0x2e4   :  { %v2851_v44 = vmul.f32 %v2813_v57, %v4977_v58  ;;  %v2818_v48 = vmul.f32 %v2813_v57, %v4935_v37  ;;  %v2820_v58 = vmul.f32 %v2813_v57, %v4937_v38  ;;  %v2822_v18 = vmul.f32 %v2813_v57, %v4959_v49 }
 0x2e5   :  { %v2824_v62 = vmul.f32 %v2813_v57, %v4972_v13  ;;  %v2847_v50 = vmul.f32 %v2813_v57, %v4942_v41  ;;  %v2849_v5 = vmul.f32 %v2813_v57, %v4962_v47 }
 0x2e6   :  { %v3868_v0 = vpop.eup %3867 }
 0x2e7   :  { %v2787_v2 = vmul.f32 %v3868_v0, %v2783_v60 }
 0x2e9   :  { %v2790_v3 = vmul.f32 %v2787_v2, %v5007_v59  ;;  %v2817_v55 = vrot.slane %v2787_v2, %v2778_v26  ;;  %v2845_v59 = vmul.f32 %v2813_v57, %v4940_v39 }
 0x2eb   :  { %v2793_v6 = vcombine.low %v2789_v1, %v2790_v3  ;;  %v2819_v15 = vmul.f32 %v2817_v55, %v4945_v56  ;;  %v2821_v25 = vmul.f32 %v2817_v55, %v4951_v34  ;;  %v2823_v21 = vmul.f32 %v2817_v55, %v4966_v11 }
 0x2ec   :  { %v2825_v37 = vmul.f32 %v2817_v55, %v4981_v19  ;;  %v2846_v49 = vmul.f32 %v2817_v55, %v4947_v32  ;;  %v2848_v13 = vmul.f32 %v2817_v55, %v4957_v61  ;;  %v2850_v39 = vmul.f32 %v2817_v55, %v4968_v12 }
 0x2ed   :  { %v2800_v52 = vrot.slane %v2793_v6, %v2799_v4  ;;  %v2852_v56 = vmul.f32 %v2817_v55, %v4985_v23 }
 0x2ef   :  { %v2807_v54 = vrot.slane %v2800_v52, %v2799_v4 }
 0x2f1   :  { %v2809_v16 = vsub.f32 %v2788_v51, %v2807_v54 }
 0x2f3   :  { %v2830_v38 = vrot.slane %v2809_v16, %v2778_v26  ;;  %v2834_v31 = vrot.slane %v2809_v16, %v2782_v43 }
 0x2f5   :  { %v2837_v27 = vadd.f32 %v2830_v38, %v2818_v48  ;;  %v2838_v34 = vadd.f32 %v2834_v31, %v2819_v15  ;;  %v2839_v8 = vadd.f32 %v2830_v38, %v2820_v58  ;;  %v2840_v41 = vadd.f32 %v2834_v31, %v2821_v25 }
 0x2f6   :  { %v2841_v10 = vadd.f32 %v2830_v38, %v2822_v18  ;;  %v2842_v47 = vadd.f32 %v2834_v31, %v2823_v21  ;;  %v2843_v20 = vadd.f32 %v2830_v38, %v2824_v62  ;;  %v2844_v11 = vadd.f32 %v2834_v31, %v2825_v37 }
 0x2f7   :  { %v2853_v14 = vadd.f32 %v2845_v59, %v2830_v38  ;;  %v2854_v19 = vadd.f32 %v2846_v49, %v2834_v31  ;;  %v2855_v53 = vadd.f32 %v2847_v50, %v2830_v38  ;;  %v2856_v29 = vadd.f32 %v2848_v13, %v2834_v31 }
 0x2f8   :  { %v2857_v30 = vadd.f32 %v2849_v5, %v2830_v38  ;;  %v2858_v32 = vadd.f32 %v2850_v39, %v2834_v31  ;;  %v2859_v33 = vadd.f32 %v2851_v44, %v2830_v38  ;;  %v2860_v61 = vadd.f32 %v2852_v56, %v2834_v31 }
 0x2f9   :  { %v3392_v35 = vpack.c.bf16 %v2838_v34, %v2837_v27  ;;  %v3393_v12 = vpack.c.bf16 %v2840_v41, %v2839_v8  ;;  %v3394_v22 = vpack.c.bf16 %v2842_v47, %v2841_v10  ;;  %v3395_v23 = vpack.c.bf16 %v2844_v11, %v2843_v20 }
 0x2fa   :  { %v3396_v7 = vpack.c.bf16 %v2854_v19, %v2853_v14  ;;  %v3397_v9 = vpack.c.bf16 %v2856_v29, %v2855_v53  ;;  %v3398_v26 = vpack.c.bf16 %v2858_v32, %v2857_v30  ;;  %v3399_v36 = vpack.c.bf16 %v2860_v61, %v2859_v33 }
 0x2fb   :  { %2885 = vst [vmem:[%s5081_s4] sm:$0xff] %v3392_v35  ;;  %2886 = vst [vmem:[%s5081_s4 + $0x8] sm:$0xff] %v3393_v12 }
 0x2fc   :  { %2887 = vst [vmem:[%s5081_s4 + $0x10] sm:$0xff] %v3394_v22  ;;  %2888 = vst [vmem:[%s5081_s4 + $0x18] sm:$0x11] %v3395_v23 }
 0x2fd   :  { %3388 = vst [vmem:[%s5081_s4 + $0x20] sm:$0xff] %v3396_v7  ;;  %3389 = vst [vmem:[%s5081_s4 + $0x28] sm:$0xff] %v3397_v9 }
 0x2fe   :  { %3390 = vst [vmem:[%s5081_s4 + $0x30] sm:$0xff] %v3398_v26  ;;  %3391 = vst [vmem:[%s5081_s4 + $0x38] sm:$0x11] %v3399_v36 }

// kernel: generator_forward.11
= control target key start
LH: loop header
LB: loop body
LE: loop exit
PB: predicated region body
PF: predicated region fallthrough
CT: control target
= control target key end

     0   :  { %vm97_vm0 = vsmask.f32 7424  ;;  %vm589_vm1 = vcmask 130048   ;;  %s1157_s1 = inlined_call_operand.vmem [shape: bf16[2,256,16], index: 1, kind: input, shape index: {}]   ;;  %s1158_s0 = inlined_call_operand.vmem [shape: bf16[1,2,25,256], index: 0, kind: input, shape index: {}]   ;;  %s1159_s2 = inlined_call_operand.vmem [shape: f32[2,24,16], index: 2, kind: output, shape index: {}]  }
   0x1   :  { %v872_v0 = vld [vmem:[%s1157_s1 + $0xc0] sm:$0xff]   ;;  %v895_v4 = vld [vmem:[%s1157_s1 + $0xc8] sm:$0xff]   ;;  %v919_v8 = vld [vmem:[%s1157_s1 + $0xd0] sm:$0xff]  }
   0x2   :  { %v877_v1 = vld [vmem:[%s1157_s1 + $0x40] sm:$0xff]   ;;  %684 = vmatprep.subr.bf16.mxu0 %v872_v0  ;;  %v901_v5 = vld [vmem:[%s1157_s1 + $0x48] sm:$0xff]   ;;  %v925_v9 = vld [vmem:[%s1157_s1 + $0x50] sm:$0xff]  }
   0x3   :  { %v883_v2 = vld [vmem:[%s1157_s1 + $0x80] sm:$0xff]   ;;  %712 = vmatprep.subr.bf16.mxu1 %v877_v1  ;;  %v907_v6 = vld [vmem:[%s1157_s1 + $0x88] sm:$0xff]   ;;  %v931_v10 = vld [vmem:[%s1157_s1 + $0x90] sm:$0xff]  }
   0x4   :  { %v889_v3 = vld [vmem:[%s1157_s1] sm:$0xff]   ;;  %685 = vmatpush3.bf16.msra.mxu0 %v883_v2  ;;  %v913_v7 = vld [vmem:[%s1157_s1 + $0x8] sm:$0xff]   ;;  %v937_v11 = vld [vmem:[%s1157_s1 + $0x10] sm:$0xff]  }
   0x5   :  { %713 = vmatpush3.bf16.msra.mxu1 %v889_v3  ;;  %686 = vmatprep.subr.bf16.mxu0 %v895_v4  ;;  %v943_v12 = vld [vmem:[%s1157_s1 + $0xd8] sm:$0xff]   ;;  %v967_v16 = vld [vmem:[%s1157_s1 + $0xe0] sm:$0xff]   ;;  %v991_v20 = vld [vmem:[%s1157_s1 + $0xe8] sm:$0xff]  }
   0x6   :  { %714 = vmatprep.subr.bf16.mxu1 %v901_v5  ;;  %v949_v13 = vld [vmem:[%s1157_s1 + $0x58] sm:$0xff]   ;;  %v973_v17 = vld [vmem:[%s1157_s1 + $0x60] sm:$0xff]   ;;  %v997_v21 = vld [vmem:[%s1157_s1 + $0x68] sm:$0xff]  }
   0x7   :  { %v955_v14 = vld [vmem:[%s1157_s1 + $0x98] sm:$0xff]   ;;  %v979_v18 = vld [vmem:[%s1157_s1 + $0xa0] sm:$0xff]   ;;  %v1003_v22 = vld [vmem:[%s1157_s1 + $0xa8] sm:$0xff]  }
   0x8   :  { %687 = vmatpush3.bf16.msra.mxu0 %v907_v6  ;;  %v961_v15 = vld [vmem:[%s1157_s1 + $0x18] sm:$0xff]   ;;  %v985_v19 = vld [vmem:[%s1157_s1 + $0x20] sm:$0xff]   ;;  %v1009_v23 = vld [vmem:[%s1157_s1 + $0x28] sm:$0xff]  }
   0x9   :  { %715 = vmatpush3.bf16.msra.mxu1 %v913_v7  ;;  %688 = vmatprep.subr.bf16.mxu0 %v919_v8  ;;  %v1015_v24 = vld [vmem:[%s1157_s1 + $0xf0] sm:$0xff]   ;;  %v1039_v28 = vld [vmem:[%s1157_s1 + $0xf8] sm:$0xff]   ;;  %v828_v34 = vld [vmem:[%s1158_s0 + $0x4] ss:$8 sps:$4 sm:$0xff]  }
   0xa   :  { %716 = vmatprep.subr.bf16.mxu1 %v925_v9  ;;  %v1021_v25 = vld [vmem:[%s1157_s1 + $0x70] sm:$0xff]   ;;  %v1045_v29 = vld [vmem:[%s1157_s1 + $0x78] sm:$0xff]   ;;  %v831_v35 = vld [vmem:[%s1158_s0] ss:$8 sps:$4 sm:$0xff]   ;;  %v111_v40 = vshrl.u32 %v828_v34, 16  ;;  %v113_v41 = vshll.u32 %v828_v34, 16  ;;  %410 = vmatprep.mubr.bf16.mxu1 %v828_v34 }
   0xb   :  { %v1027_v26 = vld [vmem:[%s1157_s1 + $0xb0] sm:$0xff]   ;;  %v1051_v30 = vld [vmem:[%s1157_s1 + $0xb8] sm:$0xff]   ;;  %v99_v42 = vshrl.u32 %v831_v35, 16  ;;  %v101_v43 = vshll.u32 %v831_v35, 16  ;;  %v837_v50 = vld [vmem:[%s1158_s0 + $0x24] ss:$8 sps:$4 sm:$0xff]  }
   0xc   :  { %689 = vmatpush3.bf16.msra.mxu0 %v931_v10  ;;  %v1033_v27 = vld [vmem:[%s1157_s1 + $0x30] sm:$0xff]   ;;  %v1057_v31 = vld [vmem:[%s1157_s1 + $0x38] sm:$0xff]   ;;  %v115_v48 = vrot.slane %v113_v41, 1  ;;  %v465_v56 = vshll.u32 %v837_v50, 16  ;;  %v463_v58 = vshrl.u32 %v837_v50, 16 }
   0xd   :  { %717 = vmatpush3.bf16.msra.mxu1 %v937_v11  ;;  %690 = vmatprep.subr.bf16.mxu0 %v943_v12  ;;  %v14_v32 = vld [vmem:[%s1158_s0 + $0x10] sm:$0xff]  ;;  %v47_v33 = vld [vmem:[%s1158_s0 + $0x18] sm:$0x11]  ;;  %v103_v49 = vrot.slane %v101_v43, 1 }
   0xe   :  { %718 = vmatprep.subr.bf16.mxu1 %v949_v13  ;;  %v654_v36 = vcombine.high %v14_v32, %v14_v32  ;;  %v636_v37 = vcombine.high %v14_v32, %v47_v33  ;;  %v635_v38 = vcombine.low %v14_v32, %v47_v33  ;;  %v1078_v39 = vld [vmem:[%s1158_s0 + $0x30] sm:$0xff]  ;;  %v674_v44 = vld [vmem:[%s1158_s0 + $0x38] sm:$0x11]  ;;  %v116_v54 = vor.u32 %v115_v48, %v111_v40 }
   0xf   :  { %v1088_v51 = vcombine.high %v1078_v39, %v674_v44  ;;  %v104_v55 = vor.u32 %v103_v49, %v99_v42  ;;  %v467_v61 = vrot.slane %v465_v56, 1  ;;  %v653_v63 = vcombine.low %v14_v32, %v14_v32 }
  0x10   :  { %691 = vmatpush3.bf16.msra.mxu0 %v955_v14  ;;  %v118_v45 = vshll.u32 %v636_v37, 16  ;;  %v106_v46 = vshll.u32 %v635_v38, 16  ;;  %v125_v47 = vshrl.u32 %v636_v37, 16 }
  0x11   :  { %719 = vmatpush3.bf16.msra.mxu1 %v961_v15  ;;  %692 = vmatprep.subr.bf16.mxu0 %v967_v16  ;;  %v470_v62 = vshll.u32 %v1088_v51, 16 }
  0x12   :  { %720 = vmatprep.subr.bf16.mxu1 %v973_v17  ;;  %v120_v52 = vrot.slane %v118_v45, 1  ;;  %v108_v53 = vrot.slane %v106_v46, 1 }
  0x14   :  { %693 = vmatpush3.bf16.msra.mxu0 %v979_v18  ;;  %v127_v57 = vor.u32 %v125_v47, %v120_v52  ;;  %v121_v59 = vsel %vm97_vm0, %v116_v54, %v120_v52  ;;  %v109_v60 = vsel %vm97_vm0, %v104_v55, %v108_v53 }
  0x15   :  { %721 = vmatpush3.bf16.msra.mxu1 %v985_v19  ;;  %694 = vmatprep.subr.bf16.mxu0 %v991_v20 }
  0x16   :  { %722 = vmatprep.subr.bf16.mxu1 %v997_v21  ;;  %260 = vmatprep.mubr.bf16.mxu0 %v121_v59 }
  0x18   :  { %695 = vmatpush3.bf16.msra.mxu0 %v1003_v22 }
  0x19   :  { %723 = vmatpush3.bf16.msra.mxu1 %v1009_v23  ;;  %696 = vmatprep.subr.bf16.mxu0 %v1015_v24 }
  0x1a   :  { %724 = vmatprep.subr.bf16.mxu1 %v1021_v25 }
  0x1c   :  { %697 = vmatpush3.bf16.msra.mxu0 %v1027_v26 }
  0x1d   :  { %725 = vmatpush3.bf16.msra.mxu1 %v1033_v27  ;;  %698 = vmatprep.subr.bf16.mxu0 %v1039_v28 }
  0x1e   :  { %726 = vmatprep.subr.bf16.mxu1 %v1045_v29 }
  0x20   :  { %699 = vmatpush3.bf16.msra.mxu0 %v1051_v30 }
  0x21   :  { %727 = vmatpush3.bf16.msra.mxu1 %v1057_v31  ;;  %740 = vmatprep.subr.bf16.mxu0 %v872_v0  ;;  %v122_v0 = vshrl.u32 %v635_v38, 16 }
  0x22   :  { %768 = vmatprep.subr.bf16.mxu1 %v877_v1  ;;  %v468_v1 = vor.u32 %v467_v61, %v463_v58 }
  0x23   :  { %261 = vmatmul.mubr.bf16.vlgmr.msra.gmra.mrb[0].mxu0 %v109_v60 }
  0x24   :  { %411 = vmatmul.mubr.bf16.vlgmr.msra.gmra.mrb[0].mxu1 %v831_v35  ;;  %741 = vmatpush3.bf16.msra.mxu0 %v883_v2 }
  0x25   :  { %769 = vmatpush3.bf16.msra.mxu1 %v889_v3  ;;  %418 = vmatprep.mubr.bf16.mxu1 %v654_v36  ;;  %v472_v3 = vrot.slane %v470_v62, 1 }
  0x26   :  { %770 = vmatprep.subr.bf16.mxu1 %v901_v5  ;;  %268 = vmatprep.mubr.bf16.mxu0 %v127_v57  ;;  %v124_v5 = vor.u32 %v122_v0, %v108_v53 }
  0x27   :  { %742 = vmatprep.subr.bf16.mxu0 %v895_v4  ;;  %v473_v2 = vsel %vm97_vm0, %v468_v1, %v472_v3  ;;  %v835_v4 = vld [vmem:[%s1158_s0 + $0x20] ss:$8 sps:$4 sm:$0xff]  }
  0x28   :  { %743 = vmatpush3.bf16.msra.mxu0 %v907_v6  ;;  %v677_v6 = vcombine.low %v1078_v39, %v674_v44 }
  0x29   :  { %771 = vmatpush3.bf16.msra.mxu1 %v913_v7  ;;  %744 = vmatprep.subr.bf16.mxu0 %v919_v8  ;;  %v453_v7 = vshll.u32 %v835_v4, 16  ;;  %v451_v8 = vshrl.u32 %v835_v4, 16 }
  0x2a   :  { %772 = vmatprep.subr.bf16.mxu1 %v925_v9 }
  0x2b   :  { %269 = vmatmul.mubr.bf16.gmra.mrb[4].mxu0 %v124_v5  ;;  %v455_v9 = vrot.slane %v453_v7, 1 }
  0x2c   :  { %419 = vmatmul.mubr.bf16.gmra.mrb[4].mxu1 %v653_v63  ;;  %745 = vmatpush3.bf16.msra.mxu0 %v931_v10  ;;  %v458_v10 = vshll.u32 %v677_v6, 16 }
  0x2d   :  { %773 = vmatpush3.bf16.msra.mxu1 %v937_v11  ;;  %570 = vmatprep.mubr.bf16.mxu1 %v837_v50  ;;  %v680_v11 = vcombine.high %v1078_v39, %v1078_v39 }
  0x2e   :  { %774 = vmatprep.subr.bf16.mxu1 %v949_v13  ;;  %516 = vmatprep.mubr.bf16.mxu0 %v473_v2  ;;  %v460_v13 = vrot.slane %v458_v10, 1 }
  0x2f   :  { %746 = vmatprep.subr.bf16.mxu0 %v943_v12  ;;  %v456_v12 = vor.u32 %v455_v9, %v451_v8 }
  0x30   :  { %747 = vmatpush3.bf16.msra.mxu0 %v955_v14  ;;  %v477_v14 = vshrl.u32 %v1088_v51, 16 }
  0x31   :  { %775 = vmatpush3.bf16.msra.mxu1 %v961_v15  ;;  %748 = vmatprep.subr.bf16.mxu0 %v967_v16  ;;  %v461_v15 = vsel %vm97_vm0, %v456_v12, %v460_v13 }
  0x32   :  { %776 = vmatprep.subr.bf16.mxu1 %v973_v17  ;;  %v479_v16 = vor.u32 %v477_v14, %v472_v3  ;;  %v679_v17 = vcombine.low %v1078_v39, %v1078_v39 }
  0x34   :  { %749 = vmatpush3.bf16.msra.mxu0 %v979_v18  ;;  %v474_v18 = vshrl.u32 %v677_v6, 16 }
  0x35   :  { %777 = vmatpush3.bf16.msra.mxu1 %v985_v19  ;;  %750 = vmatprep.subr.bf16.mxu0 %v991_v20 }
  0x36   :  { %778 = vmatprep.subr.bf16.mxu1 %v997_v21  ;;  %v476_v19 = vor.u32 %v474_v18, %v460_v13 }
  0x38   :  { %751 = vmatpush3.bf16.msra.mxu0 %v1003_v22 }
  0x39   :  { %779 = vmatpush3.bf16.msra.mxu1 %v1009_v23  ;;  %752 = vmatprep.subr.bf16.mxu0 %v1015_v24 }
  0x3a   :  { %780 = vmatprep.subr.bf16.mxu1 %v1021_v25 }
  0x3c   :  { %753 = vmatpush3.bf16.msra.mxu0 %v1027_v26 }
  0x3d   :  { %781 = vmatpush3.bf16.msra.mxu1 %v1033_v27  ;;  %754 = vmatprep.subr.bf16.mxu0 %v1039_v28 }
  0x3e   :  { %782 = vmatprep.subr.bf16.mxu1 %v1045_v29 }
  0x40   :  { %755 = vmatpush3.bf16.msra.mxu0 %v1051_v30 }
  0x41   :  { %783 = vmatpush3.bf16.msra.mxu1 %v1057_v31 }
  0x43   :  { %517 = vmatmul.mubr.bf16.vlgmr.msra.gmra.mrb[8].mxu0 %v461_v15 }
  0x44   :  { %571 = vmatmul.mubr.bf16.vlgmr.msra.gmra.mrb[8].mxu1 %v835_v4  ;;  %524 = vmatprep.mubr.bf16.mxu0 %v479_v16 }
  0x45   :  { %578 = vmatprep.mubr.bf16.mxu1 %v680_v11 }
  0x4b   :  { %525 = vmatmul.mubr.bf16.gmra.mrb[12].mxu0 %v476_v19 }
  0x4c   :  { %579 = vmatmul.mubr.bf16.gmra.mrb[12].mxu1 %v679_v17 }
  0xf6   :  { %v700_v26 = vpop.f32.mrb[0].mxu0 }
  0xf7   :  { %v728_v20 = vpop.f32.mrb[0].mxu1  ;;  %v701_v27 = vpop.f32.mrb[1].mxu0 }
  0xf8   :  { %v729_v21 = vpop.f32.mrb[1].mxu1  ;;  %v702_v28 = vadd.f32 %v701_v27, %v700_v26  ;;  %v703_v29 = vpop.f32.mrb[2].mxu0 }
  0xf9   :  { %v730_v22 = vadd.f32 %v729_v21, %v728_v20  ;;  %v731_v23 = vpop.f32.mrb[2].mxu1  ;;  %v704_v30 = vpop.f32.mrb[3].mxu0 }
  0xfa   :  { %v732_v24 = vpop.f32.mrb[3].mxu1  ;;  %v705_v33 = vadd.f32 %v704_v30, %v703_v29 }
  0xfb   :  { %v733_v25 = vadd.f32 %v732_v24, %v731_v23  ;;  %v413_v32 = vadd.f32 %v730_v22, %v702_v28 }
  0xfd   :  { %842 = vtanh.f32 %v413_v32  ;;  %v416_v37 = vadd.f32 %v733_v25, %v705_v33 }
  0xfe   :  { %v706_v39 = vpop.f32.mrb[4].mxu0 }
  0xff   :  { %v734_v31 = vpop.f32.mrb[4].mxu1  ;;  %844 = vtanh.f32 %v416_v37  ;;  %v707_v40 = vpop.f32.mrb[5].mxu0 }
 0x100   :  { %v735_v34 = vpop.f32.mrb[5].mxu1  ;;  %v708_v41 = vadd.f32 %v707_v40, %v706_v39  ;;  %v709_v42 = vpop.f32.mrb[6].mxu0 }
 0x101   :  { %v736_v35 = vadd.f32 %v735_v34, %v734_v31  ;;  %v737_v36 = vpop.f32.mrb[6].mxu1  ;;  %v710_v43 = vpop.f32.mrb[7].mxu0 }
 0x102   :  { %v738_v38 = vpop.f32.mrb[7].mxu1 }
 0x103   :  { %v421_v44 = vadd.f32 %v736_v35, %v708_v41 }
 0x105   :  { %846 = vtanh.f32 %v421_v44 }
 0x107   :  { %v843_v45 = vpop.eup %842 }
 0x108   :  { %590 = vst.msk [vmem:[%s1159_s2] sm:$0xff] %vm589_vm1, %v843_v45 }
 0x109   :  { %v845_v46 = vpop.eup %844 }
 0x10a   :  { %591 = vst.msk [vmem:[%s1159_s2 + $0x8] sm:$0xff] %vm589_vm1, %v845_v46 }
 0x10f   :  { %v847_v47 = vpop.eup %846 }
 0x110   :  { %592 = vst.msk [vmem:[%s1159_s2 + $0x10] sm:$0xff] %vm589_vm1, %v847_v47 }
 0x116   :  { %v756_v54 = vpop.f32.mrb[8].mxu0 }
 0x117   :  { %v784_v48 = vpop.f32.mrb[8].mxu1  ;;  %v757_v55 = vpop.f32.mrb[9].mxu0 }
 0x118   :  { %v785_v49 = vpop.f32.mrb[9].mxu1  ;;  %v758_v57 = vadd.f32 %v757_v55, %v756_v54  ;;  %v759_v58 = vpop.f32.mrb[10].mxu0 }
 0x119   :  { %v786_v50 = vadd.f32 %v785_v49, %v784_v48  ;;  %v787_v51 = vpop.f32.mrb[10].mxu1  ;;  %v760_v60 = vpop.f32.mrb[11].mxu0 }
 0x11a   :  { %v788_v52 = vpop.f32.mrb[11].mxu1  ;;  %v761_v0 = vadd.f32 %v760_v60, %v759_v58 }
 0x11b   :  { %v789_v53 = vadd.f32 %v788_v52, %v787_v51  ;;  %v573_v63 = vadd.f32 %v786_v50, %v758_v57 }
 0x11d   :  { %848 = vtanh.f32 %v573_v63  ;;  %v576_v3 = vadd.f32 %v789_v53, %v761_v0 }
 0x11e   :  { %v762_v5 = vpop.f32.mrb[12].mxu0 }
 0x11f   :  { %v790_v56 = vpop.f32.mrb[12].mxu1  ;;  %850 = vtanh.f32 %v576_v3  ;;  %v763_v2 = vpop.f32.mrb[13].mxu0 }
 0x120   :  { %v791_v59 = vpop.f32.mrb[13].mxu1  ;;  %v764_v4 = vadd.f32 %v763_v2, %v762_v5  ;;  %v765_v6 = vpop.f32.mrb[14].mxu0 }
 0x121   :  { %v792_v61 = vadd.f32 %v791_v59, %v790_v56  ;;  %v793_v62 = vpop.f32.mrb[14].mxu1  ;;  %v766_v7 = vpop.f32.mrb[15].mxu0 }
 0x122   :  { %v794_v1 = vpop.f32.mrb[15].mxu1 }
 0x123   :  { %v581_v8 = vadd.f32 %v792_v61, %v764_v4 }
 0x125   :  { %852 = vtanh.f32 %v581_v8 }
 0x127   :  { %v849_v9 = vpop.eup %848 }
 0x128   :  { %681 = vst.msk [vmem:[%s1159_s2 + $0x18] sm:$0xff] %vm589_vm1, %v849_v9 }
 0x129   :  { %v851_v10 = vpop.eup %850 }
 0x12a   :  { %682 = vst.msk [vmem:[%s1159_s2 + $0x20] sm:$0xff] %vm589_vm1, %v851_v10 }
 0x12f   :  { %v853_v11 = vpop.eup %852 }
 0x130   :  { %683 = vst.msk [vmem:[%s1159_s2 + $0x28] sm:$0xff] %vm589_vm1, %v853_v11 }

// kernel: generator_forward.10
= control target key start
LH: loop header
LB: loop body
LE: loop exit
PB: predicated region body
PF: predicated region fallthrough
CT: control target
= control target key end

     0   :  { %vm127_vm0 = vsmask.f32 7424  ;;  %vm756_vm1 = vcmask 1046528   ;;  %vm1137_vm2 = vsmask.f32 6400  ;;  %vm1548_vm3 = vcmask 1045504   ;;  %s8561_s1 = inlined_call_operand.vmem [shape: bf16[9,256,256], index: 1, kind: input, shape index: {}]   ;;  %s8562_s0 = inlined_call_operand.vmem [shape: bf16[1,2,86,256], index: 0, kind: input, shape index: {}]   ;;  %s8563_s2 = inlined_call_operand.vmem [shape: bf16[2,78,256], index: 2, kind: output, shape index: {}]  }
   0x1   :  { %v6047_v0 = vld [vmem:[%s8561_s1 + $0x104] ss:$8 sps:$4 sm:$0xff]   ;;  %v6049_v1 = vld [vmem:[%s8561_s1 + $0x100] ss:$8 sps:$4 sm:$0xff]   ;;  %v6050_v2 = vld [vmem:[%s8561_s1 + $0x114] ss:$8 sps:$4 sm:$0xff]  }
   0x2   :  { %376 = vmatprep.subr.bf16.mxu0 %v6047_v0  ;;  %3453 = vmatprep.subr.bf16.mxu1 %v6047_v0  ;;  %v6052_v3 = vld [vmem:[%s8561_s1 + $0x110] ss:$8 sps:$4 sm:$0xff]   ;;  %v6053_v4 = vld [vmem:[%s8561_s1 + $0x124] ss:$8 sps:$4 sm:$0xff]   ;;  %v6055_v5 = vld [vmem:[%s8561_s1 + $0x120] ss:$8 sps:$4 sm:$0xff]  }
   0x3   :  { %377 = vmatpush1.bf16.msra.mxu0 %v6049_v1  ;;  %3454 = vmatpush1.bf16.msra.mxu1 %v6049_v1  ;;  %v6056_v6 = vld [vmem:[%s8561_s1 + $0x134] ss:$8 sps:$4 sm:$0xff]   ;;  %v6058_v7 = vld [vmem:[%s8561_s1 + $0x130] ss:$8 sps:$4 sm:$0xff]   ;;  %v6059_v8 = vld [vmem:[%s8561_s1 + $0x144] ss:$8 sps:$4 sm:$0xff]  }
   0x4   :  { %378 = vmatprep.subr.bf16.mxu0 %v6050_v2  ;;  %3455 = vmatprep.subr.bf16.mxu1 %v6050_v2  ;;  %v6061_v9 = vld [vmem:[%s8561_s1 + $0x140] ss:$8 sps:$4 sm:$0xff]   ;;  %v6062_v10 = vld [vmem:[%s8561_s1 + $0x154] ss:$8 sps:$4 sm:$0xff]   ;;  %v6064_v11 = vld [vmem:[%s8561_s1 + $0x150] ss:$8 sps:$4 sm:$0xff]  }
   0x5   :  { %v6065_v12 = vld [vmem:[%s8561_s1 + $0x164] ss:$8 sps:$4 sm:$0xff]   ;;  %v6670_v16 = vld [vmem:[%s8562_s0 + $0x14] ss:$8 sps:$4 sm:$0xff]   ;;  %v6067_v17 = vld [vmem:[%s8561_s1 + $0x160] ss:$8 sps:$4 sm:$0xff]  }
   0x6   :  { %v11_v13 = vld [vmem:[%s8562_s0] sm:$0xff]  ;;  %v12_v14 = vld [vmem:[%s8562_s0 + $0x8] sm:$0xff]  ;;  %v6068_v18 = vld [vmem:[%s8561_s1 + $0x174] ss:$8 sps:$4 sm:$0xff]   ;;  %v148_v21 = vshll.u32 %v6670_v16, 16  ;;  %vm2262_vm5 = vcmask 1044480  }
   0x7   :  { %379 = vmatpush1.bf16.msra.mxu0 %v6052_v3  ;;  %3456 = vmatpush1.bf16.msra.mxu1 %v6052_v3  ;;  %v6665_v15 = vcombine.high %v11_v13, %v12_v14  ;;  %v5606_v22 = vld [vmem:[%s8562_s0 + $0x58] sm:$0xff]  ;;  %v5607_v23 = vld [vmem:[%s8562_s0 + $0x60] sm:$0xff]  ;;  %v6694_v27 = vld [vmem:[%s8562_s0 + $0x6c] ss:$8 sps:$4 sm:$0xff]   ;;  %v6735_v47 = vcombine.low %v11_v13, %v12_v14  ;;  %vm1883_vm4 = vsmask.f32 5376 }
   0x8   :  { %380 = vmatprep.subr.bf16.mxu0 %v6053_v4  ;;  %3457 = vmatprep.subr.bf16.mxu1 %v6053_v4  ;;  %v6687_v25 = vrot.slane %v148_v21, 1  ;;  %v6689_v26 = vcombine.high %v5606_v22, %v5607_v23  ;;  %v6070_v28 = vld [vmem:[%s8561_s1 + $0x170] ss:$8 sps:$4 sm:$0xff]   ;;  %v6071_v29 = vld [vmem:[%s8561_s1 + $0x184] ss:$8 sps:$4 sm:$0xff]   ;;  %v3385_v33 = vshll.u32 %v6694_v27, 16  ;;  %v6740_v49 = vcombine.low %v5606_v22, %v5607_v23 }
   0x9   :  { %v141_v19 = vshrl.u32 %v6665_v15, 16  ;;  %v143_v20 = vshll.u32 %v6665_v15, 16  ;;  %v6073_v37 = vld [vmem:[%s8561_s1 + $0x180] ss:$8 sps:$4 sm:$0xff]   ;;  %v6074_v38 = vld [vmem:[%s8561_s1 + $0x194] ss:$8 sps:$4 sm:$0xff]  }
   0xa   :  { %v3378_v31 = vshrl.u32 %v6689_v26, 16  ;;  %v3380_v32 = vshll.u32 %v6689_v26, 16  ;;  %v6707_v36 = vrot.slane %v3385_v33, 1  ;;  %v6076_v41 = vld [vmem:[%s8561_s1 + $0x190] ss:$8 sps:$4 sm:$0xff]   ;;  %v131_v52 = vshll.u32 %v6735_v47, 16 }
   0xb   :  { %381 = vmatpush1.bf16.msra.mxu0 %v6055_v5  ;;  %3458 = vmatpush1.bf16.msra.mxu1 %v6055_v5  ;;  %v145_v24 = vrot.slane %v143_v20, 1  ;;  %v6077_v42 = vld [vmem:[%s8561_s1 + $0x1a4] ss:$8 sps:$4 sm:$0xff]   ;;  %v6079_v43 = vld [vmem:[%s8561_s1 + $0x1a0] ss:$8 sps:$4 sm:$0xff]   ;;  %v3368_v55 = vshll.u32 %v6740_v49, 16 }
   0xc   :  { %382 = vmatprep.subr.bf16.mxu0 %v6056_v6  ;;  %3459 = vmatprep.subr.bf16.mxu1 %v6056_v6  ;;  %v3382_v35 = vrot.slane %v3380_v32, 1  ;;  %v6080_v44 = vld [vmem:[%s8561_s1 + $0x1b4] ss:$8 sps:$4 sm:$0xff]   ;;  %v6082_v45 = vld [vmem:[%s8561_s1 + $0x1b0] ss:$8 sps:$4 sm:$0xff]   ;;  %v129_v57 = vshrl.u32 %v6735_v47, 16 }
   0xd   :  { %v146_v30 = vor.u32 %v145_v24, %v141_v19  ;;  %v6083_v46 = vld [vmem:[%s8561_s1 + $0x1c4] ss:$8 sps:$4 sm:$0xff]   ;;  %v6085_v48 = vld [vmem:[%s8561_s1 + $0x1c0] ss:$8 sps:$4 sm:$0xff]   ;;  %v6086_v50 = vld [vmem:[%s8561_s1 + $0x1d4] ss:$8 sps:$4 sm:$0xff]  }
   0xe   :  { %v3383_v39 = vor.u32 %v3382_v35, %v3378_v31  ;;  %v6748_v51 = vld [vmem:[%s8562_s0 + $0x10] ss:$8 sps:$4 sm:$0xff]   ;;  %v6089_v56 = vld [vmem:[%s8561_s1 + $0x1e4] ss:$8 sps:$4 sm:$0xff]   ;;  %v133_v59 = vrot.slane %v131_v52, 1  ;;  %v3366_v63 = vshrl.u32 %v6740_v49, 16 }
   0xf   :  { %383 = vmatpush1.bf16.msra.mxu0 %v6058_v7  ;;  %3460 = vmatpush1.bf16.msra.mxu1 %v6058_v7  ;;  %v151_v34 = vsel %vm127_vm0, %v146_v30, %v6687_v25  ;;  %v6088_v53 = vld [vmem:[%s8561_s1 + $0x1d0] ss:$8 sps:$4 sm:$0xff]   ;;  %v136_v58 = vshll.u32 %v6748_v51, 16  ;;  %v6768_v60 = vld [vmem:[%s8562_s0 + $0x24] ss:$8 sps:$4 sm:$0xff]   ;;  %v3370_v0 = vrot.slane %v3368_v55, 1 }
  0x10   :  { %384 = vmatprep.subr.bf16.mxu0 %v6059_v8  ;;  %3461 = vmatprep.subr.bf16.mxu1 %v6059_v8  ;;  %v3388_v40 = vsel %vm127_vm0, %v3383_v39, %v6707_v36  ;;  %v6757_v54 = vld [vmem:[%s8562_s0 + $0x68] ss:$8 sps:$4 sm:$0xff]   ;;  %v6773_v61 = vld [vmem:[%s8562_s0 + $0x7c] ss:$8 sps:$4 sm:$0xff]   ;;  %v160_v5 = vshrl.u32 %v6670_v16, 16  ;;  %v3397_v6 = vshrl.u32 %v6694_v27, 16  ;;  %v134_v7 = vor.u32 %v133_v59, %v129_v57 }
  0x11   :  { %408 = vmatprep.mubr.bf16.mxu0 %v151_v34  ;;  %3485 = vmatprep.mubr.bf16.mxu1 %v3388_v40  ;;  %v6091_v62 = vld [vmem:[%s8561_s1 + $0x1e0] ss:$8 sps:$4 sm:$0xff]   ;;  %v3373_v1 = vshll.u32 %v6757_v54, 16  ;;  %v6092_v2 = vld [vmem:[%s8561_s1 + $0x1f4] ss:$8 sps:$4 sm:$0xff]   ;;  %v138_v4 = vrot.slane %v136_v58, 1 }
  0x12   :  { %v6094_v3 = vld [vmem:[%s8561_s1 + $0x1f0] ss:$8 sps:$4 sm:$0xff]   ;;  %v164_v8 = vshll.u32 %v6768_v60, 16  ;;  %v6100_v14 = vld [vmem:[%s8561_s1 + $0x4] ss:$8 sps:$4 sm:$0xff]   ;;  %v152_v19 = vshrl.u32 %v6748_v51, 16  ;;  %v3399_v24 = vor.u32 %v3397_v6, %v6707_v36 }
  0x13   :  { %385 = vmatpush1.bf16.msra.mxu0 %v6061_v9  ;;  %3462 = vmatpush1.bf16.msra.mxu1 %v6061_v9  ;;  %v3401_v9 = vshll.u32 %v6773_v61, 16  ;;  %v6798_v13 = vld [vmem:[%s8562_s0 + $0x78] ss:$8 sps:$4 sm:$0xff]   ;;  %v6811_v20 = vld [vmem:[%s8562_s0 + $0x34] ss:$8 sps:$4 sm:$0xff]   ;;  %v139_v21 = vsel %vm127_vm0, %v134_v7, %v138_v4  ;;  %v3389_v31 = vshrl.u32 %v6757_v54, 16 }
  0x14   :  { %386 = vmatprep.subr.bf16.mxu0 %v6062_v10  ;;  %3463 = vmatprep.subr.bf16.mxu1 %v6062_v10  ;;  %v6793_v10 = vld [vmem:[%s8562_s0 + $0x20] ss:$8 sps:$4 sm:$0xff]   ;;  %v6110_v22 = vld [vmem:[%s8561_s1 + $0x14] ss:$8 sps:$4 sm:$0xff]   ;;  %v166_v23 = vrot.slane %v164_v8, 1  ;;  %v3393_v32 = vshll.u32 %v6798_v13, 16 }
  0x15   :  { %v156_v30 = vshll.u32 %v6793_v10, 16  ;;  %v6830_v33 = vld [vmem:[%s8562_s0 + $0x30] ss:$8 sps:$4 sm:$0xff]   ;;  %v176_v36 = vshrl.u32 %v6768_v60, 16  ;;  %v53_v39 = vld [vmem:[%s8562_s0 + $0x48] sm:$0xff]  ;;  %v5616_v52 = vld [vmem:[%s8562_s0 + $0xa0] sm:$0xff] }
  0x16   :  { %v6835_v34 = vld [vmem:[%s8562_s0 + $0x88] ss:$8 sps:$4 sm:$0xff]   ;;  %v168_v55 = vshrl.u32 %v6793_v10, 16  ;;  %v172_v59 = vshll.u32 %v6830_v33, 16  ;;  %v6116_v6 = vld [vmem:[%s8561_s1 + $0x34] ss:$8 sps:$4 sm:$0xff]  }
  0x17   :  { %387 = vmatpush1.bf16.msra.mxu0 %v6064_v11  ;;  %3464 = vmatpush1.bf16.msra.mxu1 %v6064_v11  ;;  %v3371_v11 = vor.u32 %v3370_v0, %v3366_v63  ;;  %v6108_v35 = vld [vmem:[%s8561_s1 + $0x10] ss:$8 sps:$4 sm:$0xff]   ;;  %v178_v57 = vor.u32 %v176_v36, %v166_v23  ;;  %vm2597_vm6 = vsmask.f32 4352 }
  0x18   :  { %388 = vmatprep.subr.bf16.mxu0 %v6065_v12  ;;  %3465 = vmatprep.subr.bf16.mxu1 %v6065_v12  ;;  %v3375_v12 = vrot.slane %v3373_v1, 1 }
  0x1b   :  { %389 = vmatpush1.bf16.msra.mxu0 %v6067_v17  ;;  %3466 = vmatpush1.bf16.msra.mxu1 %v6067_v17  ;;  %v6098_v17 = vld [vmem:[%s8561_s1] ss:$8 sps:$4 sm:$0xff]  }
  0x1c   :  { %390 = vmatprep.subr.bf16.mxu0 %v6068_v18  ;;  %3467 = vmatprep.subr.bf16.mxu1 %v6068_v18  ;;  %v162_v18 = vor.u32 %v160_v5, %v6687_v25  ;;  %v6821_v25 = vld [vmem:[%s8562_s0 + $0x8c] ss:$8 sps:$4 sm:$0xff]  }
  0x1e   :  { %v167_v40 = vsel %vm127_vm0, %v162_v18, %v166_v23 }
  0x1f   :  { %391 = vmatpush1.bf16.msra.mxu0 %v6070_v28  ;;  %3468 = vmatpush1.bf16.msra.mxu1 %v6070_v28  ;;  %v3403_v28 = vrot.slane %v3401_v9, 1 }
  0x20   :  { %392 = vmatprep.subr.bf16.mxu0 %v6071_v29  ;;  %3469 = vmatprep.subr.bf16.mxu1 %v6071_v29  ;;  %v3376_v29 = vsel %vm127_vm0, %v3371_v11, %v3375_v12  ;;  %v174_v11 = vrot.slane %v172_v59, 1  ;;  %v6123_v59 = vld [vmem:[%s8561_s1 + $0x60] ss:$8 sps:$4 sm:$0xff]  }
  0x23   :  { %393 = vmatpush1.bf16.msra.mxu0 %v6073_v37  ;;  %3470 = vmatpush1.bf16.msra.mxu1 %v6073_v37  ;;  %v180_v37 = vshll.u32 %v6811_v20, 16 }
  0x24   :  { %394 = vmatprep.subr.bf16.mxu0 %v6074_v38  ;;  %3471 = vmatprep.subr.bf16.mxu1 %v6074_v38  ;;  %v6845_v38 = vld [vmem:[%s8562_s0 + $0x40] sm:$0xff] }
  0x25   :  { %v182_v58 = vrot.slane %v180_v37, 1  ;;  %v6870_v1 = vcombine.high %v6845_v38, %v53_v39  ;;  %v6893_v23 = vcombine.low %v6845_v38, %v53_v39  ;;  %v184_v39 = vshrl.u32 %v6830_v33, 16 }
  0x27   :  { %395 = vmatpush1.bf16.msra.mxu0 %v6076_v41  ;;  %3472 = vmatpush1.bf16.msra.mxu1 %v6076_v41  ;;  %v3404_v41 = vsel %vm127_vm0, %v3399_v24, %v3403_v28  ;;  %v183_v9 = vsel %vm127_vm0, %v178_v57, %v182_v58  ;;  %v196_v18 = vshll.u32 %v6870_v1, 16  ;;  %v203_v57 = vshrl.u32 %v6870_v1, 16 }
  0x28   :  { %396 = vmatprep.subr.bf16.mxu0 %v6077_v42  ;;  %3473 = vmatprep.subr.bf16.mxu1 %v6077_v42  ;;  %v3413_v42 = vshrl.u32 %v6773_v61, 16 }
  0x2a   :  { %v3415_v63 = vor.u32 %v3413_v42, %v3403_v28  ;;  %v6119_v28 = vld [vmem:[%s8561_s1 + $0x44] ss:$8 sps:$4 sm:$0xff]  }
  0x2b   :  { %397 = vmatpush1.bf16.msra.mxu0 %v6079_v43  ;;  %3474 = vmatpush1.bf16.msra.mxu1 %v6079_v43  ;;  %v3417_v43 = vshll.u32 %v6821_v25, 16 }
  0x2c   :  { %398 = vmatprep.subr.bf16.mxu0 %v6080_v44  ;;  %3475 = vmatprep.subr.bf16.mxu1 %v6080_v44  ;;  %v6857_v44 = vld [vmem:[%s8562_s0 + $0x98] sm:$0xff] }
  0x2d   :  { %v3419_v0 = vrot.slane %v3417_v43, 1  ;;  %v6896_v24 = vcombine.low %v6857_v44, %v5616_v52  ;;  %v6122_v43 = vld [vmem:[%s8561_s1 + $0x54] ss:$8 sps:$4 sm:$0xff]  }
  0x2f   :  { %399 = vmatpush1.bf16.msra.mxu0 %v6082_v45  ;;  %3476 = vmatpush1.bf16.msra.mxu1 %v6082_v45  ;;  %v154_v45 = vor.u32 %v152_v19, %v138_v4  ;;  %v3429_v19 = vshrl.u32 %v6821_v25, 16  ;;  %v3425_v42 = vshll.u32 %v6896_v24, 16 }
  0x30   :  { %400 = vmatprep.subr.bf16.mxu0 %v6083_v46  ;;  %3477 = vmatprep.subr.bf16.mxu1 %v6083_v46  ;;  %v158_v46 = vrot.slane %v156_v30, 1 }
  0x31   :  { %v3431_v36 = vor.u32 %v3429_v19, %v3419_v0  ;;  %v6143_v19 = vld [vmem:[%s8561_s1 + $0xa0] ss:$8 sps:$4 sm:$0xff]  }
  0x32   :  { %v159_v4 = vsel %vm127_vm0, %v154_v45, %v158_v46  ;;  %v170_v7 = vor.u32 %v168_v55, %v158_v46  ;;  %v3427_v55 = vrot.slane %v3425_v42, 1  ;;  %v20_v42 = vld [vmem:[%s8562_s0 + $0x48] sm:$0x77] }
  0x33   :  { %401 = vmatpush1.bf16.msra.mxu0 %v6085_v48  ;;  %3478 = vmatpush1.bf16.msra.mxu1 %v6085_v48  ;;  %v3391_v48 = vor.u32 %v3389_v31, %v3375_v12  ;;  %v6117_v31 = vld [vmem:[%s8561_s1 + $0x40] ss:$8 sps:$4 sm:$0xff]  }
  0x34   :  { %402 = vmatprep.subr.bf16.mxu0 %v6086_v50  ;;  %3479 = vmatprep.subr.bf16.mxu1 %v6086_v50  ;;  %v3395_v50 = vrot.slane %v3393_v32, 1 }
  0x36   :  { %v3396_v5 = vsel %vm127_vm0, %v3391_v48, %v3395_v50  ;;  %v6120_v48 = vld [vmem:[%s8561_s1 + $0x50] ss:$8 sps:$4 sm:$0xff]  }
  0x37   :  { %403 = vmatpush1.bf16.msra.mxu0 %v6088_v53  ;;  %3480 = vmatpush1.bf16.msra.mxu1 %v6088_v53  ;;  %v6113_v53 = vld [vmem:[%s8561_s1 + $0x24] ss:$8 sps:$4 sm:$0xff]  }
  0x38   :  { %404 = vmatprep.subr.bf16.mxu0 %v6089_v56  ;;  %3481 = vmatprep.subr.bf16.mxu1 %v6089_v56  ;;  %v3405_v56 = vshrl.u32 %v6798_v13, 16 }
  0x3a   :  { %v3407_v8 = vor.u32 %v3405_v56, %v3395_v50  ;;  %v186_v50 = vor.u32 %v184_v39, %v174_v11  ;;  %v6125_v56 = vld [vmem:[%s8561_s1 + $0x64] ss:$8 sps:$4 sm:$0xff]   ;;  %v6174_v39 = vld [vmem:[%s8561_s1 + $0x214] ss:$8 sps:$4 sm:$0xff]  }
  0x3b   :  { %405 = vmatpush1.bf16.msra.mxu0 %v6091_v62  ;;  %3482 = vmatpush1.bf16.msra.mxu1 %v6091_v62  ;;  %v3409_v62 = vshll.u32 %v6835_v34, 16 }
  0x3c   :  { %406 = vmatprep.subr.bf16.mxu0 %v6092_v2  ;;  %3483 = vmatprep.subr.bf16.mxu1 %v6092_v2  ;;  %v6873_v2 = vcombine.high %v6857_v44, %v5616_v52 }
  0x3d   :  { %v3411_v12 = vrot.slane %v3409_v62, 1 }
  0x3f   :  { %407 = vmatpush1.bf16.msra.mxu0 %v6094_v3  ;;  %3484 = vmatpush1.bf16.msra.mxu1 %v6094_v3  ;;  %v6111_v3 = vld [vmem:[%s8561_s1 + $0x20] ss:$8 sps:$4 sm:$0xff]   ;;  %v3412_v32 = vsel %vm127_vm0, %v3407_v8, %v3411_v12  ;;  %v6133_v8 = vld [vmem:[%s8561_s1 + $0x84] ss:$8 sps:$4 sm:$0xff]  }
  0x40   :  { %634 = vmatprep.subr.bf16.mxu0 %v6100_v14  ;;  %3551 = vmatprep.subr.bf16.mxu1 %v6100_v14  ;;  %v192_v14 = vshrl.u32 %v6811_v20, 16 }
  0x42   :  { %409 = vmatmul.mubr.bf16.vlgmr.msra.gmra.mrb[0].mxu0 %v139_v21  ;;  %3486 = vmatmul.mubr.bf16.vlgmr.msra.gmra.mrb[0].mxu1 %v3376_v29  ;;  %v3433_v21 = vshll.u32 %v6873_v2, 16  ;;  %v175_v29 = vsel %vm127_vm0, %v170_v7, %v174_v11  ;;  %v194_v30 = vor.u32 %v192_v14, %v182_v58  ;;  %v3440_v58 = vshrl.u32 %v6873_v2, 16  ;;  %v6126_v7 = vld [vmem:[%s8561_s1 + $0x70] ss:$8 sps:$4 sm:$0xff]   ;;  %v6140_v14 = vld [vmem:[%s8561_s1 + $0x94] ss:$8 sps:$4 sm:$0xff]  }
  0x43   :  { %635 = vmatpush1.bf16.msra.mxu0 %v6098_v17  ;;  %3552 = vmatpush1.bf16.msra.mxu1 %v6098_v17  ;;  %v3420_v17 = vsel %vm127_vm0, %v3415_v63, %v3419_v0  ;;  %v6128_v0 = vld [vmem:[%s8561_s1 + $0x74] ss:$8 sps:$4 sm:$0xff]  }
  0x44   :  { %636 = vmatprep.subr.bf16.mxu0 %v6110_v22  ;;  %3553 = vmatprep.subr.bf16.mxu1 %v6110_v22  ;;  %v6114_v22 = vld [vmem:[%s8561_s1 + $0x30] ss:$8 sps:$4 sm:$0xff]   ;;  %v3435_v37 = vrot.slane %v3433_v21, 1  ;;  %v6152_v21 = vld [vmem:[%s8561_s1 + $0xb4] ss:$8 sps:$4 sm:$0xff]  }
  0x45   :  { %418 = vmatprep.mubr.bf16.mxu0 %v167_v40  ;;  %3495 = vmatprep.mubr.bf16.mxu1 %v3404_v41  ;;  %v188_v40 = vshll.u32 %v6893_v23, 16  ;;  %v3421_v41 = vshrl.u32 %v6835_v34, 16 }
  0x46   :  { %v3436_v46 = vsel %vm127_vm0, %v3431_v36, %v3435_v37  ;;  %v6171_v36 = vld [vmem:[%s8561_s1 + $0x204] ss:$8 sps:$4 sm:$0xff]  }
  0x47   :  { %637 = vmatpush1.bf16.msra.mxu0 %v6108_v35  ;;  %3554 = vmatpush1.bf16.msra.mxu1 %v6108_v35  ;;  %v198_v35 = vrot.slane %v196_v18, 1  ;;  %v190_v52 = vrot.slane %v188_v40, 1  ;;  %v6145_v18 = vld [vmem:[%s8561_s1 + $0xa4] ss:$8 sps:$4 sm:$0xff]   ;;  %v6172_v40 = vld [vmem:[%s8561_s1 + $0x210] ss:$8 sps:$4 sm:$0xff]  }
  0x48   :  { %638 = vmatprep.subr.bf16.mxu0 %v6113_v53  ;;  %3555 = vmatprep.subr.bf16.mxu1 %v6113_v53  ;;  %v3423_v53 = vor.u32 %v3421_v41, %v3411_v12  ;;  %v6131_v12 = vld [vmem:[%s8561_s1 + $0x80] ss:$8 sps:$4 sm:$0xff]   ;;  %v6177_v41 = vld [vmem:[%s8561_s1 + $0x224] ss:$8 sps:$4 sm:$0xff]  }
  0x49   :  { %v199_v45 = vsel %vm127_vm0, %v194_v30, %v198_v35  ;;  %v191_v62 = vsel %vm127_vm0, %v186_v50, %v190_v52  ;;  %v6165_v30 = vld [vmem:[%s8561_s1 + $0xe4] ss:$8 sps:$4 sm:$0xff]  }
  0x4a   :  { %419 = vmatmul.mubr.bf16.gmra.mrb[4].mxu0 %v159_v4  ;;  %3496 = vmatmul.mubr.bf16.gmra.mrb[4].mxu1 %v3396_v5  ;;  %v3428_v63 = vsel %vm127_vm0, %v3423_v53, %v3427_v55  ;;  %v3442_v4 = vor.u32 %v3440_v58, %v3435_v37  ;;  %v200_v5 = vshrl.u32 %v6893_v23, 16  ;;  %v6169_v37 = vld [vmem:[%s8561_s1 + $0x200] ss:$8 sps:$4 sm:$0xff]  }
  0x4b   :  { %639 = vmatpush1.bf16.msra.mxu0 %v6111_v3  ;;  %3556 = vmatpush1.bf16.msra.mxu1 %v6111_v3  ;;  %v205_v3 = vor.u32 %v203_v57, %v198_v35  ;;  %v6166_v35 = vld [vmem:[%s8561_s1 + $0xf0] ss:$8 sps:$4 sm:$0xff]   ;;  %v7092_v57 = vld [vmem:[%s8562_s0 + $0x6c] ss:$8 sps:$4 sm:$0xff]  }
  0x4c   :  { %640 = vmatprep.subr.bf16.mxu0 %v6116_v6  ;;  %3557 = vmatprep.subr.bf16.mxu1 %v6116_v6  ;;  %v3437_v6 = vshrl.u32 %v6896_v24, 16  ;;  %v3644_v58 = vrot.slane %v7092_v57, 1 }
  0x4d   :  { %428 = vmatprep.mubr.bf16.mxu0 %v183_v9  ;;  %3505 = vmatprep.mubr.bf16.mxu1 %v3420_v17  ;;  %v202_v9 = vor.u32 %v200_v5, %v190_v52  ;;  %v6138_v17 = vld [vmem:[%s8561_s1 + $0x90] ss:$8 sps:$4 sm:$0xff]   ;;  %v7073_v52 = vld [vmem:[%s8562_s0 + $0x60] sm:$0xff] }
  0x4e   :  { %v3439_v11 = vor.u32 %v3437_v6, %v3427_v55  ;;  %v7086_v55 = vld [vmem:[%s8562_s0 + $0x14] ss:$8 sps:$4 sm:$0xff]   ;;  %v6196_v5 = vld [vmem:[%s8561_s1 + $0x290] ss:$8 sps:$4 sm:$0xff]   ;;  %v6201_v6 = vld [vmem:[%s8561_s1 + $0x2a4] ss:$8 sps:$4 sm:$0xff]  }
  0x4f   :  { %641 = vmatpush1.bf16.msra.mxu0 %v6114_v22  ;;  %3558 = vmatpush1.bf16.msra.mxu1 %v6114_v22  ;;  %v6154_v22 = vld [vmem:[%s8561_s1 + $0xc0] ss:$8 sps:$4 sm:$0xff]  }
  0x50   :  { %642 = vmatprep.subr.bf16.mxu0 %v6119_v28  ;;  %3559 = vmatprep.subr.bf16.mxu1 %v6119_v28  ;;  %v6162_v28 = vld [vmem:[%s8561_s1 + $0xd4] ss:$8 sps:$4 sm:$0xff]  }
  0x52   :  { %429 = vmatmul.mubr.bf16.gmra.mrb[8].mxu0 %v175_v29  ;;  %3506 = vmatmul.mubr.bf16.gmra.mrb[8].mxu1 %v3412_v32  ;;  %v6160_v29 = vld [vmem:[%s8561_s1 + $0xd0] ss:$8 sps:$4 sm:$0xff]   ;;  %v6168_v32 = vld [vmem:[%s8561_s1 + $0xf4] ss:$8 sps:$4 sm:$0xff]  }
  0x53   :  { %643 = vmatpush1.bf16.msra.mxu0 %v6117_v31  ;;  %3560 = vmatpush1.bf16.msra.mxu1 %v6117_v31  ;;  %v6163_v31 = vld [vmem:[%s8561_s1 + $0xe0] ss:$8 sps:$4 sm:$0xff]  }
  0x54   :  { %644 = vmatprep.subr.bf16.mxu0 %v6122_v43  ;;  %3561 = vmatprep.subr.bf16.mxu1 %v6122_v43  ;;  %v7049_v43 = vld [vmem:[%s8562_s0] sm:$0xee] }
  0x55   :  { %438 = vmatprep.mubr.bf16.mxu0 %v199_v45  ;;  %3515 = vmatprep.mubr.bf16.mxu1 %v3436_v46  ;;  %v7054_v45 = vld [vmem:[%s8562_s0 + $0x58] sm:$0xee] }
  0x56   :  { %v5631_v53 = vcombine.high %v7054_v45, %v7073_v52 }
  0x57   :  { %645 = vmatpush1.bf16.msra.mxu0 %v6120_v48  ;;  %3562 = vmatpush1.bf16.msra.mxu1 %v6120_v48  ;;  %v7066_v48 = vld [vmem:[%s8562_s0 + $0x8] sm:$0xff] }
  0x58   :  { %646 = vmatprep.subr.bf16.mxu0 %v6125_v56  ;;  %3563 = vmatprep.subr.bf16.mxu1 %v6125_v56  ;;  %v5159_v50 = vcombine.high %v7049_v43, %v7066_v48  ;;  %v761_v56 = vrot.slane %v7086_v55, 1  ;;  %v6234_v55 = vld [vmem:[%s8561_s1 + $0x330] ss:$8 sps:$4 sm:$0xff]  }
  0x5a   :  { %439 = vmatmul.mubr.bf16.gmra.mrb[12].mxu0 %v191_v62  ;;  %3516 = vmatmul.mubr.bf16.gmra.mrb[12].mxu1 %v3428_v63  ;;  %v760_v63 = vrot.slane %v5159_v50, 1 }
  0x5b   :  { %647 = vmatpush1.bf16.msra.mxu0 %v6123_v59  ;;  %3564 = vmatpush1.bf16.msra.mxu1 %v6123_v59  ;;  %v5092_v59 = vcombine.low %v6845_v38, %v20_v42 }
  0x5c   :  { %648 = vmatprep.subr.bf16.mxu0 %v6128_v0  ;;  %3565 = vmatprep.subr.bf16.mxu1 %v6128_v0  ;;  %v3643_v0 = vrot.slane %v5631_v53, 1  ;;  %v6236_v53 = vld [vmem:[%s8561_s1 + $0x334] ss:$8 sps:$4 sm:$0xff]  }
  0x5d   :  { %448 = vmatprep.mubr.bf16.mxu0 %v205_v3  ;;  %3525 = vmatprep.mubr.bf16.mxu1 %v3442_v4  ;;  %v6193_v3 = vld [vmem:[%s8561_s1 + $0x280] ss:$8 sps:$4 sm:$0xff]   ;;  %v6198_v4 = vld [vmem:[%s8561_s1 + $0x294] ss:$8 sps:$4 sm:$0xff]  }
  0x5f   :  { %649 = vmatpush1.bf16.msra.mxu0 %v6126_v7  ;;  %3566 = vmatpush1.bf16.msra.mxu1 %v6126_v7  ;;  %v6199_v7 = vld [vmem:[%s8561_s1 + $0x2a0] ss:$8 sps:$4 sm:$0xff]  }
  0x60   :  { %650 = vmatprep.subr.bf16.mxu0 %v6133_v8  ;;  %3567 = vmatprep.subr.bf16.mxu1 %v6133_v8  ;;  %v6204_v8 = vld [vmem:[%s8561_s1 + $0x2b4] ss:$8 sps:$4 sm:$0xff]  }
  0x62   :  { %449 = vmatmul.mubr.bf16.gmra.mrb[16].mxu0 %v202_v9  ;;  %3526 = vmatmul.mubr.bf16.gmra.mrb[16].mxu1 %v3439_v11  ;;  %v6202_v9 = vld [vmem:[%s8561_s1 + $0x2b0] ss:$8 sps:$4 sm:$0xff]   ;;  %v6207_v11 = vld [vmem:[%s8561_s1 + $0x2c4] ss:$8 sps:$4 sm:$0xff]  }
  0x63   :  { %651 = vmatpush1.bf16.msra.mxu0 %v6131_v12  ;;  %3568 = vmatpush1.bf16.msra.mxu1 %v6131_v12  ;;  %v6205_v12 = vld [vmem:[%s8561_s1 + $0x2c0] ss:$8 sps:$4 sm:$0xff]  }
  0x64   :  { %652 = vmatprep.subr.bf16.mxu0 %v6140_v14  ;;  %3569 = vmatprep.subr.bf16.mxu1 %v6140_v14  ;;  %v6210_v14 = vld [vmem:[%s8561_s1 + $0x2d4] ss:$8 sps:$4 sm:$0xff]  }
  0x65   :  { %666 = vmatprep.mubr.bf16.mxu0 %v6665_v15  ;;  %3583 = vmatprep.mubr.bf16.mxu1 %v6689_v26  ;;  %v6150_v15 = vld [vmem:[%s8561_s1 + $0xb0] ss:$8 sps:$4 sm:$0xff]   ;;  %v6156_v26 = vld [vmem:[%s8561_s1 + $0xc4] ss:$8 sps:$4 sm:$0xff]  }
  0x67   :  { %653 = vmatpush1.bf16.msra.mxu0 %v6138_v17  ;;  %3570 = vmatpush1.bf16.msra.mxu1 %v6138_v17  ;;  %v6208_v17 = vld [vmem:[%s8561_s1 + $0x2d0] ss:$8 sps:$4 sm:$0xff]  }
  0x68   :  { %654 = vmatprep.subr.bf16.mxu0 %v6145_v18  ;;  %3571 = vmatprep.subr.bf16.mxu1 %v6145_v18  ;;  %v6214_v18 = vld [vmem:[%s8561_s1 + $0x2e4] ss:$8 sps:$4 sm:$0xff]  }
  0x6b   :  { %655 = vmatpush1.bf16.msra.mxu0 %v6143_v19  ;;  %3572 = vmatpush1.bf16.msra.mxu1 %v6143_v19  ;;  %v6212_v19 = vld [vmem:[%s8561_s1 + $0x2e0] ss:$8 sps:$4 sm:$0xff]  }
  0x6c   :  { %656 = vmatprep.subr.bf16.mxu0 %v6152_v21  ;;  %3573 = vmatprep.subr.bf16.mxu1 %v6152_v21  ;;  %v5158_v21 = vcombine.low %v7049_v43, %v7066_v48  ;;  %v6233_v43 = vld [vmem:[%s8561_s1 + $0x324] ss:$8 sps:$4 sm:$0xff]   ;;  %v6231_v48 = vld [vmem:[%s8561_s1 + $0x320] ss:$8 sps:$4 sm:$0xff]  }
  0x6f   :  { %657 = vmatpush1.bf16.msra.mxu0 %v6150_v15  ;;  %3574 = vmatpush1.bf16.msra.mxu1 %v6150_v15  ;;  %v5630_v15 = vcombine.low %v7054_v45, %v7073_v52  ;;  %v6583_v45 = vld [vmem:[%s8562_s0 + $0x34] ss:$8 sps:$4 sm:$0xff]  }
  0x70   :  { %658 = vmatprep.subr.bf16.mxu0 %v6156_v26  ;;  %3575 = vmatprep.subr.bf16.mxu1 %v6156_v26  ;;  %v6220_v26 = vld [vmem:[%s8561_s1 + $0x2f4] ss:$8 sps:$4 sm:$0xff]  }
  0x73   :  { %659 = vmatpush1.bf16.msra.mxu0 %v6154_v22  ;;  %3576 = vmatpush1.bf16.msra.mxu1 %v6154_v22  ;;  %v6218_v22 = vld [vmem:[%s8561_s1 + $0x2f0] ss:$8 sps:$4 sm:$0xff]  }
  0x74   :  { %660 = vmatprep.subr.bf16.mxu0 %v6162_v28  ;;  %3577 = vmatprep.subr.bf16.mxu1 %v6162_v28  ;;  %v757_v28 = vrot.slane %v5158_v21, 1 }
  0x77   :  { %661 = vmatpush1.bf16.msra.mxu0 %v6160_v29  ;;  %3578 = vmatpush1.bf16.msra.mxu1 %v6160_v29  ;;  %v3640_v29 = vrot.slane %v5630_v15, 1 }
  0x78   :  { %662 = vmatprep.subr.bf16.mxu0 %v6165_v30  ;;  %3579 = vmatprep.subr.bf16.mxu1 %v6165_v30  ;;  %v6577_v30 = vld [vmem:[%s8562_s0 + $0x10] ss:$8 sps:$4 sm:$0xff]  }
  0x7b   :  { %663 = vmatpush1.bf16.msra.mxu0 %v6163_v31  ;;  %3580 = vmatpush1.bf16.msra.mxu1 %v6163_v31  ;;  %v758_v31 = vrot.slane %v6577_v30, 1  ;;  %v6245_v30 = vld [vmem:[%s8561_s1 + $0x364] ss:$8 sps:$4 sm:$0xff]  }
  0x7c   :  { %664 = vmatprep.subr.bf16.mxu0 %v6168_v32  ;;  %3581 = vmatprep.subr.bf16.mxu1 %v6168_v32  ;;  %v6578_v32 = vld [vmem:[%s8562_s0 + $0x68] ss:$8 sps:$4 sm:$0xff]  }
  0x7f   :  { %665 = vmatpush1.bf16.msra.mxu0 %v6166_v35  ;;  %3582 = vmatpush1.bf16.msra.mxu1 %v6166_v35  ;;  %v3641_v35 = vrot.slane %v6578_v32, 1 }
  0x80   :  { %945 = vmatprep.subr.bf16.mxu0 %v6171_v36  ;;  %3668 = vmatprep.subr.bf16.mxu1 %v6171_v36  ;;  %v6225_v36 = vld [vmem:[%s8561_s1 + $0x304] ss:$8 sps:$4 sm:$0xff]  }
  0x82   :  { %667 = vmatmul.mubr.bf16.vlgmr.msra.gmra.mrb[0].mxu0 %v6735_v47  ;;  %3584 = vmatmul.mubr.bf16.vlgmr.msra.gmra.mrb[0].mxu1 %v6740_v49  ;;  %v6175_v47 = vld [vmem:[%s8561_s1 + $0x220] ss:$8 sps:$4 sm:$0xff]   ;;  %v6180_v49 = vld [vmem:[%s8561_s1 + $0x234] ss:$8 sps:$4 sm:$0xff]  }
  0x83   :  { %946 = vmatpush1.bf16.msra.mxu0 %v6169_v37  ;;  %3669 = vmatpush1.bf16.msra.mxu1 %v6169_v37  ;;  %v6579_v37 = vld [vmem:[%s8562_s0 + $0x24] ss:$8 sps:$4 sm:$0xff]  }
  0x84   :  { %947 = vmatprep.subr.bf16.mxu0 %v6174_v39  ;;  %3670 = vmatprep.subr.bf16.mxu1 %v6174_v39  ;;  %v765_v39 = vrot.slane %v6579_v37, 1 }
  0x85   :  { %676 = vmatprep.mubr.bf16.mxu0 %v6670_v16  ;;  %3593 = vmatprep.mubr.bf16.mxu1 %v6694_v27  ;;  %v6178_v16 = vld [vmem:[%s8561_s1 + $0x230] ss:$8 sps:$4 sm:$0xff]   ;;  %v6183_v27 = vld [vmem:[%s8561_s1 + $0x244] ss:$8 sps:$4 sm:$0xff]  }
  0x87   :  { %948 = vmatpush1.bf16.msra.mxu0 %v6172_v40  ;;  %3671 = vmatpush1.bf16.msra.mxu1 %v6172_v40  ;;  %v6580_v40 = vld [vmem:[%s8562_s0 + $0x7c] ss:$8 sps:$4 sm:$0xff]  }
  0x88   :  { %949 = vmatprep.subr.bf16.mxu0 %v6177_v41  ;;  %3672 = vmatprep.subr.bf16.mxu1 %v6177_v41  ;;  %v3648_v41 = vrot.slane %v6580_v40, 1  ;;  %v6243_v40 = vld [vmem:[%s8561_s1 + $0x360] ss:$8 sps:$4 sm:$0xff]  }
  0x8a   :  { %677 = vmatmul.mubr.bf16.gmra.mrb[4].mxu0 %v6748_v51  ;;  %3594 = vmatmul.mubr.bf16.gmra.mrb[4].mxu1 %v6757_v54  ;;  %v6181_v51 = vld [vmem:[%s8561_s1 + $0x240] ss:$8 sps:$4 sm:$0xff]   ;;  %v6186_v54 = vld [vmem:[%s8561_s1 + $0x254] ss:$8 sps:$4 sm:$0xff]  }
  0x8b   :  { %950 = vmatpush1.bf16.msra.mxu0 %v6175_v47  ;;  %3673 = vmatpush1.bf16.msra.mxu1 %v6175_v47  ;;  %v6223_v47 = vld [vmem:[%s8561_s1 + $0x300] ss:$8 sps:$4 sm:$0xff]  }
  0x8c   :  { %951 = vmatprep.subr.bf16.mxu0 %v6180_v49  ;;  %3674 = vmatprep.subr.bf16.mxu1 %v6180_v49  ;;  %v759_v49 = vsel %vm756_vm1, %v757_v28, %v758_v31  ;;  %v771_v28 = vrot.slane %v6893_v23, 1 }
  0x8d   :  { %686 = vmatprep.mubr.bf16.mxu0 %v6768_v60  ;;  %3603 = vmatprep.mubr.bf16.mxu1 %v6773_v61  ;;  %v6184_v60 = vld [vmem:[%s8561_s1 + $0x250] ss:$8 sps:$4 sm:$0xff]   ;;  %v6189_v61 = vld [vmem:[%s8561_s1 + $0x264] ss:$8 sps:$4 sm:$0xff]  }
  0x8f   :  { %952 = vmatpush1.bf16.msra.mxu0 %v6178_v16  ;;  %3675 = vmatpush1.bf16.msra.mxu1 %v6178_v16  ;;  %v3642_v16 = vsel %vm756_vm1, %v3640_v29, %v3641_v35  ;;  %v3654_v29 = vrot.slane %v6896_v24, 1 }
  0x90   :  { %953 = vmatprep.subr.bf16.mxu0 %v6183_v27  ;;  %3676 = vmatprep.subr.bf16.mxu1 %v6183_v27  ;;  %v6230_v27 = vld [vmem:[%s8561_s1 + $0x314] ss:$8 sps:$4 sm:$0xff]  }
  0x92   :  { %687 = vmatmul.mubr.bf16.gmra.mrb[8].mxu0 %v6793_v10  ;;  %3604 = vmatmul.mubr.bf16.gmra.mrb[8].mxu1 %v6798_v13  ;;  %v5615_v10 = vld [vmem:[%s8562_s0 + $0xa0] sm:$0x77] }
  0x93   :  { %954 = vmatpush1.bf16.msra.mxu0 %v6181_v51  ;;  %3677 = vmatpush1.bf16.msra.mxu1 %v6181_v51  ;;  %v6187_v13 = vld [vmem:[%s8561_s1 + $0x260] ss:$8 sps:$4 sm:$0xff]   ;;  %v5628_v46 = vcombine.high %v6857_v44, %v5615_v10  ;;  %v5627_v62 = vcombine.low %v6857_v44, %v5615_v10  ;;  %v3645_v44 = vsel %vm756_vm1, %v3643_v0, %v3644_v58  ;;  %v773_v0 = vrot.slane %v6870_v1, 1  ;;  %v6254_v1 = vld [vmem:[%s8561_s1 + $0x394] ss:$8 sps:$4 sm:$0xff]  }
  0x94   :  { %955 = vmatprep.subr.bf16.mxu0 %v6186_v54  ;;  %3678 = vmatprep.subr.bf16.mxu1 %v6186_v54  ;;  %v766_v51 = vsel %vm756_vm1, %v761_v56, %v765_v39  ;;  %v3649_v54 = vsel %vm756_vm1, %v3644_v58, %v3648_v41  ;;  %v6582_v10 = vld [vmem:[%s8562_s0 + $0x78] ss:$8 sps:$4 sm:$0xff]   ;;  %v6586_v58 = vld [vmem:[%s8562_s0 + $0x88] ss:$8 sps:$4 sm:$0xff]  }
  0x95   :  { %696 = vmatprep.mubr.bf16.mxu0 %v6811_v20  ;;  %3613 = vmatprep.mubr.bf16.mxu1 %v6821_v25  ;;  %v6192_v20 = vld [vmem:[%s8561_s1 + $0x274] ss:$8 sps:$4 sm:$0xff]   ;;  %v5093_v25 = vcombine.high %v6845_v38, %v20_v42  ;;  %v762_v38 = vsel %vm756_vm1, %v760_v63, %v761_v56  ;;  %v6585_v56 = vld [vmem:[%s8562_s0 + $0x30] ss:$8 sps:$4 sm:$0xff]   ;;  %v6237_v63 = vld [vmem:[%s8561_s1 + $0x340] ss:$8 sps:$4 sm:$0xff]  }
  0x96   :  { %v767_v57 = vrot.slane %v6585_v56, 1  ;;  %v6263_v56 = vld [vmem:[%s8561_s1 + $0x3c4] ss:$8 sps:$4 sm:$0xff]  }
  0x97   :  { %956 = vmatpush1.bf16.msra.mxu0 %v6184_v60  ;;  %3679 = vmatpush1.bf16.msra.mxu1 %v6184_v60  ;;  %v6228_v60 = vld [vmem:[%s8561_s1 + $0x310] ss:$8 sps:$4 sm:$0xff]  }
  0x98   :  { %957 = vmatprep.subr.bf16.mxu0 %v6189_v61  ;;  %3680 = vmatprep.subr.bf16.mxu1 %v6189_v61  ;;  %v6581_v61 = vld [vmem:[%s8562_s0 + $0x20] ss:$8 sps:$4 sm:$0xff]  }
  0x99   :  { %v763_v42 = vrot.slane %v6581_v61, 1 }
  0x9a   :  { %697 = vmatmul.mubr.bf16.gmra.mrb[12].mxu0 %v6830_v33  ;;  %3614 = vmatmul.mubr.bf16.gmra.mrb[12].mxu1 %v6835_v34  ;;  %v6190_v33 = vld [vmem:[%s8561_s1 + $0x270] ss:$8 sps:$4 sm:$0xff]   ;;  %v6195_v34 = vld [vmem:[%s8561_s1 + $0x284] ss:$8 sps:$4 sm:$0xff]  }
  0x9b   :  { %958 = vmatpush1.bf16.msra.mxu0 %v6187_v13  ;;  %3681 = vmatpush1.bf16.msra.mxu1 %v6187_v13  ;;  %v3646_v13 = vrot.slane %v6582_v10, 1  ;;  %v764_v50 = vsel %vm756_vm1, %v758_v31, %v763_v42 }
  0x9c   :  { %959 = vmatprep.subr.bf16.mxu0 %v6192_v20  ;;  %3682 = vmatprep.subr.bf16.mxu1 %v6192_v20  ;;  %v769_v20 = vrot.slane %v6583_v45, 1 }
  0x9d   :  { %706 = vmatprep.mubr.bf16.mxu0 %v5093_v25  ;;  %3623 = vmatprep.mubr.bf16.mxu1 %v5628_v46  ;;  %v6584_v25 = vld [vmem:[%s8562_s0 + $0x8c] ss:$8 sps:$4 sm:$0xff]   ;;  %v3647_v52 = vsel %vm756_vm1, %v3641_v35, %v3646_v13 }
  0x9e   :  { %v3652_v46 = vrot.slane %v6584_v25, 1 }
  0x9f   :  { %960 = vmatpush1.bf16.msra.mxu0 %v6190_v33  ;;  %3683 = vmatpush1.bf16.msra.mxu1 %v6190_v33  ;;  %v770_v33 = vsel %vm756_vm1, %v765_v39, %v769_v20 }
  0xa0   :  { %961 = vmatprep.subr.bf16.mxu0 %v6195_v34  ;;  %3684 = vmatprep.subr.bf16.mxu1 %v6195_v34  ;;  %v3653_v34 = vsel %vm756_vm1, %v3648_v41, %v3652_v46  ;;  %v772_v41 = vsel %vm756_vm1, %v767_v57, %v771_v28 }
  0xa2   :  { %707 = vmatmul.mubr.bf16.gmra.mrb[16].mxu0 %v5092_v59  ;;  %3624 = vmatmul.mubr.bf16.gmra.mrb[16].mxu1 %v5627_v62  ;;  %v3650_v59 = vrot.slane %v6586_v58, 1  ;;  %v6239_v62 = vld [vmem:[%s8561_s1 + $0x344] ss:$8 sps:$4 sm:$0xff]  }
  0xa3   :  { %962 = vmatpush1.bf16.msra.mxu0 %v6193_v3  ;;  %3685 = vmatpush1.bf16.msra.mxu1 %v6193_v3  ;;  %v7228_v3 = vld [vmem:[%s8562_s0] sm:$0xee] }
  0xa4   :  { %963 = vmatprep.subr.bf16.mxu0 %v6198_v4  ;;  %3686 = vmatprep.subr.bf16.mxu1 %v6198_v4  ;;  %v7233_v4 = vld [vmem:[%s8562_s0 + $0x8] sm:$0xff] }
  0xa5   :  { %977 = vmatprep.mubr.bf16.mxu0 %v762_v38  ;;  %3700 = vmatprep.mubr.bf16.mxu1 %v3645_v44  ;;  %v3656_v38 = vrot.slane %v6873_v2, 1  ;;  %v7239_v44 = vld [vmem:[%s8562_s0 + $0x10] sm:$0xff] }
  0xa7   :  { %964 = vmatpush1.bf16.msra.mxu0 %v6196_v5  ;;  %3687 = vmatpush1.bf16.msra.mxu1 %v6196_v5  ;;  %v7244_v5 = vld [vmem:[%s8562_s0 + $0x18] sm:$0xff]  ;;  %v3657_v21 = vsel %vm756_vm1, %v3652_v46, %v3656_v38 }
  0xa8   :  { %965 = vmatprep.subr.bf16.mxu0 %v6201_v6  ;;  %3688 = vmatprep.subr.bf16.mxu1 %v6201_v6  ;;  %v7249_v6 = vld [vmem:[%s8562_s0 + $0x58] sm:$0xee] }
  0xab   :  { %966 = vmatpush1.bf16.msra.mxu0 %v6199_v7  ;;  %3689 = vmatpush1.bf16.msra.mxu1 %v6199_v7  ;;  %v768_v7 = vsel %vm756_vm1, %v763_v42, %v767_v57  ;;  %v5224_v57 = vcombine.low %v7228_v3, %v7233_v4 }
  0xac   :  { %967 = vmatprep.subr.bf16.mxu0 %v6204_v8  ;;  %3690 = vmatprep.subr.bf16.mxu1 %v6204_v8  ;;  %v3651_v8 = vsel %vm756_vm1, %v3646_v13, %v3650_v59  ;;  %v6246_v13 = vld [vmem:[%s8561_s1 + $0x370] ss:$8 sps:$4 sm:$0xff]  }
  0xaf   :  { %968 = vmatpush1.bf16.msra.mxu0 %v6202_v9  ;;  %3691 = vmatpush1.bf16.msra.mxu1 %v6202_v9  ;;  %v7256_v9 = vld [vmem:[%s8562_s0 + $0x60] sm:$0xff] }
  0xb0   :  { %969 = vmatprep.subr.bf16.mxu0 %v6207_v11  ;;  %3692 = vmatprep.subr.bf16.mxu1 %v6207_v11  ;;  %v7261_v11 = vld [vmem:[%s8562_s0 + $0x68] sm:$0xff]  ;;  %v5644_v15 = vcombine.high %v7249_v6, %v7256_v9  ;;  %v5643_v58 = vcombine.low %v7249_v6, %v7256_v9  ;;  %v1139_v6 = vshrl.u32 %v5224_v57, 16 }
  0xb2   :  { %v3845_v37 = vshrl.u32 %v5644_v15, 16  ;;  %v3848_v23 = vshll.u32 %v5644_v15, 16 }
  0xb3   :  { %970 = vmatpush1.bf16.msra.mxu0 %v6205_v12  ;;  %3693 = vmatpush1.bf16.msra.mxu1 %v6205_v12  ;;  %v7266_v12 = vld [vmem:[%s8562_s0 + $0x70] sm:$0xff] }
  0xb4   :  { %971 = vmatprep.subr.bf16.mxu0 %v6210_v14  ;;  %3694 = vmatprep.subr.bf16.mxu1 %v6210_v14  ;;  %v6242_v14 = vld [vmem:[%s8561_s1 + $0x354] ss:$8 sps:$4 sm:$0xff]   ;;  %v3850_v61 = vrot.slane %v3848_v23, 2 }
  0xb7   :  { %972 = vmatpush1.bf16.msra.mxu0 %v6208_v17  ;;  %3695 = vmatpush1.bf16.msra.mxu1 %v6208_v17  ;;  %v774_v17 = vsel %vm756_vm1, %v769_v20, %v773_v0 }
  0xb8   :  { %973 = vmatprep.subr.bf16.mxu0 %v6214_v18  ;;  %3696 = vmatprep.subr.bf16.mxu1 %v6214_v18  ;;  %v5225_v18 = vcombine.high %v7228_v3, %v7233_v4  ;;  %v1053_v3 = vld [vmem:[%s8562_s0 + $0x28] sm:$0xff] }
  0xba   :  { %v1156_v31 = vshrl.u32 %v5225_v18, 16  ;;  %v1159_v32 = vshll.u32 %v5225_v18, 16  ;;  %v6264_v18 = vld [vmem:[%s8561_s1 + $0x3d0] ss:$8 sps:$4 sm:$0xff]  }
  0xbb   :  { %974 = vmatpush1.bf16.msra.mxu0 %v6212_v19  ;;  %3697 = vmatpush1.bf16.msra.mxu1 %v6212_v19  ;;  %v7278_v19 = vcombine.high %v7239_v44, %v7244_v5 }
  0xbc   :  { %975 = vmatprep.subr.bf16.mxu0 %v6220_v26  ;;  %3698 = vmatprep.subr.bf16.mxu1 %v6220_v26  ;;  %v7287_v26 = vcombine.high %v7261_v11, %v7266_v12 }
  0xbd   :  { %v7298_v35 = vshrl.u32 %v7278_v19, 16 }
  0xbe   :  { %v7304_v24 = vshrl.u32 %v7287_v26, 16  ;;  %v7307_v39 = vshll.u32 %v7287_v26, 16 }
  0xbf   :  { %976 = vmatpush1.bf16.msra.mxu0 %v6218_v22  ;;  %3699 = vmatpush1.bf16.msra.mxu1 %v6218_v22  ;;  %v6240_v22 = vld [vmem:[%s8561_s1 + $0x350] ss:$8 sps:$4 sm:$0xff]  }
  0xc0   :  { %1406 = vmatprep.subr.bf16.mxu0 %v6225_v36  ;;  %3935 = vmatprep.subr.bf16.mxu1 %v6225_v36  ;;  %v7301_v36 = vshll.u32 %v7278_v19, 16  ;;  %v3855_v42 = vrot.slane %v7304_v24, 1  ;;  %v3858_v10 = vrot.slane %v7307_v39, 2 }
  0xc2   :  { %978 = vmatmul.mubr.bf16.vlgmr.msra.gmra.mrb[0].mxu0 %v759_v49  ;;  %3701 = vmatmul.mubr.bf16.vlgmr.msra.gmra.mrb[0].mxu1 %v3642_v16  ;;  %v6248_v49 = vld [vmem:[%s8561_s1 + $0x374] ss:$8 sps:$4 sm:$0xff]   ;;  %v1158_v16 = vrot.slane %v1156_v31, 1  ;;  %v7333_v46 = vor.u32 %v3858_v10, %v3855_v42 }
  0xc3   :  { %1407 = vmatpush1.bf16.msra.mxu0 %v6223_v47  ;;  %3936 = vmatpush1.bf16.msra.mxu1 %v6223_v47  ;;  %v3655_v47 = vsel %vm756_vm1, %v3650_v59, %v3654_v29  ;;  %v7369_v59 = vcombine.low %v7239_v44, %v7244_v5  ;;  %v5637_v44 = vld [vmem:[%s8562_s0 + $0x80] sm:$0xff]  ;;  %v6266_v5 = vld [vmem:[%s8561_s1 + $0x3d4] ss:$8 sps:$4 sm:$0xff]  }
  0xc4   :  { %1408 = vmatprep.subr.bf16.mxu0 %v6230_v27  ;;  %3937 = vmatprep.subr.bf16.mxu1 %v6230_v27  ;;  %v1161_v27 = vrot.slane %v1159_v32, 2 }
  0xc5   :  { %987 = vmatprep.mubr.bf16.mxu0 %v766_v51  ;;  %3710 = vmatprep.mubr.bf16.mxu1 %v3649_v54  ;;  %v1166_v51 = vrot.slane %v7298_v35, 1  ;;  %v1169_v54 = vrot.slane %v7301_v36, 2 }
  0xc6   :  { %v1162_v45 = vor.u32 %v1161_v27, %v1158_v16 }
  0xc7   :  { %1409 = vmatpush1.bf16.msra.mxu0 %v6228_v60  ;;  %3938 = vmatpush1.bf16.msra.mxu1 %v6228_v60  ;;  %v3847_v60 = vrot.slane %v3845_v37, 1  ;;  %v7331_v20 = vor.u32 %v1169_v54, %v1166_v51  ;;  %v5638_v54 = vld [vmem:[%s8562_s0 + $0x88] sm:$0xff] }
  0xc8   :  { %1410 = vmatprep.subr.bf16.mxu0 %v6233_v43  ;;  %3939 = vmatprep.subr.bf16.mxu1 %v6233_v43  ;;  %v6251_v43 = vld [vmem:[%s8561_s1 + $0x384] ss:$8 sps:$4 sm:$0xff]  }
  0xc9   :  { %v3851_v25 = vor.u32 %v3850_v61, %v3847_v60  ;;  %v1171_v2 = vsel %vm1137_vm2, %v1162_v45, %v7331_v20  ;;  %v5639_v60 = vld [vmem:[%s8562_s0 + $0x90] sm:$0xff]  ;;  %v6267_v61 = vld [vmem:[%s8561_s1 + $0x3e0] ss:$8 sps:$4 sm:$0xff]  }
  0xca   :  { %988 = vmatmul.mubr.bf16.gmra.mrb[4].mxu0 %v764_v50  ;;  %3711 = vmatmul.mubr.bf16.gmra.mrb[4].mxu1 %v3647_v52  ;;  %v6252_v52 = vld [vmem:[%s8561_s1 + $0x390] ss:$8 sps:$4 sm:$0xff]   ;;  %v6272_v45 = vld [vmem:[%s8561_s1 + $0x3f4] ss:$8 sps:$4 sm:$0xff]  }
  0xcb   :  { %1411 = vmatpush1.bf16.msra.mxu0 %v6231_v48  ;;  %3940 = vmatpush1.bf16.msra.mxu1 %v6231_v48  ;;  %v6249_v48 = vld [vmem:[%s8561_s1 + $0x380] ss:$8 sps:$4 sm:$0xff]   ;;  %v3860_v50 = vsel %vm1137_vm2, %v3851_v25, %v7333_v46 }
  0xcc   :  { %1412 = vmatprep.subr.bf16.mxu0 %v6236_v53  ;;  %3941 = vmatprep.subr.bf16.mxu1 %v6236_v53  ;;  %v6257_v53 = vld [vmem:[%s8561_s1 + $0x3a4] ss:$8 sps:$4 sm:$0xff]  }
  0xcd   :  { %997 = vmatprep.mubr.bf16.mxu0 %v770_v33  ;;  %3720 = vmatprep.mubr.bf16.mxu1 %v3653_v34  ;;  %v6255_v33 = vld [vmem:[%s8561_s1 + $0x3a0] ss:$8 sps:$4 sm:$0xff]   ;;  %v6260_v34 = vld [vmem:[%s8561_s1 + $0x3b4] ss:$8 sps:$4 sm:$0xff]  }
  0xcf   :  { %1413 = vmatpush1.bf16.msra.mxu0 %v6234_v55  ;;  %3942 = vmatpush1.bf16.msra.mxu1 %v6234_v55  ;;  %v6258_v55 = vld [vmem:[%s8561_s1 + $0x3b0] ss:$8 sps:$4 sm:$0xff]  }
  0xd0   :  { %1414 = vmatprep.subr.bf16.mxu0 %v6239_v62  ;;  %3943 = vmatprep.subr.bf16.mxu1 %v6239_v62  ;;  %v6261_v62 = vld [vmem:[%s8561_s1 + $0x3c0] ss:$8 sps:$4 sm:$0xff]  }
  0xd2   :  { %998 = vmatmul.mubr.bf16.gmra.mrb[8].mxu0 %v768_v7  ;;  %3721 = vmatmul.mubr.bf16.gmra.mrb[8].mxu1 %v3651_v8  ;;  %v1142_v7 = vshll.u32 %v5224_v57, 16  ;;  %v7394_v8 = vshrl.u32 %v7369_v59, 16 }
  0xd3   :  { %1415 = vmatpush1.bf16.msra.mxu0 %v6237_v63  ;;  %3944 = vmatpush1.bf16.msra.mxu1 %v6237_v63  ;;  %v1052_v63 = vld [vmem:[%s8562_s0 + $0x20] sm:$0xff] }
  0xd4   :  { %1416 = vmatprep.subr.bf16.mxu0 %v6242_v14  ;;  %3945 = vmatprep.subr.bf16.mxu1 %v6242_v14  ;;  %v7399_v14 = vcombine.high %v1052_v63, %v1053_v3  ;;  %v1144_v32 = vrot.slane %v1142_v7, 2  ;;  %v1149_v37 = vrot.slane %v7394_v8, 1 }
  0xd5   :  { %1007 = vmatprep.mubr.bf16.mxu0 %v774_v17  ;;  %3730 = vmatprep.mubr.bf16.mxu1 %v3657_v21  ;;  %v3831_v21 = vshll.u32 %v5643_v58, 16 }
  0xd6   :  { %v7431_v16 = vshll.u32 %v7399_v14, 16 }
  0xd7   :  { %1417 = vmatpush1.bf16.msra.mxu0 %v6240_v22  ;;  %3946 = vmatpush1.bf16.msra.mxu1 %v6240_v22  ;;  %v3833_v42 = vrot.slane %v3831_v21, 2 }
  0xd8   :  { %1418 = vmatprep.subr.bf16.mxu0 %v6245_v30  ;;  %3947 = vmatprep.subr.bf16.mxu1 %v6245_v30  ;;  %v1141_v30 = vrot.slane %v1139_v6, 1 }
  0xda   :  { %1008 = vmatmul.mubr.bf16.gmra.mrb[12].mxu0 %v772_v41  ;;  %3731 = vmatmul.mubr.bf16.gmra.mrb[12].mxu1 %v3655_v47  ;;  %v1054_v41 = vld [vmem:[%s8562_s0 + $0x30] sm:$0xff]  ;;  %v1055_v47 = vld [vmem:[%s8562_s0 + $0x38] sm:$0xff] }
  0xdb   :  { %1419 = vmatpush1.bf16.msra.mxu0 %v6243_v40  ;;  %3948 = vmatpush1.bf16.msra.mxu1 %v6243_v40 }
  0xdc   :  { %1420 = vmatprep.subr.bf16.mxu0 %v6248_v49  ;;  %3949 = vmatprep.subr.bf16.mxu1 %v6248_v49  ;;  %v7428_v49 = vshrl.u32 %v7399_v14, 16 }
  0xdd   :  { %1017 = vmatprep.mubr.bf16.mxu0 %v773_v0  ;;  %3740 = vmatprep.mubr.bf16.mxu1 %v3656_v38  ;;  %v7379_v0 = vcombine.low %v7261_v11, %v7266_v12  ;;  %v5636_v38 = vld [vmem:[%s8562_s0 + $0x78] sm:$0xff]  ;;  %v7397_v11 = vshll.u32 %v7369_v59, 16  ;;  %v3828_v12 = vshrl.u32 %v5643_v58, 16 }
  0xde   :  { %v7401_v17 = vcombine.high %v5636_v38, %v5637_v44  ;;  %v7417_v31 = vcombine.low %v5636_v38, %v5637_v44 }
  0xdf   :  { %1421 = vmatpush1.bf16.msra.mxu0 %v6246_v13  ;;  %3950 = vmatpush1.bf16.msra.mxu1 %v6246_v13  ;;  %v7407_v15 = vshrl.u32 %v7379_v0, 16  ;;  %v7410_v22 = vshll.u32 %v7379_v0, 16  ;;  %v1152_v23 = vrot.slane %v7397_v11, 2  ;;  %v3830_v40 = vrot.slane %v3828_v12, 1 }
  0xe0   :  { %1422 = vmatprep.subr.bf16.mxu0 %v6251_v43  ;;  %3951 = vmatprep.subr.bf16.mxu1 %v6251_v43  ;;  %v7434_v27 = vshrl.u32 %v7401_v17, 16  ;;  %v7437_v51 = vshll.u32 %v7401_v17, 16 }
  0xe1   :  { %v3838_v10 = vrot.slane %v7407_v15, 1  ;;  %v3841_v13 = vrot.slane %v7410_v22, 2  ;;  %v1153_v57 = vor.u32 %v1152_v23, %v1149_v37  ;;  %v3834_v58 = vor.u32 %v3833_v42, %v3830_v40  ;;  %v1057_v37 = vld [vmem:[%s8562_s0 + $0x48] sm:$0xff]  ;;  %v5641_v42 = vld [vmem:[%s8562_s0 + $0xa0] sm:$0xff] }
  0xe2   :  { %1018 = vmatmul.mubr.bf16.gmra.mrb[16].mxu0 %v771_v28  ;;  %3741 = vmatmul.mubr.bf16.gmra.mrb[16].mxu1 %v3654_v29  ;;  %v7412_v28 = vcombine.low %v1052_v63, %v1053_v3  ;;  %v6269_v29 = vld [vmem:[%s8561_s1 + $0x3e4] ss:$8 sps:$4 sm:$0xff]   ;;  %v6276_v23 = vld [vmem:[%s8561_s1 + $0x400] ss:$8 sps:$4 sm:$0xff]  }
  0xe3   :  { %1423 = vmatpush1.bf16.msra.mxu0 %v6249_v48  ;;  %3952 = vmatpush1.bf16.msra.mxu1 %v6249_v48  ;;  %v7460_v48 = vshrl.u32 %v7417_v31, 16  ;;  %v6278_v3 = vld [vmem:[%s8561_s1 + $0x404] ss:$8 sps:$4 sm:$0xff]  }
  0xe4   :  { %1424 = vmatprep.subr.bf16.mxu0 %v6254_v1  ;;  %3953 = vmatprep.subr.bf16.mxu1 %v6254_v1  ;;  %v7451_v43 = vshrl.u32 %v7412_v28, 16  ;;  %v7457_v25 = vshll.u32 %v7412_v28, 16  ;;  %v7463_v1 = vshll.u32 %v7417_v31, 16 }
  0xe5   :  { %1438 = vmatprep.mubr.bf16.mxu0 %v1171_v2  ;;  %3967 = vmatprep.mubr.bf16.mxu1 %v3860_v50  ;;  %v7465_v2 = vcombine.high %v1054_v41, %v1055_v47  ;;  %v1145_v50 = vor.u32 %v1144_v32, %v1141_v30  ;;  %v3864_v44 = vrot.slane %v7460_v48, 1  ;;  %v7495_v30 = vcombine.low %v1054_v41, %v1055_v47  ;;  %v1056_v32 = vld [vmem:[%s8562_s0 + $0x40] sm:$0xff]  ;;  %v5640_v47 = vld [vmem:[%s8562_s0 + $0x98] sm:$0xff] }
  0xe6   :  { %v1175_v63 = vrot.slane %v7451_v43, 1  ;;  %v1178_v38 = vrot.slane %v7457_v25, 2  ;;  %v7508_v41 = vcombine.low %v5638_v54, %v5639_v60 }
  0xe7   :  { %1425 = vmatpush1.bf16.msra.mxu0 %v6252_v52  ;;  %3954 = vmatpush1.bf16.msra.mxu1 %v6252_v52  ;;  %v7467_v52 = vcombine.high %v5638_v54, %v5639_v60  ;;  %v7484_v6 = vshrl.u32 %v7465_v2, 16  ;;  %v7487_v7 = vshll.u32 %v7465_v2, 16  ;;  %v1154_v40 = vsel %vm1137_vm2, %v1145_v50, %v1153_v57 }
  0xe8   :  { %1426 = vmatprep.subr.bf16.mxu0 %v6257_v53  ;;  %3955 = vmatprep.subr.bf16.mxu1 %v6257_v53  ;;  %v1184_v53 = vrot.slane %v7428_v49, 1 }
  0xe9   :  { %8593 = vst [vmem:[#allocation2_spill] sm:$0xff] %v7484_v6  ;;  %8594 = vst [vmem:[#allocation3_spill] sm:$0xff] %v7487_v7  ;;  %v7490_v12 = vshrl.u32 %v7467_v52, 16  ;;  %v1202_v54 = vrot.slane %v7484_v6, 1  ;;  %v1205_v60 = vrot.slane %v7487_v7, 2 }
  0xeb   :  { %1427 = vmatpush1.bf16.msra.mxu0 %v6255_v33  ;;  %3956 = vmatpush1.bf16.msra.mxu1 %v6255_v33  ;;  %v1187_v33 = vrot.slane %v7431_v16, 2  ;;  %8595 = vst [vmem:[#allocation4_spill] sm:$0xff] %v7490_v12  ;;  %v3891_v50 = vrot.slane %v7490_v12, 1 }
  0xec   :  { %1428 = vmatprep.subr.bf16.mxu0 %v6260_v34  ;;  %3957 = vmatprep.subr.bf16.mxu1 %v6260_v34  ;;  %v3873_v34 = vrot.slane %v7434_v27, 1 }
  0xed   :  { %v1188_v21 = vor.u32 %v1187_v33, %v1184_v53  ;;  %v7527_v33 = vcombine.high %v1056_v32, %v1057_v37 }
  0xef   :  { %1429 = vmatpush1.bf16.msra.mxu0 %v6258_v55  ;;  %3958 = vmatpush1.bf16.msra.mxu1 %v6258_v55  ;;  %v3876_v55 = vrot.slane %v7437_v51, 2  ;;  %v7564_v12 = vshll.u32 %v7527_v33, 16 }
  0xf0   :  { %1430 = vmatprep.subr.bf16.mxu0 %v6263_v56  ;;  %3959 = vmatprep.subr.bf16.mxu1 %v6263_v56  ;;  %v6270_v56 = vld [vmem:[%s8561_s1 + $0x3f0] ss:$8 sps:$4 sm:$0xff]  }
  0xf1   :  { %8602 = vst [vmem:[#allocation11_spill] sm:$0xff] %v7564_v12 }
  0xf3   :  { %1431 = vmatpush1.bf16.msra.mxu0 %v6261_v62  ;;  %3960 = vmatpush1.bf16.msra.mxu1 %v6261_v62  ;;  %v3842_v62 = vor.u32 %v3841_v13, %v3838_v10  ;;  %v6286_v10 = vld [vmem:[%s8561_s1 + $0x414] ss:$8 sps:$4 sm:$0xff]   ;;  %v7519_v13 = vor.u32 %v1178_v38, %v1175_v63  ;;  %v6284_v63 = vld [vmem:[%s8561_s1 + $0x410] ss:$8 sps:$4 sm:$0xff]   ;;  %v7545_v38 = vshrl.u32 %v7508_v41, 16 }
  0xf4   :  { %1432 = vmatprep.subr.bf16.mxu0 %v6266_v5  ;;  %3961 = vmatprep.subr.bf16.mxu1 %v6266_v5  ;;  %v3867_v5 = vrot.slane %v7463_v1, 2 }
  0xf5   :  { %8599 = vst [vmem:[#allocation8_spill] sm:$0xff] %v7545_v38 }
  0xf7   :  { %1433 = vmatpush1.bf16.msra.mxu0 %v6264_v18  ;;  %3962 = vmatpush1.bf16.msra.mxu1 %v6264_v18  ;;  %v7493_v18 = vshll.u32 %v7467_v52, 16 }
  0xf8   :  { %1434 = vmatprep.subr.bf16.mxu0 %v6269_v29  ;;  %3963 = vmatprep.subr.bf16.mxu1 %v6269_v29  ;;  %v3877_v29 = vor.u32 %v3876_v55, %v3873_v34  ;;  %v1189_v34 = vsel %vm1137_vm2, %v7331_v20, %v1188_v21  ;;  %v7548_v20 = vshll.u32 %v7508_v41, 16 }
  0xf9   :  { %8596 = vst [vmem:[#allocation5_spill] sm:$0xff] %v7493_v18  ;;  %v3894_v53 = vrot.slane %v7493_v18, 2  ;;  %v7560_v18 = vcombine.low %v1056_v32, %v1057_v37  ;;  %v3882_v37 = vrot.slane %v7545_v38, 1 }
  0xfa   :  { %v3878_v55 = vsel %vm1137_vm2, %v7333_v46, %v3877_v29  ;;  %8600 = vst [vmem:[#allocation9_spill] sm:$0xff] %v7548_v20  ;;  %v6289_v46 = vld [vmem:[%s8561_s1 + $0x424] ss:$8 sps:$4 sm:$0xff]  }
  0xfb   :  { %1435 = vmatpush1.bf16.msra.mxu0 %v6267_v61  ;;  %3964 = vmatpush1.bf16.msra.mxu1 %v6267_v61  ;;  %v3843_v61 = vsel %vm1137_vm2, %v3834_v58, %v3842_v62  ;;  %v7536_v58 = vcombine.high %v5640_v47, %v5641_v42 }
  0xfc   :  { %1436 = vmatprep.subr.bf16.mxu0 %v6272_v45  ;;  %3965 = vmatprep.subr.bf16.mxu1 %v6272_v45  ;;  %v7521_v45 = vor.u32 %v3867_v5, %v3864_v44  ;;  %v1180_v44 = vsel %vm1137_vm2, %v1153_v57, %v7519_v13 }
  0xfd   :  { %v7567_v7 = vshrl.u32 %v7536_v58, 16  ;;  %v7570_v57 = vshll.u32 %v7536_v58, 16 }
  0xfe   :  { %v3869_v5 = vsel %vm1137_vm2, %v3842_v62, %v7521_v45  ;;  %v6287_v62 = vld [vmem:[%s8561_s1 + $0x420] ss:$8 sps:$4 sm:$0xff]  }
  0xff   :  { %1437 = vmatpush1.bf16.msra.mxu0 %v6270_v56  ;;  %3966 = vmatpush1.bf16.msra.mxu1 %v6270_v56  ;;  %v7534_v56 = vshrl.u32 %v7495_v30, 16  ;;  %8603 = vst [vmem:[#allocation12_spill] sm:$0xff] %v7567_v7  ;;  %8604 = vst [vmem:[#allocation13_spill] sm:$0xff] %v7570_v57 }
 0x100   :  { %1741 = vmatprep.subr.bf16.mxu0 %v6278_v3  ;;  %4076 = vmatprep.subr.bf16.mxu1 %v6278_v3  ;;  %v7542_v3 = vshll.u32 %v7495_v30, 16 }
 0x101   :  { %8597 = vst [vmem:[#allocation6_spill] sm:$0xff] %v7534_v56 }
 0x102   :  { %1439 = vmatmul.mubr.bf16.vlgmr.msra.gmra.mrb[0].mxu0 %v1154_v40  ;;  %3968 = vmatmul.mubr.bf16.vlgmr.msra.gmra.mrb[0].mxu1 %v3843_v61  ;;  %8598 = vst [vmem:[#allocation7_spill] sm:$0xff] %v7542_v3  ;;  %v3895_v40 = vor.u32 %v3894_v53, %v3891_v50  ;;  %v7558_v61 = vshrl.u32 %v7527_v33, 16  ;;  %v1196_v32 = vrot.slane %v7542_v3, 2  ;;  %v6292_v50 = vld [vmem:[%s8561_s1 + $0x434] ss:$8 sps:$4 sm:$0xff]  }
 0x103   :  { %1742 = vmatpush1.bf16.msra.mxu0 %v6276_v23  ;;  %4077 = vmatpush1.bf16.msra.mxu1 %v6276_v23  ;;  %v1206_v23 = vor.u32 %v1205_v60, %v1202_v54  ;;  %v3885_v54 = vrot.slane %v7548_v20, 2  ;;  %v7578_v60 = vcombine.low %v5640_v47, %v5641_v42  ;;  %v1223_v47 = vrot.slane %v7564_v12, 2 }
 0x104   :  { %1743 = vmatprep.subr.bf16.mxu0 %v6286_v10  ;;  %4078 = vmatprep.subr.bf16.mxu1 %v6286_v10  ;;  %8601 = vst [vmem:[#allocation10_spill] sm:$0xff] %v7558_v61  ;;  %v1193_v10 = vrot.slane %v7534_v56, 1  ;;  %v3909_v42 = vrot.slane %v7567_v7, 1  ;;  %v7593_v20 = vshll.u32 %v7560_v18, 16  ;;  %v5642_v7 = vld [vmem:[%s8562_s0 + $0xa8] sm:$0x11] }
 0x105   :  { %1448 = vmatprep.mubr.bf16.mxu0 %v1189_v34  ;;  %3977 = vmatprep.mubr.bf16.mxu1 %v3878_v55  ;;  %v1207_v53 = vsel %vm1137_vm2, %v1188_v21, %v1206_v23  ;;  %v3896_v34 = vsel %vm1137_vm2, %v3877_v29, %v3895_v40  ;;  %v1220_v55 = vrot.slane %v7558_v61, 1  ;;  %v1058_v21 = vld [vmem:[%s8562_s0 + $0x50] sm:$0x11]  ;;  %v7602_v12 = vshrl.u32 %v7578_v60, 16 }
 0x106   :  { %8606 = vst [vmem:[#allocation15_spill] sm:$0xff] %v7593_v20  ;;  %v6290_v29 = vld [vmem:[%s8561_s1 + $0x430] ss:$8 sps:$4 sm:$0xff]   ;;  %v1214_v61 = vrot.slane %v7593_v20, 2  ;;  %v7617_v38 = vcombine.high %v5642_v7, %v5642_v7  ;;  %v7640_v20 = vcombine.low %v5642_v7, %v5642_v7 }
 0x107   :  { %1744 = vmatpush1.bf16.msra.mxu0 %v6284_v63  ;;  %4079 = vmatpush1.bf16.msra.mxu1 %v6284_v63  ;;  %v7587_v63 = vshrl.u32 %v7560_v18, 16  ;;  %8607 = vst [vmem:[#allocation16_spill] sm:$0xff] %v7602_v12 }
 0x108   :  { %1745 = vmatprep.subr.bf16.mxu0 %v6289_v46  ;;  %4080 = vmatprep.subr.bf16.mxu1 %v6289_v46  ;;  %v3912_v46 = vrot.slane %v7570_v57, 2  ;;  %v7605_v57 = vshll.u32 %v7578_v60, 16 }
 0x109   :  { %8605 = vst [vmem:[#allocation14_spill] sm:$0xff] %v7587_v63 }
 0x10a   :  { %1449 = vmatmul.mubr.bf16.gmra.mrb[4].mxu0 %v1180_v44  ;;  %3978 = vmatmul.mubr.bf16.gmra.mrb[4].mxu1 %v3869_v5  ;;  %v1197_v44 = vor.u32 %v1196_v32, %v1193_v10  ;;  %v3886_v5 = vor.u32 %v3885_v54, %v3882_v37  ;;  %8608 = vst [vmem:[#allocation17_spill] sm:$0xff] %v7605_v57  ;;  %v1211_v10 = vrot.slane %v7587_v63, 1  ;;  %v3900_v63 = vrot.slane %v7602_v12, 1 }
 0x10b   :  { %1746 = vmatpush1.bf16.msra.mxu0 %v6287_v62  ;;  %4081 = vmatpush1.bf16.msra.mxu1 %v6287_v62  ;;  %v6295_v62 = vld [vmem:[%s8561_s1 + $0x444] ss:$8 sps:$4 sm:$0xff]   ;;  %v7614_v32 = vcombine.high %v1058_v21, %v1058_v21  ;;  %v1224_v37 = vor.u32 %v1223_v47, %v1220_v55  ;;  %v3913_v54 = vor.u32 %v3912_v46, %v3909_v42  ;;  %v3903_v55 = vrot.slane %v7605_v57, 2  ;;  %v6298_v47 = vld [vmem:[%s8561_s1 + $0x454] ss:$8 sps:$4 sm:$0xff]  }
 0x10c   :  { %1747 = vmatprep.subr.bf16.mxu0 %v6292_v50  ;;  %4082 = vmatprep.subr.bf16.mxu1 %v6292_v50  ;;  %v6293_v50 = vld [vmem:[%s8561_s1 + $0x440] ss:$8 sps:$4 sm:$0xff]   ;;  %v7638_v12 = vcombine.low %v1058_v21, %v1058_v21 }
 0x10d   :  { %1458 = vmatprep.mubr.bf16.mxu0 %v1207_v53  ;;  %3987 = vmatprep.mubr.bf16.mxu1 %v3896_v34  ;;  %v1198_v53 = vsel %vm1137_vm2, %v7519_v13, %v1197_v44  ;;  %v3887_v34 = vsel %vm1137_vm2, %v7521_v45, %v3886_v5  ;;  %v1232_v42 = vshll.u32 %v7614_v32, 16  ;;  %v1225_v46 = vsel %vm1137_vm2, %v1206_v23, %v1224_v37  ;;  %v6301_v23 = vld [vmem:[%s8561_s1 + $0x464] ss:$8 sps:$4 sm:$0xff]  }
 0x10e   :  { %v3914_v13 = vsel %vm1137_vm2, %v3895_v40, %v3913_v54  ;;  %v3921_v45 = vshll.u32 %v7617_v38, 16  ;;  %v3904_v57 = vor.u32 %v3903_v55, %v3900_v63  ;;  %v1227_v21 = vshll.u32 %v7638_v12, 16 }
 0x10f   :  { %1748 = vmatpush1.bf16.msra.mxu0 %v6290_v29  ;;  %4083 = vmatpush1.bf16.msra.mxu1 %v6290_v29  ;;  %v1215_v29 = vor.u32 %v1214_v61, %v1211_v10  ;;  %v1234_v40 = vrot.slane %v1232_v42, 2  ;;  %v6299_v61 = vld [vmem:[%s8561_s1 + $0x460] ss:$8 sps:$4 sm:$0xff]  }
 0x110   :  { %1749 = vmatprep.subr.bf16.mxu0 %v6295_v62  ;;  %4084 = vmatprep.subr.bf16.mxu1 %v6295_v62  ;;  %v6296_v62 = vld [vmem:[%s8561_s1 + $0x450] ss:$8 sps:$4 sm:$0xff]   ;;  %v3923_v10 = vrot.slane %v3921_v45, 2  ;;  %v3905_v7 = vsel %vm1137_vm2, %v3886_v5, %v3904_v57 }
 0x111   :  { %v1216_v63 = vsel %vm1137_vm2, %v1197_v44, %v1215_v29  ;;  %v6304_v44 = vld [vmem:[%s8561_s1 + $0x474] ss:$8 sps:$4 sm:$0xff]   ;;  %v1235_v5 = vsel %vm1137_vm2, %v1224_v37, %v1234_v40  ;;  %v4048_v40 = vrot.slane %v7287_v26, 2 }
 0x112   :  { %1459 = vmatmul.mubr.bf16.gmra.mrb[8].mxu0 %v1198_v53  ;;  %3988 = vmatmul.mubr.bf16.gmra.mrb[8].mxu1 %v3887_v34  ;;  %v7655_v53 = vld [vmem:[%s8562_s0] sm:$0xcc]  ;;  %v7660_v34 = vld [vmem:[%s8562_s0 + $0x58] sm:$0xcc]  ;;  %v3924_v55 = vsel %vm1137_vm2, %v3913_v54, %v3923_v10 }
 0x113   :  { %1750 = vmatpush1.bf16.msra.mxu0 %v6293_v50  ;;  %4085 = vmatpush1.bf16.msra.mxu1 %v6293_v50  ;;  %v3916_v50 = vshll.u32 %v7640_v20, 16  ;;  %v7673_v42 = vcombine.high %v7660_v34, %v7256_v9  ;;  %v6308_v54 = vld [vmem:[%s8561_s1 + $0x484] ss:$8 sps:$4 sm:$0xff]  }
 0x114   :  { %1751 = vmatprep.subr.bf16.mxu0 %v6298_v47  ;;  %4086 = vmatprep.subr.bf16.mxu1 %v6298_v47  ;;  %v7669_v47 = vcombine.high %v7655_v53, %v7233_v4 }
 0x115   :  { %1468 = vmatprep.mubr.bf16.mxu0 %v1225_v46  ;;  %3997 = vmatprep.mubr.bf16.mxu1 %v3914_v13  ;;  %v6302_v46 = vld [vmem:[%s8561_s1 + $0x470] ss:$8 sps:$4 sm:$0xff]   ;;  %v1229_v13 = vrot.slane %v1227_v21, 2  ;;  %v3918_v37 = vrot.slane %v3916_v50, 2 }
 0x116   :  { %v1552_v45 = vrot.slane %v7669_v47, 2 }
 0x117   :  { %1752 = vmatpush1.bf16.msra.mxu0 %v6296_v62  ;;  %4087 = vmatpush1.bf16.msra.mxu1 %v6296_v62  ;;  %v1553_v62 = vrot.slane %v7278_v19, 2  ;;  %v1230_v10 = vsel %vm1137_vm2, %v1215_v29, %v1229_v13  ;;  %v6318_v29 = vld [vmem:[%s8561_s1 + $0x4a4] ss:$8 sps:$4 sm:$0xff]   ;;  %v6326_v13 = vld [vmem:[%s8561_s1 + $0x4c0] ss:$8 sps:$4 sm:$0xff]  }
 0x118   :  { %1753 = vmatprep.subr.bf16.mxu0 %v6301_v23  ;;  %4088 = vmatprep.subr.bf16.mxu1 %v6301_v23  ;;  %v4047_v23 = vrot.slane %v7673_v42, 2 }
 0x119   :  { %v1554_v21 = vsel %vm1548_vm3, %v1552_v45, %v1553_v62  ;;  %v6338_v45 = vld [vmem:[%s8561_s1 + $0x4e4] ss:$8 sps:$4 sm:$0xff]  }
 0x11a   :  { %1469 = vmatmul.mubr.bf16.gmra.mrb[12].mxu0 %v1216_v63  ;;  %3998 = vmatmul.mubr.bf16.gmra.mrb[12].mxu1 %v3905_v7  ;;  %v3919_v63 = vsel %vm1137_vm2, %v3904_v57, %v3918_v37  ;;  %v6314_v7 = vld [vmem:[%s8561_s1 + $0x494] ss:$8 sps:$4 sm:$0xff]   ;;  %v4049_v50 = vsel %vm1548_vm3, %v4047_v23, %v4048_v40  ;;  %v6312_v57 = vld [vmem:[%s8561_s1 + $0x490] ss:$8 sps:$4 sm:$0xff]   ;;  %v6336_v23 = vld [vmem:[%s8561_s1 + $0x4e0] ss:$8 sps:$4 sm:$0xff]  }
 0x11b   :  { %1754 = vmatpush1.bf16.msra.mxu0 %v6299_v61  ;;  %4089 = vmatpush1.bf16.msra.mxu1 %v6299_v61  ;;  %v6306_v61 = vld [vmem:[%s8561_s1 + $0x480] ss:$8 sps:$4 sm:$0xff]   ;;  %v6334_v37 = vld [vmem:[%s8561_s1 + $0x4d4] ss:$8 sps:$4 sm:$0xff]  }
 0x11c   :  { %1755 = vmatprep.subr.bf16.mxu0 %v6304_v44  ;;  %4090 = vmatprep.subr.bf16.mxu1 %v6304_v44  ;;  %v6316_v44 = vld [vmem:[%s8561_s1 + $0x4a0] ss:$8 sps:$4 sm:$0xff]  }
 0x11d   :  { %1478 = vmatprep.mubr.bf16.mxu0 %v1235_v5  ;;  %4007 = vmatprep.mubr.bf16.mxu1 %v3924_v55  ;;  %v6324_v5 = vld [vmem:[%s8561_s1 + $0x4b4] ss:$8 sps:$4 sm:$0xff]   ;;  %v6322_v55 = vld [vmem:[%s8561_s1 + $0x4b0] ss:$8 sps:$4 sm:$0xff]  }
 0x11f   :  { %1756 = vmatpush1.bf16.msra.mxu0 %v6302_v46  ;;  %4091 = vmatpush1.bf16.msra.mxu1 %v6302_v46  ;;  %v6328_v46 = vld [vmem:[%s8561_s1 + $0x4c4] ss:$8 sps:$4 sm:$0xff]  }
 0x120   :  { %1757 = vmatprep.subr.bf16.mxu0 %v6308_v54  ;;  %4092 = vmatprep.subr.bf16.mxu1 %v6308_v54  ;;  %v6332_v54 = vld [vmem:[%s8561_s1 + $0x4d0] ss:$8 sps:$4 sm:$0xff]  }
 0x122   :  { %1479 = vmatmul.mubr.bf16.gmra.mrb[16].mxu0 %v1230_v10  ;;  %4008 = vmatmul.mubr.bf16.gmra.mrb[16].mxu1 %v3919_v63  ;;  %v7738_v10 = vcombine.low %v7660_v34, %v7256_v9  ;;  %v6344_v63 = vld [vmem:[%s8561_s1 + $0x4f4] ss:$8 sps:$4 sm:$0xff]   ;;  %v4045_v9 = vrot.slane %v7379_v0, 2  ;;  %v6349_v34 = vld [vmem:[%s8561_s1 + $0x504] ss:$8 sps:$4 sm:$0xff]  }
 0x123   :  { %1758 = vmatpush1.bf16.msra.mxu0 %v6306_v61  ;;  %4093 = vmatpush1.bf16.msra.mxu1 %v6306_v61  ;;  %v7734_v61 = vcombine.low %v7655_v53, %v7233_v4  ;;  %v1550_v4 = vrot.slane %v7369_v59, 2 }
 0x124   :  { %1759 = vmatprep.subr.bf16.mxu0 %v6314_v7  ;;  %4094 = vmatprep.subr.bf16.mxu1 %v6314_v7  ;;  %v6342_v7 = vld [vmem:[%s8561_s1 + $0x4f0] ss:$8 sps:$4 sm:$0xff]   ;;  %v4044_v53 = vrot.slane %v7738_v10, 2 }
 0x125   :  { %1773 = vmatprep.mubr.bf16.mxu0 %v1554_v21  ;;  %4108 = vmatprep.mubr.bf16.mxu1 %v4049_v50  ;;  %v1549_v21 = vrot.slane %v7734_v61, 2  ;;  %v1557_v50 = vrot.slane %v7399_v14, 2 }
 0x127   :  { %1760 = vmatpush1.bf16.msra.mxu0 %v6312_v57  ;;  %4095 = vmatpush1.bf16.msra.mxu1 %v6312_v57  ;;  %v4052_v57 = vrot.slane %v7401_v17, 2 }
 0x128   :  { %1761 = vmatprep.subr.bf16.mxu0 %v6318_v29  ;;  %4096 = vmatprep.subr.bf16.mxu1 %v6318_v29  ;;  %v6347_v29 = vld [vmem:[%s8561_s1 + $0x500] ss:$8 sps:$4 sm:$0xff]  }
 0x12b   :  { %1762 = vmatpush1.bf16.msra.mxu0 %v6316_v44  ;;  %4097 = vmatpush1.bf16.msra.mxu1 %v6316_v44  ;;  %v1551_v44 = vsel %vm1548_vm3, %v1549_v21, %v1550_v4 }
 0x12c   :  { %1763 = vmatprep.subr.bf16.mxu0 %v6324_v5  ;;  %4098 = vmatprep.subr.bf16.mxu1 %v6324_v5  ;;  %v4046_v5 = vsel %vm1548_vm3, %v4044_v53, %v4045_v9  ;;  %v6360_v53 = vld [vmem:[%s8561_s1 + $0x534] ss:$8 sps:$4 sm:$0xff]  }
 0x12f   :  { %1764 = vmatpush1.bf16.msra.mxu0 %v6322_v55  ;;  %4099 = vmatpush1.bf16.msra.mxu1 %v6322_v55  ;;  %v6354_v55 = vld [vmem:[%s8561_s1 + $0x514] ss:$8 sps:$4 sm:$0xff]  }
 0x130   :  { %1765 = vmatprep.subr.bf16.mxu0 %v6328_v46  ;;  %4100 = vmatprep.subr.bf16.mxu1 %v6328_v46  ;;  %v1558_v46 = vsel %vm1548_vm3, %v1553_v62, %v1557_v50  ;;  %v6357_v62 = vld [vmem:[%s8561_s1 + $0x524] ss:$8 sps:$4 sm:$0xff]  }
 0x133   :  { %1766 = vmatpush1.bf16.msra.mxu0 %v6326_v13  ;;  %4101 = vmatpush1.bf16.msra.mxu1 %v6326_v13  ;;  %v4053_v13 = vsel %vm1548_vm3, %v4048_v40, %v4052_v57  ;;  %v1561_v40 = vrot.slane %v7465_v2, 2 }
 0x134   :  { %1767 = vmatprep.subr.bf16.mxu0 %v6334_v37  ;;  %4102 = vmatprep.subr.bf16.mxu1 %v6334_v37  ;;  %v6352_v37 = vld [vmem:[%s8561_s1 + $0x510] ss:$8 sps:$4 sm:$0xff]  }
 0x137   :  { %1768 = vmatpush1.bf16.msra.mxu0 %v6332_v54  ;;  %4103 = vmatpush1.bf16.msra.mxu1 %v6332_v54  ;;  %v1555_v54 = vrot.slane %v7412_v28, 2 }
 0x138   :  { %1769 = vmatprep.subr.bf16.mxu0 %v6338_v45  ;;  %4104 = vmatprep.subr.bf16.mxu1 %v6338_v45  ;;  %v4050_v45 = vrot.slane %v7417_v31, 2 }
 0x13a   :  { %v4051_v21 = vsel %vm1548_vm3, %v4045_v9, %v4050_v45  ;;  %v1559_v9 = vrot.slane %v7495_v30, 2 }
 0x13b   :  { %1770 = vmatpush1.bf16.msra.mxu0 %v6336_v23  ;;  %4105 = vmatpush1.bf16.msra.mxu1 %v6336_v23  ;;  %v4056_v23 = vrot.slane %v7467_v52, 2 }
 0x13c   :  { %1771 = vmatprep.subr.bf16.mxu0 %v6344_v63  ;;  %4106 = vmatprep.subr.bf16.mxu1 %v6344_v63  ;;  %v6355_v63 = vld [vmem:[%s8561_s1 + $0x520] ss:$8 sps:$4 sm:$0xff]  }
 0x13f   :  { %1772 = vmatpush1.bf16.msra.mxu0 %v6342_v7  ;;  %4107 = vmatpush1.bf16.msra.mxu1 %v6342_v7  ;;  %v1556_v7 = vsel %vm1548_vm3, %v1550_v4, %v1555_v54  ;;  %v6358_v4 = vld [vmem:[%s8561_s1 + $0x530] ss:$8 sps:$4 sm:$0xff]  }
 0x140   :  { %2120 = vmatprep.subr.bf16.mxu0 %v6349_v34  ;;  %4261 = vmatprep.subr.bf16.mxu1 %v6349_v34  ;;  %v1562_v34 = vsel %vm1548_vm3, %v1557_v50, %v1561_v40  ;;  %v1565_v50 = vrot.slane %v7527_v33, 2 }
 0x142   :  { %1774 = vmatmul.mubr.bf16.vlgmr.msra.gmra.mrb[0].mxu0 %v1551_v44  ;;  %4109 = vmatmul.mubr.bf16.vlgmr.msra.gmra.mrb[0].mxu1 %v4046_v5  ;;  %v4054_v44 = vrot.slane %v7508_v41, 2  ;;  %v6363_v5 = vld [vmem:[%s8561_s1 + $0x544] ss:$8 sps:$4 sm:$0xff]  }
 0x143   :  { %2121 = vmatpush1.bf16.msra.mxu0 %v6347_v29  ;;  %4262 = vmatpush1.bf16.msra.mxu1 %v6347_v29  ;;  %v4057_v29 = vsel %vm1548_vm3, %v4052_v57, %v4056_v23  ;;  %v4060_v57 = vrot.slane %v7536_v58, 2 }
 0x144   :  { %2122 = vmatprep.subr.bf16.mxu0 %v6354_v55  ;;  %4263 = vmatprep.subr.bf16.mxu1 %v6354_v55  ;;  %v6361_v55 = vld [vmem:[%s8561_s1 + $0x540] ss:$8 sps:$4 sm:$0xff]  }
 0x145   :  { %1783 = vmatprep.mubr.bf16.mxu0 %v1558_v46  ;;  %4118 = vmatprep.mubr.bf16.mxu1 %v4053_v13  ;;  %v1560_v46 = vsel %vm1548_vm3, %v1555_v54, %v1559_v9  ;;  %v4055_v13 = vsel %vm1548_vm3, %v4050_v45, %v4054_v44  ;;  %v6364_v54 = vld [vmem:[%s8561_s1 + $0x550] ss:$8 sps:$4 sm:$0xff]   ;;  %v1563_v45 = vrot.slane %v7560_v18, 2 }
 0x147   :  { %2123 = vmatpush1.bf16.msra.mxu0 %v6352_v37  ;;  %4264 = vmatpush1.bf16.msra.mxu1 %v6352_v37  ;;  %v6366_v37 = vld [vmem:[%s8561_s1 + $0x554] ss:$8 sps:$4 sm:$0xff]  }
 0x148   :  { %2124 = vmatprep.subr.bf16.mxu0 %v6357_v62  ;;  %4265 = vmatprep.subr.bf16.mxu1 %v6357_v62  ;;  %v1566_v62 = vsel %vm1548_vm3, %v1561_v40, %v1565_v50  ;;  %v1569_v40 = vrot.slane %v7614_v32, 2  ;;  %v1564_v32 = vsel %vm1548_vm3, %v1559_v9, %v1563_v45 }
 0x14a   :  { %1784 = vmatmul.mubr.bf16.gmra.mrb[4].mxu0 %v1556_v7  ;;  %4119 = vmatmul.mubr.bf16.gmra.mrb[4].mxu1 %v4051_v21  ;;  %v4058_v7 = vrot.slane %v7578_v60, 2  ;;  %v6369_v21 = vld [vmem:[%s8561_s1 + $0x564] ss:$8 sps:$4 sm:$0xff]  }
 0x14b   :  { %2125 = vmatpush1.bf16.msra.mxu0 %v6355_v63  ;;  %4266 = vmatpush1.bf16.msra.mxu1 %v6355_v63  ;;  %v4061_v63 = vsel %vm1548_vm3, %v4056_v23, %v4060_v57  ;;  %v4064_v23 = vrot.slane %v7617_v38, 2 }
 0x14c   :  { %2126 = vmatprep.subr.bf16.mxu0 %v6360_v53  ;;  %4267 = vmatprep.subr.bf16.mxu1 %v6360_v53  ;;  %v1897_v53 = vshrl.u32 %v7669_v47, 16  ;;  %v4059_v38 = vsel %vm1548_vm3, %v4054_v44, %v4058_v7 }
 0x14d   :  { %1793 = vmatprep.mubr.bf16.mxu0 %v1562_v34  ;;  %4128 = vmatprep.mubr.bf16.mxu1 %v4057_v29  ;;  %v1900_v34 = vshll.u32 %v7669_v47, 16  ;;  %v4198_v29 = vshrl.u32 %v7673_v42, 16  ;;  %v6372_v47 = vld [vmem:[%s8561_s1 + $0x574] ss:$8 sps:$4 sm:$0xff]  }
 0x14f   :  { %2127 = vmatpush1.bf16.msra.mxu0 %v6358_v4  ;;  %4268 = vmatpush1.bf16.msra.mxu1 %v6358_v4  ;;  %v4201_v4 = vshll.u32 %v7673_v42, 16  ;;  %v4065_v42 = vsel %vm1548_vm3, %v4060_v57, %v4064_v23  ;;  %v4200_v9 = vrot.slane %v4198_v29, 2  ;;  %v1567_v57 = vrot.slane %v7638_v12, 2  ;;  %v6373_v12 = vld [vmem:[%s8561_s1 + $0x580] ss:$8 sps:$4 sm:$0xff]  }
 0x150   :  { %2128 = vmatprep.subr.bf16.mxu0 %v6363_v5  ;;  %4269 = vmatprep.subr.bf16.mxu1 %v6363_v5  ;;  %v6367_v5 = vld [vmem:[%s8561_s1 + $0x560] ss:$8 sps:$4 sm:$0xff]  }
 0x151   :  { %v4203_v44 = vrot.slane %v4201_v4, 3 }
 0x152   :  { %1794 = vmatmul.mubr.bf16.gmra.mrb[8].mxu0 %v1560_v46  ;;  %4129 = vmatmul.mubr.bf16.gmra.mrb[8].mxu1 %v4055_v13  ;;  %v1899_v46 = vrot.slane %v1897_v53, 2  ;;  %v1902_v13 = vrot.slane %v1900_v34, 3 }
 0x153   :  { %2129 = vmatpush1.bf16.msra.mxu0 %v6361_v55  ;;  %4270 = vmatpush1.bf16.msra.mxu1 %v6361_v55  ;;  %v1570_v55 = vsel %vm1548_vm3, %v1565_v50, %v1569_v40  ;;  %v6370_v50 = vld [vmem:[%s8561_s1 + $0x570] ss:$8 sps:$4 sm:$0xff]   ;;  %v6375_v40 = vld [vmem:[%s8561_s1 + $0x584] ss:$8 sps:$4 sm:$0xff]   ;;  %v4204_v34 = vor.u32 %v4203_v44, %v4200_v9  ;;  %v1888_v9 = vshll.u32 %v7734_v61, 16  ;;  %v4186_v44 = vshrl.u32 %v7738_v10, 16 }
 0x154   :  { %2130 = vmatprep.subr.bf16.mxu0 %v6366_v37  ;;  %4271 = vmatprep.subr.bf16.mxu1 %v6366_v37  ;;  %v1904_v37 = vrot.slane %v7298_v35, 2  ;;  %v1903_v23 = vor.u32 %v1902_v13, %v1899_v46  ;;  %v6387_v46 = vld [vmem:[%s8561_s1 + $0x5c4] ss:$8 sps:$4 sm:$0xff]   ;;  %v6385_v13 = vld [vmem:[%s8561_s1 + $0x5c0] ss:$8 sps:$4 sm:$0xff]  }
 0x155   :  { %1803 = vmatprep.mubr.bf16.mxu0 %v1566_v62  ;;  %4138 = vmatprep.mubr.bf16.mxu1 %v4061_v63  ;;  %v1905_v62 = vrot.slane %v7301_v36, 3  ;;  %v4205_v63 = vrot.slane %v7304_v24, 2 }
 0x157   :  { %2131 = vmatpush1.bf16.msra.mxu0 %v6364_v54  ;;  %4272 = vmatpush1.bf16.msra.mxu1 %v6364_v54  ;;  %v4206_v54 = vrot.slane %v7307_v39, 3  ;;  %v7845_v53 = vor.u32 %v1905_v62, %v1904_v37  ;;  %v6390_v37 = vld [vmem:[%s8561_s1 + $0x5d4] ss:$8 sps:$4 sm:$0xff]   ;;  %v1885_v62 = vshrl.u32 %v7734_v61, 16  ;;  %v1892_v61 = vrot.slane %v7394_v8, 2 }
 0x158   :  { %2132 = vmatprep.subr.bf16.mxu0 %v6369_v21  ;;  %4273 = vmatprep.subr.bf16.mxu1 %v6369_v21  ;;  %v4062_v21 = vrot.slane %v7640_v20, 2  ;;  %v1568_v20 = vsel %vm1548_vm3, %v1563_v45, %v1567_v57  ;;  %v6376_v45 = vld [vmem:[%s8561_s1 + $0x590] ss:$8 sps:$4 sm:$0xff]  }
 0x159   :  { %v7847_v29 = vor.u32 %v4206_v54, %v4205_v63  ;;  %v4189_v63 = vshll.u32 %v7738_v10, 16  ;;  %v6388_v54 = vld [vmem:[%s8561_s1 + $0x5d0] ss:$8 sps:$4 sm:$0xff]   ;;  %v1887_v57 = vrot.slane %v1885_v62, 2 }
 0x15a   :  { %1804 = vmatmul.mubr.bf16.gmra.mrb[12].mxu0 %v1564_v32  ;;  %4139 = vmatmul.mubr.bf16.gmra.mrb[12].mxu1 %v4059_v38  ;;  %v4063_v4 = vsel %vm1548_vm3, %v4058_v7, %v4062_v21  ;;  %v1907_v32 = vsel %vm1883_vm4, %v1903_v23, %v7845_v53  ;;  %v6381_v7 = vld [vmem:[%s8561_s1 + $0x5a4] ss:$8 sps:$4 sm:$0xff]   ;;  %v1890_v21 = vrot.slane %v1888_v9, 3  ;;  %v4188_v23 = vrot.slane %v4186_v44, 2 }
 0x15b   :  { %2133 = vmatpush1.bf16.msra.mxu0 %v6367_v5  ;;  %4274 = vmatpush1.bf16.msra.mxu1 %v6367_v5  ;;  %v6378_v5 = vld [vmem:[%s8561_s1 + $0x594] ss:$8 sps:$4 sm:$0xff]   ;;  %v4208_v38 = vsel %vm1883_vm4, %v4204_v34, %v7847_v29  ;;  %v4191_v10 = vrot.slane %v4189_v63, 3  ;;  %v4193_v34 = vrot.slane %v7407_v15, 2  ;;  %v6397_v63 = vld [vmem:[%s8561_s1 + $0x600] ss:$8 sps:$4 sm:$0xff]  }
 0x15c   :  { %2134 = vmatprep.subr.bf16.mxu0 %v6372_v47  ;;  %4275 = vmatprep.subr.bf16.mxu1 %v6372_v47  ;;  %v6379_v47 = vld [vmem:[%s8561_s1 + $0x5a0] ss:$8 sps:$4 sm:$0xff]  }
 0x15d   :  { %1813 = vmatprep.mubr.bf16.mxu0 %v1570_v55  ;;  %4148 = vmatprep.mubr.bf16.mxu1 %v4065_v42  ;;  %v6384_v55 = vld [vmem:[%s8561_s1 + $0x5b4] ss:$8 sps:$4 sm:$0xff]   ;;  %v6382_v42 = vld [vmem:[%s8561_s1 + $0x5b0] ss:$8 sps:$4 sm:$0xff]  }
 0x15f   :  { %2135 = vmatpush1.bf16.msra.mxu0 %v6370_v50  ;;  %4276 = vmatpush1.bf16.msra.mxu1 %v6370_v50  ;;  %v6393_v50 = vld [vmem:[%s8561_s1 + $0x5e4] ss:$8 sps:$4 sm:$0xff]  }
 0x160   :  { %2136 = vmatprep.subr.bf16.mxu0 %v6375_v40  ;;  %4277 = vmatprep.subr.bf16.mxu1 %v6375_v40  ;;  %v1893_v40 = vrot.slane %v7397_v11, 3 }
 0x162   :  { %1814 = vmatmul.mubr.bf16.gmra.mrb[16].mxu0 %v1568_v20  ;;  %4149 = vmatmul.mubr.bf16.gmra.mrb[16].mxu1 %v4063_v4  ;;  %v6391_v20 = vld [vmem:[%s8561_s1 + $0x5e0] ss:$8 sps:$4 sm:$0xff]   ;;  %v6396_v4 = vld [vmem:[%s8561_s1 + $0x5f4] ss:$8 sps:$4 sm:$0xff]  }
 0x163   :  { %2137 = vmatpush1.bf16.msra.mxu0 %v6373_v12  ;;  %4278 = vmatpush1.bf16.msra.mxu1 %v6373_v12  ;;  %v4194_v12 = vrot.slane %v7410_v22, 3 }
 0x164   :  { %2138 = vmatprep.subr.bf16.mxu0 %v6378_v5  ;;  %4279 = vmatprep.subr.bf16.mxu1 %v6378_v5  ;;  %v1912_v5 = vrot.slane %v7428_v49, 2 }
 0x165   :  { %2152 = vmatprep.mubr.bf16.mxu0 %v1907_v32  ;;  %4293 = vmatprep.mubr.bf16.mxu1 %v4208_v38  ;;  %v1913_v32 = vrot.slane %v7431_v16, 3  ;;  %v4213_v38 = vrot.slane %v7434_v27, 2 }
 0x167   :  { %2139 = vmatpush1.bf16.msra.mxu0 %v6376_v45  ;;  %4280 = vmatpush1.bf16.msra.mxu1 %v6376_v45  ;;  %v4214_v45 = vrot.slane %v7437_v51, 3 }
 0x168   :  { %2140 = vmatprep.subr.bf16.mxu0 %v6381_v7  ;;  %4281 = vmatprep.subr.bf16.mxu1 %v6381_v7  ;;  %v1891_v7 = vor.u32 %v1890_v21, %v1887_v57  ;;  %v4209_v57 = vrot.slane %v7460_v48, 2  ;;  %v4210_v21 = vrot.slane %v7463_v1, 3 }
 0x169   :  { %v4215_v62 = vor.u32 %v4214_v45, %v4213_v38  ;;  %v6400_v38 = vld [vmem:[%s8561_s1 + $0x610] ss:$8 sps:$4 sm:$0xff]  }
 0x16a   :  { %v4211_v45 = vor.u32 %v4210_v21, %v4209_v57 }
 0x16b   :  { %2141 = vmatpush1.bf16.msra.mxu0 %v6379_v47  ;;  %4282 = vmatpush1.bf16.msra.mxu1 %v6379_v47  ;;  %v1894_v47 = vor.u32 %v1893_v40, %v1892_v61  ;;  %v6402_v61 = vld [vmem:[%s8561_s1 + $0x614] ss:$8 sps:$4 sm:$0xff]  }
 0x16c   :  { %2142 = vmatprep.subr.bf16.mxu0 %v6384_v55  ;;  %4283 = vmatprep.subr.bf16.mxu1 %v6384_v55  ;;  %v4192_v55 = vor.u32 %v4191_v10, %v4188_v23  ;;  %v4216_v23 = vsel %vm1883_vm4, %v7847_v29, %v4215_v62  ;;  %v1920_v10 = vrot.slane %v7484_v6, 2  ;;  %v6405_v29 = vld [vmem:[%s8561_s1 + $0x624] ss:$8 sps:$4 sm:$0xff]  }
 0x16d   :  { %v1895_v9 = vsel %vm1883_vm4, %v1891_v7, %v1894_v47  ;;  %v1916_v7 = vrot.slane %v7534_v56, 2 }
 0x16f   :  { %2143 = vmatpush1.bf16.msra.mxu0 %v6382_v42  ;;  %4284 = vmatpush1.bf16.msra.mxu1 %v6382_v42  ;;  %v4195_v42 = vor.u32 %v4194_v12, %v4193_v34  ;;  %v8609_v34 = vld [vmem:[#allocation3_spill] sm:$0xff] }
 0x170   :  { %2144 = vmatprep.subr.bf16.mxu0 %v6387_v46  ;;  %4285 = vmatprep.subr.bf16.mxu1 %v6387_v46  ;;  %v6394_v46 = vld [vmem:[%s8561_s1 + $0x5f0] ss:$8 sps:$4 sm:$0xff]   ;;  %v1921_v12 = vrot.slane %v8609_v34, 3 }
 0x171   :  { %v4196_v44 = vsel %vm1883_vm4, %v4192_v55, %v4195_v42  ;;  %v1917_v55 = vrot.slane %v7542_v3, 3  ;;  %v4212_v21 = vsel %vm1883_vm4, %v4195_v42, %v4211_v45 }
 0x173   :  { %2145 = vmatpush1.bf16.msra.mxu0 %v6385_v13  ;;  %4286 = vmatpush1.bf16.msra.mxu1 %v6385_v13  ;;  %v6399_v13 = vld [vmem:[%s8561_s1 + $0x604] ss:$8 sps:$4 sm:$0xff]  }
 0x174   :  { %2146 = vmatprep.subr.bf16.mxu0 %v6390_v37  ;;  %4287 = vmatprep.subr.bf16.mxu1 %v6390_v37  ;;  %v1914_v37 = vor.u32 %v1913_v32, %v1912_v5  ;;  %v8611_v5 = vld [vmem:[#allocation5_spill] sm:$0xff] }
 0x175   :  { %v4222_v32 = vrot.slane %v8611_v5, 3 }
 0x176   :  { %v1915_v40 = vsel %vm1883_vm4, %v7845_v53, %v1914_v37 }
 0x177   :  { %2147 = vmatpush1.bf16.msra.mxu0 %v6388_v54  ;;  %4288 = vmatpush1.bf16.msra.mxu1 %v6388_v54  ;;  %v1908_v54 = vrot.slane %v7451_v43, 2 }
 0x178   :  { %2148 = vmatprep.subr.bf16.mxu0 %v6393_v50  ;;  %4289 = vmatprep.subr.bf16.mxu1 %v6393_v50  ;;  %v1909_v50 = vrot.slane %v7457_v25, 3 }
 0x17a   :  { %v1910_v53 = vor.u32 %v1909_v50, %v1908_v54  ;;  %v1844_v54 = vld [vmem:[%s8562_s0 + $0x50] sm:$0x33]  ;;  %v6403_v50 = vld [vmem:[%s8561_s1 + $0x620] ss:$8 sps:$4 sm:$0xff]  }
 0x17b   :  { %2149 = vmatpush1.bf16.msra.mxu0 %v6391_v20  ;;  %4290 = vmatpush1.bf16.msra.mxu1 %v6391_v20  ;;  %v8610_v20 = vld [vmem:[#allocation4_spill] sm:$0xff]  ;;  %v7967_v3 = vcombine.high %v1844_v54, %v1844_v54 }
 0x17c   :  { %2150 = vmatprep.subr.bf16.mxu0 %v6396_v4  ;;  %4291 = vmatprep.subr.bf16.mxu1 %v6396_v4  ;;  %v4221_v4 = vrot.slane %v8610_v20, 2  ;;  %v1911_v57 = vsel %vm1883_vm4, %v1894_v47, %v1910_v53 }
 0x17e   :  { %v4223_v5 = vor.u32 %v4222_v32, %v4221_v4  ;;  %v8615_v32 = vld [vmem:[#allocation11_spill] sm:$0xff] }
 0x17f   :  { %2151 = vmatpush1.bf16.msra.mxu0 %v6394_v46  ;;  %4292 = vmatpush1.bf16.msra.mxu1 %v6394_v46  ;;  %v8612_v46 = vld [vmem:[#allocation8_spill] sm:$0xff]  ;;  %v1929_v47 = vrot.slane %v8615_v32, 3 }
 0x180   :  { %2455 = vmatprep.subr.bf16.mxu0 %v6399_v13  ;;  %4402 = vmatprep.subr.bf16.mxu1 %v6399_v13  ;;  %v4217_v13 = vrot.slane %v8612_v46, 2  ;;  %v4224_v56 = vsel %vm1883_vm4, %v4215_v62, %v4223_v5 }
 0x182   :  { %2153 = vmatmul.mubr.bf16.vlgmr.msra.gmra.mrb[0].mxu0 %v1895_v9  ;;  %4294 = vmatmul.mubr.bf16.vlgmr.msra.gmra.mrb[0].mxu1 %v4196_v44  ;;  %v8613_v9 = vld [vmem:[#allocation9_spill] sm:$0xff] }
 0x183   :  { %2456 = vmatpush1.bf16.msra.mxu0 %v6397_v63  ;;  %4403 = vmatpush1.bf16.msra.mxu1 %v6397_v63  ;;  %v4218_v44 = vrot.slane %v8613_v9, 3  ;;  %v1922_v63 = vor.u32 %v1921_v12, %v1920_v10  ;;  %v8614_v12 = vld [vmem:[#allocation10_spill] sm:$0xff]  ;;  %v8617_v9 = vld [vmem:[#allocation13_spill] sm:$0xff] }
 0x184   :  { %2457 = vmatprep.subr.bf16.mxu0 %v6402_v61  ;;  %4404 = vmatprep.subr.bf16.mxu1 %v6402_v61  ;;  %v5658_v61 = vld [vmem:[%s8562_s0 + $0xa8] sm:$0x33]  ;;  %v1928_v4 = vrot.slane %v8614_v12, 2  ;;  %v4230_v46 = vrot.slane %v8617_v9, 3  ;;  %v8618_v9 = vld [vmem:[#allocation14_spill] sm:$0xff]  ;;  %v7988_v12 = vcombine.low %v1844_v54, %v1844_v54 }
 0x185   :  { %2162 = vmatprep.mubr.bf16.mxu0 %v1915_v40  ;;  %4303 = vmatprep.mubr.bf16.mxu1 %v4216_v23  ;;  %v6408_v40 = vld [vmem:[%s8561_s1 + $0x634] ss:$8 sps:$4 sm:$0xff]   ;;  %v7959_v23 = vor.u32 %v1917_v55, %v1916_v7  ;;  %v7961_v10 = vor.u32 %v4218_v44, %v4217_v13  ;;  %v7971_v7 = vcombine.high %v5658_v61, %v5658_v61  ;;  %v6406_v55 = vld [vmem:[%s8561_s1 + $0x630] ss:$8 sps:$4 sm:$0xff]   ;;  %v6411_v13 = vld [vmem:[%s8561_s1 + $0x644] ss:$8 sps:$4 sm:$0xff]  }
 0x186   :  { %v1930_v62 = vor.u32 %v1929_v47, %v1928_v4  ;;  %v8621_v47 = vld [vmem:[#allocation17_spill] sm:$0xff] }
 0x187   :  { %2458 = vmatpush1.bf16.msra.mxu0 %v6400_v38  ;;  %4405 = vmatpush1.bf16.msra.mxu1 %v6400_v38  ;;  %v8616_v38 = vld [vmem:[#allocation12_spill] sm:$0xff]  ;;  %v1919_v44 = vsel %vm1883_vm4, %v1910_v53, %v7959_v23  ;;  %v4246_v32 = vshll.u32 %v7971_v7, 16  ;;  %v8619_v53 = vld [vmem:[#allocation15_spill] sm:$0xff] }
 0x188   :  { %2459 = vmatprep.subr.bf16.mxu0 %v6405_v29  ;;  %4406 = vmatprep.subr.bf16.mxu1 %v6405_v29  ;;  %v4229_v42 = vrot.slane %v8616_v38, 2  ;;  %v1923_v29 = vsel %vm1883_vm4, %v1914_v37, %v1922_v63  ;;  %v4220_v37 = vsel %vm1883_vm4, %v4211_v45, %v7961_v10  ;;  %v4243_v38 = vshrl.u32 %v7971_v7, 16  ;;  %v6414_v54 = vld [vmem:[%s8561_s1 + $0x654] ss:$8 sps:$4 sm:$0xff]  }
 0x189   :  { %v1925_v45 = vrot.slane %v8619_v53, 3 }
 0x18a   :  { %2163 = vmatmul.mubr.bf16.gmra.mrb[4].mxu0 %v1911_v57  ;;  %4304 = vmatmul.mubr.bf16.gmra.mrb[4].mxu1 %v4212_v21  ;;  %v1942_v57 = vshrl.u32 %v7967_v3, 16  ;;  %v1945_v21 = vshll.u32 %v7967_v3, 16  ;;  %v4245_v53 = vrot.slane %v4243_v38, 2 }
 0x18b   :  { %2460 = vmatpush1.bf16.msra.mxu0 %v6403_v50  ;;  %4407 = vmatpush1.bf16.msra.mxu1 %v6403_v50  ;;  %v4231_v50 = vor.u32 %v4230_v46, %v4229_v42  ;;  %v8620_v46 = vld [vmem:[#allocation16_spill] sm:$0xff]  ;;  %v4226_v42 = vrot.slane %v8621_v47, 3  ;;  %v1933_v47 = vshrl.u32 %v7988_v12, 16 }
 0x18c   :  { %2461 = vmatprep.subr.bf16.mxu0 %v6408_v40  ;;  %4408 = vmatprep.subr.bf16.mxu1 %v6408_v40  ;;  %v1924_v40 = vrot.slane %v8618_v9, 2  ;;  %v4225_v4 = vrot.slane %v8620_v46, 2  ;;  %v1944_v20 = vrot.slane %v1942_v57, 2  ;;  %v1947_v34 = vrot.slane %v1945_v21, 3 }
 0x18d   :  { %2172 = vmatprep.mubr.bf16.mxu0 %v1923_v29  ;;  %4313 = vmatprep.mubr.bf16.mxu1 %v4224_v56  ;;  %v6409_v56 = vld [vmem:[%s8561_s1 + $0x640] ss:$8 sps:$4 sm:$0xff]   ;;  %v7996_v29 = vcombine.low %v5658_v61, %v5658_v61  ;;  %v4232_v9 = vsel %vm1883_vm4, %v4223_v5, %v4231_v50  ;;  %v4248_v46 = vrot.slane %v4246_v32, 3  ;;  %v1936_v61 = vshll.u32 %v7988_v12, 16  ;;  %v6417_v32 = vld [vmem:[%s8561_s1 + $0x664] ss:$8 sps:$4 sm:$0xff]  }
 0x18e   :  { %v1926_v6 = vor.u32 %v1925_v45, %v1924_v40  ;;  %v1948_v38 = vor.u32 %v1947_v34, %v1944_v20  ;;  %v1935_v21 = vrot.slane %v1933_v47, 2  ;;  %v8023_v34 = vld [vmem:[%s8562_s0] sm:$0x88]  ;;  %v8028_v20 = vld [vmem:[%s8562_s0 + $0x58] sm:$0x88] }
 0x18f   :  { %2462 = vmatpush1.bf16.msra.mxu0 %v6406_v55  ;;  %4409 = vmatpush1.bf16.msra.mxu1 %v6406_v55  ;;  %v1931_v55 = vsel %vm1883_vm4, %v1922_v63, %v1930_v62  ;;  %v4227_v63 = vor.u32 %v4226_v42, %v4225_v4  ;;  %v4234_v5 = vshrl.u32 %v7996_v29, 16  ;;  %v4237_v57 = vshll.u32 %v7996_v29, 16  ;;  %v8047_v47 = vld [vmem:[%s8562_s0 + $0x60] sm:$0xff] }
 0x190   :  { %2463 = vmatprep.subr.bf16.mxu0 %v6411_v13  ;;  %4410 = vmatprep.subr.bf16.mxu1 %v6411_v13  ;;  %v6412_v13 = vld [vmem:[%s8561_s1 + $0x650] ss:$8 sps:$4 sm:$0xff]   ;;  %v1938_v40 = vrot.slane %v1936_v61, 3  ;;  %v6423_v61 = vld [vmem:[%s8561_s1 + $0x684] ss:$8 sps:$4 sm:$0xff]  }
 0x191   :  { %v4228_v45 = vsel %vm1883_vm4, %v7961_v10, %v4227_v63  ;;  %v4236_v4 = vrot.slane %v4234_v5, 2  ;;  %v4239_v42 = vrot.slane %v4237_v57, 3  ;;  %v2267_v5 = vrot.slane %v7278_v19, 3  ;;  %v6461_v19 = vld [vmem:[%s8561_s1 + $0x724] ss:$8 sps:$4 sm:$0xff]  }
 0x192   :  { %2173 = vmatmul.mubr.bf16.gmra.mrb[8].mxu0 %v1919_v44  ;;  %4314 = vmatmul.mubr.bf16.gmra.mrb[8].mxu1 %v4220_v37  ;;  %v6415_v44 = vld [vmem:[%s8561_s1 + $0x660] ss:$8 sps:$4 sm:$0xff]   ;;  %v4249_v37 = vor.u32 %v4248_v46, %v4245_v53 }
 0x193   :  { %2464 = vmatpush1.bf16.msra.mxu0 %v6409_v56  ;;  %4411 = vmatpush1.bf16.msra.mxu1 %v6409_v56  ;;  %v1927_v56 = vsel %vm1883_vm4, %v7959_v23, %v1926_v6  ;;  %v1949_v23 = vsel %vm1883_vm4, %v1930_v62, %v1948_v38  ;;  %v8038_v53 = vld [vmem:[%s8562_s0 + $0x8] sm:$0xff]  ;;  %v8051_v62 = vcombine.high %v8028_v20, %v8047_v47 }
 0x194   :  { %2465 = vmatprep.subr.bf16.mxu0 %v6414_v54  ;;  %4412 = vmatprep.subr.bf16.mxu1 %v6414_v54  ;;  %v4250_v10 = vsel %vm1883_vm4, %v4231_v50, %v4249_v37  ;;  %v8042_v46 = vcombine.high %v8023_v34, %v8038_v53  ;;  %v6418_v50 = vld [vmem:[%s8561_s1 + $0x670] ss:$8 sps:$4 sm:$0xff]   ;;  %v1939_v54 = vor.u32 %v1938_v40, %v1935_v21  ;;  %v6421_v38 = vld [vmem:[%s8561_s1 + $0x680] ss:$8 sps:$4 sm:$0xff]   ;;  %v6426_v21 = vld [vmem:[%s8561_s1 + $0x694] ss:$8 sps:$4 sm:$0xff]  }
 0x195   :  { %2182 = vmatprep.mubr.bf16.mxu0 %v1931_v55  ;;  %4323 = vmatprep.mubr.bf16.mxu1 %v4232_v9  ;;  %v6420_v9 = vld [vmem:[%s8561_s1 + $0x674] ss:$8 sps:$4 sm:$0xff]   ;;  %v4240_v55 = vor.u32 %v4239_v42, %v4236_v4  ;;  %v4373_v57 = vrot.slane %v8051_v62, 3  ;;  %v6430_v42 = vld [vmem:[%s8561_s1 + $0x6b0] ss:$8 sps:$4 sm:$0xff]  }
 0x196   :  { %v6432_v4 = vld [vmem:[%s8561_s1 + $0x6b4] ss:$8 sps:$4 sm:$0xff]  }
 0x197   :  { %2466 = vmatpush1.bf16.msra.mxu0 %v6412_v13  ;;  %4413 = vmatpush1.bf16.msra.mxu1 %v6412_v13  ;;  %v2266_v13 = vrot.slane %v8042_v46, 3  ;;  %v4241_v37 = vsel %vm1883_vm4, %v4227_v63, %v4240_v55  ;;  %v6429_v63 = vld [vmem:[%s8561_s1 + $0x6a4] ss:$8 sps:$4 sm:$0xff]   ;;  %v6440_v55 = vld [vmem:[%s8561_s1 + $0x6e0] ss:$8 sps:$4 sm:$0xff]  }
 0x198   :  { %2467 = vmatprep.subr.bf16.mxu0 %v6417_v32  ;;  %4414 = vmatprep.subr.bf16.mxu1 %v6417_v32  ;;  %v4374_v32 = vrot.slane %v7287_v26, 3  ;;  %v2275_v26 = vrot.slane %v7465_v2, 3 }
 0x199   :  { %v2268_v40 = vsel %vm2262_vm5, %v2266_v13, %v2267_v5  ;;  %v8116_v13 = vcombine.low %v8028_v20, %v8047_v47  ;;  %v4371_v20 = vrot.slane %v7379_v0, 3 }
 0x19a   :  { %2183 = vmatmul.mubr.bf16.gmra.mrb[12].mxu0 %v1927_v56  ;;  %4324 = vmatmul.mubr.bf16.gmra.mrb[12].mxu1 %v4228_v45  ;;  %v4375_v56 = vsel %vm2262_vm5, %v4373_v57, %v4374_v32  ;;  %v6427_v45 = vld [vmem:[%s8561_s1 + $0x6a0] ss:$8 sps:$4 sm:$0xff]   ;;  %v6448_v57 = vld [vmem:[%s8561_s1 + $0x6f4] ss:$8 sps:$4 sm:$0xff]  }
 0x19b   :  { %2468 = vmatpush1.bf16.msra.mxu0 %v6415_v44  ;;  %4415 = vmatpush1.bf16.msra.mxu1 %v6415_v44  ;;  %v1940_v44 = vsel %vm1883_vm4, %v1926_v6, %v1939_v54  ;;  %v6424_v6 = vld [vmem:[%s8561_s1 + $0x690] ss:$8 sps:$4 sm:$0xff]   ;;  %v6442_v54 = vld [vmem:[%s8561_s1 + $0x6e4] ss:$8 sps:$4 sm:$0xff]  }
 0x19c   :  { %2469 = vmatprep.subr.bf16.mxu0 %v6420_v9  ;;  %4416 = vmatprep.subr.bf16.mxu1 %v6420_v9  ;;  %v6435_v9 = vld [vmem:[%s8561_s1 + $0x6c4] ss:$8 sps:$4 sm:$0xff]  }
 0x19d   :  { %2192 = vmatprep.mubr.bf16.mxu0 %v1949_v23  ;;  %4333 = vmatprep.mubr.bf16.mxu1 %v4250_v10  ;;  %v6433_v23 = vld [vmem:[%s8561_s1 + $0x6c0] ss:$8 sps:$4 sm:$0xff]   ;;  %v6438_v10 = vld [vmem:[%s8561_s1 + $0x6d4] ss:$8 sps:$4 sm:$0xff]  }
 0x19f   :  { %2470 = vmatpush1.bf16.msra.mxu0 %v6418_v50  ;;  %4417 = vmatpush1.bf16.msra.mxu1 %v6418_v50  ;;  %v6436_v50 = vld [vmem:[%s8561_s1 + $0x6d0] ss:$8 sps:$4 sm:$0xff]  }
 0x1a0   :  { %2471 = vmatprep.subr.bf16.mxu0 %v6423_v61  ;;  %4418 = vmatprep.subr.bf16.mxu1 %v6423_v61  ;;  %v8112_v61 = vcombine.low %v8023_v34, %v8038_v53  ;;  %v2264_v34 = vrot.slane %v7369_v59, 3  ;;  %v6451_v59 = vld [vmem:[%s8561_s1 + $0x700] ss:$8 sps:$4 sm:$0xff]  }
 0x1a2   :  { %2193 = vmatmul.mubr.bf16.gmra.mrb[16].mxu0 %v1940_v44  ;;  %4334 = vmatmul.mubr.bf16.gmra.mrb[16].mxu1 %v4241_v37  ;;  %v2263_v44 = vrot.slane %v8112_v61, 3  ;;  %v4370_v37 = vrot.slane %v8116_v13, 3 }
 0x1a3   :  { %2472 = vmatpush1.bf16.msra.mxu0 %v6421_v38  ;;  %4419 = vmatpush1.bf16.msra.mxu1 %v6421_v38  ;;  %v6446_v38 = vld [vmem:[%s8561_s1 + $0x6f0] ss:$8 sps:$4 sm:$0xff]  }
 0x1a4   :  { %2473 = vmatprep.subr.bf16.mxu0 %v6426_v21  ;;  %4420 = vmatprep.subr.bf16.mxu1 %v6426_v21  ;;  %v6453_v21 = vld [vmem:[%s8561_s1 + $0x704] ss:$8 sps:$4 sm:$0xff]   ;;  %v4372_v0 = vsel %vm2262_vm5, %v4370_v37, %v4371_v20  ;;  %v2277_v37 = vrot.slane %v7560_v18, 3  ;;  %v4524_v18 = vshrl.u32 %v8051_v62, 16 }
 0x1a5   :  { %2487 = vmatprep.mubr.bf16.mxu0 %v2268_v40  ;;  %4434 = vmatprep.mubr.bf16.mxu1 %v4375_v56  ;;  %v2271_v40 = vrot.slane %v7399_v14, 3  ;;  %v4378_v56 = vrot.slane %v7401_v17, 3 }
 0x1a7   :  { %2474 = vmatpush1.bf16.msra.mxu0 %v6424_v6  ;;  %4421 = vmatpush1.bf16.msra.mxu1 %v6424_v6  ;;  %v2265_v6 = vsel %vm2262_vm5, %v2263_v44, %v2264_v34  ;;  %v2272_v14 = vsel %vm2262_vm5, %v2267_v5, %v2271_v40  ;;  %v4379_v17 = vsel %vm2262_vm5, %v4374_v32, %v4378_v56  ;;  %v4382_v5 = vrot.slane %v7467_v52, 3  ;;  %v6470_v44 = vld [vmem:[%s8561_s1 + $0x754] ss:$8 sps:$4 sm:$0xff]  }
 0x1a8   :  { %2475 = vmatprep.subr.bf16.mxu0 %v6429_v63  ;;  %4422 = vmatprep.subr.bf16.mxu1 %v6429_v63  ;;  %v6458_v63 = vld [vmem:[%s8561_s1 + $0x714] ss:$8 sps:$4 sm:$0xff]   ;;  %v2276_v2 = vsel %vm2262_vm5, %v2271_v40, %v2275_v26  ;;  %v2283_v40 = vrot.slane %v7967_v3, 3 }
 0x1a9   :  { %v4383_v52 = vsel %vm2262_vm5, %v4378_v56, %v4382_v5  ;;  %v4390_v56 = vrot.slane %v7971_v7, 3 }
 0x1ab   :  { %2476 = vmatpush1.bf16.msra.mxu0 %v6427_v45  ;;  %4423 = vmatpush1.bf16.msra.mxu1 %v6427_v45  ;;  %v6456_v45 = vld [vmem:[%s8561_s1 + $0x710] ss:$8 sps:$4 sm:$0xff]  }
 0x1ac   :  { %2477 = vmatprep.subr.bf16.mxu0 %v6432_v4  ;;  %4424 = vmatprep.subr.bf16.mxu1 %v6432_v4  ;;  %v2269_v4 = vrot.slane %v7412_v28, 3  ;;  %v6459_v28 = vld [vmem:[%s8561_s1 + $0x720] ss:$8 sps:$4 sm:$0xff]  }
 0x1af   :  { %2478 = vmatpush1.bf16.msra.mxu0 %v6430_v42  ;;  %4425 = vmatpush1.bf16.msra.mxu1 %v6430_v42  ;;  %v4376_v42 = vrot.slane %v7417_v31, 3  ;;  %v2270_v31 = vsel %vm2262_vm5, %v2264_v34, %v2269_v4  ;;  %v6468_v34 = vld [vmem:[%s8561_s1 + $0x750] ss:$8 sps:$4 sm:$0xff]  }
 0x1b0   :  { %2479 = vmatprep.subr.bf16.mxu0 %v6435_v9  ;;  %4426 = vmatprep.subr.bf16.mxu1 %v6435_v9  ;;  %v6464_v9 = vld [vmem:[%s8561_s1 + $0x734] ss:$8 sps:$4 sm:$0xff]  }
 0x1b1   :  { %v4377_v32 = vsel %vm2262_vm5, %v4371_v20, %v4376_v42  ;;  %v4384_v20 = vrot.slane %v7578_v60, 3  ;;  %v4527_v60 = vshll.u32 %v8051_v62, 16 }
 0x1b3   :  { %2480 = vmatpush1.bf16.msra.mxu0 %v6433_v23  ;;  %4427 = vmatpush1.bf16.msra.mxu1 %v6433_v23  ;;  %v6462_v23 = vld [vmem:[%s8561_s1 + $0x730] ss:$8 sps:$4 sm:$0xff]  }
 0x1b4   :  { %2481 = vmatprep.subr.bf16.mxu0 %v6438_v10  ;;  %4428 = vmatprep.subr.bf16.mxu1 %v6438_v10  ;;  %v2273_v10 = vrot.slane %v7495_v30, 3  ;;  %v6465_v30 = vld [vmem:[%s8561_s1 + $0x740] ss:$8 sps:$4 sm:$0xff]  }
 0x1b6   :  { %v2278_v3 = vsel %vm2262_vm5, %v2273_v10, %v2277_v37 }
 0x1b7   :  { %2482 = vmatpush1.bf16.msra.mxu0 %v6436_v50  ;;  %4429 = vmatpush1.bf16.msra.mxu1 %v6436_v50  ;;  %v4380_v50 = vrot.slane %v7508_v41, 3  ;;  %v2274_v41 = vsel %vm2262_vm5, %v2269_v4, %v2273_v10  ;;  %v2619_v4 = vrot.slane %v7301_v36, 4  ;;  %v6479_v36 = vld [vmem:[%s8561_s1 + $0x784] ss:$8 sps:$4 sm:$0xff]  }
 0x1b8   :  { %2483 = vmatprep.subr.bf16.mxu0 %v6442_v54  ;;  %4430 = vmatprep.subr.bf16.mxu1 %v6442_v54  ;;  %v6467_v54 = vld [vmem:[%s8561_s1 + $0x744] ss:$8 sps:$4 sm:$0xff]  }
 0x1b9   :  { %v4385_v7 = vsel %vm2262_vm5, %v4380_v50, %v4384_v20 }
 0x1bb   :  { %2484 = vmatpush1.bf16.msra.mxu0 %v6440_v55  ;;  %4431 = vmatpush1.bf16.msra.mxu1 %v6440_v55  ;;  %v2279_v55 = vrot.slane %v7527_v33, 3 }
 0x1bc   :  { %2485 = vmatprep.subr.bf16.mxu0 %v6448_v57  ;;  %4432 = vmatprep.subr.bf16.mxu1 %v6448_v57  ;;  %v4386_v57 = vrot.slane %v7536_v58, 3 }
 0x1bd   :  { %v2280_v33 = vsel %vm2262_vm5, %v2275_v26, %v2279_v55  ;;  %v4531_v26 = vrot.slane %v7304_v24, 3 }
 0x1be   :  { %v4387_v58 = vsel %vm2262_vm5, %v4382_v5, %v4386_v57  ;;  %v4391_v62 = vsel %vm2262_vm5, %v4386_v57, %v4390_v56  ;;  %v4532_v5 = vrot.slane %v7307_v39, 4  ;;  %v6488_v57 = vld [vmem:[%s8561_s1 + $0x7b4] ss:$8 sps:$4 sm:$0xff]  }
 0x1bf   :  { %2486 = vmatpush1.bf16.msra.mxu0 %v6446_v38  ;;  %4433 = vmatpush1.bf16.msra.mxu1 %v6446_v38  ;;  %v4381_v38 = vsel %vm2262_vm5, %v4376_v42, %v4380_v50  ;;  %v4526_v42 = vrot.slane %v4524_v18, 3  ;;  %v6480_v50 = vld [vmem:[%s8561_s1 + $0x790] ss:$8 sps:$4 sm:$0xff]   ;;  %v4519_v18 = vrot.slane %v7407_v15, 3  ;;  %v2626_v15 = vrot.slane %v7428_v49, 3 }
 0x1c0   :  { %2834 = vmatprep.subr.bf16.mxu0 %v6453_v21  ;;  %4587 = vmatprep.subr.bf16.mxu1 %v6453_v21  ;;  %v6473_v21 = vld [vmem:[%s8561_s1 + $0x764] ss:$8 sps:$4 sm:$0xff]  }
 0x1c2   :  { %2488 = vmatmul.mubr.bf16.vlgmr.msra.gmra.mrb[0].mxu0 %v2265_v6  ;;  %4435 = vmatmul.mubr.bf16.vlgmr.msra.gmra.mrb[0].mxu1 %v4372_v0  ;;  %v2614_v6 = vshll.u32 %v8042_v46, 16  ;;  %v6471_v0 = vld [vmem:[%s8561_s1 + $0x760] ss:$8 sps:$4 sm:$0xff]  }
 0x1c3   :  { %2835 = vmatpush1.bf16.msra.mxu0 %v6451_v59  ;;  %4588 = vmatpush1.bf16.msra.mxu1 %v6451_v59  ;;  %v2611_v59 = vshrl.u32 %v8042_v46, 16  ;;  %v6476_v46 = vld [vmem:[%s8561_s1 + $0x774] ss:$8 sps:$4 sm:$0xff]  }
 0x1c4   :  { %2836 = vmatprep.subr.bf16.mxu0 %v6458_v63  ;;  %4589 = vmatprep.subr.bf16.mxu1 %v6458_v63  ;;  %v2284_v63 = vsel %vm2262_vm5, %v2279_v55, %v2283_v40  ;;  %v6483_v55 = vld [vmem:[%s8561_s1 + $0x7a0] ss:$8 sps:$4 sm:$0xff]  }
 0x1c5   :  { %2497 = vmatprep.mubr.bf16.mxu0 %v2272_v14  ;;  %4444 = vmatprep.mubr.bf16.mxu1 %v4379_v17  ;;  %v2613_v14 = vrot.slane %v2611_v59, 3  ;;  %v2616_v17 = vrot.slane %v2614_v6, 4  ;;  %v2607_v59 = vrot.slane %v7397_v11, 4 }
 0x1c7   :  { %2837 = vmatpush1.bf16.msra.mxu0 %v6456_v45  ;;  %4590 = vmatpush1.bf16.msra.mxu1 %v6456_v45  ;;  %v2618_v45 = vrot.slane %v7298_v35, 3  ;;  %v4388_v35 = vrot.slane %v7996_v29, 3  ;;  %v2617_v24 = vor.u32 %v2616_v17, %v2613_v14  ;;  %v6498_v14 = vld [vmem:[%s8561_s1 + $0x7f0] ss:$8 sps:$4 sm:$0xff]   ;;  %v6503_v17 = vld [vmem:[%s8561_s1 + $0x804] ss:$8 sps:$4 sm:$0xff]  }
 0x1c8   :  { %2838 = vmatprep.subr.bf16.mxu0 %v6461_v19  ;;  %4591 = vmatprep.subr.bf16.mxu1 %v6461_v19  ;;  %v4529_v19 = vrot.slane %v4527_v60, 4  ;;  %v4520_v60 = vrot.slane %v7410_v22, 4  ;;  %v2627_v22 = vrot.slane %v7431_v16, 4 }
 0x1c9   :  { %v8223_v39 = vor.u32 %v2619_v4, %v2618_v45  ;;  %v2622_v4 = vrot.slane %v7451_v43, 3 }
 0x1ca   :  { %2498 = vmatmul.mubr.bf16.gmra.mrb[4].mxu0 %v2270_v31  ;;  %4445 = vmatmul.mubr.bf16.gmra.mrb[4].mxu1 %v4377_v32  ;;  %v2281_v31 = vrot.slane %v7988_v12, 3  ;;  %v4530_v32 = vor.u32 %v4529_v19, %v4526_v42  ;;  %v6477_v12 = vld [vmem:[%s8561_s1 + $0x780] ss:$8 sps:$4 sm:$0xff]   ;;  %v2628_v45 = vor.u32 %v2627_v22, %v2626_v15  ;;  %v2623_v42 = vrot.slane %v7457_v25, 4 }
 0x1cb   :  { %2839 = vmatpush1.bf16.msra.mxu0 %v6459_v28  ;;  %4592 = vmatpush1.bf16.msra.mxu1 %v6459_v28  ;;  %v6474_v28 = vld [vmem:[%s8561_s1 + $0x770] ss:$8 sps:$4 sm:$0xff]   ;;  %v4535_v19 = vrot.slane %v7460_v48, 3  ;;  %v8634_v22 = vld [vmem:[#allocation14_spill] sm:$0xff] }
 0x1cc   :  { %2840 = vmatprep.subr.bf16.mxu0 %v6464_v9  ;;  %4593 = vmatprep.subr.bf16.mxu1 %v6464_v9  ;;  %v8225_v9 = vor.u32 %v4532_v5, %v4531_v26  ;;  %v2282_v29 = vsel %vm2262_vm5, %v2277_v37, %v2281_v31  ;;  %v4515_v37 = vshll.u32 %v8116_v13, 16  ;;  %v4536_v26 = vrot.slane %v7463_v1, 4  ;;  %v6506_v5 = vld [vmem:[%s8561_s1 + $0x814] ss:$8 sps:$4 sm:$0xff]  }
 0x1cd   :  { %2507 = vmatprep.mubr.bf16.mxu0 %v2276_v2  ;;  %4454 = vmatprep.mubr.bf16.mxu1 %v4383_v52  ;;  %v4389_v2 = vsel %vm2262_vm5, %v4384_v20, %v4388_v35  ;;  %v6482_v52 = vld [vmem:[%s8561_s1 + $0x794] ss:$8 sps:$4 sm:$0xff]   ;;  %v6492_v20 = vld [vmem:[%s8561_s1 + $0x7d0] ss:$8 sps:$4 sm:$0xff]   ;;  %v8623_v35 = vld [vmem:[#allocation3_spill] sm:$0xff]  ;;  %v2629_v43 = vsel %vm2597_vm6, %v8223_v39, %v2628_v45 }
 0x1ce   :  { %v4534_v10 = vsel %vm2597_vm6, %v4530_v32, %v8225_v9  ;;  %v8624_v48 = vld [vmem:[#allocation4_spill] sm:$0xff] }
 0x1cf   :  { %2841 = vmatpush1.bf16.msra.mxu0 %v6462_v23  ;;  %4594 = vmatpush1.bf16.msra.mxu1 %v6462_v23  ;;  %v2621_v23 = vsel %vm2597_vm6, %v2617_v24, %v8223_v39  ;;  %v4547_v1 = vrot.slane %v8624_v48, 3  ;;  %v8625_v24 = vld [vmem:[#allocation5_spill] sm:$0xff]  ;;  %v6509_v39 = vld [vmem:[%s8561_s1 + $0x824] ss:$8 sps:$4 sm:$0xff]  }
 0x1d0   :  { %2842 = vmatprep.subr.bf16.mxu0 %v6467_v54  ;;  %4595 = vmatprep.subr.bf16.mxu1 %v6467_v54  ;;  %v6485_v54 = vld [vmem:[%s8561_s1 + $0x7a4] ss:$8 sps:$4 sm:$0xff]   ;;  %v4548_v32 = vrot.slane %v8625_v24, 4 }
 0x1d2   :  { %2508 = vmatmul.mubr.bf16.gmra.mrb[8].mxu0 %v2274_v41  ;;  %4455 = vmatmul.mubr.bf16.gmra.mrb[8].mxu1 %v4381_v38  ;;  %v6491_v41 = vld [vmem:[%s8561_s1 + $0x7c4] ss:$8 sps:$4 sm:$0xff]   ;;  %v6489_v38 = vld [vmem:[%s8561_s1 + $0x7c0] ss:$8 sps:$4 sm:$0xff]  }
 0x1d3   :  { %2843 = vmatpush1.bf16.msra.mxu0 %v6465_v30  ;;  %4596 = vmatpush1.bf16.msra.mxu1 %v6465_v30  ;;  %v6486_v30 = vld [vmem:[%s8561_s1 + $0x7b0] ss:$8 sps:$4 sm:$0xff]  }
 0x1d4   :  { %2844 = vmatprep.subr.bf16.mxu0 %v6470_v44  ;;  %4597 = vmatprep.subr.bf16.mxu1 %v6470_v44  ;;  %v6494_v44 = vld [vmem:[%s8561_s1 + $0x7d4] ss:$8 sps:$4 sm:$0xff]  }
 0x1d5   :  { %2517 = vmatprep.mubr.bf16.mxu0 %v2280_v33  ;;  %4464 = vmatprep.mubr.bf16.mxu1 %v4387_v58  ;;  %v2599_v33 = vshrl.u32 %v8112_v61, 16  ;;  %v2602_v58 = vshll.u32 %v8112_v61, 16  ;;  %v2606_v61 = vrot.slane %v7394_v8, 3  ;;  %v6500_v8 = vld [vmem:[%s8561_s1 + $0x7f4] ss:$8 sps:$4 sm:$0xff]  }
 0x1d7   :  { %2845 = vmatpush1.bf16.msra.mxu0 %v6468_v34  ;;  %4598 = vmatpush1.bf16.msra.mxu1 %v6468_v34  ;;  %v4512_v34 = vshrl.u32 %v8116_v13, 16  ;;  %v2601_v40 = vrot.slane %v2599_v33, 3  ;;  %v2604_v56 = vrot.slane %v2602_v58, 4  ;;  %v4517_v13 = vrot.slane %v4515_v37, 4  ;;  %v8331_v58 = vld [vmem:[%s8562_s0 + $0x50] sm:$0x77] }
 0x1d8   :  { %2846 = vmatprep.subr.bf16.mxu0 %v6473_v21  ;;  %4599 = vmatprep.subr.bf16.mxu1 %v6473_v21  ;;  %v6497_v21 = vld [vmem:[%s8561_s1 + $0x7e4] ss:$8 sps:$4 sm:$0xff]   ;;  %v2608_v11 = vor.u32 %v2607_v59, %v2606_v61  ;;  %v6512_v37 = vld [vmem:[%s8561_s1 + $0x834] ss:$8 sps:$4 sm:$0xff]  }
 0x1d9   :  { %v4514_v6 = vrot.slane %v4512_v34, 3  ;;  %v8336_v34 = vld [vmem:[%s8562_s0 + $0xa8] sm:$0x77] }
 0x1da   :  { %2518 = vmatmul.mubr.bf16.gmra.mrb[12].mxu0 %v2278_v3  ;;  %4465 = vmatmul.mubr.bf16.gmra.mrb[12].mxu1 %v4385_v7  ;;  %v2605_v3 = vor.u32 %v2604_v56, %v2601_v40  ;;  %v8630_v40 = vld [vmem:[#allocation10_spill] sm:$0xff]  ;;  %v8631_v61 = vld [vmem:[#allocation11_spill] sm:$0xff] }
 0x1db   :  { %2847 = vmatpush1.bf16.msra.mxu0 %v6471_v0  ;;  %4600 = vmatpush1.bf16.msra.mxu1 %v6471_v0  ;;  %v6495_v0 = vld [vmem:[%s8561_s1 + $0x7e0] ss:$8 sps:$4 sm:$0xff]   ;;  %v4518_v7 = vor.u32 %v4517_v13, %v4514_v6  ;;  %v2642_v56 = vrot.slane %v8630_v40, 3  ;;  %v2643_v59 = vrot.slane %v8631_v61, 4  ;;  %v8632_v6 = vld [vmem:[#allocation12_spill] sm:$0xff] }
 0x1dc   :  { %2848 = vmatprep.subr.bf16.mxu0 %v6476_v46  ;;  %4601 = vmatprep.subr.bf16.mxu1 %v6476_v46  ;;  %v4521_v46 = vor.u32 %v4520_v60, %v4519_v18  ;;  %v2609_v49 = vsel %vm2597_vm6, %v2605_v3, %v2608_v11  ;;  %v4555_v13 = vrot.slane %v8632_v6, 3  ;;  %v8633_v18 = vld [vmem:[#allocation13_spill] sm:$0xff]  ;;  %v5666_v3 = vcombine.high %v8336_v34, %v8336_v34  ;;  %v6525_v6 = vld [vmem:[%s8561_s1 + $0x880] ss:$8 sps:$4 sm:$0xff]  }
 0x1dd   :  { %2527 = vmatprep.mubr.bf16.mxu0 %v2284_v63  ;;  %4474 = vmatprep.mubr.bf16.mxu1 %v4391_v62  ;;  %v4539_v63 = vrot.slane %v7434_v27, 3  ;;  %v4540_v62 = vrot.slane %v7437_v51, 4  ;;  %v6501_v51 = vld [vmem:[%s8561_s1 + $0x800] ss:$8 sps:$4 sm:$0xff]   ;;  %v4556_v60 = vrot.slane %v8633_v18, 4 }
 0x1de   :  { %v4522_v16 = vsel %vm2597_vm6, %v4518_v7, %v4521_v46  ;;  %v6522_v40 = vld [vmem:[%s8561_s1 + $0x870] ss:$8 sps:$4 sm:$0xff]  }
 0x1df   :  { %2849 = vmatpush1.bf16.msra.mxu0 %v6474_v28  ;;  %4602 = vmatpush1.bf16.msra.mxu1 %v6474_v28  ;;  %v4541_v27 = vor.u32 %v4540_v62, %v4539_v63  ;;  %v8622_v28 = vld [vmem:[#allocation2_spill] sm:$0xff]  ;;  %v2638_v63 = vrot.slane %v8634_v22, 3  ;;  %v8635_v62 = vld [vmem:[#allocation15_spill] sm:$0xff]  ;;  %v6536_v22 = vld [vmem:[%s8561_s1 + $0x8b4] ss:$8 sps:$4 sm:$0xff]  }
 0x1e0   :  { %2850 = vmatprep.subr.bf16.mxu0 %v6479_v36  ;;  %4603 = vmatprep.subr.bf16.mxu1 %v6479_v36  ;;  %v2634_v31 = vrot.slane %v8622_v28, 3  ;;  %v2635_v36 = vrot.slane %v8623_v35, 4  ;;  %v5665_v35 = vcombine.low %v8336_v34, %v8336_v34 }
 0x1e1   :  { %v4542_v25 = vsel %vm2597_vm6, %v8225_v9, %v4541_v27  ;;  %v8626_v9 = vld [vmem:[#allocation6_spill] sm:$0xff] }
 0x1e2   :  { %2528 = vmatmul.mubr.bf16.gmra.mrb[16].mxu0 %v2282_v29  ;;  %4475 = vmatmul.mubr.bf16.gmra.mrb[16].mxu1 %v4389_v2  ;;  %v2624_v29 = vor.u32 %v2623_v42, %v2622_v4  ;;  %v4537_v2 = vor.u32 %v4536_v26, %v4535_v19  ;;  %v4569_v19 = vshrl.u32 %v5666_v3, 16  ;;  %v4572_v26 = vshll.u32 %v5666_v3, 16  ;;  %v6590_v3 = vld [vmem:[%s8562_s0 + $0x68] sm:$0xff] }
 0x1e3   :  { %2851 = vmatpush1.bf16.msra.mxu0 %v6477_v12  ;;  %4604 = vmatpush1.bf16.msra.mxu1 %v6477_v12  ;;  %v6504_v12 = vld [vmem:[%s8561_s1 + $0x810] ss:$8 sps:$4 sm:$0xff]  }
 0x1e4   :  { %2852 = vmatprep.subr.bf16.mxu0 %v6482_v52  ;;  %4605 = vmatprep.subr.bf16.mxu1 %v6482_v52  ;;  %v2636_v52 = vor.u32 %v2635_v36, %v2634_v31  ;;  %v5498_v31 = vcombine.low %v8331_v58, %v8331_v58  ;;  %v6518_v36 = vld [vmem:[%s8561_s1 + $0x854] ss:$8 sps:$4 sm:$0xff]  }
 0x1e5   :  { %2866 = vmatprep.mubr.bf16.mxu0 %v2621_v23  ;;  %4619 = vmatprep.mubr.bf16.mxu1 %v4534_v10  ;;  %v2630_v23 = vrot.slane %v8626_v9, 3  ;;  %v8627_v10 = vld [vmem:[#allocation7_spill] sm:$0xff] }
 0x1e6   :  { %v2650_v9 = vshll.u32 %v5498_v31, 16 }
 0x1e7   :  { %2853 = vmatpush1.bf16.msra.mxu0 %v6480_v50  ;;  %4606 = vmatpush1.bf16.msra.mxu1 %v6480_v50  ;;  %v2631_v50 = vrot.slane %v8627_v10, 4  ;;  %v6521_v10 = vld [vmem:[%s8561_s1 + $0x864] ss:$8 sps:$4 sm:$0xff]  }
 0x1e8   :  { %2854 = vmatprep.subr.bf16.mxu0 %v6485_v54  ;;  %4607 = vmatprep.subr.bf16.mxu1 %v6485_v54  ;;  %v6507_v54 = vld [vmem:[%s8561_s1 + $0x820] ss:$8 sps:$4 sm:$0xff]  }
 0x1eb   :  { %2855 = vmatpush1.bf16.msra.mxu0 %v6483_v55  ;;  %4608 = vmatpush1.bf16.msra.mxu1 %v6483_v55  ;;  %v4549_v55 = vor.u32 %v4548_v32, %v4547_v1 }
 0x1ec   :  { %2856 = vmatprep.subr.bf16.mxu0 %v6488_v57  ;;  %4609 = vmatprep.subr.bf16.mxu1 %v6488_v57  ;;  %v2625_v57 = vsel %vm2597_vm6, %v2608_v11, %v2624_v29  ;;  %v6510_v11 = vld [vmem:[%s8561_s1 + $0x830] ss:$8 sps:$4 sm:$0xff]  }
 0x1ef   :  { %2857 = vmatpush1.bf16.msra.mxu0 %v6486_v30  ;;  %4610 = vmatpush1.bf16.msra.mxu1 %v6486_v30  ;;  %v4538_v30 = vsel %vm2597_vm6, %v4521_v46, %v4537_v2  ;;  %v6515_v46 = vld [vmem:[%s8561_s1 + $0x844] ss:$8 sps:$4 sm:$0xff]  }
 0x1f0   :  { %2858 = vmatprep.subr.bf16.mxu0 %v6491_v41  ;;  %4611 = vmatprep.subr.bf16.mxu1 %v6491_v41  ;;  %v8628_v41 = vld [vmem:[#allocation8_spill] sm:$0xff] }
 0x1f3   :  { %2859 = vmatpush1.bf16.msra.mxu0 %v6489_v38  ;;  %4612 = vmatpush1.bf16.msra.mxu1 %v6489_v38  ;;  %v4543_v38 = vrot.slane %v8628_v41, 3 }
 0x1f4   :  { %2860 = vmatprep.subr.bf16.mxu0 %v6494_v44  ;;  %4613 = vmatprep.subr.bf16.mxu1 %v6494_v44  ;;  %v8629_v44 = vld [vmem:[#allocation9_spill] sm:$0xff] }
 0x1f5   :  { %v4544_v33 = vrot.slane %v8629_v44, 4 }
 0x1f7   :  { %2861 = vmatpush1.bf16.msra.mxu0 %v6492_v20  ;;  %4614 = vmatpush1.bf16.msra.mxu1 %v6492_v20  ;;  %v2637_v20 = vsel %vm2597_vm6, %v2628_v45, %v2636_v52  ;;  %v4545_v7 = vor.u32 %v4544_v33, %v4543_v38  ;;  %v2652_v38 = vrot.slane %v2650_v9, 4  ;;  %v6601_v9 = vld [vmem:[%s8562_s0 + $0x90] sm:$0xff] }
 0x1f8   :  { %2862 = vmatprep.subr.bf16.mxu0 %v6497_v21  ;;  %4615 = vmatprep.subr.bf16.mxu1 %v6497_v21  ;;  %v2632_v21 = vor.u32 %v2631_v50, %v2630_v23  ;;  %v4560_v23 = vshrl.u32 %v5665_v35, 16 }
 0x1f9   :  { %v4546_v28 = vsel %vm2597_vm6, %v4537_v2, %v4545_v7  ;;  %v6516_v2 = vld [vmem:[%s8561_s1 + $0x850] ss:$8 sps:$4 sm:$0xff]  }
 0x1fa   :  { %v2633_v15 = vsel %vm2597_vm6, %v2624_v29, %v2632_v21  ;;  %v4574_v29 = vrot.slane %v4572_v26, 4  ;;  %v4562_v44 = vrot.slane %v4560_v23, 3  ;;  %v6592_v26 = vld [vmem:[%s8562_s0 + $0x20] sm:$0xff]  ;;  %v6602_v23 = vld [vmem:[%s8562_s0 + $0x98] sm:$0xff] }
 0x1fb   :  { %2863 = vmatpush1.bf16.msra.mxu0 %v6495_v0  ;;  %4616 = vmatpush1.bf16.msra.mxu1 %v6495_v0  ;;  %v4550_v0 = vsel %vm2597_vm6, %v4541_v27, %v4549_v55  ;;  %v8637_v27 = vld [vmem:[#allocation17_spill] sm:$0xff] }
 0x1fc   :  { %2864 = vmatprep.subr.bf16.mxu0 %v6500_v8  ;;  %4617 = vmatprep.subr.bf16.mxu1 %v6500_v8  ;;  %v5499_v8 = vcombine.high %v8331_v58, %v8331_v58 }
 0x1fe   :  { %v2656_v4 = vshrl.u32 %v5499_v8, 16  ;;  %v2659_v42 = vshll.u32 %v5499_v8, 16 }
 0x1ff   :  { %2865 = vmatpush1.bf16.msra.mxu0 %v6498_v14  ;;  %4618 = vmatpush1.bf16.msra.mxu1 %v6498_v14  ;;  %v2639_v14 = vrot.slane %v8635_v62, 4  ;;  %v6539_v62 = vld [vmem:[%s8561_s1 + $0x8c4] ss:$8 sps:$4 sm:$0xff]  }
 0x200   :  { %3150 = vmatprep.subr.bf16.mxu0 %v6503_v17  ;;  %4710 = vmatprep.subr.bf16.mxu1 %v6503_v17  ;;  %v2644_v17 = vor.u32 %v2643_v59, %v2642_v56  ;;  %v2658_v24 = vrot.slane %v2656_v4, 3  ;;  %v2661_v32 = vrot.slane %v2659_v42, 4  ;;  %v6527_v59 = vld [vmem:[%s8561_s1 + $0x884] ss:$8 sps:$4 sm:$0xff]   ;;  %v5667_v42 = vcombine.low %v8047_v47, %v6590_v3 }
 0x201   :  { %v2640_v48 = vor.u32 %v2639_v14, %v2638_v63  ;;  %v6534_v63 = vld [vmem:[%s8561_s1 + $0x8b0] ss:$8 sps:$4 sm:$0xff]   ;;  %v6537_v14 = vld [vmem:[%s8561_s1 + $0x8c0] ss:$8 sps:$4 sm:$0xff]  }
 0x202   :  { %2867 = vmatmul.mubr.bf16.vlgmr.msra.gmra.mrb[0].mxu0 %v2609_v49  ;;  %4620 = vmatmul.mubr.bf16.vlgmr.msra.gmra.mrb[0].mxu1 %v4522_v16  ;;  %v4557_v49 = vor.u32 %v4556_v60, %v4555_v13  ;;  %v8636_v16 = vld [vmem:[#allocation16_spill] sm:$0xff] }
 0x203   :  { %3151 = vmatpush1.bf16.msra.mxu0 %v6501_v51  ;;  %4711 = vmatpush1.bf16.msra.mxu1 %v6501_v51  ;;  %v4551_v45 = vrot.slane %v8636_v16, 3  ;;  %v4552_v51 = vrot.slane %v8637_v27, 4  ;;  %v2641_v50 = vsel %vm2597_vm6, %v2632_v21, %v2640_v48  ;;  %v6530_v60 = vld [vmem:[%s8561_s1 + $0x894] ss:$8 sps:$4 sm:$0xff]   ;;  %v6548_v16 = vld [vmem:[%s8561_s1 + $0x8e4] ss:$8 sps:$4 sm:$0xff]  }
 0x204   :  { %3152 = vmatprep.subr.bf16.mxu0 %v6506_v5  ;;  %4712 = vmatprep.subr.bf16.mxu1 %v6506_v5  ;;  %v6513_v5 = vld [vmem:[%s8561_s1 + $0x840] ss:$8 sps:$4 sm:$0xff]   ;;  %v6552_v27 = vld [vmem:[%s8561_s1 + $0x8f4] ss:$8 sps:$4 sm:$0xff]  }
 0x205   :  { %2876 = vmatprep.mubr.bf16.mxu0 %v2629_v43  ;;  %4629 = vmatprep.mubr.bf16.mxu1 %v4542_v25  ;;  %v2645_v43 = vsel %vm2597_vm6, %v2636_v52, %v2644_v17  ;;  %v4558_v25 = vsel %vm2597_vm6, %v4549_v55, %v4557_v49  ;;  %v4553_v1 = vor.u32 %v4552_v51, %v4551_v45  ;;  %v4563_v52 = vshll.u32 %v5665_v35, 16  ;;  %v6546_v45 = vld [vmem:[%s8561_s1 + $0x8e0] ss:$8 sps:$4 sm:$0xff]   ;;  %v6550_v51 = vld [vmem:[%s8561_s1 + $0x8f0] ss:$8 sps:$4 sm:$0xff]  }
 0x206   :  { %v2662_v55 = vor.u32 %v2661_v32, %v2658_v24 }
 0x207   :  { %3153 = vmatpush1.bf16.msra.mxu0 %v6504_v12  ;;  %4713 = vmatpush1.bf16.msra.mxu1 %v6504_v12  ;;  %v4571_v12 = vrot.slane %v4569_v19, 3  ;;  %v4565_v33 = vrot.slane %v4563_v52, 4  ;;  %v6591_v19 = vld [vmem:[%s8562_s0 + $0x18] sm:$0xff]  ;;  %v5674_v52 = vcombine.high %v6601_v9, %v6602_v23 }
 0x208   :  { %3154 = vmatprep.subr.bf16.mxu0 %v6509_v39  ;;  %4714 = vmatprep.subr.bf16.mxu1 %v6509_v39  ;;  %v2647_v39 = vshrl.u32 %v5498_v31, 16  ;;  %v5566_v31 = vcombine.low %v6591_v19, %v6592_v26 }
 0x209   :  { %v4566_v61 = vor.u32 %v4565_v33, %v4562_v44 }
 0x20a   :  { %2877 = vmatmul.mubr.bf16.gmra.mrb[4].mxu0 %v2625_v57  ;;  %4630 = vmatmul.mubr.bf16.gmra.mrb[4].mxu1 %v4538_v30  ;;  %v4575_v57 = vor.u32 %v4574_v29, %v4571_v12  ;;  %v6519_v30 = vld [vmem:[%s8561_s1 + $0x860] ss:$8 sps:$4 sm:$0xff]   ;;  %v2649_v41 = vrot.slane %v2647_v39, 3  ;;  %v6599_v29 = vld [vmem:[%s8562_s0 + $0x38] sm:$0xff] }
 0x20b   :  { %3155 = vmatpush1.bf16.msra.mxu0 %v6507_v54  ;;  %4715 = vmatpush1.bf16.msra.mxu1 %v6507_v54  ;;  %v4554_v54 = vsel %vm2597_vm6, %v4545_v7, %v4553_v1  ;;  %v4567_v18 = vsel %vm2597_vm6, %v4553_v1, %v4566_v61  ;;  %v6528_v7 = vld [vmem:[%s8561_s1 + $0x890] ss:$8 sps:$4 sm:$0xff]   ;;  %v6598_v1 = vld [vmem:[%s8562_s0 + $0x88] sm:$0xff] }
 0x20c   :  { %3156 = vmatprep.subr.bf16.mxu0 %v6512_v37  ;;  %4716 = vmatprep.subr.bf16.mxu1 %v6512_v37  ;;  %v6524_v37 = vld [vmem:[%s8561_s1 + $0x874] ss:$8 sps:$4 sm:$0xff]   ;;  %v4576_v21 = vsel %vm2597_vm6, %v4557_v49, %v4575_v57  ;;  %v2653_v56 = vor.u32 %v2652_v38, %v2649_v41  ;;  %v6540_v49 = vld [vmem:[%s8561_s1 + $0x8d0] ss:$8 sps:$4 sm:$0xff]   ;;  %v6604_v57 = vld [vmem:[%s8562_s0 + $0xa0] sm:$0xff] }
 0x20d   :  { %2886 = vmatprep.mubr.bf16.mxu0 %v2637_v20  ;;  %4639 = vmatprep.mubr.bf16.mxu1 %v4550_v0  ;;  %v2663_v20 = vsel %vm2597_vm6, %v2644_v17, %v2662_v55  ;;  %v6589_v0 = vld [vmem:[%s8562_s0 + $0x10] sm:$0xff]  ;;  %v5675_v38 = vcombine.low %v6604_v57, %v8336_v34 }
 0x20e   :  { %v2654_v13 = vsel %vm2597_vm6, %v2640_v48, %v2653_v56  ;;  %v5565_v8 = vcombine.high %v8038_v53, %v6589_v0  ;;  %v6542_v17 = vld [vmem:[%s8561_s1 + $0x8d4] ss:$8 sps:$4 sm:$0xff]   ;;  %v5564_v4 = vcombine.low %v8038_v53, %v6589_v0  ;;  %v6597_v48 = vld [vmem:[%s8562_s0 + $0x80] sm:$0xff] }
 0x20f   :  { %3157 = vmatpush1.bf16.msra.mxu0 %v6510_v11  ;;  %4717 = vmatpush1.bf16.msra.mxu1 %v6510_v11  ;;  %v5668_v11 = vcombine.high %v8047_v47, %v6590_v3  ;;  %v6594_v53 = vld [vmem:[%s8562_s0 + $0x78] sm:$0xff]  ;;  %v5672_v24 = vcombine.high %v6597_v48, %v6598_v1  ;;  %v5671_v12 = vcombine.low %v6597_v48, %v6598_v1 }
 0x210   :  { %3158 = vmatprep.subr.bf16.mxu0 %v6515_v46  ;;  %4718 = vmatprep.subr.bf16.mxu1 %v6515_v46  ;;  %v6533_v46 = vld [vmem:[%s8561_s1 + $0x8a4] ss:$8 sps:$4 sm:$0xff]  }
 0x212   :  { %2887 = vmatmul.mubr.bf16.gmra.mrb[8].mxu0 %v2633_v15  ;;  %4640 = vmatmul.mubr.bf16.gmra.mrb[8].mxu1 %v4546_v28  ;;  %v6531_v15 = vld [vmem:[%s8561_s1 + $0x8a0] ss:$8 sps:$4 sm:$0xff]   ;;  %v6593_v28 = vld [vmem:[%s8562_s0 + $0x70] sm:$0xff] }
 0x213   :  { %3159 = vmatpush1.bf16.msra.mxu0 %v6513_v5  ;;  %4719 = vmatpush1.bf16.msra.mxu1 %v6513_v5  ;;  %v5567_v5 = vcombine.high %v6591_v19, %v6592_v26  ;;  %v5670_v47 = vcombine.high %v6593_v28, %v6594_v53  ;;  %v5669_v35 = vcombine.low %v6593_v28, %v6594_v53 }
 0x214   :  { %3160 = vmatprep.subr.bf16.mxu0 %v6518_v36  ;;  %4720 = vmatprep.subr.bf16.mxu1 %v6518_v36  ;;  %v6595_v36 = vld [vmem:[%s8562_s0 + $0x28] sm:$0xff] }
 0x215   :  { %2896 = vmatprep.mubr.bf16.mxu0 %v2645_v43  ;;  %4649 = vmatprep.mubr.bf16.mxu1 %v4558_v25  ;;  %v6596_v43 = vld [vmem:[%s8562_s0 + $0x30] sm:$0xff] }
 0x216   :  { %v5569_v25 = vcombine.high %v6595_v36, %v6596_v43  ;;  %v5568_v32 = vcombine.low %v6595_v36, %v6596_v43 }
 0x217   :  { %3161 = vmatpush1.bf16.msra.mxu0 %v6516_v2  ;;  %4721 = vmatpush1.bf16.msra.mxu1 %v6516_v2  ;;  %v6600_v2 = vld [vmem:[%s8562_s0 + $0x40] sm:$0xff] }
 0x218   :  { %3162 = vmatprep.subr.bf16.mxu0 %v6521_v10  ;;  %4722 = vmatprep.subr.bf16.mxu1 %v6521_v10  ;;  %v5571_v39 = vcombine.high %v6599_v29, %v6600_v2  ;;  %v5570_v10 = vcombine.low %v6599_v29, %v6600_v2 }
 0x21a   :  { %2897 = vmatmul.mubr.bf16.gmra.mrb[12].mxu0 %v2641_v50  ;;  %4650 = vmatmul.mubr.bf16.gmra.mrb[12].mxu1 %v4554_v54  ;;  %v5673_v50 = vcombine.low %v6601_v9, %v6602_v23  ;;  %v6603_v54 = vld [vmem:[%s8562_s0 + $0x48] sm:$0xff] }
 0x21b   :  { %3163 = vmatpush1.bf16.msra.mxu0 %v6519_v30  ;;  %4723 = vmatpush1.bf16.msra.mxu1 %v6519_v30  ;;  %v5573_v55 = vcombine.high %v6603_v54, %v8331_v58  ;;  %v5676_v30 = vcombine.high %v6604_v57, %v8336_v34  ;;  %v5572_v41 = vcombine.low %v6603_v54, %v8331_v58 }
 0x21c   :  { %3164 = vmatprep.subr.bf16.mxu0 %v6524_v37  ;;  %4724 = vmatprep.subr.bf16.mxu1 %v6524_v37 }
 0x21d   :  { %2906 = vmatprep.mubr.bf16.mxu0 %v2663_v20  ;;  %4659 = vmatprep.mubr.bf16.mxu1 %v4576_v21 }
 0x21f   :  { %3165 = vmatpush1.bf16.msra.mxu0 %v6522_v40  ;;  %4725 = vmatpush1.bf16.msra.mxu1 %v6522_v40 }
 0x220   :  { %3166 = vmatprep.subr.bf16.mxu0 %v6527_v59  ;;  %4726 = vmatprep.subr.bf16.mxu1 %v6527_v59 }
 0x222   :  { %2907 = vmatmul.mubr.bf16.gmra.mrb[16].mxu0 %v2654_v13  ;;  %4660 = vmatmul.mubr.bf16.gmra.mrb[16].mxu1 %v4567_v18 }
 0x223   :  { %3167 = vmatpush1.bf16.msra.mxu0 %v6525_v6  ;;  %4727 = vmatpush1.bf16.msra.mxu1 %v6525_v6 }
 0x224   :  { %3168 = vmatprep.subr.bf16.mxu0 %v6530_v60  ;;  %4728 = vmatprep.subr.bf16.mxu1 %v6530_v60 }
 0x225   :  { %3182 = vmatprep.mubr.bf16.mxu0 %v5565_v8  ;;  %4742 = vmatprep.mubr.bf16.mxu1 %v5668_v11 }
 0x227   :  { %3169 = vmatpush1.bf16.msra.mxu0 %v6528_v7  ;;  %4729 = vmatpush1.bf16.msra.mxu1 %v6528_v7 }
 0x228   :  { %3170 = vmatprep.subr.bf16.mxu0 %v6533_v46  ;;  %4730 = vmatprep.subr.bf16.mxu1 %v6533_v46 }
 0x22b   :  { %3171 = vmatpush1.bf16.msra.mxu0 %v6531_v15  ;;  %4731 = vmatpush1.bf16.msra.mxu1 %v6531_v15 }
 0x22c   :  { %3172 = vmatprep.subr.bf16.mxu0 %v6536_v22  ;;  %4732 = vmatprep.subr.bf16.mxu1 %v6536_v22 }
 0x22f   :  { %3173 = vmatpush1.bf16.msra.mxu0 %v6534_v63  ;;  %4733 = vmatpush1.bf16.msra.mxu1 %v6534_v63 }
 0x230   :  { %3174 = vmatprep.subr.bf16.mxu0 %v6539_v62  ;;  %4734 = vmatprep.subr.bf16.mxu1 %v6539_v62 }
 0x233   :  { %3175 = vmatpush1.bf16.msra.mxu0 %v6537_v14  ;;  %4735 = vmatpush1.bf16.msra.mxu1 %v6537_v14 }
 0x234   :  { %3176 = vmatprep.subr.bf16.mxu0 %v6542_v17  ;;  %4736 = vmatprep.subr.bf16.mxu1 %v6542_v17 }
 0x237   :  { %3177 = vmatpush1.bf16.msra.mxu0 %v6540_v49  ;;  %4737 = vmatpush1.bf16.msra.mxu1 %v6540_v49 }
 0x238   :  { %3178 = vmatprep.subr.bf16.mxu0 %v6548_v16  ;;  %4738 = vmatprep.subr.bf16.mxu1 %v6548_v16 }
 0x23b   :  { %3179 = vmatpush1.bf16.msra.mxu0 %v6546_v45  ;;  %4739 = vmatpush1.bf16.msra.mxu1 %v6546_v45 }
 0x23c   :  { %3180 = vmatprep.subr.bf16.mxu0 %v6552_v27  ;;  %4740 = vmatprep.subr.bf16.mxu1 %v6552_v27 }
 0x23f   :  { %3181 = vmatpush1.bf16.msra.mxu0 %v6550_v51  ;;  %4741 = vmatpush1.bf16.msra.mxu1 %v6550_v51 }
 0x242   :  { %3183 = vmatmul.mubr.bf16.vlgmr.msra.gmra.mrb[0].mxu0 %v5564_v4  ;;  %4743 = vmatmul.mubr.bf16.vlgmr.msra.gmra.mrb[0].mxu1 %v5667_v42 }
 0x243   :  { %3192 = vmatprep.mubr.bf16.mxu0 %v5567_v5  ;;  %4752 = vmatprep.mubr.bf16.mxu1 %v5670_v47 }
 0x24a   :  { %3193 = vmatmul.mubr.bf16.gmra.mrb[4].mxu0 %v5566_v31  ;;  %4753 = vmatmul.mubr.bf16.gmra.mrb[4].mxu1 %v5669_v35 }
 0x24b   :  { %3202 = vmatprep.mubr.bf16.mxu0 %v5569_v25  ;;  %4762 = vmatprep.mubr.bf16.mxu1 %v5672_v24 }
 0x252   :  { %3203 = vmatmul.mubr.bf16.gmra.mrb[8].mxu0 %v5568_v32  ;;  %4763 = vmatmul.mubr.bf16.gmra.mrb[8].mxu1 %v5671_v12 }
 0x253   :  { %3212 = vmatprep.mubr.bf16.mxu0 %v5571_v39  ;;  %4772 = vmatprep.mubr.bf16.mxu1 %v5674_v52 }
 0x25a   :  { %3213 = vmatmul.mubr.bf16.gmra.mrb[12].mxu0 %v5570_v10  ;;  %4773 = vmatmul.mubr.bf16.gmra.mrb[12].mxu1 %v5673_v50 }
 0x25b   :  { %3222 = vmatprep.mubr.bf16.mxu0 %v5573_v55  ;;  %4782 = vmatprep.mubr.bf16.mxu1 %v5676_v30 }
 0x262   :  { %3223 = vmatmul.mubr.bf16.gmra.mrb[16].mxu0 %v5572_v41  ;;  %4783 = vmatmul.mubr.bf16.gmra.mrb[16].mxu1 %v5675_v38 }
 0x315   :  { %v3184_v44 = vpop.f32.mrb[0].mxu0  ;;  %v4744_v33 = vpop.f32.mrb[0].mxu1 }
 0x316   :  { %vm3253_vm7 = vcmp.ge.f32.partialorder %v3184_v44, 0.0  ;;  %v3273_v37 = vmul.f32 0.2, %v3184_v44  ;;  %vm4813_vm8 = vcmp.ge.f32.partialorder %v4744_v33, 0.0  ;;  %v4833_v20 = vmul.f32 0.2, %v4744_v33 }
 0x317   :  { %v3186_v21 = vpop.f32.mrb[1].mxu0  ;;  %v4746_v40 = vpop.f32.mrb[1].mxu1 }
 0x318   :  { %v3293_v56 = vsel %vm3253_vm7, %v3184_v44, %v3273_v37  ;;  %v4853_v61 = vsel %vm4813_vm8, %v4744_v33, %v4833_v20  ;;  %vm3254_vm9 = vcmp.ge.f32.partialorder %v3186_v21, 0.0  ;;  %v3274_v59 = vmul.f32 0.2, %v3186_v21  ;;  %v3188_v6 = vpop.f32.mrb[2].mxu0  ;;  %v4748_v13 = vpop.f32.mrb[2].mxu1 }
 0x319   :  { %vm4814_vm10 = vcmp.ge.f32.partialorder %v4746_v40, 0.0  ;;  %v4834_v58 = vmul.f32 0.2, %v4746_v40  ;;  %vm3255_vm11 = vcmp.ge.f32.partialorder %v3188_v6, 0.0  ;;  %v3275_v34 = vmul.f32 0.2, %v3188_v6 }
 0x31a   :  { %v3294_v18 = vsel %vm3254_vm9, %v3186_v21, %v3274_v59  ;;  %vm4815_vm12 = vcmp.ge.f32.partialorder %v4748_v13, 0.0  ;;  %v4835_v60 = vmul.f32 0.2, %v4748_v13  ;;  %v3190_v0 = vpop.f32.mrb[3].mxu0  ;;  %v4750_v8 = vpop.f32.mrb[3].mxu1 }
 0x31b   :  { %v5707_v3 = vpack.c.bf16 %v3294_v18, %v3293_v56  ;;  %v4854_v11 = vsel %vm4814_vm10, %v4746_v40, %v4834_v58  ;;  %vm3256_vm13 = vcmp.ge.f32.partialorder %v3190_v0, 0.0  ;;  %v3295_v46 = vsel %vm3255_vm11, %v3188_v6, %v3275_v34 }
 0x31c   :  { %v5717_v7 = vpack.c.bf16 %v4854_v11, %v4853_v61  ;;  %v3276_v15 = vmul.f32 0.2, %v3190_v0  ;;  %vm4816_vm14 = vcmp.ge.f32.partialorder %v4750_v8, 0.0  ;;  %v4855_v22 = vsel %vm4815_vm12, %v4748_v13, %v4835_v60 }
 0x31d   :  { %4933 = vst [vmem:[%s8563_s2] sm:$0xff] %v5707_v3  ;;  %v4836_v63 = vmul.f32 0.2, %v4750_v8  ;;  %v3194_v62 = vpop.f32.mrb[4].mxu0  ;;  %v4754_v14 = vpop.f32.mrb[4].mxu1 }
 0x31e   :  { %5697 = vst [vmem:[%s8563_s2 + $0x50] sm:$0xff] %v5717_v7  ;;  %v3296_v17 = vsel %vm3256_vm13, %v3190_v0, %v3276_v15  ;;  %vm3257_vm15 = vcmp.ge.f32.partialorder %v3194_v62, 0.0  ;;  %v3277_v49 = vmul.f32 0.2, %v3194_v62  ;;  %vm4817_vm0 = vcmp.ge.f32.partialorder %v4754_v14, 0.0  ;;  %v3196_v16 = vpop.f32.mrb[5].mxu0 }
 0x31f   :  { %v4756_v45 = vpop.f32.mrb[5].mxu1  ;;  %v5708_v27 = vpack.c.bf16 %v3296_v17, %v3295_v46  ;;  %v4856_v51 = vsel %vm4816_vm14, %v4750_v8, %v4836_v63  ;;  %v4837_v4 = vmul.f32 0.2, %v4754_v14  ;;  %vm3258_vm1 = vcmp.ge.f32.partialorder %v3196_v16, 0.0  ;;  %v3198_v42 = vpop.f32.mrb[6].mxu0 }
 0x320   :  { %v4758_v19 = vpop.f32.mrb[6].mxu1  ;;  %v5718_v26 = vpack.c.bf16 %v4856_v51, %v4855_v22  ;;  %v3297_v5 = vsel %vm3257_vm15, %v3194_v62, %v3277_v49  ;;  %v3278_v28 = vmul.f32 0.2, %v3196_v16  ;;  %vm4818_vm2 = vcmp.ge.f32.partialorder %v4756_v45, 0.0  ;;  %v3200_v53 = vpop.f32.mrb[7].mxu0 }
 0x321   :  { %v4760_v47 = vpop.f32.mrb[7].mxu1  ;;  %4934 = vst [vmem:[%s8563_s2 + $0x8] sm:$0xff] %v5708_v27  ;;  %v4857_v31 = vsel %vm4817_vm0, %v4754_v14, %v4837_v4  ;;  %v4838_v35 = vmul.f32 0.2, %v4756_v45  ;;  %vm3259_vm3 = vcmp.ge.f32.partialorder %v3198_v42, 0.0  ;;  %vm4819_vm4 = vcmp.ge.f32.partialorder %v4758_v19, 0.0 }
 0x322   :  { %v3279_v36 = vmul.f32 0.2, %v3198_v42  ;;  %5698 = vst [vmem:[%s8563_s2 + $0x58] sm:$0xff] %v5718_v26  ;;  %v3298_v43 = vsel %vm3258_vm1, %v3196_v16, %v3278_v28  ;;  %v4839_v25 = vmul.f32 0.2, %v4758_v19  ;;  %vm3260_vm5 = vcmp.ge.f32.partialorder %v3200_v53, 0.0 }
 0x323   :  { %v5709_v48 = vpack.c.bf16 %v3298_v43, %v3297_v5  ;;  %v4858_v1 = vsel %vm4818_vm2, %v4756_v45, %v4838_v35  ;;  %v3280_v32 = vmul.f32 0.2, %v3200_v53  ;;  %vm4820_vm6 = vcmp.ge.f32.partialorder %v4760_v47, 0.0 }
 0x324   :  { %v3299_v24 = vsel %vm3259_vm3, %v3198_v42, %v3279_v36  ;;  %v5719_v12 = vpack.c.bf16 %v4858_v1, %v4857_v31  ;;  %v4859_v29 = vsel %vm4819_vm4, %v4758_v19, %v4839_v25  ;;  %v4840_v2 = vmul.f32 0.2, %v4760_v47 }
 0x325   :  { %4935 = vst [vmem:[%s8563_s2 + $0x10] sm:$0xff] %v5709_v48  ;;  %v3300_v39 = vsel %vm3260_vm5, %v3200_v53, %v3280_v32  ;;  %v3204_v9 = vpop.f32.mrb[8].mxu0  ;;  %v4764_v23 = vpop.f32.mrb[8].mxu1 }
 0x326   :  { %5699 = vst [vmem:[%s8563_s2 + $0x60] sm:$0xff] %v5719_v12  ;;  %v5710_v52 = vpack.c.bf16 %v3300_v39, %v3299_v24  ;;  %v4860_v10 = vsel %vm4820_vm6, %v4760_v47, %v4840_v2  ;;  %vm3261_vm7 = vcmp.ge.f32.partialorder %v3204_v9, 0.0  ;;  %v3281_v50 = vmul.f32 0.2, %v3204_v9  ;;  %v3206_v54 = vpop.f32.mrb[9].mxu0  ;;  %v4766_v55 = vpop.f32.mrb[9].mxu1 }
 0x327   :  { %v5720_v57 = vpack.c.bf16 %v4860_v10, %v4859_v29  ;;  %vm4821_vm8 = vcmp.ge.f32.partialorder %v4764_v23, 0.0  ;;  %v4841_v30 = vmul.f32 0.2, %v4764_v23  ;;  %vm3262_vm9 = vcmp.ge.f32.partialorder %v3206_v54, 0.0  ;;  %v3208_v41 = vpop.f32.mrb[10].mxu0  ;;  %v4768_v38 = vpop.f32.mrb[10].mxu1 }
 0x328   :  { %4936 = vst [vmem:[%s8563_s2 + $0x18] sm:$0xff] %v5710_v52  ;;  %v3301_v44 = vsel %vm3261_vm7, %v3204_v9, %v3281_v50  ;;  %v3282_v33 = vmul.f32 0.2, %v3206_v54  ;;  %vm4822_vm10 = vcmp.ge.f32.partialorder %v4766_v55, 0.0  ;;  %v4842_v37 = vmul.f32 0.2, %v4766_v55 }
 0x329   :  { %v3210_v20 = vpop.f32.mrb[11].mxu0  ;;  %5700 = vst [vmem:[%s8563_s2 + $0x68] sm:$0xff] %v5720_v57  ;;  %v4861_v21 = vsel %vm4821_vm8, %v4764_v23, %v4841_v30  ;;  %vm3263_vm11 = vcmp.ge.f32.partialorder %v3208_v41, 0.0  ;;  %v3283_v40 = vmul.f32 0.2, %v3208_v41  ;;  %vm4823_vm12 = vcmp.ge.f32.partialorder %v4768_v38, 0.0 }
 0x32a   :  { %v4770_v56 = vpop.f32.mrb[11].mxu1  ;;  %v3302_v61 = vsel %vm3262_vm9, %v3206_v54, %v3282_v33  ;;  %v4862_v59 = vsel %vm4822_vm10, %v4766_v55, %v4842_v37  ;;  %v4843_v6 = vmul.f32 0.2, %v4768_v38  ;;  %vm3264_vm13 = vcmp.ge.f32.partialorder %v3210_v20, 0.0 }
 0x32b   :  { %v5711_v13 = vpack.c.bf16 %v3302_v61, %v3301_v44  ;;  %v5721_v58 = vpack.c.bf16 %v4862_v59, %v4861_v21  ;;  %v3303_v34 = vsel %vm3263_vm11, %v3208_v41, %v3283_v40  ;;  %v3284_v18 = vmul.f32 0.2, %v3210_v20 }
 0x32c   :  { %v4863_v60 = vsel %vm4823_vm12, %v4768_v38, %v4843_v6  ;;  %vm4824_vm14 = vcmp.ge.f32.partialorder %v4770_v56, 0.0  ;;  %v4844_v0 = vmul.f32 0.2, %v4770_v56 }
 0x32d   :  { %4937 = vst [vmem:[%s8563_s2 + $0x20] sm:$0xff] %v5711_v13  ;;  %5701 = vst [vmem:[%s8563_s2 + $0x70] sm:$0xff] %v5721_v58  ;;  %v3304_v8 = vsel %vm3264_vm13, %v3210_v20, %v3284_v18  ;;  %v3214_v3 = vpop.f32.mrb[12].mxu0  ;;  %v4774_v11 = vpop.f32.mrb[12].mxu1 }
 0x32e   :  { %v5712_v7 = vpack.c.bf16 %v3304_v8, %v3303_v34  ;;  %v4864_v46 = vsel %vm4824_vm14, %v4770_v56, %v4844_v0  ;;  %vm3265_vm15 = vcmp.ge.f32.partialorder %v3214_v3, 0.0  ;;  %v3285_v15 = vmul.f32 0.2, %v3214_v3  ;;  %v3216_v22 = vpop.f32.mrb[13].mxu0  ;;  %v4776_v63 = vpop.f32.mrb[13].mxu1 }
 0x32f   :  { %v5722_v62 = vpack.c.bf16 %v4864_v46, %v4863_v60  ;;  %vm4825_vm0 = vcmp.ge.f32.partialorder %v4774_v11, 0.0  ;;  %v4845_v14 = vmul.f32 0.2, %v4774_v11  ;;  %vm3266_vm1 = vcmp.ge.f32.partialorder %v3216_v22, 0.0  ;;  %v3218_v17 = vpop.f32.mrb[14].mxu0  ;;  %v4778_v49 = vpop.f32.mrb[14].mxu1 }
 0x330   :  { %4938 = vst [vmem:[%s8563_s2 + $0x28] sm:$0xff] %v5712_v7  ;;  %v3305_v16 = vsel %vm3265_vm15, %v3214_v3, %v3285_v15  ;;  %v3286_v45 = vmul.f32 0.2, %v3216_v22  ;;  %vm4826_vm2 = vcmp.ge.f32.partialorder %v4776_v63, 0.0  ;;  %v4846_v27 = vmul.f32 0.2, %v4776_v63 }
 0x331   :  { %v3220_v51 = vpop.f32.mrb[15].mxu0  ;;  %5702 = vst [vmem:[%s8563_s2 + $0x78] sm:$0xff] %v5722_v62  ;;  %v4865_v4 = vsel %vm4825_vm0, %v4774_v11, %v4845_v14  ;;  %vm3267_vm3 = vcmp.ge.f32.partialorder %v3218_v17, 0.0  ;;  %v3287_v42 = vmul.f32 0.2, %v3218_v17  ;;  %vm4827_vm4 = vcmp.ge.f32.partialorder %v4778_v49, 0.0 }
 0x332   :  { %v4780_v19 = vpop.f32.mrb[15].mxu1  ;;  %v3306_v26 = vsel %vm3266_vm1, %v3216_v22, %v3286_v45  ;;  %v4866_v5 = vsel %vm4826_vm2, %v4776_v63, %v4846_v27  ;;  %v4847_v28 = vmul.f32 0.2, %v4778_v49  ;;  %vm3268_vm5 = vcmp.ge.f32.partialorder %v3220_v51, 0.0 }
 0x333   :  { %v5713_v53 = vpack.c.bf16 %v3306_v26, %v3305_v16  ;;  %v5723_v47 = vpack.c.bf16 %v4866_v5, %v4865_v4  ;;  %v3307_v31 = vsel %vm3267_vm3, %v3218_v17, %v3287_v42  ;;  %v3288_v35 = vmul.f32 0.2, %v3220_v51 }
 0x334   :  { %v4867_v36 = vsel %vm4827_vm4, %v4778_v49, %v4847_v28  ;;  %vm4828_vm6 = vcmp.ge.f32.partialorder %v4780_v19, 0.0  ;;  %v4848_v43 = vmul.f32 0.2, %v4780_v19 }
 0x335   :  { %4939 = vst [vmem:[%s8563_s2 + $0x30] sm:$0xff] %v5713_v53  ;;  %5703 = vst [vmem:[%s8563_s2 + $0x80] sm:$0xff] %v5723_v47  ;;  %v3308_v25 = vsel %vm3268_vm5, %v3220_v51, %v3288_v35  ;;  %v3224_v48 = vpop.f32.mrb[16].mxu0  ;;  %v4784_v1 = vpop.f32.mrb[16].mxu1 }
 0x336   :  { %v5714_v24 = vpack.c.bf16 %v3308_v25, %v3307_v31  ;;  %v4868_v32 = vsel %vm4828_vm6, %v4780_v19, %v4848_v43  ;;  %vm3269_vm7 = vcmp.ge.f32.partialorder %v3224_v48, 0.0  ;;  %v3289_v12 = vmul.f32 0.2, %v3224_v48  ;;  %v3226_v29 = vpop.f32.mrb[17].mxu0  ;;  %v4786_v2 = vpop.f32.mrb[17].mxu1 }
 0x337   :  { %v5724_v39 = vpack.c.bf16 %v4868_v32, %v4867_v36  ;;  %vm4829_vm8 = vcmp.ge.f32.partialorder %v4784_v1, 0.0  ;;  %v4849_v9 = vmul.f32 0.2, %v4784_v1  ;;  %vm3270_vm9 = vcmp.ge.f32.partialorder %v3226_v29, 0.0  ;;  %v3228_v23 = vpop.f32.mrb[18].mxu0  ;;  %v4788_v52 = vpop.f32.mrb[18].mxu1 }
 0x338   :  { %4940 = vst [vmem:[%s8563_s2 + $0x38] sm:$0xff] %v5714_v24  ;;  %v3309_v10 = vsel %vm3269_vm7, %v3224_v48, %v3289_v12  ;;  %v3290_v50 = vmul.f32 0.2, %v3226_v29  ;;  %vm4830_vm10 = vcmp.ge.f32.partialorder %v4786_v2, 0.0  ;;  %v4850_v54 = vmul.f32 0.2, %v4786_v2 }
 0x339   :  { %v3230_v55 = vpop.f32.mrb[19].mxu0  ;;  %5704 = vst [vmem:[%s8563_s2 + $0x88] sm:$0xff] %v5724_v39  ;;  %v4869_v57 = vsel %vm4829_vm8, %v4784_v1, %v4849_v9  ;;  %vm3271_vm11 = vcmp.ge.f32.partialorder %v3228_v23, 0.0  ;;  %v3291_v30 = vmul.f32 0.2, %v3228_v23  ;;  %vm4831_vm12 = vcmp.ge.f32.partialorder %v4788_v52, 0.0 }
 0x33a   :  { %v4790_v41 = vpop.f32.mrb[19].mxu1  ;;  %v3310_v38 = vsel %vm3270_vm9, %v3226_v29, %v3290_v50  ;;  %v4870_v44 = vsel %vm4830_vm10, %v4786_v2, %v4850_v54  ;;  %v4851_v33 = vmul.f32 0.2, %v4788_v52  ;;  %vm3272_vm13 = vcmp.ge.f32.partialorder %v3230_v55, 0.0 }
 0x33b   :  { %v5715_v37 = vpack.c.bf16 %v3310_v38, %v3309_v10  ;;  %v5725_v20 = vpack.c.bf16 %v4870_v44, %v4869_v57  ;;  %v3311_v21 = vsel %vm3271_vm11, %v3228_v23, %v3291_v30  ;;  %v3292_v40 = vmul.f32 0.2, %v3230_v55 }
 0x33c   :  { %v4871_v56 = vsel %vm4831_vm12, %v4788_v52, %v4851_v33  ;;  %vm4832_vm14 = vcmp.ge.f32.partialorder %v4790_v41, 0.0  ;;  %v4852_v61 = vmul.f32 0.2, %v4790_v41 }
 0x33d   :  { %4941 = vst [vmem:[%s8563_s2 + $0x40] sm:$0xff] %v5715_v37  ;;  %5705 = vst [vmem:[%s8563_s2 + $0x90] sm:$0xff] %v5725_v20  ;;  %v3312_v59 = vsel %vm3272_vm13, %v3230_v55, %v3292_v40 }
 0x33e   :  { %v5716_v6 = vpack.c.bf16 %v3312_v59, %v3311_v21  ;;  %v4872_v13 = vsel %vm4832_vm14, %v4790_v41, %v4852_v61 }
 0x33f   :  { %v5726_v58 = vpack.c.bf16 %v4872_v13, %v4871_v56 }
 0x340   :  { %4942 = vst [vmem:[%s8563_s2 + $0x48] sm:$0x77] %v5716_v6 }
 0x341   :  { %5706 = vst [vmem:[%s8563_s2 + $0x98] sm:$0x77] %v5726_v58 }

</bundles_post_ra>
